<compile_context>
chip_gen: v5e
topology: v5e:2x2
jax: 0.10.0
libtpu: 0.0.40
codegen_flags: <defaults>
</compile_context>

<pallas_src>
import jax
import jax.numpy as jnp
from jax.experimental import pallas as pl
from jax.experimental.pallas import tpu as pltpu

EPS = 1e-07  # matches the PyTorch module (eps=epsilon=1e-07)


def _round_up(x, m):
    return pl.cdiv(x, m) * m


# --------------------------------------------------------------------------
# Pallas kernels
# --------------------------------------------------------------------------
def _fused_matmul_bias_relu_kernel(x_ref, w_ref, b_ref, o1_ref, o2_ref, o3_ref):
    """One wide matmul feeding the three 1x1 branch stems.

    x: (tm, Cin); w: (Cin, C1+C2+C3) with BN scale pre-folded; b: (1, C1+C2+C3).
    """
    acc = jnp.dot(x_ref[...], w_ref[...], preferred_element_type=jnp.float32)
    y = jnp.maximum(acc + b_ref[...], 0.0)
    c1 = o1_ref.shape[-1]
    c2 = o2_ref.shape[-1]
    o1_ref[...] = y[:, :c1].astype(o1_ref.dtype)
    o2_ref[...] = y[:, c1:c1 + c2].astype(o2_ref.dtype)
    o3_ref[...] = y[:, c1 + c2:].astype(o3_ref.dtype)


def _pad1(a, axis, value):
    """Pad one element of `value` on both sides of `axis` (in-VMEM concat)."""
    shp = list(a.shape)
    shp[axis] = 1
    halo = jnp.full(shp, value, a.dtype)
    return jnp.concatenate([halo, a, halo], axis=axis)


def _conv3x3x3_bias_relu_kernel(x_ref, w_ref, b_ref, o_ref):
    """3x3x3 conv (stride 1, pad 1) + folded BN + ReLU for one batch element.

    x: (1, D, H, W, Cin) unpadded; w: (27*Cin, Cout) with BN scale folded in,
    rows ordered (kd, kh, kw, cin); b: (1, Cout); o: (1, D, H, W, Cout).
    Builds a hierarchical im2col patch in VMEM, then ONE MXU matmul.
    """
    _, D, H, W, Cout = o_ref.shape
    Cin = x_ref.shape[-1]
    x = x_ref[0]                                            # (D, H, W, Cin)

    # Gather the 3 taps along W (zero halo) -> channels become 3*Cin.
    t = _pad1(x, 2, 0.0)                                    # (D, H, W+2, Cin)
    t = jnp.concatenate([t[:, :, k:k + W, :] for k in range(3)], axis=-1)
    # Gather the 3 taps along H -> 9*Cin.
    t = _pad1(t, 1, 0.0)                                    # (D, H+2, W, 3Cin)
    t = jnp.concatenate([t[:, k:k + H, :, :] for k in range(3)], axis=-1)
    # Gather the 3 taps along D -> 27*Cin.
    t = _pad1(t, 0, 0.0)                                    # (D+2, H, W, 9Cin)
    t = jnp.concatenate([t[k:k + D, :, :, :] for k in range(3)], axis=-1)

    patch = t.reshape(D * H * W, 27 * Cin)                  # im2col (M, 27*Cin)
    acc = jnp.dot(patch, w_ref[...], preferred_element_type=jnp.float32)
    out = jnp.maximum(acc + b_ref[...], 0.0)
    o_ref[...] = out.reshape(1, D, H, W, Cout).astype(o_ref.dtype)


def _maxpool3_conv1x1_bias_relu_kernel(x_ref, w_ref, b_ref, o_ref):
    """MaxPool3d(3, stride=1, pad=1) fused with 1x1 conv + folded BN + ReLU.

    Separable max (W, then H, then D) with -inf halo, then one matmul.
    """
    _, D, H, W, Cout = o_ref.shape
    Cin = x_ref.shape[-1]
    x = x_ref[0]                                            # (D, H, W, Cin)
    neg = -jnp.inf

    t = _pad1(x, 2, neg)
    t = jnp.maximum(jnp.maximum(t[:, :, 0:W, :], t[:, :, 1:W + 1, :]),
                    t[:, :, 2:W + 2, :])
    t = _pad1(t, 1, neg)
    t = jnp.maximum(jnp.maximum(t[:, 0:H, :, :], t[:, 1:H + 1, :, :]),
                    t[:, 2:H + 2, :, :])
    t = _pad1(t, 0, neg)
    t = jnp.maximum(jnp.maximum(t[0:D], t[1:D + 1]), t[2:D + 2])

    pooled = t.reshape(D * H * W, Cin)
    acc = jnp.dot(pooled, w_ref[...], preferred_element_type=jnp.float32)
    out = jnp.maximum(acc + b_ref[...], 0.0)
    o_ref[...] = out.reshape(1, D, H, W, Cout).astype(o_ref.dtype)


# --------------------------------------------------------------------------
# Pallas wrappers
# --------------------------------------------------------------------------
def fused_conv1x1_bias_relu(x_flat, w, b, splits, *, tm=512):
    """Fused 1x1x1 Conv3d + BN + ReLU for three branches as one tiled matmul.

    x_flat: (M, Cin); w: (Cin, c1+c2+c3) (scale folded); b: (1, c1+c2+c3).
    Returns three (M, ci) arrays.
    """
    M, Cin = x_flat.shape
    Ctot = w.shape[1]
    c1, c2, c3 = splits
    tm = min(tm, _round_up(M, 8))
    Mp = _round_up(M, tm)
    xp = jnp.pad(x_flat, ((0, Mp - M), (0, 0))) if Mp != M else x_flat

    y1, y2, y3 = pl.pallas_call(
        _fused_matmul_bias_relu_kernel,
        out_shape=(jax.ShapeDtypeStruct((Mp, c1), jnp.float32),
                   jax.ShapeDtypeStruct((Mp, c2), jnp.float32),
                   jax.ShapeDtypeStruct((Mp, c3), jnp.float32)),
        grid=(Mp // tm,),
        in_specs=[
            pl.BlockSpec((tm, Cin), lambda i: (i, 0)),
            pl.BlockSpec((Cin, Ctot), lambda i: (0, 0)),
            pl.BlockSpec((1, Ctot), lambda i: (0, 0)),
        ],
        out_specs=(
            pl.BlockSpec((tm, c1), lambda i: (i, 0)),
            pl.BlockSpec((tm, c2), lambda i: (i, 0)),
            pl.BlockSpec((tm, c3), lambda i: (i, 0)),
        ),
        compiler_params=pltpu.CompilerParams(
            dimension_semantics=("parallel",)),
    )(xp, w, b)
    if Mp != M:
        y1, y2, y3 = y1[:M], y2[:M], y3[:M]
    return y1, y2, y3


def conv3x3x3_bias_relu(x, wf, bias):
    """3x3x3 Conv3d (pad=1, stride=1) + folded BN + ReLU.  x: (N, D, H, W, Cin)."""
    N, D, H, W, Cin = x.shape
    Cout = wf.shape[-1]
    return pl.pallas_call(
        _conv3x3x3_bias_relu_kernel,
        out_shape=jax.ShapeDtypeStruct((N, D, H, W, Cout), jnp.float32),
        grid=(N,),
        in_specs=[
            pl.BlockSpec((1, D, H, W, Cin), lambda n: (n, 0, 0, 0, 0)),
            pl.BlockSpec((27 * Cin, Cout), lambda n: (0, 0)),
            pl.BlockSpec((1, Cout), lambda n: (0, 0)),
        ],
        out_specs=pl.BlockSpec((1, D, H, W, Cout), lambda n: (n, 0, 0, 0, 0)),
        compiler_params=pltpu.CompilerParams(dimension_semantics=("parallel",)),
    )(x, wf, bias)


def maxpool3_conv1x1_bias_relu(x, wf, bias):
    """MaxPool3d(3,1,1) + 1x1 conv + folded BN + ReLU.  x: (N, D, H, W, Cin)."""
    N, D, H, W, Cin = x.shape
    Cout = wf.shape[-1]
    return pl.pallas_call(
        _maxpool3_conv1x1_bias_relu_kernel,
        out_shape=jax.ShapeDtypeStruct((N, D, H, W, Cout), jnp.float32),
        grid=(N,),
        in_specs=[
            pl.BlockSpec((1, D, H, W, Cin), lambda n: (n, 0, 0, 0, 0)),
            pl.BlockSpec((Cin, Cout), lambda n: (0, 0)),
            pl.BlockSpec((1, Cout), lambda n: (0, 0)),
        ],
        out_specs=pl.BlockSpec((1, D, H, W, Cout), lambda n: (n, 0, 0, 0, 0)),
        compiler_params=pltpu.CompilerParams(dimension_semantics=("parallel",)),
    )(x, wf, bias)


# --------------------------------------------------------------------------
# Parameter init (deterministic, synthetic) + BN folding / branch fusion
# --------------------------------------------------------------------------
def _init_conv_bn(key, cin, cout, ksize):
    k1, k2, k3, k4, k5, k6 = jax.random.split(key, 6)
    if ksize == 1:
        w = 0.1 * jax.random.normal(k1, (cin, cout), jnp.float32)
    else:
        w = 0.1 * jax.random.normal(k1, (ksize, ksize, ksize, cin, cout),
                                    jnp.float32)
    conv_b = 0.1 * jax.random.normal(k2, (cout,), jnp.float32)
    gamma = 1.0 + 0.1 * jax.random.normal(k3, (cout,), jnp.float32)
    beta = 0.1 * jax.random.normal(k4, (cout,), jnp.float32)
    rmean = 0.1 * jax.random.normal(k5, (cout,), jnp.float32)
    rvar = 1.0 + 0.1 * jax.random.uniform(k6, (cout,), jnp.float32)
    scale = gamma / jnp.sqrt(rvar + EPS)
    bias = beta + (conv_b - rmean) * scale
    return {"w": w, "scale": scale, "bias": bias}


def init_inception_params(key, in_planes, n1x1, n3x3red, n3x3,
                          n5x5red, n5x5, pool_planes):
    keys = jax.random.split(key, 7)
    return {
        "b1_0": _init_conv_bn(keys[0], in_planes, n1x1, 1),
        "b2_0": _init_conv_bn(keys[1], in_planes, n3x3red, 1),
        "b2_1": _init_conv_bn(keys[2], n3x3red, n3x3, 3),
        "b3_0": _init_conv_bn(keys[3], in_planes, n5x5red, 1),
        "b3_1": _init_conv_bn(keys[4], n5x5red, n5x5, 3),
        "b3_2": _init_conv_bn(keys[5], n5x5, n5x5, 3),
        "b4_1": _init_conv_bn(keys[6], in_planes, pool_planes, 1),
    }


def prepare_kernel_params(params):
    """Fold BN scale into conv weights; fuse the three 1x1 stem branches."""
    def fold1x1(p):
        return p["w"] * p["scale"], p["bias"].reshape(1, -1)

    def fold3x3(p):
        cin, cout = p["w"].shape[3], p["w"].shape[4]
        wf = (p["w"] * p["scale"]).reshape(27 * cin, cout)
        return wf, p["bias"].reshape(1, -1)

    w1, b1 = fold1x1(params["b1_0"])
    w2, b2 = fold1x1(params["b2_0"])
    w3, b3 = fold1x1(params["b3_0"])

    return {
        "stem_w": jnp.concatenate([w1, w2, w3], axis=1),
        "stem_b1": b1, "stem_b2": b2, "stem_b3": b3,
        "b2_1": fold3x3(params["b2_1"]),
        "b3_1": fold3x3(params["b3_1"]),
        "b3_2": fold3x3(params["b3_2"]),
        "b4_1": fold1x1(params["b4_1"]),
    }


# --------------------------------------------------------------------------
# Inception forward (Pallas)
# --------------------------------------------------------------------------
def inception_forward(x_ncdhw, kp):
    # External NCDHW -> internal NDHWC.
    x = jnp.transpose(x_ncdhw, (0, 2, 3, 4, 1)).astype(jnp.float32)
    N, D, H, W, Cin = x.shape
    x_flat = x.reshape(N * D * H * W, Cin)

    # Branches 1/2/3 share a single fused 1x1 matmul over x.
    stem_b = jnp.concatenate([kp["stem_b1"], kp["stem_b2"], kp["stem_b3"]],
                             axis=1)
    splits = (kp["stem_b1"].shape[1], kp["stem_b2"].shape[1],
              kp["stem_b3"].shape[1])
    y1_f, t2_f, t3_f = fused_conv1x1_bias_relu(x_flat, kp["stem_w"], stem_b,
                                               splits)
    y1 = y1_f.reshape(N, D, H, W, -1)
    t2 = t2_f.reshape(N, D, H, W, -1)
    t3 = t3_f.reshape(N, D, H, W, -1)

    y2 = conv3x3x3_bias_relu(t2, *kp["b2_1"])                  # branch 2
    t3 = conv3x3x3_bias_relu(t3, *kp["b3_1"])                  # branch 3
    y3 = conv3x3x3_bias_relu(t3, *kp["b3_2"])
    y4 = maxpool3_conv1x1_bias_relu(x, *kp["b4_1"])            # branch 4

    out = jnp.concatenate([y1, y2, y3, y4], axis=-1)           # channel concat
    return jnp.transpose(out, (0, 4, 1, 2, 3))                 # back to NCDHW


# --------------------------------------------------------------------------
# Pure-JAX reference (for correctness check) — uses the un-folded params
# --------------------------------------------------------------------------
def _ref_c1(x, p):
    y = jnp.einsum("ndhwc,co->ndhwo", x, p["w"],
                   precision=jax.lax.Precision.HIGHEST)
    return jnp.maximum(y * p["scale"] + p["bias"], 0.0)


def _ref_c3(x, p):
    y = jax.lax.conv_general_dilated(
        x, p["w"], window_strides=(1, 1, 1),
        padding=((1, 1), (1, 1), (1, 1)),
        dimension_numbers=("NDHWC", "DHWIO", "NDHWC"),
        precision=jax.lax.Precision.HIGHEST)
    return jnp.maximum(y * p["scale"] + p["bias"], 0.0)


def _ref_pool(x):
    return jax.lax.reduce_window(
        x, -jnp.inf, jax.lax.max,
        (1, 3, 3, 3, 1), (1, 1, 1, 1, 1),
        ((0, 0), (1, 1), (1, 1), (1, 1), (0, 0)))


def inception_reference(x_ncdhw, params):
    x = jnp.transpose(x_ncdhw, (0, 2, 3, 4, 1)).astype(jnp.float32)
    y1 = _ref_c1(x, params["b1_0"])
    y2 = _ref_c3(_ref_c1(x, params["b2_0"]), params["b2_1"])
    y3 = _ref_c3(_ref_c3(_ref_c1(x, params["b3_0"]), params["b3_1"]),
                 params["b3_2"])
    y4 = _ref_c1(_ref_pool(x), params["b4_1"])
    out = jnp.concatenate([y1, y2, y3, y4], axis=-1)
    return jnp.transpose(out, (0, 4, 1, 2, 3))


# --------------------------------------------------------------------------
if __name__ == "__main__":
    key = jax.random.PRNGKey(0)
    k_x, k_p = jax.random.split(key)

    # Small but non-degenerate shapes: N=2, in_planes=16, spatial D=H=W=8.
    in_planes, n1x1, n3x3red, n3x3 = 16, 16, 16, 16
    n5x5red, n5x5, pool_planes = 16, 16, 16
    N, D, H, W = 2, 8, 8, 8

    x = jax.random.normal(k_x, (N, in_planes, D, H, W), jnp.float32)  # NCDHW
    params = init_inception_params(k_p, in_planes, n1x1, n3x3red, n3x3,
                                   n5x5red, n5x5, pool_planes)
    kparams = prepare_kernel_params(params)

    fwd = jax.jit(inception_forward)
    out = jax.block_until_ready(fwd(x, kparams))

    expected_channels = n1x1 + n3x3 + n5x5 + pool_planes
    assert out.shape == (N, expected_channels, D, H, W), out.shape

    ref = jax.block_until_ready(inception_reference(x, params))
    max_err = float(jnp.max(jnp.abs(out - ref)))
    assert jnp.allclose(out, ref, rtol=2e-4, atol=2e-4), max_err

    print("KERNEL_OK")
</pallas_src>

<mosaic_0001>
module attributes {stable_mosaic.version = 11 : i64} {
  func.func @_fused_matmul_bias_relu_kernel(%arg0: i32, %arg1: memref<512x16xf32, #tpu.memory_space<vmem>>, %arg2: memref<16x48xf32, #tpu.memory_space<vmem>>, %arg3: memref<1x48xf32, #tpu.memory_space<vmem>>, %arg4: memref<512x16xf32, #tpu.memory_space<vmem>>, %arg5: memref<512x16xf32, #tpu.memory_space<vmem>>, %arg6: memref<512x16xf32, #tpu.memory_space<vmem>>) attributes {dimension_semantics = [#tpu.dimension_semantics<parallel>], iteration_bounds = array<i64: 2>, scalar_prefetch = 0 : i64, scratch_operands = 0 : i64, tpu.core_type = #tpu.core_type<tc>, window_params = [{transform_indices = @transform_0, window_bounds = array<i64: 512, 16>}, {pipeline_mode = #tpu.pipeline_mode<synchronous>, transform_indices = @transform_1, window_bounds = array<i64: 16, 48>}, {pipeline_mode = #tpu.pipeline_mode<synchronous>, transform_indices = @transform_2, window_bounds = array<i64: 1, 48>}, {transform_indices = @transform_3, window_bounds = array<i64: 512, 16>}, {transform_indices = @transform_4, window_bounds = array<i64: 512, 16>}, {transform_indices = @transform_5, window_bounds = array<i64: 512, 16>}]} {
    %c0 = arith.constant 0 : index
    %c0_0 = arith.constant 0 : index
    %0 = vector.load %arg1[%c0, %c0_0] : memref<512x16xf32, #tpu.memory_space<vmem>>, vector<512x16xf32>
    %c0_1 = arith.constant 0 : index
    %c0_2 = arith.constant 0 : index
    %1 = vector.load %arg2[%c0_1, %c0_2] : memref<16x48xf32, #tpu.memory_space<vmem>>, vector<16x48xf32>
    %cst = arith.constant dense<0.000000e+00> : vector<512x48xf32>
    %2 = tpu.matmul %0, %1, %cst {dimension_numbers = #tpu.dot_dimension_numbers<[1], [0], [0], [1], [0, 0, 1, 1], [], []>} : vector<512x16xf32>, vector<16x48xf32>, vector<512x48xf32> -> vector<512x48xf32>
    %c0_3 = arith.constant 0 : index
    %c0_4 = arith.constant 0 : index
    %3 = vector.load %arg3[%c0_3, %c0_4] : memref<1x48xf32, #tpu.memory_space<vmem>>, vector<1x48xf32>
    %4 = vector.broadcast %3 : vector<1x48xf32> to vector<512x48xf32>
    %5 = arith.addf %2, %4 : vector<512x48xf32>
    %cst_5 = arith.constant 0.000000e+00 : f32
    %6 = vector.broadcast %cst_5 : f32 to vector<512x48xf32>
    %7 = arith.maximumf %5, %6 : vector<512x48xf32>
    %8 = vector.extract_strided_slice %7 {offsets = [0, 0], sizes = [512, 16], strides = [1, 1]} : vector<512x48xf32> to vector<512x16xf32>
    %c0_6 = arith.constant 0 : index
    %c0_7 = arith.constant 0 : index
    %9 = vector.load %arg4[%c0_6, %c0_7] : memref<512x16xf32, #tpu.memory_space<vmem>>, vector<512x16xf32>
    tpu.vector_store %arg4[%c0_6, %c0_7], %8 {strides = array<i32>} : memref<512x16xf32, #tpu.memory_space<vmem>>, vector<512x16xf32>,
    %10 = vector.extract_strided_slice %7 {offsets = [0, 16], sizes = [512, 16], strides = [1, 1]} : vector<512x48xf32> to vector<512x16xf32>
    %c0_8 = arith.constant 0 : index
    %c0_9 = arith.constant 0 : index
    %11 = vector.load %arg5[%c0_8, %c0_9] : memref<512x16xf32, #tpu.memory_space<vmem>>, vector<512x16xf32>
    tpu.vector_store %arg5[%c0_8, %c0_9], %10 {strides = array<i32>} : memref<512x16xf32, #tpu.memory_space<vmem>>, vector<512x16xf32>,
    %12 = vector.extract_strided_slice %7 {offsets = [0, 32], sizes = [512, 16], strides = [1, 1]} : vector<512x48xf32> to vector<512x16xf32>
    %c0_10 = arith.constant 0 : index
    %c0_11 = arith.constant 0 : index
    %13 = vector.load %arg6[%c0_10, %c0_11] : memref<512x16xf32, #tpu.memory_space<vmem>>, vector<512x16xf32>
    tpu.vector_store %arg6[%c0_10, %c0_11], %12 {strides = array<i32>} : memref<512x16xf32, #tpu.memory_space<vmem>>, vector<512x16xf32>,
    return
  }
  func.func @transform_0(%arg0: i32) -> (i32, i32) {
    %c0_i32 = arith.constant 0 : i32
    %c0_i32_0 = arith.constant 0 : i32
    return %arg0, %c0_i32 : i32, i32
  }
  func.func @transform_1(%arg0: i32) -> (i32, i32) {
    %c0_i32 = arith.constant 0 : i32
    %c0_i32_0 = arith.constant 0 : i32
    %c0_i32_1 = arith.constant 0 : i32
    return %c0_i32, %c0_i32_0 : i32, i32
  }
  func.func @transform_2(%arg0: i32) -> (i32, i32) {
    %c0_i32 = arith.constant 0 : i32
    %c0_i32_0 = arith.constant 0 : i32
    %c0_i32_1 = arith.constant 0 : i32
    return %c0_i32, %c0_i32_0 : i32, i32
  }
  func.func @transform_3(%arg0: i32) -> (i32, i32) {
    %c0_i32 = arith.constant 0 : i32
    %c0_i32_0 = arith.constant 0 : i32
    return %arg0, %c0_i32 : i32, i32
  }
  func.func @transform_4(%arg0: i32) -> (i32, i32) {
    %c0_i32 = arith.constant 0 : i32
    %c0_i32_0 = arith.constant 0 : i32
    return %arg0, %c0_i32 : i32, i32
  }
  func.func @transform_5(%arg0: i32) -> (i32, i32) {
    %c0_i32 = arith.constant 0 : i32
    %c0_i32_0 = arith.constant 0 : i32
    return %arg0, %c0_i32 : i32, i32
  }
}

module attributes {stable_mosaic.version = 11 : i64} {
  func.func @_conv3x3x3_bias_relu_kernel(%arg0: i32, %arg1: memref<1x8x8x8x16xf32, #tpu.memory_space<vmem>>, %arg2: memref<432x16xf32, #tpu.memory_space<vmem>>, %arg3: memref<1x16xf32, #tpu.memory_space<vmem>>, %arg4: memref<1x8x8x8x16xf32, #tpu.memory_space<vmem>>) attributes {dimension_semantics = [#tpu.dimension_semantics<parallel>], iteration_bounds = array<i64: 2>, scalar_prefetch = 0 : i64, scratch_operands = 0 : i64, tpu.core_type = #tpu.core_type<tc>, window_params = [{transform_indices = @transform_0, window_bounds = array<i64: 1, 8, 8, 8, 16>}, {pipeline_mode = #tpu.pipeline_mode<synchronous>, transform_indices = @transform_1, window_bounds = array<i64: 432, 16>}, {pipeline_mode = #tpu.pipeline_mode<synchronous>, transform_indices = @transform_2, window_bounds = array<i64: 1, 16>}, {transform_indices = @transform_3, window_bounds = array<i64: 1, 8, 8, 8, 16>}]} {
    %c0 = arith.constant 0 : index
    %c0_0 = arith.constant 0 : index
    %c0_1 = arith.constant 0 : index
    %c0_2 = arith.constant 0 : index
    %c0_3 = arith.constant 0 : index
    %0 = vector.load %arg1[%c0, %c0_0, %c0_1, %c0_2, %c0_3] : memref<1x8x8x8x16xf32, #tpu.memory_space<vmem>>, vector<1x8x8x8x16xf32>
    %1 = vector.shape_cast %0 : vector<1x8x8x8x16xf32> to vector<8x8x8x16xf32>
    %cst = arith.constant 0.000000e+00 : f32
    %2 = vector.broadcast %cst : f32 to vector<8x8x1x16xf32>
    %3 = tpu.concatenate %2, %1, %2 in 2 : vector<8x8x1x16xf32>, vector<8x8x8x16xf32>, vector<8x8x1x16xf32> -> vector<8x8x10x16xf32>
    %4 = vector.extract_strided_slice %3 {offsets = [0, 0, 0, 0], sizes = [8, 8, 8, 16], strides = [1, 1, 1, 1]} : vector<8x8x10x16xf32> to vector<8x8x8x16xf32>
    %5 = vector.extract_strided_slice %3 {offsets = [0, 0, 1, 0], sizes = [8, 8, 8, 16], strides = [1, 1, 1, 1]} : vector<8x8x10x16xf32> to vector<8x8x8x16xf32>
    %6 = vector.extract_strided_slice %3 {offsets = [0, 0, 2, 0], sizes = [8, 8, 8, 16], strides = [1, 1, 1, 1]} : vector<8x8x10x16xf32> to vector<8x8x8x16xf32>
    %7 = tpu.concatenate %4, %5, %6 in 3 : vector<8x8x8x16xf32>, vector<8x8x8x16xf32>, vector<8x8x8x16xf32> -> vector<8x8x8x48xf32>
    %cst_4 = arith.constant 0.000000e+00 : f32
    %8 = vector.broadcast %cst_4 : f32 to vector<8x1x8x48xf32>
    %9 = tpu.concatenate %8, %7, %8 in 1 : vector<8x1x8x48xf32>, vector<8x8x8x48xf32>, vector<8x1x8x48xf32> -> vector<8x10x8x48xf32>
    %10 = vector.extract_strided_slice %9 {offsets = [0, 0, 0, 0], sizes = [8, 8, 8, 48], strides = [1, 1, 1, 1]} : vector<8x10x8x48xf32> to vector<8x8x8x48xf32>
    %11 = vector.extract_strided_slice %9 {offsets = [0, 1, 0, 0], sizes = [8, 8, 8, 48], strides = [1, 1, 1, 1]} : vector<8x10x8x48xf32> to vector<8x8x8x48xf32>
    %12 = vector.extract_strided_slice %9 {offsets = [0, 2, 0, 0], sizes = [8, 8, 8, 48], strides = [1, 1, 1, 1]} : vector<8x10x8x48xf32> to vector<8x8x8x48xf32>
    %13 = tpu.concatenate %10, %11, %12 in 3 : vector<8x8x8x48xf32>, vector<8x8x8x48xf32>, vector<8x8x8x48xf32> -> vector<8x8x8x144xf32>
    %cst_5 = arith.constant 0.000000e+00 : f32
    %14 = vector.broadcast %cst_5 : f32 to vector<1x8x8x144xf32>
    %15 = tpu.concatenate %14, %13, %14 in 0 : vector<1x8x8x144xf32>, vector<8x8x8x144xf32>, vector<1x8x8x144xf32> -> vector<10x8x8x144xf32>
    %16 = vector.extract_strided_slice %15 {offsets = [0, 0, 0, 0], sizes = [8, 8, 8, 144], strides = [1, 1, 1, 1]} : vector<10x8x8x144xf32> to vector<8x8x8x144xf32>
    %17 = vector.extract_strided_slice %15 {offsets = [1, 0, 0, 0], sizes = [8, 8, 8, 144], strides = [1, 1, 1, 1]} : vector<10x8x8x144xf32> to vector<8x8x8x144xf32>
    %18 = vector.extract_strided_slice %15 {offsets = [2, 0, 0, 0], sizes = [8, 8, 8, 144], strides = [1, 1, 1, 1]} : vector<10x8x8x144xf32> to vector<8x8x8x144xf32>
    %19 = tpu.concatenate %16, %17, %18 in 3 : vector<8x8x8x144xf32>, vector<8x8x8x144xf32>, vector<8x8x8x144xf32> -> vector<8x8x8x432xf32>
    %20 = vector.shape_cast %19 : vector<8x8x8x432xf32> to vector<512x432xf32>
    %c0_6 = arith.constant 0 : index
    %c0_7 = arith.constant 0 : index
    %21 = vector.load %arg2[%c0_6, %c0_7] : memref<432x16xf32, #tpu.memory_space<vmem>>, vector<432x16xf32>
    %cst_8 = arith.constant dense<0.000000e+00> : vector<512x16xf32>
    %22 = tpu.matmul %20, %21, %cst_8 {dimension_numbers = #tpu.dot_dimension_numbers<[1], [0], [0], [1], [0, 0, 1, 1], [], []>} : vector<512x432xf32>, vector<432x16xf32>, vector<512x16xf32> -> vector<512x16xf32>
    %c0_9 = arith.constant 0 : index
    %c0_10 = arith.constant 0 : index
    %23 = vector.load %arg3[%c0_9, %c0_10] : memref<1x16xf32, #tpu.memory_space<vmem>>, vector<1x16xf32>
    %24 = vector.broadcast %23 : vector<1x16xf32> to vector<512x16xf32>
    %25 = arith.addf %22, %24 : vector<512x16xf32>
    %cst_11 = arith.constant 0.000000e+00 : f32
    %26 = vector.broadcast %cst_11 : f32 to vector<512x16xf32>
    %27 = arith.maximumf %25, %26 : vector<512x16xf32>
    %28 = vector.shape_cast %27 : vector<512x16xf32> to vector<1x8x8x8x16xf32>
    %c0_12 = arith.constant 0 : index
    %c0_13 = arith.constant 0 : index
    %c0_14 = arith.constant 0 : index
    %c0_15 = arith.constant 0 : index
    %c0_16 = arith.constant 0 : index
    %29 = vector.load %arg4[%c0_12, %c0_13, %c0_14, %c0_15, %c0_16] : memref<1x8x8x8x16xf32, #tpu.memory_space<vmem>>, vector<1x8x8x8x16xf32>
    tpu.vector_store %arg4[%c0_12, %c0_13, %c0_14, %c0_15, %c0_16], %28 {strides = array<i32>} : memref<1x8x8x8x16xf32, #tpu.memory_space<vmem>>, vector<1x8x8x8x16xf32>,
    return
  }
  func.func @transform_0(%arg0: i32) -> (i32, i32, i32, i32, i32) {
    %c0_i32 = arith.constant 0 : i32
    %c0_i32_0 = arith.constant 0 : i32
    %c0_i32_1 = arith.constant 0 : i32
    %c0_i32_2 = arith.constant 0 : i32
    %c0_i32_3 = arith.constant 0 : i32
    return %arg0, %c0_i32, %c0_i32_0, %c0_i32_1, %c0_i32_2 : i32, i32, i32, i32, i32
  }
  func.func @transform_1(%arg0: i32) -> (i32, i32) {
    %c0_i32 = arith.constant 0 : i32
    %c0_i32_0 = arith.constant 0 : i32
    %c0_i32_1 = arith.constant 0 : i32
    return %c0_i32, %c0_i32_0 : i32, i32
  }
  func.func @transform_2(%arg0: i32) -> (i32, i32) {
    %c0_i32 = arith.constant 0 : i32
    %c0_i32_0 = arith.constant 0 : i32
    %c0_i32_1 = arith.constant 0 : i32
    return %c0_i32, %c0_i32_0 : i32, i32
  }
  func.func @transform_3(%arg0: i32) -> (i32, i32, i32, i32, i32) {
    %c0_i32 = arith.constant 0 : i32
    %c0_i32_0 = arith.constant 0 : i32
    %c0_i32_1 = arith.constant 0 : i32
    %c0_i32_2 = arith.constant 0 : i32
    %c0_i32_3 = arith.constant 0 : i32
    return %arg0, %c0_i32, %c0_i32_0, %c0_i32_1, %c0_i32_2 : i32, i32, i32, i32, i32
  }
}

module attributes {stable_mosaic.version = 11 : i64} {
  func.func @_maxpool3_conv1x1_bias_relu_kernel(%arg0: i32, %arg1: memref<1x8x8x8x16xf32, #tpu.memory_space<vmem>>, %arg2: memref<16x16xf32, #tpu.memory_space<vmem>>, %arg3: memref<1x16xf32, #tpu.memory_space<vmem>>, %arg4: memref<1x8x8x8x16xf32, #tpu.memory_space<vmem>>) attributes {dimension_semantics = [#tpu.dimension_semantics<parallel>], iteration_bounds = array<i64: 2>, scalar_prefetch = 0 : i64, scratch_operands = 0 : i64, tpu.core_type = #tpu.core_type<tc>, window_params = [{transform_indices = @transform_0, window_bounds = array<i64: 1, 8, 8, 8, 16>}, {pipeline_mode = #tpu.pipeline_mode<synchronous>, transform_indices = @transform_1, window_bounds = array<i64: 16, 16>}, {pipeline_mode = #tpu.pipeline_mode<synchronous>, transform_indices = @transform_2, window_bounds = array<i64: 1, 16>}, {transform_indices = @transform_3, window_bounds = array<i64: 1, 8, 8, 8, 16>}]} {
    %c0 = arith.constant 0 : index
    %c0_0 = arith.constant 0 : index
    %c0_1 = arith.constant 0 : index
    %c0_2 = arith.constant 0 : index
    %c0_3 = arith.constant 0 : index
    %0 = vector.load %arg1[%c0, %c0_0, %c0_1, %c0_2, %c0_3] : memref<1x8x8x8x16xf32, #tpu.memory_space<vmem>>, vector<1x8x8x8x16xf32>
    %1 = vector.shape_cast %0 : vector<1x8x8x8x16xf32> to vector<8x8x8x16xf32>
    %cst = arith.constant 0xFF800000 : f32
    %2 = vector.broadcast %cst : f32 to vector<8x8x1x16xf32>
    %3 = tpu.concatenate %2, %1, %2 in 2 : vector<8x8x1x16xf32>, vector<8x8x8x16xf32>, vector<8x8x1x16xf32> -> vector<8x8x10x16xf32>
    %4 = vector.extract_strided_slice %3 {offsets = [0, 0, 0, 0], sizes = [8, 8, 8, 16], strides = [1, 1, 1, 1]} : vector<8x8x10x16xf32> to vector<8x8x8x16xf32>
    %5 = vector.extract_strided_slice %3 {offsets = [0, 0, 1, 0], sizes = [8, 8, 8, 16], strides = [1, 1, 1, 1]} : vector<8x8x10x16xf32> to vector<8x8x8x16xf32>
    %6 = arith.maximumf %4, %5 : vector<8x8x8x16xf32>
    %7 = vector.extract_strided_slice %3 {offsets = [0, 0, 2, 0], sizes = [8, 8, 8, 16], strides = [1, 1, 1, 1]} : vector<8x8x10x16xf32> to vector<8x8x8x16xf32>
    %8 = arith.maximumf %6, %7 : vector<8x8x8x16xf32>
    %cst_4 = arith.constant 0xFF800000 : f32
    %9 = vector.broadcast %cst_4 : f32 to vector<8x1x8x16xf32>
    %10 = tpu.concatenate %9, %8, %9 in 1 : vector<8x1x8x16xf32>, vector<8x8x8x16xf32>, vector<8x1x8x16xf32> -> vector<8x10x8x16xf32>
    %11 = vector.extract_strided_slice %10 {offsets = [0, 0, 0, 0], sizes = [8, 8, 8, 16], strides = [1, 1, 1, 1]} : vector<8x10x8x16xf32> to vector<8x8x8x16xf32>
    %12 = vector.extract_strided_slice %10 {offsets = [0, 1, 0, 0], sizes = [8, 8, 8, 16], strides = [1, 1, 1, 1]} : vector<8x10x8x16xf32> to vector<8x8x8x16xf32>
    %13 = arith.maximumf %11, %12 : vector<8x8x8x16xf32>
    %14 = vector.extract_strided_slice %10 {offsets = [0, 2, 0, 0], sizes = [8, 8, 8, 16], strides = [1, 1, 1, 1]} : vector<8x10x8x16xf32> to vector<8x8x8x16xf32>
    %15 = arith.maximumf %13, %14 : vector<8x8x8x16xf32>
    %cst_5 = arith.constant 0xFF800000 : f32
    %16 = vector.broadcast %cst_5 : f32 to vector<1x8x8x16xf32>
    %17 = tpu.concatenate %16, %15, %16 in 0 : vector<1x8x8x16xf32>, vector<8x8x8x16xf32>, vector<1x8x8x16xf32> -> vector<10x8x8x16xf32>
    %18 = vector.extract_strided_slice %17 {offsets = [0, 0, 0, 0], sizes = [8, 8, 8, 16], strides = [1, 1, 1, 1]} : vector<10x8x8x16xf32> to vector<8x8x8x16xf32>
    %19 = vector.extract_strided_slice %17 {offsets = [1, 0, 0, 0], sizes = [8, 8, 8, 16], strides = [1, 1, 1, 1]} : vector<10x8x8x16xf32> to vector<8x8x8x16xf32>
    %20 = arith.maximumf %18, %19 : vector<8x8x8x16xf32>
    %21 = vector.extract_strided_slice %17 {offsets = [2, 0, 0, 0], sizes = [8, 8, 8, 16], strides = [1, 1, 1, 1]} : vector<10x8x8x16xf32> to vector<8x8x8x16xf32>
    %22 = arith.maximumf %20, %21 : vector<8x8x8x16xf32>
    %23 = vector.shape_cast %22 : vector<8x8x8x16xf32> to vector<512x16xf32>
    %c0_6 = arith.constant 0 : index
    %c0_7 = arith.constant 0 : index
    %24 = vector.load %arg2[%c0_6, %c0_7] : memref<16x16xf32, #tpu.memory_space<vmem>>, vector<16x16xf32>
    %cst_8 = arith.constant dense<0.000000e+00> : vector<512x16xf32>
    %25 = tpu.matmul %23, %24, %cst_8 {dimension_numbers = #tpu.dot_dimension_numbers<[1], [0], [0], [1], [0, 0, 1, 1], [], []>} : vector<512x16xf32>, vector<16x16xf32>, vector<512x16xf32> -> vector<512x16xf32>
    %c0_9 = arith.constant 0 : index
    %c0_10 = arith.constant 0 : index
    %26 = vector.load %arg3[%c0_9, %c0_10] : memref<1x16xf32, #tpu.memory_space<vmem>>, vector<1x16xf32>
    %27 = vector.broadcast %26 : vector<1x16xf32> to vector<512x16xf32>
    %28 = arith.addf %25, %27 : vector<512x16xf32>
    %cst_11 = arith.constant 0.000000e+00 : f32
    %29 = vector.broadcast %cst_11 : f32 to vector<512x16xf32>
    %30 = arith.maximumf %28, %29 : vector<512x16xf32>
    %31 = vector.shape_cast %30 : vector<512x16xf32> to vector<1x8x8x8x16xf32>
    %c0_12 = arith.constant 0 : index
    %c0_13 = arith.constant 0 : index
    %c0_14 = arith.constant 0 : index
    %c0_15 = arith.constant 0 : index
    %c0_16 = arith.constant 0 : index
    %32 = vector.load %arg4[%c0_12, %c0_13, %c0_14, %c0_15, %c0_16] : memref<1x8x8x8x16xf32, #tpu.memory_space<vmem>>, vector<1x8x8x8x16xf32>
    tpu.vector_store %arg4[%c0_12, %c0_13, %c0_14, %c0_15, %c0_16], %31 {strides = array<i32>} : memref<1x8x8x8x16xf32, #tpu.memory_space<vmem>>, vector<1x8x8x8x16xf32>,
    return
  }
  func.func @transform_0(%arg0: i32) -> (i32, i32, i32, i32, i32) {
    %c0_i32 = arith.constant 0 : i32
    %c0_i32_0 = arith.constant 0 : i32
    %c0_i32_1 = arith.constant 0 : i32
    %c0_i32_2 = arith.constant 0 : i32
    %c0_i32_3 = arith.constant 0 : i32
    return %arg0, %c0_i32, %c0_i32_0, %c0_i32_1, %c0_i32_2 : i32, i32, i32, i32, i32
  }
  func.func @transform_1(%arg0: i32) -> (i32, i32) {
    %c0_i32 = arith.constant 0 : i32
    %c0_i32_0 = arith.constant 0 : i32
    %c0_i32_1 = arith.constant 0 : i32
    return %c0_i32, %c0_i32_0 : i32, i32
  }
  func.func @transform_2(%arg0: i32) -> (i32, i32) {
    %c0_i32 = arith.constant 0 : i32
    %c0_i32_0 = arith.constant 0 : i32
    %c0_i32_1 = arith.constant 0 : i32
    return %c0_i32, %c0_i32_0 : i32, i32
  }
  func.func @transform_3(%arg0: i32) -> (i32, i32, i32, i32, i32) {
    %c0_i32 = arith.constant 0 : i32
    %c0_i32_0 = arith.constant 0 : i32
    %c0_i32_1 = arith.constant 0 : i32
    %c0_i32_2 = arith.constant 0 : i32
    %c0_i32_3 = arith.constant 0 : i32
    return %arg0, %c0_i32, %c0_i32_0, %c0_i32_1, %c0_i32_2 : i32, i32, i32, i32, i32
  }
}

</mosaic_0001>

<bundles_post_ra>
// kernel: inception_forward.5
= control target key start
LH: loop header
LB: loop body
LE: loop exit
PB: predicated region body
PF: predicated region fallthrough
CT: control target
= control target key end

     0   :  { %11 = vsyncpa [#allocation3], 0  ;;  %s3009_s0 = inlined_call_operand.hbm [shape: f32[1024,16], index: 0, kind: input, shape index: {}]   ;;  %s3010_s1 = inlined_call_operand.hbm [shape: f32[16,48], index: 1, kind: input, shape index: {}]   ;;  %s3011_s2 = inlined_call_operand.vmem [shape: f32[1,48], index: 2, kind: input, shape index: {}]   ;;  %s3012_s3 = inlined_call_operand.vmem [shape: f32[1024,16], index: 3, kind: output, shape index: {0}]   ;;  %s3013_s4 = inlined_call_operand.vmem [shape: f32[1024,16], index: 4, kind: output, shape index: {1}]   ;;  %s3014_s5 = inlined_call_operand.vmem [shape: f32[1024,16], index: 5, kind: output, shape index: {2}]  }
   0x1   :  { %13 = vsyncpa [#allocation3 + $0x1], 0 }
   0x2   :  { %14 = vsyncpa [#allocation5], 0  ;;  %s1894_s18 = smov 0   ;;  %s1896_s19 = smov 0  }
   0x3   :  { %s1898_s20 = smov 0   ;;  %s1900_s21 = smov 0  }
   0x4 LB: > { %s1614_s22 = sadd.s32 4294967295, %s1857_s21   ;;  %p40_p0 = scmp.ne.s32.totalorder %s1849_s19, %s1845_s18  ;;  %s1857_s21 = sphi %s1900_s21, %s3022_s21   ;;  %s1853_s20 = sphi %s1898_s20, %s3021_s20   ;;  %s1849_s19 = sphi %s1896_s19, %s3020_s19   ;;  %s1845_s18 = sphi %s1894_s18, %s3019_s18  }
   0x5   : > { %p1916_p1 = scmp.eq.s32.totalorder %s1614_s22, 0  ;;  %p1616_p2 = scmp.ge.s32.totalorder %s1857_s21, 1 }
   0x6   : > { %p171_p3 = scmp.lt.s32.totalorder %s1857_s21, 3  ;;  %s182_s27 = sshll.u32 %s3010_s1, 4  ;;  %s183_s27 = int_to_ptr.hbm [resolvable:$true] %s182_s27 }
   0x7   : > { %p1924_p4 = por %p1916_p1, %p40_p0  ;;  %s1859_s29 = smov [#allocation4]  }
   0x8   : > { %p1931_p5 = pnand %p1616_p2, %p171_p3  ;;  %s184_s30 = sshll.u32 %s1859_s29, 4  ;;  %s185_s30 = int_to_ptr.vmem [resolvable:$true] %s184_s30 }
   0x9   : > { %s1940_s6 = sadd.s32 1, %s1857_s21   ;;  %s1860_s7 = smov 128  }
   0xa   : > { %p1710_p6 = pneg %p1931_p5  ;;  %s1861_s8 = smov 8  }
   0xb   : > { %s24_s9 = ssub.s32 %s1857_s21, %s1940_s6  ;;  %s27_s10 = sadd.s32 1, %s1853_s20 }
   0xc   : > { %p1711_p7 = pnand %p1710_p6, %p1916_p1  ;;  %p25_p8 = scmp.eq.s32.totalorder %s24_s9, 0 }
   0xd   : > { %p34_p9 = scmp.ne.s32.totalorder %s1853_s20, %s1849_s19  ;;  %p35_p10 = scmp.eq.s32.totalorder %s1857_s21, 0 }
   0xe   : > { %1713 = dma.hbm_to_vmem [thread:$0]  (!%p1711_p7), %s183_s27, 256, %s185_s30, [#allocation5], %s1860_s7, %s1860_s7, %s1861_s8  }
   0xf   : > { %p1719_p11 = scmp.lt.s32.totalorder %s1857_s21, 2  ;;  %p36_p12 = por %p35_p10, %p34_p9 }
  0x10   : > { %s1953_s11 = scalar_select %p25_p8, %s1853_s20, %s27_s10  }
  0x11   : > { %s201_s12 = sand.u32 1, %s1853_s20   ;;  %s1697_s14 = sshll.u32 %s1857_s21, 9 }
  0x12   : > { %s1619_s13 = sshll.u32 %s201_s12, 9  ;;  %s210_s17 = scalar_lea.hbm %s3009_s0, %s1697_s14 }
  0x13   : > { %s205_s18 = scalar_lea.vmem [#allocation2], %s1619_s13  ;;  %s211_s26 = sshll.u32 %s210_s17, 4  ;;  %s212_s26 = int_to_ptr.hbm [resolvable:$true] %s211_s26 }
  0x14   : > { %s213_s25 = sshll.u32 %s205_s18, 4  ;;  %p1960_p13 = pnand %p1719_p11, %p36_p12  ;;  %s214_s25 = int_to_ptr.vmem [resolvable:$true] %s213_s25 }
  0x15   : > { %s202_s29 = scalar_lea.sflag [#allocation3], %s201_s12  ;;  %s1789_s30 = sshra.s32 %s212_s26, 4  ;;  %s1790_s30 = int_to_ptr.hbm [resolvable:$true] %s1789_s30 }
  0x16   : > { %s1791_s9 = scalar_lea.hbm %s1790_s30, 512  ;;  %p1793_p2 = pneg %p1960_p13 }
  0x17   : > { %p1792_p0 = scmp.ne.s32.totalorder %s1790_s30, %s1791_s9  ;;  %s1796_s14 = scalar_lea.hbm %s3009_s0, 1024 }
  0x18   : > { %p1797_p7 = scmp.lt.s32.totalorder %s1790_s30, %s3009_s0  ;;  %p1798_p8 = scmp.lt.s32.totalorder %s1796_s14, %s1791_s9 }
  0x19   : > { %p1794_p3 = pnand %p1793_p2, %p1792_p0 }
  0x1a   : > { %p1799_p9 = por %p1798_p8, %p1797_p7 }
  0x1b   : > { %p1795_p6 = pneg %p1794_p3 }
  0x1d   : > { %p1800_p10 = pnand %p1799_p9, %p1795_p6 }
  0x1f   : > { %1803 = shalt.err (!%p1800_p10)
}
  0x20   : > { %1717 = dma.hbm_to_vmem [thread:$0]  (!%p1960_p13), %s212_s26, 8192, %s214_s25, %s202_s29, %s1860_s7, %s1860_s7, %s1861_s8  }
  0x21   : > { %225 = sbr.rel (%p1931_p5) target bundleno = 628 (0x274), region = 32  ;;  %s227_s12 = sand.u32 (!%p1931_p5), 1, %s1849_s19  }
  0x22   : > { %s1623_s17 = sshll.u32 (!%p1931_p5), %s227_s12, 9  ;;  %s228_s18 = scalar_lea.sflag (!%p1931_p5), [#allocation3], %s227_s12 }
  0x23   : > { %s1980_s10 = scalar_lea.vmem (!%p1931_p5), [#allocation2], %s1623_s17 }
  0x26   : > { %1836 = dma.done.wait (%p1924_p4), %s228_s18, 8192  }
  0x27   : > { %1838 = vsyncadd (%p1924_p4), %s228_s18, 4294959104 }
  0x28   : > { %1840 = dma.done.wait (%p1916_p1), [#allocation5], 256  }
  0x29   : > { %1842 = vsyncadd (%p1916_p1), [#allocation5], 4294967040  ;;  %v358_v0 = vld [vmem:[#allocation4 + $0x8] sm:$0xff]  ;;  %v357_v1 = vld [vmem:[#allocation4] sm:$0xff]  ;;  %vm363_vm0 = vcmask 130048   ;;  %s1625_s23 = sshll.u32 %s1614_s22, 6 }
  0x2a   : > { %570 = vmatpush.msra.mxu0 %v358_v0  ;;  %1698 = vmatpush.msra.mxu1 %v358_v0  ;;  %v293_v2 = vld [vmem:[%s1980_s10] sm:$0xff]  ;;  %v310_v6 = vld [vmem:[%s1980_s10 + $0x88] sm:$0xff]  ;;  %v295_v10 = vld [vmem:[%s1980_s10 + $0x10] sm:$0xff]  ;;  %p276_p1 = scmp.lt.s32.totalorder %s1625_s23, 127  ;;  %s1862_s25 = smov 96  }
  0x2b   : > { %v309_v3 = vld [vmem:[%s1980_s10 + $0x80] sm:$0xff]  ;;  %1699 = vmatpush.msra.mxu2 %v358_v0  ;;  %1700 = vmatpush.msra.mxu3 %v358_v0  ;;  %v294_v7 = vld [vmem:[%s1980_s10 + $0x8] sm:$0xff]  ;;  %v311_v11 = vld [vmem:[%s1980_s10 + $0x90] sm:$0xff]  ;;  %s1863_s26 = smov 112  }
  0x2c   : > { %571 = vmatpush.msra.mxu0 %v357_v1  ;;  %1701 = vmatpush.msra.mxu1 %v357_v1  ;;  %v325_v4 = vld [vmem:[%s1980_s10 + $0x100] sm:$0xff]  ;;  %v342_v8 = vld [vmem:[%s1980_s10 + $0x188] sm:$0xff]  ;;  %v343_v12 = vld [vmem:[%s1980_s10 + $0x190] sm:$0xff]  ;;  %s3024_s23 = smov (!%p276_p1, %s1625_s23), 127 }
  0x2d   : > { %v341_v5 = vld [vmem:[%s1980_s10 + $0x180] sm:$0xff]  ;;  %1631 = vmatmul.msk.f32.vlgmr.msra.gmra.mxu0 %vm363_vm0, %v293_v2  ;;  %1647 = vmatmul.msk.f32.vlgmr.msra.gmra.mxu1 %vm363_vm0, %v309_v3  ;;  %v326_v9 = vld [vmem:[%s1980_s10 + $0x108] sm:$0xff]  ;;  %v327_v13 = vld [vmem:[%s1980_s10 + $0x110] sm:$0xff]  ;;  %s2073_s7 = sshll.u32 %s3024_s23, 3 }
  0x2e   : > { %1702 = vmatpush.msra.mxu2 %v357_v1  ;;  %1703 = vmatpush.msra.mxu3 %v357_v1  ;;  %v312_v14 = vld [vmem:[%s1980_s10 + $0x98] sm:$0xff]  ;;  %v297_v18 = vld [vmem:[%s1980_s10 + $0x20] sm:$0xff]  ;;  %v298_v22 = vld [vmem:[%s1980_s10 + $0x28] sm:$0xff]  ;;  %s2083_s8 = scalar_lea.vmem %s3012_s3, %s2073_s7  ;;  %s2333_s30 = scalar_lea.vmem %s3014_s5, %s2073_s7 }
  0x2f   : > { %1663 = vmatmul.msk.f32.vlgmr.msra.gmra.mxu2 %vm363_vm0, %v325_v4  ;;  %1679 = vmatmul.msk.f32.vlgmr.msra.gmra.mxu3 %vm363_vm0, %v341_v5  ;;  %v296_v15 = vld [vmem:[%s1980_s10 + $0x18] sm:$0xff]  ;;  %v313_v19 = vld [vmem:[%s1980_s10 + $0xa0] sm:$0xff]  ;;  %v314_v23 = vld [vmem:[%s1980_s10 + $0xa8] sm:$0xff]  ;;  %s2369_s14 = scalar_lea.vmem %s3013_s4, %s2073_s7 }
  0x30   : > { %v328_v16 = vld [vmem:[%s1980_s10 + $0x118] sm:$0xff]  ;;  %v345_v20 = vld [vmem:[%s1980_s10 + $0x1a0] sm:$0xff]  ;;  %v330_v24 = vld [vmem:[%s1980_s10 + $0x128] sm:$0xff] }
  0x31   : > { %v344_v17 = vld [vmem:[%s1980_s10 + $0x198] sm:$0xff]  ;;  %v329_v21 = vld [vmem:[%s1980_s10 + $0x120] sm:$0xff]  ;;  %v346_v25 = vld [vmem:[%s1980_s10 + $0x1a8] sm:$0xff] }
  0x32   : > { %v315_v26 = vld [vmem:[%s1980_s10 + $0xb0] sm:$0xff]  ;;  %v300_v30 = vld [vmem:[%s1980_s10 + $0x38] sm:$0xff]  ;;  %v301_v34 = vld [vmem:[%s1980_s10 + $0x40] sm:$0xff] }
  0x33   : > { %v299_v27 = vld [vmem:[%s1980_s10 + $0x30] sm:$0xff]  ;;  %v316_v31 = vld [vmem:[%s1980_s10 + $0xb8] sm:$0xff]  ;;  %v317_v35 = vld [vmem:[%s1980_s10 + $0xc0] sm:$0xff] }
  0x34   : > { %v331_v28 = vld [vmem:[%s1980_s10 + $0x130] sm:$0xff]  ;;  %v348_v32 = vld [vmem:[%s1980_s10 + $0x1b8] sm:$0xff]  ;;  %v333_v36 = vld [vmem:[%s1980_s10 + $0x140] sm:$0xff] }
  0x35   : > { %1648 = vmatmul.msk.f32.gmra.mxu1 %vm363_vm0, %v310_v6  ;;  %1632 = vmatmul.msk.f32.gmra.mxu0 %vm363_vm0, %v294_v7  ;;  %v347_v29 = vld [vmem:[%s1980_s10 + $0x1b0] sm:$0xff]  ;;  %v332_v33 = vld [vmem:[%s1980_s10 + $0x138] sm:$0xff]  ;;  %v349_v37 = vld [vmem:[%s1980_s10 + $0x1c0] sm:$0xff] }
  0x36   : > { %v318_v38 = vld [vmem:[%s1980_s10 + $0xc8] sm:$0xff]  ;;  %v2071_v40 = vld [vmem:[%s3011_s2] ss:$0 sm:$0xff]  ;;  %v303_v49 = vld [vmem:[%s1980_s10 + $0x50] sm:$0xff] }
  0x37   : > { %1680 = vmatmul.msk.f32.gmra.mxu3 %vm363_vm0, %v342_v8  ;;  %1664 = vmatmul.msk.f32.gmra.mxu2 %vm363_vm0, %v326_v9  ;;  %v334_v39 = vld [vmem:[%s1980_s10 + $0x148] sm:$0xff]  ;;  %v319_v50 = vld [vmem:[%s1980_s10 + $0xd0] sm:$0xff] }
  0x38   : > { %v302_v41 = vld [vmem:[%s1980_s10 + $0x48] sm:$0xff]  ;;  %v351_v51 = vld [vmem:[%s1980_s10 + $0x1d0] sm:$0xff] }
  0x39   : > { %v350_v42 = vld [vmem:[%s1980_s10 + $0x1c8] sm:$0xff]  ;;  %v335_v0 = vld [vmem:[%s1980_s10 + $0x150] sm:$0xff] }
  0x3d   : > { %1633 = vmatmul.msk.f32.gmra.mxu0 %vm363_vm0, %v295_v10  ;;  %1649 = vmatmul.msk.f32.gmra.mxu1 %vm363_vm0, %v311_v11 }
  0x3f   : > { %1681 = vmatmul.msk.f32.gmra.mxu3 %vm363_vm0, %v343_v12  ;;  %1665 = vmatmul.msk.f32.gmra.mxu2 %vm363_vm0, %v327_v13  ;;  %v304_v13 = vld [vmem:[%s1980_s10 + $0x58] sm:$0xff] }
  0x45   : > { %1650 = vmatmul.msk.f32.gmra.mxu1 %vm363_vm0, %v312_v14  ;;  %1634 = vmatmul.msk.f32.gmra.mxu0 %vm363_vm0, %v296_v15  ;;  %v320_v14 = vld [vmem:[%s1980_s10 + $0xd8] sm:$0xff] }
  0x46   : > { %v336_v15 = vld [vmem:[%s1980_s10 + $0x158] sm:$0xff] }
  0x47   : > { %1666 = vmatmul.msk.f32.gmra.mxu2 %vm363_vm0, %v328_v16  ;;  %1682 = vmatmul.msk.f32.gmra.mxu3 %vm363_vm0, %v344_v17  ;;  %v352_v16 = vld [vmem:[%s1980_s10 + $0x1d8] sm:$0xff] }
  0x4d   : > { %1635 = vmatmul.msk.f32.gmra.mxu0 %vm363_vm0, %v297_v18  ;;  %1651 = vmatmul.msk.f32.gmra.mxu1 %vm363_vm0, %v313_v19 }
  0x4f   : > { %1683 = vmatmul.msk.f32.gmra.mxu3 %vm363_vm0, %v345_v20  ;;  %1667 = vmatmul.msk.f32.gmra.mxu2 %vm363_vm0, %v329_v21 }
  0x55   : > { %1636 = vmatmul.msk.f32.gmra.mxu0 %vm363_vm0, %v298_v22  ;;  %1652 = vmatmul.msk.f32.gmra.mxu1 %vm363_vm0, %v314_v23 }
  0x57   : > { %1668 = vmatmul.msk.f32.gmra.mxu2 %vm363_vm0, %v330_v24  ;;  %1684 = vmatmul.msk.f32.gmra.mxu3 %vm363_vm0, %v346_v25 }
  0x5d   : > { %1653 = vmatmul.msk.f32.gmra.mxu1 %vm363_vm0, %v315_v26  ;;  %1637 = vmatmul.msk.f32.gmra.mxu0 %vm363_vm0, %v299_v27 }
  0x5f   : > { %1669 = vmatmul.msk.f32.gmra.mxu2 %vm363_vm0, %v331_v28  ;;  %1685 = vmatmul.msk.f32.gmra.mxu3 %vm363_vm0, %v347_v29 }
  0x65   : > { %1638 = vmatmul.msk.f32.gmra.mxu0 %vm363_vm0, %v300_v30  ;;  %1654 = vmatmul.msk.f32.gmra.mxu1 %vm363_vm0, %v316_v31 }
  0x67   : > { %1686 = vmatmul.msk.f32.gmra.mxu3 %vm363_vm0, %v348_v32  ;;  %1670 = vmatmul.msk.f32.gmra.mxu2 %vm363_vm0, %v332_v33 }
  0x6d   : > { %1639 = vmatmul.msk.f32.gmra.mxu0 %vm363_vm0, %v301_v34  ;;  %1655 = vmatmul.msk.f32.gmra.mxu1 %vm363_vm0, %v317_v35 }
  0x6f   : > { %1671 = vmatmul.msk.f32.gmra.mxu2 %vm363_vm0, %v333_v36  ;;  %1687 = vmatmul.msk.f32.gmra.mxu3 %vm363_vm0, %v349_v37 }
  0x75   : > { %1656 = vmatmul.msk.f32.gmra.mxu1 %vm363_vm0, %v318_v38  ;;  %1640 = vmatmul.msk.f32.gmra.mxu0 %vm363_vm0, %v302_v41  ;;  %v337_v41 = vld [vmem:[%s1980_s10 + $0x160] sm:$0xff] }
  0x77   : > { %1672 = vmatmul.msk.f32.gmra.mxu2 %vm363_vm0, %v334_v39  ;;  %1688 = vmatmul.msk.f32.gmra.mxu3 %vm363_vm0, %v350_v42  ;;  %v321_v39 = vld [vmem:[%s1980_s10 + $0xe0] sm:$0xff] }
  0x7d   : > { %1641 = vmatmul.msk.f32.gmra.mxu0 %vm363_vm0, %v303_v49  ;;  %1657 = vmatmul.msk.f32.gmra.mxu1 %vm363_vm0, %v319_v50 }
  0x7f   : > { %1689 = vmatmul.msk.f32.gmra.mxu3 %vm363_vm0, %v351_v51  ;;  %1673 = vmatmul.msk.f32.gmra.mxu2 %vm363_vm0, %v335_v0  ;;  %v306_v51 = vld [vmem:[%s1980_s10 + $0x68] sm:$0xff] }
  0x80   : > { %v338_v0 = vld [vmem:[%s1980_s10 + $0x168] sm:$0xff] }
  0x85   : > { %1642 = vmatmul.msk.f32.gmra.mxu0 %vm363_vm0, %v304_v13  ;;  %1658 = vmatmul.msk.f32.gmra.mxu1 %vm363_vm0, %v320_v14 }
  0x87   : > { %1674 = vmatmul.msk.f32.gmra.mxu2 %vm363_vm0, %v336_v15  ;;  %1690 = vmatmul.msk.f32.gmra.mxu3 %vm363_vm0, %v352_v16 }
  0x8d   : > { %1659 = vmatmul.msk.f32.gmra.mxu1 %vm363_vm0, %v321_v39 }
  0x8f   : > { %1675 = vmatmul.msk.f32.gmra.mxu2 %vm363_vm0, %v337_v41 }
  0x97   : > { %1676 = vmatmul.msk.f32.gmra.mxu2 %vm363_vm0, %v338_v0 }
  0xaa   : > { %v573_v43 = vpop.f32.mrf.mxu0  ;;  %v621_v44 = vpop.f32.mrf.mxu1 }
  0xab   : > { %v574_v45 = vadd.f32 %v2071_v40, %v573_v43  ;;  %v622_v46 = vadd.f32 %v2071_v40, %v621_v44 }
  0xad   : > { %v765_v47 = vmax.f32 %v574_v45, 0.0  ;;  %v781_v48 = vmax.f32 %v622_v46, 0.0  ;;  %v305_v45 = vld [vmem:[%s1980_s10 + $0x60] sm:$0xff] }
  0xae   : > { %v353_v46 = vld [vmem:[%s1980_s10 + $0x1e0] sm:$0xff]  ;;  %1643 = vmatmul.msk.f32.gmra.mxu0 %vm363_vm0, %v305_v45 }
  0xaf   : > { %829 = vst.msk [vmem:[%s2083_s8] sm:$0xff] %vm363_vm0, %v765_v47  ;;  %1245 = vrot.lane.b32.xlu2 %v781_v48, %s1862_s25  ;;  %989 = vrot.lane.b32.xlu1 %v781_v48, %s1863_s26 }
  0xb0   : > { %845 = vst.msk [vmem:[%s2083_s8 + $0x80] sm:$0xff] %vm363_vm0, %v781_v48  ;;  %957 = vrot.lane.b32.xlu0 %v765_v47, %s1863_s26  ;;  %1691 = vmatmul.msk.f32.gmra.mxu3 %vm363_vm0, %v353_v46 }
  0xb2   : > { %v669_v52 = vpop.f32.mrf.mxu2  ;;  %v717_v53 = vpop.f32.mrf.mxu3 }
  0xb3   : > { %v670_v54 = vadd.f32 %v2071_v40, %v669_v52  ;;  %v718_v55 = vadd.f32 %v2071_v40, %v717_v53  ;;  %v624_v56 = vpop.f32.mrf.mxu1  ;;  %v576_v57 = vpop.f32.mrf.mxu0  ;;  %v322_v52 = vld [vmem:[%s1980_s10 + $0xe8] sm:$0xff] }
  0xb4   : > { %v625_v58 = vadd.f32 %v2071_v40, %v624_v56  ;;  %v577_v59 = vadd.f32 %v2071_v40, %v576_v57  ;;  %v354_v53 = vld [vmem:[%s1980_s10 + $0x1e8] sm:$0xff]  ;;  %1660 = vmatmul.msk.f32.gmra.mxu1 %vm363_vm0, %v322_v52 }
  0xb5   : > { %v797_v60 = vmax.f32 %v670_v54, 0.0  ;;  %v2104_v61 = vmax.f32 %v718_v55, 0.0 }
  0xb6   : > { %v766_v62 = vmax.f32 %v577_v59, 0.0  ;;  %v2110_v63 = vmax.f32 %v625_v58, 0.0  ;;  %1644 = vmatmul.msk.f32.gmra.mxu0 %vm363_vm0, %v306_v51 }
  0xb7   : > { %861 = vst.msk [vmem:[%s2083_s8 + $0x100] sm:$0xff] %vm363_vm0, %v797_v60  ;;  %1021 = vrot.lane.b32.xlu2 %v797_v60, %s1863_s26  ;;  %1213 = vrot.lane.b32.xlu1 %v765_v47, %s1862_s25 }
  0xb8   : > { %877 = vst.msk [vmem:[%s2083_s8 + $0x180] sm:$0xff] %vm363_vm0, %v2104_v61  ;;  %1053 = vrot.lane.b32.xlu0 %v2104_v61, %s1863_s26  ;;  %1692 = vmatmul.msk.f32.gmra.mxu3 %vm363_vm0, %v354_v53 }
  0xb9   : > { %846 = vst.msk [vmem:[%s2083_s8 + $0x88] sm:$0xff] %vm363_vm0, %v2110_v63 }
  0xba   : > { %v720_v1 = vpop.f32.mrf.mxu3  ;;  %830 = vst.msk [vmem:[%s2083_s8 + $0x8] sm:$0xff] %vm363_vm0, %v766_v62  ;;  %v672_v2 = vpop.f32.mrf.mxu2 }
  0xbb   : > { %v721_v3 = vadd.f32 %v2071_v40, %v720_v1  ;;  %v673_v4 = vadd.f32 %v2071_v40, %v672_v2  ;;  %v579_v5 = vpop.f32.mrf.mxu0  ;;  %v627_v6 = vpop.f32.mrf.mxu1 }
  0xbc   : > { %v580_v7 = vadd.f32 %v2071_v40, %v579_v5  ;;  %v628_v8 = vadd.f32 %v2071_v40, %v627_v6  ;;  %v307_v6 = vld [vmem:[%s1980_s10 + $0x70] sm:$0xff] }
  0xbd   : > { %v2128_v9 = vmax.f32 %v721_v3, 0.0  ;;  %v798_v10 = vmax.f32 %v673_v4, 0.0 }
  0xbe   : > { %v2130_v11 = vmax.f32 %v580_v7, 0.0  ;;  %v2132_v12 = vmax.f32 %v628_v8, 0.0  ;;  %v323_v7 = vld [vmem:[%s1980_s10 + $0xf0] sm:$0xff]  ;;  %1645 = vmatmul.msk.f32.gmra.mxu0 %vm363_vm0, %v307_v6 }
  0xbf   : > { %878 = vst.msk [vmem:[%s2083_s8 + $0x188] sm:$0xff] %vm363_vm0, %v2128_v9  ;;  %991 = vrot.lane.b32.xlu2 %v2110_v63, %s1863_s26  ;;  %1055 = vrot.lane.b32.xlu1 %v2128_v9, %s1863_s26  ;;  %v339_v8 = vld [vmem:[%s1980_s10 + $0x170] sm:$0xff] }
  0xc0   : > { %1277 = vrot.lane.b32.xlu0 %v797_v60, %s1862_s25  ;;  %862 = vst.msk [vmem:[%s2083_s8 + $0x108] sm:$0xff] %vm363_vm0, %v798_v10  ;;  %1661 = vmatmul.msk.f32.gmra.mxu1 %vm363_vm0, %v323_v7 }
  0xc1   : > { %831 = vst.msk [vmem:[%s2083_s8 + $0x10] sm:$0xff] %vm363_vm0, %v2130_v11  ;;  %1677 = vmatmul.msk.f32.gmra.mxu2 %vm363_vm0, %v339_v8 }
  0xc2   : > { %v723_v17 = vpop.f32.mrf.mxu3  ;;  %847 = vst.msk [vmem:[%s2083_s8 + $0x90] sm:$0xff] %vm363_vm0, %v2132_v12  ;;  %v675_v18 = vpop.f32.mrf.mxu2 }
  0xc3   : > { %v724_v19 = vadd.f32 %v2071_v40, %v723_v17  ;;  %v676_v20 = vadd.f32 %v2071_v40, %v675_v18  ;;  %v630_v21 = vpop.f32.mrf.mxu1  ;;  %v582_v22 = vpop.f32.mrf.mxu0 }
  0xc4   : > { %v631_v23 = vadd.f32 %v2071_v40, %v630_v21  ;;  %v583_v24 = vadd.f32 %v2071_v40, %v582_v22  ;;  %v324_v21 = vld [vmem:[%s1980_s10 + $0xf8] sm:$0xff] }
  0xc5   : > { %v2162_v25 = vmax.f32 %v724_v19, 0.0  ;;  %v799_v26 = vmax.f32 %v676_v20, 0.0 }
  0xc6   : > { %v2164_v27 = vmax.f32 %v583_v24, 0.0  ;;  %v2171_v28 = vmax.f32 %v631_v23, 0.0 }
  0xc7   : > { %1215 = vrot.lane.b32.xlu2 %v766_v62, %s1862_s25  ;;  %1279 = vrot.lane.b32.xlu1 %v798_v10, %s1862_s25  ;;  %879 = vst.msk [vmem:[%s2083_s8 + $0x190] sm:$0xff] %vm363_vm0, %v2162_v25 }
  0xc8   : > { %959 = vrot.lane.b32.xlu0 %v766_v62, %s1863_s26  ;;  %863 = vst.msk [vmem:[%s2083_s8 + $0x110] sm:$0xff] %vm363_vm0, %v799_v26  ;;  %1662 = vmatmul.msk.f32.gmra.mxu1 %vm363_vm0, %v324_v21 }
  0xc9   : > { %848 = vst.msk [vmem:[%s2083_s8 + $0x98] sm:$0xff] %vm363_vm0, %v2171_v28 }
  0xca   : > { %832 = vst.msk [vmem:[%s2083_s8 + $0x18] sm:$0xff] %vm363_vm0, %v2164_v27  ;;  %v678_v29 = vpop.f32.mrf.mxu2  ;;  %v726_v30 = vpop.f32.mrf.mxu3 }
  0xcb   : > { %v679_v31 = vadd.f32 %v2071_v40, %v678_v29  ;;  %v585_v32 = vpop.f32.mrf.mxu0  ;;  %v727_v33 = vadd.f32 %v2071_v40, %v726_v30  ;;  %v633_v38 = vpop.f32.mrf.mxu1 }
  0xcc   : > { %v586_v34 = vadd.f32 %v2071_v40, %v585_v32  ;;  %v634_v42 = vadd.f32 %v2071_v40, %v633_v38  ;;  %v340_v32 = vld [vmem:[%s1980_s10 + $0x178] sm:$0xff] }
  0xcd   : > { %v2185_v35 = vmax.f32 %v679_v31, 0.0  ;;  %v2187_v36 = vmax.f32 %v727_v33, 0.0  ;;  %v308_v31 = vld [vmem:[%s1980_s10 + $0x78] sm:$0xff]  ;;  %1678 = vmatmul.msk.f32.gmra.mxu2 %vm363_vm0, %v340_v32 }
  0xce   : > { %v2189_v37 = vmax.f32 %v586_v34, 0.0  ;;  %v2211_v43 = vmax.f32 %v634_v42, 0.0  ;;  %v356_v33 = vld [vmem:[%s1980_s10 + $0x1f8] sm:$0xff]  ;;  %1646 = vmatmul.msk.f32.gmra.mxu0 %vm363_vm0, %v308_v31 }
  0xcf   : > { %1057 = vrot.lane.b32.xlu2 %v2162_v25, %s1863_s26  ;;  %961 = vrot.lane.b32.xlu1 %v2130_v11, %s1863_s26  ;;  %864 = vst.msk [vmem:[%s2083_s8 + $0x118] sm:$0xff] %vm363_vm0, %v2185_v35 }
  0xd0   : > { %1247 = vrot.lane.b32.xlu0 %v2110_v63, %s1862_s25  ;;  %833 = vst.msk [vmem:[%s2083_s8 + $0x20] sm:$0xff] %vm363_vm0, %v2189_v37 }
  0xd1   : > { %880 = vst.msk [vmem:[%s2083_s8 + $0x198] sm:$0xff] %vm363_vm0, %v2187_v36 }
  0xd2   : > { %849 = vst.msk [vmem:[%s2083_s8 + $0xa0] sm:$0xff] %vm363_vm0, %v2211_v43  ;;  %v729_v44 = vpop.f32.mrf.mxu3  ;;  %v681_v56 = vpop.f32.mrf.mxu2 }
  0xd3   : > { %v730_v47 = vadd.f32 %v2071_v40, %v729_v44  ;;  %v588_v49 = vpop.f32.mrf.mxu0  ;;  %v636_v50 = vpop.f32.mrf.mxu1  ;;  %v682_v57 = vadd.f32 %v2071_v40, %v681_v56 }
  0xd4   : > { %v589_v54 = vadd.f32 %v2071_v40, %v588_v49  ;;  %v637_v55 = vadd.f32 %v2071_v40, %v636_v50 }
  0xd5   : > { %v2225_v48 = vmax.f32 %v730_v47, 0.0  ;;  %v2248_v60 = vmax.f32 %v682_v57, 0.0 }
  0xd6   : > { %v2244_v58 = vmax.f32 %v589_v54, 0.0  ;;  %v2246_v59 = vmax.f32 %v637_v55, 0.0 }
  0xd7   : > { %1281 = vrot.lane.b32.xlu2 %v799_v26, %s1862_s25  ;;  %1249 = vrot.lane.b32.xlu1 %v2132_v12, %s1862_s25  ;;  %881 = vst.msk [vmem:[%s2083_s8 + $0x1a0] sm:$0xff] %vm363_vm0, %v2225_v48 }
  0xd8   : > { %1023 = vrot.lane.b32.xlu0 %v798_v10, %s1863_s26  ;;  %834 = vst.msk [vmem:[%s2083_s8 + $0x28] sm:$0xff] %vm363_vm0, %v2244_v58 }
  0xd9   : > { %850 = vst.msk [vmem:[%s2083_s8 + $0xa8] sm:$0xff] %vm363_vm0, %v2246_v59 }
  0xda   : > { %865 = vst.msk [vmem:[%s2083_s8 + $0x120] sm:$0xff] %vm363_vm0, %v2248_v60  ;;  %v684_v62 = vpop.f32.mrf.mxu2  ;;  %v732_v63 = vpop.f32.mrf.mxu3 }
  0xdb   : > { %v685_v1 = vadd.f32 %v2071_v40, %v684_v62  ;;  %v733_v2 = vadd.f32 %v2071_v40, %v732_v63  ;;  %v639_v5 = vpop.f32.mrf.mxu1  ;;  %v591_v13 = vpop.f32.mrf.mxu0 }
  0xdc   : > { %v640_v10 = vadd.f32 %v2071_v40, %v639_v5  ;;  %v592_v15 = vadd.f32 %v2071_v40, %v591_v13 }
  0xdd   : > { %v2269_v3 = vmax.f32 %v685_v1, 0.0  ;;  %v2271_v4 = vmax.f32 %v733_v2, 0.0 }
  0xde   : > { %v2304_v17 = vmax.f32 %v592_v15, 0.0 }
  0xdf   : > { %1251 = vrot.lane.b32.xlu2 %v2171_v28, %s1862_s25  ;;  %1025 = vrot.lane.b32.xlu1 %v799_v26, %s1863_s26  ;;  %866 = vst.msk [vmem:[%s2083_s8 + $0x128] sm:$0xff] %vm363_vm0, %v2269_v3 }
  0xe0   : > { %993 = vrot.lane.b32.xlu0 %v2132_v12, %s1863_s26  ;;  %882 = vst.msk [vmem:[%s2083_s8 + $0x1a8] sm:$0xff] %vm363_vm0, %v2271_v4  ;;  %v787_v12 = vmax.f32 %v640_v10, 0.0 }
  0xe1   : > { %835 = vst.msk [vmem:[%s2083_s8 + $0x30] sm:$0xff] %vm363_vm0, %v2304_v17 }
  0xe2   : > { %851 = vst.msk [vmem:[%s2083_s8 + $0xb0] sm:$0xff] %vm363_vm0, %v787_v12  ;;  %v687_v14 = vpop.f32.mrf.mxu2  ;;  %v735_v24 = vpop.f32.mrf.mxu3 }
  0xe3   : > { %v688_v16 = vadd.f32 %v2071_v40, %v687_v14  ;;  %v594_v19 = vpop.f32.mrf.mxu0  ;;  %v642_v20 = vpop.f32.mrf.mxu1  ;;  %v736_v26 = vadd.f32 %v2071_v40, %v735_v24 }
  0xe4   : > { %v595_v22 = vadd.f32 %v2071_v40, %v594_v19  ;;  %v643_v23 = vadd.f32 %v2071_v40, %v642_v20 }
  0xe5   : > { %v2306_v18 = vmax.f32 %v688_v16, 0.0 }
  0xe6   : > { %v2344_v30 = vmax.f32 %v643_v23, 0.0 }
  0xe7   : > { %1027 = vrot.lane.b32.xlu2 %v2185_v35, %s1863_s26  ;;  %963 = vrot.lane.b32.xlu1 %v2164_v27, %s1863_s26  ;;  %867 = vst.msk [vmem:[%s2083_s8 + $0x130] sm:$0xff] %vm363_vm0, %v2306_v18 }
  0xe8   : > { %1217 = vrot.lane.b32.xlu0 %v2130_v11, %s1862_s25  ;;  %v355_v11 = vld [vmem:[%s1980_s10 + $0x1f0] sm:$0xff]  ;;  %852 = vst.msk [vmem:[%s2083_s8 + $0xb8] sm:$0xff] %vm363_vm0, %v2344_v30 }
  0xe9   : > { %1693 = vmatmul.msk.f32.gmra.mxu3 %vm363_vm0, %v355_v11 }
  0xea   : > { %v738_v34 = vpop.f32.mrf.mxu3  ;;  %v690_v44 = vpop.f32.mrf.mxu2 }
  0xeb   : > { %v597_v39 = vpop.f32.mrf.mxu0  ;;  %v645_v41 = vpop.f32.mrf.mxu1  ;;  %v691_v45 = vadd.f32 %v2071_v40, %v690_v44 }
  0xec   : > { %v598_v42 = vadd.f32 %v2071_v40, %v597_v39 }
  0xed   : > { %v2391_v49 = vmax.f32 %v691_v45, 0.0 }
  0xee   : > { %v2385_v46 = vmax.f32 %v598_v42, 0.0 }
  0xef   : > { %965 = vrot.lane.b32.xlu2 %v2189_v37, %s1863_s26  ;;  %995 = vrot.lane.b32.xlu1 %v2171_v28, %s1863_s26  ;;  %v2339_v28 = vmax.f32 %v736_v26, 0.0  ;;  %868 = vst.msk [vmem:[%s2083_s8 + $0x138] sm:$0xff] %vm363_vm0, %v2391_v49 }
  0xf0   : > { %1059 = vrot.lane.b32.xlu0 %v2187_v36, %s1863_s26  ;;  %837 = vst.msk [vmem:[%s2083_s8 + $0x40] sm:$0xff] %vm363_vm0, %v2385_v46 }
  0xf1   : > { %883 = vst.msk [vmem:[%s2083_s8 + $0x1b0] sm:$0xff] %vm363_vm0, %v2339_v28  ;;  %1694 = vmatmul.msk.f32.gmra.mxu3 %vm363_vm0, %v356_v33 }
  0xf2   : > { %v741_v51 = vpop.f32.mrf.mxu3  ;;  %v693_v52 = vpop.f32.mrf.mxu2 }
  0xf3   : > { %v742_v53 = vadd.f32 %v2071_v40, %v741_v51  ;;  %v694_v54 = vadd.f32 %v2071_v40, %v693_v52  ;;  %v648_v62 = vpop.f32.mrf.mxu1  ;;  %v600_v6 = vpop.f32.mrf.mxu0 }
  0xf4   : > { %v649_v63 = vadd.f32 %v2071_v40, %v648_v62  ;;  %v601_v8 = vadd.f32 %v2071_v40, %v600_v6 }
  0xf5   : > { %v2410_v55 = vmax.f32 %v742_v53, 0.0 }
  0xf6   : > { %v2433_v0 = vmax.f32 %v649_v63, 0.0  ;;  %v2451_v10 = vmax.f32 %v601_v8, 0.0 }
  0xf7   : > { %997 = vrot.lane.b32.xlu2 %v2211_v43, %s1863_s26  ;;  %1219 = vrot.lane.b32.xlu1 %v2164_v27, %s1862_s25  ;;  %v2335_v27 = vmax.f32 %v595_v22, 0.0  ;;  %885 = vst.msk [vmem:[%s2083_s8 + $0x1c0] sm:$0xff] %vm363_vm0, %v2410_v55 }
  0xf8   : > { %1283 = vrot.lane.b32.xlu0 %v2185_v35, %s1862_s25  ;;  %v739_v35 = vadd.f32 %v2071_v40, %v738_v34  ;;  %854 = vst.msk [vmem:[%s2083_s8 + $0xc8] sm:$0xff] %vm363_vm0, %v2433_v0 }
  0xf9   : > { %836 = vst.msk [vmem:[%s2083_s8 + $0x38] sm:$0xff] %vm363_vm0, %v2335_v27 }
  0xfa   : > { %v696_v7 = vpop.f32.mrf.mxu2  ;;  %838 = vst.msk [vmem:[%s2083_s8 + $0x48] sm:$0xff] %vm363_vm0, %v2451_v10  ;;  %v744_v20 = vpop.f32.mrf.mxu3 }
  0xfb   : > { %v697_v11 = vadd.f32 %v2071_v40, %v696_v7  ;;  %v603_v16 = vpop.f32.mrf.mxu0  ;;  %v745_v21 = vadd.f32 %v2071_v40, %v744_v20 }
  0xfc   : > { %v604_v19 = vadd.f32 %v2071_v40, %v603_v16 }
  0xfd   : > { %v2463_v15 = vmax.f32 %v697_v11, 0.0 }
  0xfe   : > { %v2476_v22 = vmax.f32 %v604_v19, 0.0 }
  0xff   : > { %1221 = vrot.lane.b32.xlu2 %v2189_v37, %s1862_s25  ;;  %1061 = vrot.lane.b32.xlu1 %v2225_v48, %s1863_s26  ;;  %v2373_v37 = vmax.f32 %v739_v35, 0.0  ;;  %870 = vst.msk [vmem:[%s2083_s8 + $0x148] sm:$0xff] %vm363_vm0, %v2463_v15 }
 0x100   : > { %1253 = vrot.lane.b32.xlu0 %v2211_v43, %s1862_s25  ;;  %v646_v43 = vadd.f32 %v2071_v40, %v645_v41  ;;  %839 = vst.msk [vmem:[%s2083_s8 + $0x50] sm:$0xff] %vm363_vm0, %v2476_v22 }
 0x101   : > { %884 = vst.msk [vmem:[%s2083_s8 + $0x1b8] sm:$0xff] %vm363_vm0, %v2373_v37 }
 0x102   : > { %v2387_v47 = vmax.f32 %v646_v43, 0.0  ;;  %v747_v31 = vpop.f32.mrf.mxu3  ;;  %v699_v44 = vpop.f32.mrf.mxu2 }
 0x103   : > { %v748_v32 = vadd.f32 %v2071_v40, %v747_v31  ;;  %v606_v39 = vpop.f32.mrf.mxu0  ;;  %v700_v45 = vadd.f32 %v2071_v40, %v699_v44 }
 0x104   : > { %853 = vst.msk [vmem:[%s2083_s8 + $0xc0] sm:$0xff] %vm363_vm0, %v2387_v47  ;;  %v607_v42 = vadd.f32 %v2071_v40, %v606_v39 }
 0x105   : > { %v2507_v35 = vmax.f32 %v748_v32, 0.0 }
 0x107   : > { %967 = vrot.lane.b32.xlu2 %v2244_v58, %s1863_s26  ;;  %1255 = vrot.lane.b32.xlu1 %v2246_v59, %s1862_s25  ;;  %887 = vst.msk [vmem:[%s2083_s8 + $0x1d0] sm:$0xff] %vm363_vm0, %v2507_v35 }
 0x108   : > { %1029 = vrot.lane.b32.xlu0 %v2248_v60, %s1863_s26 }
 0x109   : > { %v1246_v29 = vpop.permute.xlu2 %1245 }
 0x10a   : > { %1421 = vst.msk [vmem:[%s2333_s30 + $0x80] sm:$0xff] %vm363_vm0, %v1246_v29  ;;  %v2486_v29 = vmax.f32 %v745_v21, 0.0 }
 0x10c   : > { %886 = vst.msk [vmem:[%s2083_s8 + $0x1c8] sm:$0xff] %vm363_vm0, %v2486_v29 }
 0x10f   : > { %1063 = vrot.lane.b32.xlu2 %v2271_v4, %s1863_s26  ;;  %1031 = vrot.lane.b32.xlu1 %v2269_v3, %s1863_s26 }
 0x110   : > { %999 = vrot.lane.b32.xlu0 %v2246_v59, %s1863_s26 }
 0x111   : > { %v1022_v38 = vpop.permute.xlu2 %1021 }
 0x112   : > { %1181 = vst.msk [vmem:[%s2369_s14 + $0x100] sm:$0xff] %vm363_vm0, %v1022_v38 }
 0x117   : > { %1257 = vrot.lane.b32.xlu2 %v787_v12, %s1862_s25  ;;  %1001 = vrot.lane.b32.xlu1 %v787_v12, %s1863_s26 }
 0x118   : > { %1223 = vrot.lane.b32.xlu0 %v2244_v58, %s1862_s25  ;;  %v2414_v58 = vmax.f32 %v694_v54, 0.0  ;;  %v2536_v54 = vmax.f32 %v700_v45, 0.0 }
 0x119   : > { %v992_v50 = vpop.permute.xlu2 %991 }
 0x11a   : > { %1166 = vst.msk [vmem:[%s2369_s14 + $0x88] sm:$0xff] %vm363_vm0, %v992_v50 }
 0x11b   : > { %869 = vst.msk [vmem:[%s2083_s8 + $0x140] sm:$0xff] %vm363_vm0, %v2414_v58 }
 0x11c   : > { %871 = vst.msk [vmem:[%s2083_s8 + $0x150] sm:$0xff] %vm363_vm0, %v2536_v54 }
 0x11f   : > { %1033 = vrot.lane.b32.xlu2 %v2306_v18, %s1863_s26  ;;  %1225 = vrot.lane.b32.xlu1 %v2304_v17, %s1862_s25 }
 0x120   : > { %969 = vrot.lane.b32.xlu0 %v2304_v17, %s1863_s26  ;;  %v651_v17 = vpop.f32.mrf.mxu1 }
 0x121   : > { %v990_v56 = vpop.permute.xlu1 %989  ;;  %v1216_v57 = vpop.permute.xlu2 %1215  ;;  %v652_v23 = vadd.f32 %v2071_v40, %v651_v17 }
 0x122   : > { %1165 = vst.msk [vmem:[%s2369_s14 + $0x80] sm:$0xff] %vm363_vm0, %v990_v56  ;;  %v958_v59 = vpop.permute.xlu0 %957  ;;  %v750_v56 = vpop.f32.mrf.mxu3 }
 0x123   : > { %1406 = vst.msk [vmem:[%s2333_s30 + $0x8] sm:$0xff] %vm363_vm0, %v1216_v57  ;;  %v751_v57 = vadd.f32 %v2071_v40, %v750_v56 }
 0x124   : > { %1149 = vst.msk [vmem:[%s2369_s14] sm:$0xff] %vm363_vm0, %v958_v59 }
 0x125   : > { %v2554_v62 = vmax.f32 %v751_v57, 0.0 }
 0x127   : > { %1003 = vrot.lane.b32.xlu2 %v2344_v30, %s1863_s26  ;;  %971 = vrot.lane.b32.xlu1 %v2335_v27, %s1863_s26  ;;  %888 = vst.msk [vmem:[%s2083_s8 + $0x1d8] sm:$0xff] %vm363_vm0, %v2554_v62 }
 0x128   : > { %1065 = vrot.lane.b32.xlu0 %v2339_v28, %s1863_s26  ;;  %v654_v41 = vpop.f32.mrf.mxu1 }
 0x129   : > { %v1058_v1 = vpop.permute.xlu2 %1057  ;;  %v1214_v2 = vpop.permute.xlu1 %1213  ;;  %v655_v43 = vadd.f32 %v2071_v40, %v654_v41 }
 0x12a   : > { %1199 = vst.msk [vmem:[%s2369_s14 + $0x190] sm:$0xff] %vm363_vm0, %v1058_v1  ;;  %v1054_v5 = vpop.permute.xlu0 %1053 }
 0x12b   : > { %1405 = vst.msk [vmem:[%s2333_s30] sm:$0xff] %vm363_vm0, %v1214_v2  ;;  %v2532_v52 = vmax.f32 %v655_v43, 0.0 }
 0x12c   : > { %1197 = vst.msk [vmem:[%s2369_s14 + $0x180] sm:$0xff] %vm363_vm0, %v1054_v5 }
 0x12d   : > { %856 = vst.msk [vmem:[%s2083_s8 + $0xd8] sm:$0xff] %vm363_vm0, %v2532_v52 }
 0x12f   : > { %1227 = vrot.lane.b32.xlu2 %v2335_v27, %s1862_s25  ;;  %1067 = vrot.lane.b32.xlu1 %v2373_v37, %s1863_s26 }
 0x130   : > { %1259 = vrot.lane.b32.xlu0 %v2344_v30, %s1862_s25  ;;  %v2490_v30 = vmax.f32 %v652_v23, 0.0  ;;  %v657_v5 = vpop.f32.mrf.mxu1 }
 0x131   : > { %v1282_v12 = vpop.permute.xlu2 %1281  ;;  %v1056_v13 = vpop.permute.xlu1 %1055  ;;  %v658_v6 = vadd.f32 %v2071_v40, %v657_v5 }
 0x132   : > { %1439 = vst.msk [vmem:[%s2333_s30 + $0x110] sm:$0xff] %vm363_vm0, %v1282_v12  ;;  %v1278_v14 = vpop.permute.xlu0 %1277  ;;  %v609_v12 = vpop.f32.mrf.mxu0 }
 0x133   : > { %1198 = vst.msk [vmem:[%s2369_s14 + $0x188] sm:$0xff] %vm363_vm0, %v1056_v13  ;;  %v2577_v7 = vmax.f32 %v658_v6, 0.0 }
 0x134   : > { %1437 = vst.msk [vmem:[%s2333_s30 + $0x100] sm:$0xff] %vm363_vm0, %v1278_v14  ;;  %v610_v14 = vadd.f32 %v2071_v40, %v609_v12 }
 0x135   : > { %855 = vst.msk [vmem:[%s2083_s8 + $0xd0] sm:$0xff] %vm363_vm0, %v2490_v30 }
 0x136   : > { %857 = vst.msk [vmem:[%s2083_s8 + $0xe0] sm:$0xff] %vm363_vm0, %v2577_v7  ;;  %v2595_v16 = vmax.f32 %v610_v14, 0.0 }
 0x137   : > { %973 = vrot.lane.b32.xlu2 %v2385_v46, %s1863_s26  ;;  %1261 = vrot.lane.b32.xlu1 %v2387_v47, %s1862_s25 }
 0x138   : > { %1035 = vrot.lane.b32.xlu0 %v2391_v49, %s1863_s26  ;;  %841 = vst.msk [vmem:[%s2083_s8 + $0x60] sm:$0xff] %vm363_vm0, %v2595_v16 }
 0x139   : > { %v1252_v24 = vpop.permute.xlu2 %1251  ;;  %v1280_v26 = vpop.permute.xlu1 %1279 }
 0x13a   : > { %1424 = vst.msk [vmem:[%s2333_s30 + $0x98] sm:$0xff] %vm363_vm0, %v1252_v24  ;;  %v960_v27 = vpop.permute.xlu0 %959  ;;  %v612_v23 = vpop.f32.mrf.mxu0 }
 0x13b   : > { %1438 = vst.msk [vmem:[%s2333_s30 + $0x108] sm:$0xff] %vm363_vm0, %v1280_v26  ;;  %v660_v24 = vpop.f32.mrf.mxu1  ;;  %v613_v26 = vadd.f32 %v2071_v40, %v612_v23 }
 0x13c   : > { %1150 = vst.msk [vmem:[%s2369_s14 + $0x8] sm:$0xff] %vm363_vm0, %v960_v27  ;;  %v753_v27 = vpop.f32.mrf.mxu3  ;;  %v661_v32 = vadd.f32 %v2071_v40, %v660_v24 }
 0x13d   : > { %v2620_v31 = vmax.f32 %v613_v26, 0.0 }
 0x13e   : > { %v2634_v41 = vmax.f32 %v661_v32, 0.0 }
 0x13f   : > { %1069 = vrot.lane.b32.xlu2 %v2410_v55, %s1863_s26  ;;  %1037 = vrot.lane.b32.xlu1 %v2414_v58, %s1863_s26  ;;  %842 = vst.msk [vmem:[%s2083_s8 + $0x68] sm:$0xff] %vm363_vm0, %v2620_v31 }
 0x140   : > { %1005 = vrot.lane.b32.xlu0 %v2387_v47, %s1863_s26  ;;  %v2525_v47 = vmax.f32 %v607_v42, 0.0  ;;  %858 = vst.msk [vmem:[%s2083_s8 + $0xe8] sm:$0xff] %vm363_vm0, %v2634_v41 }
 0x141   : > { %v1028_v33 = vpop.permute.xlu2 %1027  ;;  %v962_v34 = vpop.permute.xlu1 %961 }
 0x142   : > { %1184 = vst.msk [vmem:[%s2369_s14 + $0x118] sm:$0xff] %vm363_vm0, %v1028_v33  ;;  %v1248_v38 = vpop.permute.xlu0 %1247 }
 0x143   : > { %1151 = vst.msk [vmem:[%s2369_s14 + $0x10] sm:$0xff] %vm363_vm0, %v962_v34  ;;  %v663_v56 = vpop.f32.mrf.mxu1 }
 0x144   : > { %1422 = vst.msk [vmem:[%s2333_s30 + $0x88] sm:$0xff] %vm363_vm0, %v1248_v38  ;;  %v756_v42 = vpop.f32.mrf.mxu3 }
 0x145   : > { %840 = vst.msk [vmem:[%s2083_s8 + $0x58] sm:$0xff] %vm363_vm0, %v2525_v47  ;;  %v757_v43 = vadd.f32 %v2071_v40, %v756_v42 }
 0x147   : > { %1263 = vrot.lane.b32.xlu2 %v2433_v0, %s1862_s25  ;;  %1007 = vrot.lane.b32.xlu1 %v2433_v0, %s1863_s26 }
 0x148   : > { %1229 = vrot.lane.b32.xlu0 %v2385_v46, %s1862_s25  ;;  %v702_v46 = vpop.f32.mrf.mxu2 }
 0x149   : > { %v966_v50 = vpop.permute.xlu2 %965  ;;  %v1250_v51 = vpop.permute.xlu1 %1249  ;;  %v703_v59 = vadd.f32 %v2071_v40, %v702_v46  ;;  %v664_v46 = vadd.f32 %v2071_v40, %v663_v56 }
 0x14a   : > { %1153 = vst.msk [vmem:[%s2369_s14 + $0x20] sm:$0xff] %vm363_vm0, %v966_v50  ;;  %v1024_v53 = vpop.permute.xlu0 %1023  ;;  %v2651_v50 = vmax.f32 %v757_v43, 0.0 }
 0x14b   : > { %1423 = vst.msk [vmem:[%s2333_s30 + $0x90] sm:$0xff] %vm363_vm0, %v1250_v51  ;;  %v2558_v1 = vmax.f32 %v703_v59, 0.0  ;;  %v2676_v5 = vmax.f32 %v664_v46, 0.0 }
 0x14c   : > { %1182 = vst.msk [vmem:[%s2369_s14 + $0x108] sm:$0xff] %vm363_vm0, %v1024_v53  ;;  %v615_v53 = vpop.f32.mrf.mxu0 }
 0x14d   : > { %872 = vst.msk [vmem:[%s2083_s8 + $0x158] sm:$0xff] %vm363_vm0, %v2558_v1 }
 0x14e   : > { %890 = vst.msk [vmem:[%s2083_s8 + $0x1e8] sm:$0xff] %vm363_vm0, %v2651_v50 }
 0x14f   : > { %1039 = vrot.lane.b32.xlu2 %v2463_v15, %s1863_s26  ;;  %1231 = vrot.lane.b32.xlu1 %v2451_v10, %s1862_s25  ;;  %859 = vst.msk [vmem:[%s2083_s8 + $0xf0] sm:$0xff] %vm363_vm0, %v2676_v5 }
 0x150   : > { %975 = vrot.lane.b32.xlu0 %v2451_v10, %s1863_s26  ;;  %v705_v13 = vpop.f32.mrf.mxu2 }
 0x151   : > { %v998_v63 = vpop.permute.xlu2 %997  ;;  %v1026_v0 = vpop.permute.xlu1 %1025  ;;  %v706_v17 = vadd.f32 %v2071_v40, %v705_v13 }
 0x152   : > { %1169 = vst.msk [vmem:[%s2369_s14 + $0xa0] sm:$0xff] %vm363_vm0, %v998_v63  ;;  %v994_v2 = vpop.permute.xlu0 %993 }
 0x153   : > { %1183 = vst.msk [vmem:[%s2369_s14 + $0x110] sm:$0xff] %vm363_vm0, %v1026_v0 }
 0x154   : > { %1167 = vst.msk [vmem:[%s2369_s14 + $0x90] sm:$0xff] %vm363_vm0, %v994_v2 }
 0x157   : > { %1009 = vrot.lane.b32.xlu2 %v2490_v30, %s1863_s26  ;;  %977 = vrot.lane.b32.xlu1 %v2476_v22, %s1863_s26 }
 0x158   : > { %1071 = vrot.lane.b32.xlu0 %v2486_v29, %s1863_s26  ;;  %v708_v57 = vpop.f32.mrf.mxu2 }
 0x159   : > { %v1222_v8 = vpop.permute.xlu2 %1221  ;;  %v964_v10 = vpop.permute.xlu1 %963  ;;  %v709_v59 = vadd.f32 %v2071_v40, %v708_v57 }
 0x15a   : > { %1409 = vst.msk [vmem:[%s2333_s30 + $0x20] sm:$0xff] %vm363_vm0, %v1222_v8  ;;  %v1218_v11 = vpop.permute.xlu0 %1217 }
 0x15b   : > { %1152 = vst.msk [vmem:[%s2369_s14 + $0x18] sm:$0xff] %vm363_vm0, %v964_v10  ;;  %v2680_v8 = vmax.f32 %v709_v59, 0.0 }
 0x15c   : > { %1407 = vst.msk [vmem:[%s2333_s30 + $0x10] sm:$0xff] %vm363_vm0, %v1218_v11 }
 0x15d   : > { %874 = vst.msk [vmem:[%s2083_s8 + $0x168] sm:$0xff] %vm363_vm0, %v2680_v8 }
 0x15f   : > { %1233 = vrot.lane.b32.xlu2 %v2476_v22, %s1862_s25  ;;  %1073 = vrot.lane.b32.xlu1 %v2507_v35, %s1863_s26  ;;  %v2607_v22 = vmax.f32 %v706_v17, 0.0 }
 0x160   : > { %1265 = vrot.lane.b32.xlu0 %v2490_v30, %s1862_s25  ;;  %v754_v30 = vadd.f32 %v2071_v40, %v753_v27  ;;  %v618_v27 = vpop.f32.mrf.mxu0 }
 0x161   : > { %v968_v19 = vpop.permute.xlu2 %967  ;;  %v996_v20 = vpop.permute.xlu1 %995  ;;  %873 = vst.msk [vmem:[%s2083_s8 + $0x160] sm:$0xff] %vm363_vm0, %v2607_v22 }
 0x162   : > { %1154 = vst.msk [vmem:[%s2369_s14 + $0x28] sm:$0xff] %vm363_vm0, %v968_v19  ;;  %v1060_v21 = vpop.permute.xlu0 %1059  ;;  %v2630_v39 = vmax.f32 %v754_v30, 0.0  ;;  %v619_v30 = vadd.f32 %v2071_v40, %v618_v27 }
 0x163   : > { %1168 = vst.msk [vmem:[%s2369_s14 + $0x98] sm:$0xff] %vm363_vm0, %v996_v20  ;;  %v666_v20 = vpop.f32.mrf.mxu1 }
 0x164   : > { %1200 = vst.msk [vmem:[%s2369_s14 + $0x198] sm:$0xff] %vm363_vm0, %v1060_v21  ;;  %v780_v32 = vmax.f32 %v619_v30, 0.0 }
 0x165   : > { %889 = vst.msk [vmem:[%s2083_s8 + $0x1e0] sm:$0xff] %vm363_vm0, %v2630_v39 }
 0x166   : > { %844 = vst.msk [vmem:[%s2083_s8 + $0x78] sm:$0xff] %vm363_vm0, %v780_v32 }
 0x167   : > { %979 = vrot.lane.b32.xlu2 %v2525_v47, %s1863_s26  ;;  %1267 = vrot.lane.b32.xlu1 %v2532_v52, %s1862_s25 }
 0x168   : > { %1041 = vrot.lane.b32.xlu0 %v2536_v54, %s1863_s26 }
 0x169   : > { %v1064_v33 = vpop.permute.xlu2 %1063  ;;  %v1220_v34 = vpop.permute.xlu1 %1219 }
 0x16a   : > { %1202 = vst.msk [vmem:[%s2369_s14 + $0x1a8] sm:$0xff] %vm363_vm0, %v1064_v33  ;;  %v1284_v38 = vpop.permute.xlu0 %1283 }
 0x16b   : > { %1408 = vst.msk [vmem:[%s2333_s30 + $0x18] sm:$0xff] %vm363_vm0, %v1220_v34 }
 0x16c   : > { %1440 = vst.msk [vmem:[%s2333_s30 + $0x118] sm:$0xff] %vm363_vm0, %v1284_v38 }
 0x16f   : > { %1075 = vrot.lane.b32.xlu2 %v2554_v62, %s1863_s26  ;;  %1043 = vrot.lane.b32.xlu1 %v2558_v1, %s1863_s26 }
 0x170   : > { %1011 = vrot.lane.b32.xlu0 %v2532_v52, %s1863_s26  ;;  %v616_v52 = vadd.f32 %v2071_v40, %v615_v53 }
 0x171   : > { %v1258_v44 = vpop.permute.xlu2 %1257  ;;  %v1062_v45 = vpop.permute.xlu1 %1061 }
 0x172   : > { %1427 = vst.msk [vmem:[%s2333_s30 + $0xb0] sm:$0xff] %vm363_vm0, %v1258_v44  ;;  %v1254_v51 = vpop.permute.xlu0 %1253  ;;  %v2669_v63 = vmax.f32 %v616_v52, 0.0 }
 0x173   : > { %1201 = vst.msk [vmem:[%s2369_s14 + $0x1a0] sm:$0xff] %vm363_vm0, %v1062_v45 }
 0x174   : > { %1425 = vst.msk [vmem:[%s2333_s30 + $0xa0] sm:$0xff] %vm363_vm0, %v1254_v51 }
 0x175   : > { %843 = vst.msk [vmem:[%s2083_s8 + $0x70] sm:$0xff] %vm363_vm0, %v2669_v63 }
 0x177   : > { %1269 = vrot.lane.b32.xlu2 %v2577_v7, %s1862_s25  ;;  %1013 = vrot.lane.b32.xlu1 %v2577_v7, %s1863_s26  ;;  %v759_v7 = vpop.f32.mrf.mxu3 }
 0x178   : > { %1235 = vrot.lane.b32.xlu0 %v2525_v47, %s1862_s25  ;;  %v711_v47 = vpop.f32.mrf.mxu2  ;;  %v760_v10 = vadd.f32 %v2071_v40, %v759_v7 }
 0x179   : > { %v1034_v0 = vpop.permute.xlu2 %1033  ;;  %v1256_v2 = vpop.permute.xlu1 %1255  ;;  %v712_v11 = vadd.f32 %v2071_v40, %v711_v47 }
 0x17a   : > { %1187 = vst.msk [vmem:[%s2369_s14 + $0x130] sm:$0xff] %vm363_vm0, %v1034_v0  ;;  %v1030_v6 = vpop.permute.xlu0 %1029  ;;  %v2698_v12 = vmax.f32 %v760_v10, 0.0 }
 0x17b   : > { %1426 = vst.msk [vmem:[%s2333_s30 + $0xa8] sm:$0xff] %vm363_vm0, %v1256_v2  ;;  %v2702_v17 = vmax.f32 %v712_v11, 0.0 }
 0x17c   : > { %1185 = vst.msk [vmem:[%s2369_s14 + $0x120] sm:$0xff] %vm363_vm0, %v1030_v6 }
 0x17d   : > { %891 = vst.msk [vmem:[%s2083_s8 + $0x1f0] sm:$0xff] %vm363_vm0, %v2698_v12 }
 0x17e   : > { %875 = vst.msk [vmem:[%s2083_s8 + $0x170] sm:$0xff] %vm363_vm0, %v2702_v17 }
 0x17f   : > { %1045 = vrot.lane.b32.xlu2 %v2607_v22, %s1863_s26  ;;  %1237 = vrot.lane.b32.xlu1 %v2595_v16, %s1862_s25  ;;  %v762_v42 = vpop.f32.mrf.mxu3 }
 0x180   : > { %981 = vrot.lane.b32.xlu0 %v2595_v16, %s1863_s26  ;;  %v667_v16 = vadd.f32 %v2071_v40, %v666_v20  ;;  %v763_v43 = vadd.f32 %v2071_v40, %v762_v42 }
 0x181   : > { %v1004_v13 = vpop.permute.xlu2 %1003  ;;  %v1032_v14 = vpop.permute.xlu1 %1031 }
 0x182   : > { %1172 = vst.msk [vmem:[%s2369_s14 + $0xb8] sm:$0xff] %vm363_vm0, %v1004_v13  ;;  %v1000_v19 = vpop.permute.xlu0 %999  ;;  %v796_v21 = vmax.f32 %v667_v16, 0.0 }
 0x183   : > { %1186 = vst.msk [vmem:[%s2369_s14 + $0x128] sm:$0xff] %vm363_vm0, %v1032_v14 }
 0x184   : > { %1170 = vst.msk [vmem:[%s2369_s14 + $0xa8] sm:$0xff] %vm363_vm0, %v1000_v19 }
 0x185   : > { %860 = vst.msk [vmem:[%s2083_s8 + $0xf8] sm:$0xff] %vm363_vm0, %v796_v21 }
 0x187   : > { %1015 = vrot.lane.b32.xlu2 %v2634_v41, %s1863_s26  ;;  %983 = vrot.lane.b32.xlu1 %v2620_v31, %s1863_s26 }
 0x188   : > { %1077 = vrot.lane.b32.xlu0 %v2630_v39, %s1863_s26 }
 0x189   : > { %v1228_v23 = vpop.permute.xlu2 %1227  ;;  %v1002_v24 = vpop.permute.xlu1 %1001 }
 0x18a   : > { %1412 = vst.msk [vmem:[%s2333_s30 + $0x38] sm:$0xff] %vm363_vm0, %v1228_v23  ;;  %v1224_v26 = vpop.permute.xlu0 %1223 }
 0x18b   : > { %1171 = vst.msk [vmem:[%s2369_s14 + $0xb0] sm:$0xff] %vm363_vm0, %v1002_v24 }
 0x18c   : > { %1410 = vst.msk [vmem:[%s2333_s30 + $0x28] sm:$0xff] %vm363_vm0, %v1224_v26 }
 0x18f   : > { %1239 = vrot.lane.b32.xlu2 %v2620_v31, %s1862_s25  ;;  %1079 = vrot.lane.b32.xlu1 %v2651_v50, %s1863_s26  ;;  %v714_v31 = vpop.f32.mrf.mxu2 }
 0x190   : > { %1271 = vrot.lane.b32.xlu0 %v2634_v41, %s1862_s25  ;;  %v715_v41 = vadd.f32 %v2071_v40, %v714_v31  ;;  %v2759_v40 = vmax.f32 %v763_v43, 0.0 }
 0x191   : > { %v974_v33 = vpop.permute.xlu2 %973  ;;  %v1226_v34 = vpop.permute.xlu1 %1225 }
 0x192   : > { %1157 = vst.msk [vmem:[%s2369_s14 + $0x40] sm:$0xff] %vm363_vm0, %v974_v33  ;;  %v970_v38 = vpop.permute.xlu0 %969  ;;  %v2752_v44 = vmax.f32 %v715_v41, 0.0 }
 0x193   : > { %1411 = vst.msk [vmem:[%s2333_s30 + $0x30] sm:$0xff] %vm363_vm0, %v1226_v34 }
 0x194   : > { %1155 = vst.msk [vmem:[%s2369_s14 + $0x30] sm:$0xff] %vm363_vm0, %v970_v38 }
 0x195   : > { %876 = vst.msk [vmem:[%s2083_s8 + $0x178] sm:$0xff] %vm363_vm0, %v2752_v44 }
 0x196   : > { %892 = vst.msk [vmem:[%s2083_s8 + $0x1f8] sm:$0xff] %vm363_vm0, %v2759_v40 }
 0x197   : > { %985 = vrot.lane.b32.xlu2 %v2669_v63, %s1863_s26  ;;  %1273 = vrot.lane.b32.xlu1 %v2676_v5, %s1862_s25 }
 0x198   : > { %1047 = vrot.lane.b32.xlu0 %v2680_v8, %s1863_s26 }
 0x199   : > { %v1070_v45 = vpop.permute.xlu2 %1069  ;;  %v972_v51 = vpop.permute.xlu1 %971 }
 0x19a   : > { %1205 = vst.msk [vmem:[%s2369_s14 + $0x1c0] sm:$0xff] %vm363_vm0, %v1070_v45  ;;  %v1066_v53 = vpop.permute.xlu0 %1065 }
 0x19b   : > { %1156 = vst.msk [vmem:[%s2369_s14 + $0x38] sm:$0xff] %vm363_vm0, %v972_v51 }
 0x19c   : > { %1203 = vst.msk [vmem:[%s2369_s14 + $0x1b0] sm:$0xff] %vm363_vm0, %v1066_v53 }
 0x19f   : > { %1081 = vrot.lane.b32.xlu2 %v2698_v12, %s1863_s26  ;;  %1049 = vrot.lane.b32.xlu1 %v2702_v17, %s1863_s26 }
 0x1a0   : > { %1017 = vrot.lane.b32.xlu0 %v2676_v5, %s1863_s26 }
 0x1a1   : > { %v1264_v56 = vpop.permute.xlu2 %1263  ;;  %v1068_v52 = vpop.permute.xlu1 %1067 }
 0x1a2   : > { %1430 = vst.msk [vmem:[%s2333_s30 + $0xc8] sm:$0xff] %vm363_vm0, %v1264_v56  ;;  %v1260_v46 = vpop.permute.xlu0 %1259 }
 0x1a3   : > { %1204 = vst.msk [vmem:[%s2369_s14 + $0x1b8] sm:$0xff] %vm363_vm0, %v1068_v52 }
 0x1a4   : > { %1428 = vst.msk [vmem:[%s2333_s30 + $0xb8] sm:$0xff] %vm363_vm0, %v1260_v46 }
 0x1a7   : > { %1287 = vrot.lane.b32.xlu2 %v2269_v3, %s1862_s25  ;;  %1019 = vrot.lane.b32.xlu1 %v796_v21, %s1863_s26 }
 0x1a8   : > { %1241 = vrot.lane.b32.xlu0 %v2669_v63, %s1862_s25 }
 0x1a9   : > { %v1040_v57 = vpop.permute.xlu2 %1039  ;;  %v1262_v59 = vpop.permute.xlu1 %1261 }
 0x1aa   : > { %1190 = vst.msk [vmem:[%s2369_s14 + $0x148] sm:$0xff] %vm363_vm0, %v1040_v57  ;;  %v1036_v0 = vpop.permute.xlu0 %1035 }
 0x1ab   : > { %1429 = vst.msk [vmem:[%s2333_s30 + $0xc0] sm:$0xff] %vm363_vm0, %v1262_v59 }
 0x1ac   : > { %1188 = vst.msk [vmem:[%s2369_s14 + $0x138] sm:$0xff] %vm363_vm0, %v1036_v0 }
 0x1af   : > { %1275 = vrot.lane.b32.xlu2 %v796_v21, %s1862_s25  ;;  %1243 = vrot.lane.b32.xlu1 %v780_v32, %s1862_s25 }
 0x1b0   : > { %987 = vrot.lane.b32.xlu0 %v780_v32, %s1863_s26 }
 0x1b1   : > { %v1010_v3 = vpop.permute.xlu2 %1009  ;;  %v1038_v63 = vpop.permute.xlu1 %1037 }
 0x1b2   : > { %1175 = vst.msk [vmem:[%s2369_s14 + $0xd0] sm:$0xff] %vm363_vm0, %v1010_v3  ;;  %v1006_v2 = vpop.permute.xlu0 %1005 }
 0x1b3   : > { %1189 = vst.msk [vmem:[%s2369_s14 + $0x140] sm:$0xff] %vm363_vm0, %v1038_v63 }
 0x1b4   : > { %1173 = vst.msk [vmem:[%s2369_s14 + $0xc0] sm:$0xff] %vm363_vm0, %v1006_v2 }
 0x1b7   : > { %1051 = vrot.lane.b32.xlu2 %v2752_v44, %s1863_s26  ;;  %1285 = vrot.lane.b32.xlu1 %v2248_v60, %s1862_s25 }
 0x1b8   : > { %1083 = vrot.lane.b32.xlu0 %v2759_v40, %s1863_s26 }
 0x1b9   : > { %v1234_v5 = vpop.permute.xlu2 %1233  ;;  %v1008_v6 = vpop.permute.xlu1 %1007 }
 0x1ba   : > { %1415 = vst.msk [vmem:[%s2333_s30 + $0x50] sm:$0xff] %vm363_vm0, %v1234_v5  ;;  %v1230_v7 = vpop.permute.xlu0 %1229 }
 0x1bb   : > { %1174 = vst.msk [vmem:[%s2369_s14 + $0xc8] sm:$0xff] %vm363_vm0, %v1008_v6 }
 0x1bc   : > { %1413 = vst.msk [vmem:[%s2333_s30 + $0x40] sm:$0xff] %vm363_vm0, %v1230_v7 }
 0x1bf   : > { %1293 = vrot.lane.b32.xlu2 %v2414_v58, %s1862_s25  ;;  %1291 = vrot.lane.b32.xlu1 %v2391_v49, %s1862_s25 }
 0x1c0   : > { %1289 = vrot.lane.b32.xlu0 %v2306_v18, %s1862_s25 }
 0x1c1   : > { %v980_v60 = vpop.permute.xlu2 %979  ;;  %v1232_v47 = vpop.permute.xlu1 %1231 }
 0x1c2   : > { %1160 = vst.msk [vmem:[%s2369_s14 + $0x58] sm:$0xff] %vm363_vm0, %v980_v60  ;;  %v976_v10 = vpop.permute.xlu0 %975 }
 0x1c3   : > { %1414 = vst.msk [vmem:[%s2333_s30 + $0x48] sm:$0xff] %vm363_vm0, %v1232_v47 }
 0x1c4   : > { %1158 = vst.msk [vmem:[%s2369_s14 + $0x48] sm:$0xff] %vm363_vm0, %v976_v10 }
 0x1c7   : > { %1299 = vrot.lane.b32.xlu2 %v2558_v1, %s1862_s25  ;;  %1297 = vrot.lane.b32.xlu1 %v2536_v54, %s1862_s25 }
 0x1c8   : > { %1295 = vrot.lane.b32.xlu0 %v2463_v15, %s1862_s25 }
 0x1c9   : > { %v1076_v18 = vpop.permute.xlu2 %1075  ;;  %v978_v49 = vpop.permute.xlu1 %977 }
 0x1ca   : > { %1208 = vst.msk [vmem:[%s2369_s14 + $0x1d8] sm:$0xff] %vm363_vm0, %v1076_v18  ;;  %v1072_v58 = vpop.permute.xlu0 %1071 }
 0x1cb   : > { %1159 = vst.msk [vmem:[%s2369_s14 + $0x50] sm:$0xff] %vm363_vm0, %v978_v49 }
 0x1cc   : > { %1206 = vst.msk [vmem:[%s2369_s14 + $0x1c8] sm:$0xff] %vm363_vm0, %v1072_v58 }
 0x1cf   : > { %1305 = vrot.lane.b32.xlu2 %v2702_v17, %s1862_s25  ;;  %1303 = vrot.lane.b32.xlu1 %v2680_v8, %s1862_s25 }
 0x1d0   : > { %1301 = vrot.lane.b32.xlu0 %v2607_v22, %s1862_s25 }
 0x1d1   : > { %v1270_v15 = vpop.permute.xlu2 %1269  ;;  %v1074_v54 = vpop.permute.xlu1 %1073 }
 0x1d2   : > { %1433 = vst.msk [vmem:[%s2333_s30 + $0xe0] sm:$0xff] %vm363_vm0, %v1270_v15  ;;  %v1266_v1 = vpop.permute.xlu0 %1265 }
 0x1d3   : > { %1207 = vst.msk [vmem:[%s2369_s14 + $0x1d0] sm:$0xff] %vm363_vm0, %v1074_v54 }
 0x1d4   : > { %1431 = vst.msk [vmem:[%s2333_s30 + $0xd0] sm:$0xff] %vm363_vm0, %v1266_v1 }
 0x1d7   : > { %1311 = vrot.lane.b32.xlu2 %v2128_v9, %s1862_s25  ;;  %1309 = vrot.lane.b32.xlu1 %v2104_v61, %s1862_s25 }
 0x1d8   : > { %1307 = vrot.lane.b32.xlu0 %v2752_v44, %s1862_s25 }
 0x1d9   : > { %v1046_v22 = vpop.permute.xlu2 %1045  ;;  %v1268_v8 = vpop.permute.xlu1 %1267 }
 0x1da   : > { %1193 = vst.msk [vmem:[%s2369_s14 + $0x160] sm:$0xff] %vm363_vm0, %v1046_v22  ;;  %v1042_v11 = vpop.permute.xlu0 %1041 }
 0x1db   : > { %1432 = vst.msk [vmem:[%s2333_s30 + $0xd8] sm:$0xff] %vm363_vm0, %v1268_v8 }
 0x1dc   : > { %1191 = vst.msk [vmem:[%s2369_s14 + $0x150] sm:$0xff] %vm363_vm0, %v1042_v11 }
 0x1df   : > { %1317 = vrot.lane.b32.xlu2 %v2225_v48, %s1862_s25  ;;  %1315 = vrot.lane.b32.xlu1 %v2187_v36, %s1862_s25 }
 0x1e0   : > { %1313 = vrot.lane.b32.xlu0 %v2162_v25, %s1862_s25 }
 0x1e1   : > { %v1016_v61 = vpop.permute.xlu2 %1015  ;;  %v1044_v9 = vpop.permute.xlu1 %1043 }
 0x1e2   : > { %1178 = vst.msk [vmem:[%s2369_s14 + $0xe8] sm:$0xff] %vm363_vm0, %v1016_v61  ;;  %v1012_v13 = vpop.permute.xlu0 %1011 }
 0x1e3   : > { %1192 = vst.msk [vmem:[%s2369_s14 + $0x158] sm:$0xff] %vm363_vm0, %v1044_v9 }
 0x1e4   : > { %1176 = vst.msk [vmem:[%s2369_s14 + $0xd8] sm:$0xff] %vm363_vm0, %v1012_v13 }
 0x1e7   : > { %1323 = vrot.lane.b32.xlu2 %v2373_v37, %s1862_s25  ;;  %1321 = vrot.lane.b32.xlu1 %v2339_v28, %s1862_s25 }
 0x1e8   : > { %1319 = vrot.lane.b32.xlu0 %v2271_v4, %s1862_s25 }
 0x1e9   : > { %v1240_v25 = vpop.permute.xlu2 %1239  ;;  %v1014_v36 = vpop.permute.xlu1 %1013 }
 0x1ea   : > { %1418 = vst.msk [vmem:[%s2333_s30 + $0x68] sm:$0xff] %vm363_vm0, %v1240_v25  ;;  %v1236_v48 = vpop.permute.xlu0 %1235 }
 0x1eb   : > { %1177 = vst.msk [vmem:[%s2369_s14 + $0xe0] sm:$0xff] %vm363_vm0, %v1014_v36 }
 0x1ec   : > { %1416 = vst.msk [vmem:[%s2333_s30 + $0x58] sm:$0xff] %vm363_vm0, %v1236_v48 }
 0x1ef   : > { %1329 = vrot.lane.b32.xlu2 %v2507_v35, %s1862_s25  ;;  %1327 = vrot.lane.b32.xlu1 %v2486_v29, %s1862_s25 }
 0x1f0   : > { %1325 = vrot.lane.b32.xlu0 %v2410_v55, %s1862_s25 }
 0x1f1   : > { %v986_v4 = vpop.permute.xlu2 %985  ;;  %v1238_v28 = vpop.permute.xlu1 %1237 }
 0x1f2   : > { %1163 = vst.msk [vmem:[%s2369_s14 + $0x70] sm:$0xff] %vm363_vm0, %v986_v4  ;;  %v982_v37 = vpop.permute.xlu0 %981 }
 0x1f3   : > { %1417 = vst.msk [vmem:[%s2333_s30 + $0x60] sm:$0xff] %vm363_vm0, %v1238_v28 }
 0x1f4   : > { %1161 = vst.msk [vmem:[%s2369_s14 + $0x60] sm:$0xff] %vm363_vm0, %v982_v37 }
 0x1f7   : > { %1335 = vrot.lane.b32.xlu2 %v2651_v50, %s1862_s25  ;;  %1333 = vrot.lane.b32.xlu1 %v2630_v39, %s1862_s25 }
 0x1f8   : > { %1331 = vrot.lane.b32.xlu0 %v2554_v62, %s1862_s25 }
 0x1f9   : > { %v1082_v55 = vpop.permute.xlu2 %1081  ;;  %v984_v29 = vpop.permute.xlu1 %983 }
 0x1fa   : > { %1211 = vst.msk [vmem:[%s2369_s14 + $0x1f0] sm:$0xff] %vm363_vm0, %v1082_v55  ;;  %v1078_v35 = vpop.permute.xlu0 %1077 }
 0x1fb   : > { %1162 = vst.msk [vmem:[%s2369_s14 + $0x68] sm:$0xff] %vm363_vm0, %v984_v29 }
 0x1fc   : > { %1209 = vst.msk [vmem:[%s2369_s14 + $0x1e0] sm:$0xff] %vm363_vm0, %v1078_v35 }
 0x1ff   : > { %1339 = vrot.lane.b32.xlu1 %v2759_v40, %s1862_s25 }
 0x200   : > { %1337 = vrot.lane.b32.xlu0 %v2698_v12, %s1862_s25 }
 0x201   : > { %v1288_v62 = vpop.permute.xlu2 %1287  ;;  %v1080_v39 = vpop.permute.xlu1 %1079 }
 0x202   : > { %1442 = vst.msk [vmem:[%s2333_s30 + $0x128] sm:$0xff] %vm363_vm0, %v1288_v62  ;;  %v1272_v50 = vpop.permute.xlu0 %1271 }
 0x203   : > { %1210 = vst.msk [vmem:[%s2369_s14 + $0x1e8] sm:$0xff] %vm363_vm0, %v1080_v39 }
 0x204   : > { %1434 = vst.msk [vmem:[%s2333_s30 + $0xe8] sm:$0xff] %vm363_vm0, %v1272_v50 }
 0x209   : > { %v1276_v14 = vpop.permute.xlu2 %1275  ;;  %v1274_v17 = vpop.permute.xlu1 %1273 }
 0x20a   : > { %1436 = vst.msk [vmem:[%s2333_s30 + $0xf8] sm:$0xff] %vm363_vm0, %v1276_v14  ;;  %v1048_v19 = vpop.permute.xlu0 %1047 }
 0x20b   : > { %1435 = vst.msk [vmem:[%s2333_s30 + $0xf0] sm:$0xff] %vm363_vm0, %v1274_v17 }
 0x20c   : > { %1194 = vst.msk [vmem:[%s2369_s14 + $0x168] sm:$0xff] %vm363_vm0, %v1048_v19 }
 0x211   : > { %v1052_v12 = vpop.permute.xlu2 %1051  ;;  %v1050_v20 = vpop.permute.xlu1 %1049 }
 0x212   : > { %1196 = vst.msk [vmem:[%s2369_s14 + $0x178] sm:$0xff] %vm363_vm0, %v1052_v12  ;;  %v1018_v16 = vpop.permute.xlu0 %1017 }
 0x213   : > { %1195 = vst.msk [vmem:[%s2369_s14 + $0x170] sm:$0xff] %vm363_vm0, %v1050_v20 }
 0x214   : > { %1179 = vst.msk [vmem:[%s2369_s14 + $0xf0] sm:$0xff] %vm363_vm0, %v1018_v16 }
 0x219   : > { %v1294_v21 = vpop.permute.xlu2 %1293  ;;  %v1020_v23 = vpop.permute.xlu1 %1019 }
 0x21a   : > { %1445 = vst.msk [vmem:[%s2333_s30 + $0x140] sm:$0xff] %vm363_vm0, %v1294_v21  ;;  %v1242_v24 = vpop.permute.xlu0 %1241 }
 0x21b   : > { %1180 = vst.msk [vmem:[%s2369_s14 + $0xf8] sm:$0xff] %vm363_vm0, %v1020_v23 }
 0x21c   : > { %1419 = vst.msk [vmem:[%s2333_s30 + $0x70] sm:$0xff] %vm363_vm0, %v1242_v24 }
 0x221   : > { %v1300_v26 = vpop.permute.xlu2 %1299  ;;  %v1244_v27 = vpop.permute.xlu1 %1243 }
 0x222   : > { %1448 = vst.msk [vmem:[%s2333_s30 + $0x158] sm:$0xff] %vm363_vm0, %v1300_v26  ;;  %v988_v30 = vpop.permute.xlu0 %987 }
 0x223   : > { %1420 = vst.msk [vmem:[%s2333_s30 + $0x78] sm:$0xff] %vm363_vm0, %v1244_v27 }
 0x224   : > { %1164 = vst.msk [vmem:[%s2369_s14 + $0x78] sm:$0xff] %vm363_vm0, %v988_v30 }
 0x229   : > { %v1306_v32 = vpop.permute.xlu2 %1305  ;;  %v1286_v33 = vpop.permute.xlu1 %1285 }
 0x22a   : > { %1451 = vst.msk [vmem:[%s2333_s30 + $0x170] sm:$0xff] %vm363_vm0, %v1306_v32  ;;  %v1084_v34 = vpop.permute.xlu0 %1083 }
 0x22b   : > { %1441 = vst.msk [vmem:[%s2333_s30 + $0x120] sm:$0xff] %vm363_vm0, %v1286_v33 }
 0x22c   : > { %1212 = vst.msk [vmem:[%s2369_s14 + $0x1f8] sm:$0xff] %vm363_vm0, %v1084_v34 }
 0x231   : > { %v1312_v38 = vpop.permute.xlu2 %1311  ;;  %v1292_v31 = vpop.permute.xlu1 %1291 }
 0x232   : > { %1454 = vst.msk [vmem:[%s2333_s30 + $0x188] sm:$0xff] %vm363_vm0, %v1312_v38  ;;  %v1290_v42 = vpop.permute.xlu0 %1289 }
 0x233   : > { %1444 = vst.msk [vmem:[%s2333_s30 + $0x138] sm:$0xff] %vm363_vm0, %v1292_v31 }
 0x234   : > { %1443 = vst.msk [vmem:[%s2333_s30 + $0x130] sm:$0xff] %vm363_vm0, %v1290_v42 }
 0x239   : > { %v1318_v41 = vpop.permute.xlu2 %1317  ;;  %v1298_v43 = vpop.permute.xlu1 %1297 }
 0x23a   : > { %1457 = vst.msk [vmem:[%s2333_s30 + $0x1a0] sm:$0xff] %vm363_vm0, %v1318_v41  ;;  %v1296_v44 = vpop.permute.xlu0 %1295 }
 0x23b   : > { %1447 = vst.msk [vmem:[%s2333_s30 + $0x150] sm:$0xff] %vm363_vm0, %v1298_v43 }
 0x23c   : > { %1446 = vst.msk [vmem:[%s2333_s30 + $0x148] sm:$0xff] %vm363_vm0, %v1296_v44 }
 0x241   : > { %v1324_v45 = vpop.permute.xlu2 %1323  ;;  %v1304_v51 = vpop.permute.xlu1 %1303 }
 0x242   : > { %1460 = vst.msk [vmem:[%s2333_s30 + $0x1b8] sm:$0xff] %vm363_vm0, %v1324_v45  ;;  %v1302_v40 = vpop.permute.xlu0 %1301 }
 0x243   : > { %1450 = vst.msk [vmem:[%s2333_s30 + $0x168] sm:$0xff] %vm363_vm0, %v1304_v51 }
 0x244   : > { %1449 = vst.msk [vmem:[%s2333_s30 + $0x160] sm:$0xff] %vm363_vm0, %v1302_v40 }
 0x249   : > { %v1330_v53 = vpop.permute.xlu2 %1329  ;;  %v1310_v56 = vpop.permute.xlu1 %1309 }
 0x24a   : > { %1463 = vst.msk [vmem:[%s2333_s30 + $0x1d0] sm:$0xff] %vm363_vm0, %v1330_v53  ;;  %v1308_v52 = vpop.permute.xlu0 %1307 }
 0x24b   : > { %1453 = vst.msk [vmem:[%s2333_s30 + $0x180] sm:$0xff] %vm363_vm0, %v1310_v56 }
 0x24c   : > { %1452 = vst.msk [vmem:[%s2333_s30 + $0x178] sm:$0xff] %vm363_vm0, %v1308_v52 }
 0x251   : > { %v1336_v46 = vpop.permute.xlu2 %1335  ;;  %v1316_v57 = vpop.permute.xlu1 %1315 }
 0x252   : > { %1466 = vst.msk [vmem:[%s2333_s30 + $0x1e8] sm:$0xff] %vm363_vm0, %v1336_v46  ;;  %v1314_v59 = vpop.permute.xlu0 %1313 }
 0x253   : > { %1456 = vst.msk [vmem:[%s2333_s30 + $0x198] sm:$0xff] %vm363_vm0, %v1316_v57 }
 0x254   : > { %1455 = vst.msk [vmem:[%s2333_s30 + $0x190] sm:$0xff] %vm363_vm0, %v1314_v59 }
 0x259   : > { %v1322_v0 = vpop.permute.xlu1 %1321 }
 0x25a   : > { %1459 = vst.msk [vmem:[%s2333_s30 + $0x1b0] sm:$0xff] %vm363_vm0, %v1322_v0  ;;  %v1320_v3 = vpop.permute.xlu0 %1319 }
 0x25b   : > { %1458 = vst.msk [vmem:[%s2333_s30 + $0x1a8] sm:$0xff] %vm363_vm0, %v1320_v3 }
 0x261   : > { %v1328_v63 = vpop.permute.xlu1 %1327 }
 0x262   : > { %1462 = vst.msk [vmem:[%s2333_s30 + $0x1c8] sm:$0xff] %vm363_vm0, %v1328_v63  ;;  %v1326_v2 = vpop.permute.xlu0 %1325 }
 0x263   : > { %1461 = vst.msk [vmem:[%s2333_s30 + $0x1c0] sm:$0xff] %vm363_vm0, %v1326_v2 }
 0x269   : > { %v1334_v5 = vpop.permute.xlu1 %1333 }
 0x26a   : > { %1465 = vst.msk [vmem:[%s2333_s30 + $0x1e0] sm:$0xff] %vm363_vm0, %v1334_v5  ;;  %v1332_v6 = vpop.permute.xlu0 %1331 }
 0x26b   : > { %1464 = vst.msk [vmem:[%s2333_s30 + $0x1d8] sm:$0xff] %vm363_vm0, %v1332_v6 }
 0x271   : > { %v1340_v7 = vpop.permute.xlu1 %1339 }
 0x272   : > { %1468 = vst.msk [vmem:[%s2333_s30 + $0x1f8] sm:$0xff] %vm363_vm0, %v1340_v7  ;;  %v1338_v60 = vpop.permute.xlu0 %1337 }
 0x273   : > { %1467 = vst.msk [vmem:[%s2333_s30 + $0x1f0] sm:$0xff] %vm363_vm0, %v1338_v60 }
 0x274 PF: > { %p17_p4 = scmp.ge.s32.totalorder %s1940_s6, 4   ;;  %s3019_s18 = smov %s1849_s19 }
 0x275   : > { %s3020_s19 = smov %s1853_s20  ;;  %s3021_s20 = smov %s1953_s11 }
 0x276   : > { %s3022_s21 = smov %s1940_s6  ;;  %19 = sbr.rel (!%p17_p4) target bundleno = 4 (0x4), region = 100 }
 0x27b   :  { %1525 = vsyncpa [#allocation3], 1 }
 0x27c   :  { %1527 = vsyncpa [#allocation3 + $0x1], 1 }
 0x27d   :  { %1528 = vsyncpa [#allocation5], 1 }

// kernel: inception_forward.9
= control target key start
LH: loop header
LB: loop body
LE: loop exit
PB: predicated region body
PF: predicated region fallthrough
CT: control target
= control target key end

     0   :  { %8 = vsyncpa [#allocation3], 0  ;;  %s3597_s0 = inlined_call_operand.hbm [shape: f32[2,8,8,8,16], index: 0, kind: input, shape index: {}]   ;;  %s3598_s1 = inlined_call_operand.vmem [shape: f32[16,16], index: 1, kind: input, shape index: {}]   ;;  %s3599_s2 = inlined_call_operand.vmem [shape: f32[1,16], index: 2, kind: input, shape index: {}]   ;;  %s3600_s3 = inlined_call_operand.vmem [shape: f32[2,8,8,8,16], index: 3, kind: output, shape index: {}]  }
   0x1   :  { %10 = vsyncpa [#allocation3 + $0x1], 0  ;;  %s2373_s12 = smov 0   ;;  %s2375_s13 = smov 0  }
   0x2   :  { %s2377_s14 = smov 0   ;;  %s2379_s15 = smov 0  }
   0x3 LB: > { %s2392_s16 = sadd.s32 4294967295, %s2349_s15   ;;  %s2395_s17 = sadd.s32 1, %s2349_s15   ;;  %s2349_s15 = sphi %s2379_s15, %s3689_s15   ;;  %s2345_s14 = sphi %s2377_s14, %s3688_s14   ;;  %s2341_s13 = sphi %s2375_s13, %s3687_s13   ;;  %s2337_s12 = sphi %s2373_s12, %s3686_s12  }
   0x4   : > { %s20_s18 = ssub.s32 %s2349_s15, %s2395_s17  ;;  %s23_s19 = sadd.s32 1, %s2345_s14 }
   0x5   : > { %p21_p0 = scmp.eq.s32.totalorder %s20_s18, 0  ;;  %p30_p1 = scmp.ne.s32.totalorder %s2345_s14, %s2341_s13 }
   0x6   : > { %p31_p2 = scmp.eq.s32.totalorder %s2349_s15, 0  ;;  %p36_p3 = scmp.ne.s32.totalorder %s2341_s13, %s2337_s12 }
   0x7   : > { %s2405_s20 = scalar_select %p21_p0, %s2345_s14, %s23_s19  }
   0x8   : > { %p2407_p4 = por %p31_p2, %p30_p1  ;;  %p37_p5 = scmp.eq.s32.totalorder %s2392_s16, 0 }
   0x9   : > { %p2249_p6 = scmp.lt.s32.totalorder %s2349_s15, 2  ;;  %s134_s23 = sand.u32 1, %s2345_s14  }
   0xa   : > { %p2413_p7 = por %p37_p5, %p36_p3  ;;  %s2162_s24 = sshll.u32 %s134_s23, 9 }
   0xb   : > { %s2235_s25 = sshll.u32 %s2349_s15, 9  ;;  %s138_s29 = scalar_lea.vmem [#allocation2], %s2162_s24 }
   0xc   : > { %s143_s28 = scalar_lea.hbm %s3597_s0, %s2235_s25  ;;  %s146_s30 = sshll.u32 %s138_s29, 4  ;;  %s147_s30 = int_to_ptr.vmem [resolvable:$true] %s146_s30 }
   0xd   : > { %s144_s4 = sshll.u32 %s143_s28, 4  ;;  %p2424_p8 = pnand %p2249_p6, %p2407_p4  ;;  %s145_s4 = int_to_ptr.hbm [resolvable:$true] %s144_s4 }
   0xe   : > { %p2165_p9 = scmp.ge.s32.totalorder %s2349_s15, 1  ;;  %s135_s6 = scalar_lea.sflag [#allocation3], %s134_s23 }
   0xf   : > { %s2285_s7 = sshra.s32 %s145_s4, 4  ;;  %p2289_p11 = pneg %p2424_p8  ;;  %s2286_s7 = int_to_ptr.hbm [resolvable:$true] %s2285_s7 }
  0x10   : > { %s2287_s8 = scalar_lea.hbm %s2286_s7, 512  ;;  %s2292_s11 = scalar_lea.hbm %s3597_s0, 1024 }
  0x11   : > { %p2288_p10 = scmp.ne.s32.totalorder %s2286_s7, %s2287_s8  ;;  %p2293_p0 = scmp.lt.s32.totalorder %s2286_s7, %s3597_s0 }
  0x12   : > { %p2294_p1 = scmp.lt.s32.totalorder %s2292_s11, %s2287_s8 }
  0x13   : > { %p2290_p12 = pnand %p2289_p11, %p2288_p10 }
  0x14   : > { %p2295_p2 = por %p2294_p1, %p2293_p0 }
  0x15   : > { %p2291_p13 = pneg %p2290_p12 }
  0x17   : > { %p2296_p3 = pnand %p2295_p2, %p2291_p13 }
  0x19   : > { %2299 = shalt.err (!%p2296_p3)
}
  0x1a   : > { %s2351_s19 = smov 128   ;;  %s2352_s21 = smov 8  }
  0x1b   : > { %2248 = dma.hbm_to_vmem [thread:$0]  (!%p2424_p8), %s145_s4, 8192, %s147_s30, %s135_s6, %s2351_s19, %s2351_s19, %s2352_s21  }
  0x1c   : > { %p154_p4 = scmp.lt.s32.totalorder %s2349_s15, 3 }
  0x1e   : > { %p155_p5 = pnand %p2165_p9, %p154_p4 }
  0x20   : > { %158 = sbr.rel (%p155_p5) target bundleno = 468 (0x1d4), region = 32 }
  0x25   : > { %s160_s23 = sand.u32 1, %s2341_s13  }
  0x26   : > { %s2166_s24 = sshll.u32 %s160_s23, 9  ;;  %s161_s25 = scalar_lea.sflag [#allocation3], %s160_s23 }
  0x27   : > { %s2443_s26 = scalar_lea.vmem [#allocation2], %s2166_s24 }
  0x28   : > { %2332 = dma.done.wait (%p2413_p7), %s161_s25, 8192  }
  0x29   : > { %2334 = vsyncadd (%p2413_p7), %s161_s25, 4294959104  ;;  %v1557_v0 = vld [vmem:[%s3598_s1 + $0x8] sm:$0xff]  ;;  %v1556_v1 = vld [vmem:[%s3598_s1] sm:$0xff]  ;;  %vm449_vm0 = vcmask 1040384   ;;  %vm706_vm1 = vcmask 1046528   ;;  %vm1027_vm2 = vcmask 1045504  }
  0x2a   : > { %v217_v2 = vld [vmem:[%s2443_s26 + $0xc0] sm:$0xff]  ;;  %2238 = vmatpush.msra.mxu2 %v1557_v0  ;;  %2239 = vmatpush.msra.mxu3 %v1557_v0  ;;  %v218_v3 = vld [vmem:[%s2443_s26 + $0xc8] sm:$0xff]  ;;  %vm1562_vm3 = vcmask 130048   ;;  %p188_p6 = scmp.lt.s32.totalorder %s2392_s16, 1 }
  0x2b   : > { %v225_v4 = vld [vmem:[%s2443_s26 + $0x100] sm:$0xff]  ;;  %v226_v5 = vld [vmem:[%s2443_s26 + $0x108] sm:$0xff]  ;;  %v345_v6 = vrot.slane %v217_v2, 7  ;;  %v346_v9 = vrot.slane %v218_v3, 7  ;;  %1769 = vmatpush.msra.mxu0 %v1557_v0  ;;  %2237 = vmatpush.msra.mxu1 %v1557_v0 }
  0x2c   : > { %v233_v7 = vld [vmem:[%s2443_s26 + $0x140] sm:$0xff]  ;;  %v234_v8 = vld [vmem:[%s2443_s26 + $0x148] sm:$0xff]  ;;  %v353_v10 = vrot.slane %v225_v4, 7  ;;  %v354_v11 = vrot.slane %v226_v5, 7  ;;  %2241 = vmatpush.msra.mxu2 %v1556_v1  ;;  %2242 = vmatpush.msra.mxu3 %v1556_v1  ;;  %s3691_s16 = smov (!%p188_p6, %s2392_s16), 1 }
  0x2d   : > { %v361_v12 = vrot.slane %v233_v7, 7  ;;  %v362_v13 = vrot.slane %v234_v8, 7  ;;  %v474_v14 = vsel %vm449_vm0, -inf, %v345_v6  ;;  %v538_v15 = vsel %vm449_vm0, %v345_v6, -inf  ;;  %1770 = vmatpush.msra.mxu0 %v1556_v1  ;;  %2240 = vmatpush.msra.mxu1 %v1556_v1  ;;  %v241_v60 = vld [vmem:[%s2443_s26 + $0x180] sm:$0xff]  ;;  %v242_v1 = vld [vmem:[%s2443_s26 + $0x188] sm:$0xff] }
  0x2e   : > { %v475_v16 = vsel %vm449_vm0, -inf, %v346_v9  ;;  %v482_v17 = vsel %vm449_vm0, -inf, %v353_v10  ;;  %v483_v18 = vsel %vm449_vm0, -inf, %v354_v11  ;;  %v539_v19 = vsel %vm449_vm0, %v346_v9, -inf  ;;  %v249_v6 = vld [vmem:[%s2443_s26 + $0x1c0] sm:$0xff]  ;;  %v250_v7 = vld [vmem:[%s2443_s26 + $0x1c8] sm:$0xff] }
  0x2f   : > { %v490_v20 = vsel %vm449_vm0, -inf, %v361_v12  ;;  %v491_v21 = vsel %vm449_vm0, -inf, %v362_v13  ;;  %v546_v22 = vsel %vm449_vm0, %v353_v10, -inf  ;;  %v547_v23 = vsel %vm449_vm0, %v354_v11, -inf  ;;  %s2236_s22 = sshll.u32 %s3691_s16, 9 }
  0x30   : > { %v554_v24 = vsel %vm449_vm0, %v361_v12, -inf  ;;  %v555_v25 = vsel %vm449_vm0, %v362_v13, -inf  ;;  %v779_v26 = vrot.slane %v474_v14, 1  ;;  %v780_v27 = vrot.slane %v538_v15, 1  ;;  %s3362_s6 = scalar_lea.vmem %s3600_s3, %s2236_s22 }
  0x31   : > { %v782_v28 = vrot.slane %v475_v16, 1  ;;  %v783_v29 = vrot.slane %v539_v19, 1  ;;  %v803_v30 = vrot.slane %v482_v17, 1  ;;  %v804_v31 = vrot.slane %v546_v22, 1 }
  0x32   : > { %v781_v32 = vsel %vm706_vm1, %v779_v26, %v780_v27  ;;  %v806_v33 = vrot.slane %v483_v18, 1  ;;  %v807_v34 = vrot.slane %v547_v23, 1  ;;  %v827_v35 = vrot.slane %v490_v20, 1 }
  0x33   : > { %v784_v36 = vsel %vm706_vm1, %v782_v28, %v783_v29  ;;  %v805_v37 = vsel %vm706_vm1, %v803_v30, %v804_v31  ;;  %v828_v38 = vrot.slane %v554_v24, 1  ;;  %v830_v39 = vrot.slane %v491_v21, 1 }
  0x34   : > { %v808_v40 = vsel %vm706_vm1, %v806_v33, %v807_v34  ;;  %v831_v41 = vrot.slane %v555_v25, 1  ;;  %v987_v42 = vmax.f32 %v474_v14, %v781_v32  ;;  %v988_v43 = vmax.f32 %v475_v16, %v784_v36 }
  0x35   : > { %v829_v44 = vsel %vm706_vm1, %v827_v35, %v828_v38  ;;  %v995_v45 = vmax.f32 %v482_v17, %v805_v37  ;;  %v996_v46 = vmax.f32 %v483_v18, %v808_v40  ;;  %v1100_v47 = vrot.slane %v474_v14, 2 }
  0x36   : > { %v832_v48 = vsel %vm706_vm1, %v830_v39, %v831_v41  ;;  %v1003_v49 = vmax.f32 %v490_v20, %v829_v44  ;;  %v1101_v50 = vrot.slane %v538_v15, 2  ;;  %v1103_v51 = vrot.slane %v475_v16, 2 }
  0x37   : > { %v1004_v52 = vmax.f32 %v491_v21, %v832_v48  ;;  %v1104_v53 = vrot.slane %v539_v19, 2  ;;  %v1124_v54 = vrot.slane %v482_v17, 2  ;;  %v1125_v55 = vrot.slane %v546_v22, 2  ;;  %v193_v48 = vld [vmem:[%s2443_s26] sm:$0xff] }
  0x38   : > { %v1102_v56 = vsel %vm1027_vm2, %v1100_v47, %v1101_v50  ;;  %v1127_v57 = vrot.slane %v483_v18, 2  ;;  %v1128_v58 = vrot.slane %v547_v23, 2  ;;  %v1148_v59 = vrot.slane %v490_v20, 2 }
  0x39   : > { %v1105_v61 = vsel %vm1027_vm2, %v1103_v51, %v1104_v53  ;;  %v1126_v62 = vsel %vm1027_vm2, %v1124_v54, %v1125_v55  ;;  %v1149_v63 = vrot.slane %v554_v24, 2  ;;  %v1151_v0 = vrot.slane %v491_v21, 2  ;;  %v201_v54 = vld [vmem:[%s2443_s26 + $0x40] sm:$0xff] }
  0x3a   : > { %v1129_v2 = vsel %vm1027_vm2, %v1127_v57, %v1128_v58  ;;  %v1152_v3 = vrot.slane %v555_v25, 2  ;;  %v1308_v4 = vmax.f32 %v987_v42, %v1102_v56  ;;  %v2485_v5 = vmax.f32 %v988_v43, %v1105_v61 }
  0x3b   : > { %v1150_v8 = vsel %vm1027_vm2, %v1148_v59, %v1149_v63  ;;  %v1316_v9 = vmax.f32 %v995_v45, %v1126_v62  ;;  %v2490_v10 = vmax.f32 %v996_v46, %v1129_v2  ;;  %v369_v11 = vrot.slane %v241_v60, 7  ;;  %v202_v59 = vld [vmem:[%s2443_s26 + $0x48] sm:$0xff] }
  0x3c   : > { %v1153_v12 = vsel %vm1027_vm2, %v1151_v0, %v1152_v3  ;;  %v1324_v13 = vmax.f32 %v1003_v49, %v1150_v8  ;;  %v2494_v14 = vmax.f32 %v1308_v4, %v2485_v5  ;;  %v370_v15 = vrot.slane %v242_v1, 7  ;;  %v194_v49 = vld [vmem:[%s2443_s26 + $0x8] sm:$0xff] }
  0x3d   : > { %v2496_v16 = vmax.f32 %v1004_v52, %v1153_v12  ;;  %v2499_v17 = vmax.f32 %v1316_v9, %v2490_v10  ;;  %v377_v18 = vrot.slane %v249_v6, 7  ;;  %v378_v19 = vrot.slane %v250_v7, 7 }
  0x3e   : > { %v498_v20 = vsel %vm449_vm0, -inf, %v369_v11  ;;  %v499_v21 = vsel %vm449_vm0, -inf, %v370_v15  ;;  %v562_v22 = vsel %vm449_vm0, %v369_v11, -inf  ;;  %v563_v23 = vsel %vm449_vm0, %v370_v15, -inf }
  0x3f   : > { %v2506_v24 = vmax.f32 %v1324_v13, %v2496_v16  ;;  %v1476_v25 = vmax.f32 %v2494_v14, %v2499_v17  ;;  %v506_v26 = vsel %vm449_vm0, -inf, %v377_v18  ;;  %v507_v27 = vsel %vm449_vm0, -inf, %v378_v19 }
  0x40   : > { %v570_v28 = vsel %vm449_vm0, %v377_v18, -inf  ;;  %v571_v29 = vsel %vm449_vm0, %v378_v19, -inf  ;;  %v851_v30 = vrot.slane %v498_v20, 1  ;;  %v852_v31 = vrot.slane %v562_v22, 1 }
  0x41   : > { %v1532_v32 = vmax.f32 %v1476_v25, %v2506_v24  ;;  %v854_v33 = vrot.slane %v499_v21, 1  ;;  %v855_v34 = vrot.slane %v563_v23, 1  ;;  %v875_v35 = vrot.slane %v506_v26, 1 }
  0x42   : > { %v853_v36 = vsel %vm706_vm1, %v851_v30, %v852_v31  ;;  %v876_v37 = vrot.slane %v570_v28, 1  ;;  %v878_v38 = vrot.slane %v507_v27, 1  ;;  %v879_v39 = vrot.slane %v571_v29, 1 }
  0x43   : > { %2201 = vmatmul.msk.f32.vlgmr.msra.gmra.mxu2 %vm1562_vm3, %v1532_v32  ;;  %v856_v40 = vsel %vm706_vm1, %v854_v33, %v855_v34  ;;  %v1011_v41 = vmax.f32 %v498_v20, %v853_v36  ;;  %v1172_v42 = vrot.slane %v498_v20, 2  ;;  %v1173_v43 = vrot.slane %v562_v22, 2 }
  0x44   : > { %v877_v44 = vsel %vm706_vm1, %v875_v35, %v876_v37  ;;  %v880_v45 = vsel %vm706_vm1, %v878_v38, %v879_v39  ;;  %v1012_v46 = vmax.f32 %v499_v21, %v856_v40  ;;  %v1175_v47 = vrot.slane %v499_v21, 2 }
  0x45   : > { %v1019_v50 = vmax.f32 %v506_v26, %v877_v44  ;;  %v1020_v51 = vmax.f32 %v507_v27, %v880_v45  ;;  %v1174_v52 = vsel %vm1027_vm2, %v1172_v42, %v1173_v43  ;;  %v1176_v53 = vrot.slane %v563_v23, 2  ;;  %v209_v42 = vld [vmem:[%s2443_s26 + $0x80] sm:$0xff]  ;;  %v210_v43 = vld [vmem:[%s2443_s26 + $0x88] sm:$0xff] }
  0x46   : > { %v1196_v55 = vrot.slane %v506_v26, 2  ;;  %v1197_v56 = vrot.slane %v570_v28, 2  ;;  %v1199_v57 = vrot.slane %v507_v27, 2  ;;  %v1200_v58 = vrot.slane %v571_v29, 2 }
  0x47   : > { %v1177_v60 = vsel %vm1027_vm2, %v1175_v47, %v1176_v53  ;;  %v1332_v61 = vmax.f32 %v1011_v41, %v1174_v52  ;;  %v321_v62 = vrot.slane %v193_v48, 7  ;;  %v322_v63 = vrot.slane %v194_v49, 7  ;;  %v219_v48 = vld [vmem:[%s2443_s26 + $0xd0] sm:$0xff] }
  0x48   : > { %v1198_v0 = vsel %vm1027_vm2, %v1196_v55, %v1197_v56  ;;  %v1201_v1 = vsel %vm1027_vm2, %v1199_v57, %v1200_v58  ;;  %v2528_v2 = vmax.f32 %v1012_v46, %v1177_v60  ;;  %v329_v3 = vrot.slane %v201_v54, 7 }
  0x49   : > { %v1340_v4 = vmax.f32 %v1019_v50, %v1198_v0  ;;  %v2530_v6 = vmax.f32 %v1020_v51, %v1201_v1  ;;  %v330_v7 = vrot.slane %v202_v59, 7  ;;  %v450_v8 = vsel %vm449_vm0, -inf, %v321_v62 }
  0x4a   : > { %v2534_v9 = vmax.f32 %v1332_v61, %v2528_v2  ;;  %v451_v11 = vsel %vm449_vm0, -inf, %v322_v63  ;;  %v458_v12 = vsel %vm449_vm0, -inf, %v329_v3  ;;  %v514_v13 = vsel %vm449_vm0, %v321_v62, -inf }
  0x4b   : > { %v2540_v15 = vmax.f32 %v1340_v4, %v2530_v6  ;;  %v459_v18 = vsel %vm449_vm0, -inf, %v330_v7  ;;  %v515_v19 = vsel %vm449_vm0, %v322_v63, -inf  ;;  %v522_v20 = vsel %vm449_vm0, %v329_v3, -inf }
  0x4c   : > { %v1492_v21 = vmax.f32 %v2506_v24, %v2534_v9  ;;  %v523_v22 = vsel %vm449_vm0, %v330_v7, -inf  ;;  %v707_v23 = vrot.slane %v450_v8, 1  ;;  %v708_v25 = vrot.slane %v514_v13, 1 }
  0x4d   : > { %v710_v26 = vrot.slane %v451_v11, 1  ;;  %v711_v27 = vrot.slane %v515_v19, 1  ;;  %v731_v28 = vrot.slane %v458_v12, 1  ;;  %v732_v29 = vrot.slane %v522_v20, 1 }
  0x4e   : > { %v1548_v30 = vmax.f32 %v1492_v21, %v2540_v15  ;;  %v709_v31 = vsel %vm706_vm1, %v707_v23, %v708_v25  ;;  %v734_v32 = vrot.slane %v459_v18, 1  ;;  %v735_v33 = vrot.slane %v523_v22, 1  ;;  %v235_v23 = vld [vmem:[%s2443_s26 + $0x150] sm:$0xff] }
  0x4f   : > { %v712_v34 = vsel %vm706_vm1, %v710_v26, %v711_v27  ;;  %v733_v35 = vsel %vm706_vm1, %v731_v28, %v732_v29  ;;  %v963_v36 = vmax.f32 %v450_v8, %v709_v31  ;;  %v1028_v37 = vrot.slane %v450_v8, 2  ;;  %v227_v8 = vld [vmem:[%s2443_s26 + $0x110] sm:$0xff] }
  0x50   : > { %2217 = vmatmul.msk.f32.vlgmr.msra.gmra.mxu3 %vm1562_vm3, %v1548_v30  ;;  %v736_v38 = vsel %vm706_vm1, %v734_v32, %v735_v33  ;;  %v964_v39 = vmax.f32 %v451_v11, %v712_v34  ;;  %v971_v40 = vmax.f32 %v458_v12, %v733_v35  ;;  %v1029_v41 = vrot.slane %v514_v13, 2 }
  0x51   : > { %v972_v44 = vmax.f32 %v459_v18, %v736_v38  ;;  %v1031_v45 = vrot.slane %v451_v11, 2  ;;  %v1032_v46 = vrot.slane %v515_v19, 2  ;;  %v1052_v47 = vrot.slane %v458_v12, 2 }
  0x52   : > { %v1030_v49 = vsel %vm1027_vm2, %v1028_v37, %v1029_v41  ;;  %v1053_v50 = vrot.slane %v522_v20, 2  ;;  %v1055_v51 = vrot.slane %v459_v18, 2  ;;  %v1056_v52 = vrot.slane %v523_v22, 2 }
  0x53   : > { %v1033_v53 = vsel %vm1027_vm2, %v1031_v45, %v1032_v46  ;;  %v1284_v54 = vmax.f32 %v963_v36, %v1030_v49  ;;  %v337_v55 = vrot.slane %v209_v42, 7  ;;  %v338_v56 = vrot.slane %v210_v43, 7 }
  0x54   : > { %v1054_v57 = vsel %vm1027_vm2, %v1052_v47, %v1053_v50  ;;  %v1057_v58 = vsel %vm1027_vm2, %v1055_v51, %v1056_v52  ;;  %v2561_v59 = vmax.f32 %v964_v39, %v1033_v53  ;;  %v347_v60 = vrot.slane %v219_v48, 7 }
  0x55   : > { %v1292_v61 = vmax.f32 %v971_v40, %v1054_v57  ;;  %v2563_v62 = vmax.f32 %v972_v44, %v1057_v58  ;;  %v466_v63 = vsel %vm449_vm0, -inf, %v337_v55  ;;  %v467_v0 = vsel %vm449_vm0, -inf, %v338_v56  ;;  %v243_v57 = vld [vmem:[%s2443_s26 + $0x190] sm:$0xff] }
  0x56   : > { %v2568_v1 = vmax.f32 %v1284_v54, %v2561_v59  ;;  %v530_v3 = vsel %vm449_vm0, %v337_v55, -inf  ;;  %v531_v4 = vsel %vm449_vm0, %v338_v56, -inf  ;;  %v755_v7 = vrot.slane %v466_v63, 1  ;;  %v251_v58 = vld [vmem:[%s2443_s26 + $0x1d0] sm:$0xff] }
  0x57   : > { %v2574_v11 = vmax.f32 %v1292_v61, %v2563_v62  ;;  %v756_v12 = vrot.slane %v530_v3, 1  ;;  %v758_v13 = vrot.slane %v467_v0, 1  ;;  %v759_v18 = vrot.slane %v531_v4, 1 }
  0x58   : > { %v1076_v19 = vrot.slane %v466_v63, 2  ;;  %v1077_v20 = vrot.slane %v530_v3, 2  ;;  %v1079_v21 = vrot.slane %v467_v0, 2  ;;  %v1080_v22 = vrot.slane %v531_v4, 2  ;;  %v203_v4 = vld [vmem:[%s2443_s26 + $0x50] sm:$0xff] }
  0x59   : > { %v2579_v25 = vmax.f32 %v2568_v1, %v2574_v11  ;;  %v757_v26 = vsel %vm706_vm1, %v755_v7, %v756_v12  ;;  %v760_v27 = vsel %vm706_vm1, %v758_v13, %v759_v18  ;;  %v355_v28 = vrot.slane %v227_v8, 7 }
  0x5a   : > { %v979_v29 = vmax.f32 %v466_v63, %v757_v26  ;;  %v980_v30 = vmax.f32 %v467_v0, %v760_v27  ;;  %v1078_v31 = vsel %vm1027_vm2, %v1076_v19, %v1077_v20  ;;  %v1081_v32 = vsel %vm1027_vm2, %v1079_v21, %v1080_v22 }
  0x5b   : > { %2169 = vmatmul.msk.f32.vlgmr.msra.gmra.mxu0 %vm1562_vm3, %v2579_v25  ;;  %v363_v33 = vrot.slane %v235_v23, 7  ;;  %v476_v34 = vsel %vm449_vm0, -inf, %v347_v60  ;;  %v484_v35 = vsel %vm449_vm0, -inf, %v355_v28  ;;  %v540_v36 = vsel %vm449_vm0, %v347_v60, -inf  ;;  %v195_v60 = vld [vmem:[%s2443_s26 + $0x10] sm:$0xff] }
  0x5c   : > { %v1300_v37 = vmax.f32 %v979_v29, %v1078_v31  ;;  %v2590_v38 = vmax.f32 %v980_v30, %v1081_v32  ;;  %v548_v39 = vsel %vm449_vm0, %v355_v28, -inf  ;;  %v785_v40 = vrot.slane %v476_v34, 1 }
  0x5d   : > { %v492_v41 = vsel %vm449_vm0, -inf, %v363_v33  ;;  %v556_v42 = vsel %vm449_vm0, %v363_v33, -inf  ;;  %v786_v43 = vrot.slane %v540_v36, 1  ;;  %v809_v44 = vrot.slane %v484_v35, 1 }
  0x5e   : > { %v2596_v45 = vmax.f32 %v1300_v37, %v2590_v38  ;;  %v810_v46 = vrot.slane %v548_v39, 1  ;;  %v833_v47 = vrot.slane %v492_v41, 1  ;;  %v834_v48 = vrot.slane %v556_v42, 1 }
  0x5f   : > { %v787_v49 = vsel %vm706_vm1, %v785_v40, %v786_v43  ;;  %v1106_v50 = vrot.slane %v476_v34, 2  ;;  %v1107_v51 = vrot.slane %v540_v36, 2  ;;  %v1130_v52 = vrot.slane %v484_v35, 2 }
  0x60   : > { %v1460_v53 = vmax.f32 %v2574_v11, %v2596_v45  ;;  %v811_v54 = vsel %vm706_vm1, %v809_v44, %v810_v46  ;;  %v835_v55 = vsel %vm706_vm1, %v833_v47, %v834_v48  ;;  %v989_v56 = vmax.f32 %v476_v34, %v787_v49 }
  0x61   : > { %v997_v61 = vmax.f32 %v484_v35, %v811_v54  ;;  %v1005_v63 = vmax.f32 %v492_v41, %v835_v55  ;;  %v1108_v0 = vsel %vm1027_vm2, %v1106_v50, %v1107_v51  ;;  %v1131_v3 = vrot.slane %v548_v39, 2 }
  0x62   : > { %v1516_v7 = vmax.f32 %v1460_v53, %v2494_v14  ;;  %v1154_v8 = vrot.slane %v492_v41, 2  ;;  %v1155_v12 = vrot.slane %v556_v42, 2  ;;  %v2609_v13 = vmax.f32 %v989_v56, %v1108_v0 }
  0x63   : > { %v1132_v18 = vsel %vm1027_vm2, %v1130_v52, %v1131_v3  ;;  %v371_v19 = vrot.slane %v243_v57, 7  ;;  %v379_v20 = vrot.slane %v251_v58, 7  ;;  %v323_v21 = vrot.slane %v195_v60, 7 }
  0x64   : > { %2185 = vmatmul.msk.f32.vlgmr.msra.gmra.mxu1 %vm1562_vm3, %v1516_v7  ;;  %v1156_v22 = vsel %vm1027_vm2, %v1154_v8, %v1155_v12  ;;  %v2614_v23 = vmax.f32 %v997_v61, %v1132_v18  ;;  %v2618_v26 = vmax.f32 %v2494_v14, %v2609_v13  ;;  %v331_v27 = vrot.slane %v203_v4, 7  ;;  %v211_v8 = vld [vmem:[%s2443_s26 + $0x90] sm:$0xff]  ;;  %v220_v12 = vld [vmem:[%s2443_s26 + $0xd8] sm:$0xff] }
  0x65   : > { %v2620_v28 = vmax.f32 %v1005_v63, %v1156_v22  ;;  %v500_v29 = vsel %vm449_vm0, -inf, %v371_v19  ;;  %v508_v30 = vsel %vm449_vm0, -inf, %v379_v20  ;;  %v564_v31 = vsel %vm449_vm0, %v371_v19, -inf  ;;  %v228_v22 = vld [vmem:[%s2443_s26 + $0x118] sm:$0xff] }
  0x66   : > { %3638 = vst [vmem:[#allocation5_spill] sm:$0xff] %v2618_v26  ;;  %v2627_v32 = vmax.f32 %v2499_v17, %v2614_v23  ;;  %v572_v33 = vsel %vm449_vm0, %v379_v20, -inf  ;;  %v857_v34 = vrot.slane %v500_v29, 1  ;;  %v858_v35 = vrot.slane %v564_v31, 1 }
  0x67   : > { %v2632_v36 = vmax.f32 %v2506_v24, %v2620_v28  ;;  %v881_v37 = vrot.slane %v508_v30, 1  ;;  %v882_v39 = vrot.slane %v572_v33, 1  ;;  %v1178_v40 = vrot.slane %v500_v29, 2 }
  0x68   : > { %v1477_v41 = vmax.f32 %v2618_v26, %v2627_v32  ;;  %v859_v42 = vsel %vm706_vm1, %v857_v34, %v858_v35  ;;  %v1179_v43 = vrot.slane %v564_v31, 2  ;;  %v1202_v44 = vrot.slane %v508_v30, 2 }
  0x69   : > { %v883_v46 = vsel %vm706_vm1, %v881_v37, %v882_v39  ;;  %v1013_v47 = vmax.f32 %v500_v29, %v859_v42  ;;  %v1203_v48 = vrot.slane %v572_v33, 2  ;;  %v452_v49 = vsel %vm449_vm0, -inf, %v323_v21 }
  0x6a   : > { %v1533_v50 = vmax.f32 %v1477_v41, %v2632_v36  ;;  %v1021_v51 = vmax.f32 %v508_v30, %v883_v46  ;;  %v1180_v52 = vsel %vm1027_vm2, %v1178_v40, %v1179_v43  ;;  %v460_v53 = vsel %vm449_vm0, -inf, %v331_v27 }
  0x6b   : > { %v1204_v54 = vsel %vm1027_vm2, %v1202_v44, %v1203_v48  ;;  %v2643_v55 = vmax.f32 %v1013_v47, %v1180_v52  ;;  %v516_v56 = vsel %vm449_vm0, %v323_v21, -inf  ;;  %v524_v57 = vsel %vm449_vm0, %v331_v27, -inf  ;;  %v236_v27 = vld [vmem:[%s2443_s26 + $0x158] sm:$0xff] }
  0x6c   : > { %2202 = vmatmul.msk.f32.gmra.mxu2 %vm1562_vm3, %v1533_v50  ;;  %v2648_v58 = vmax.f32 %v1021_v51, %v1204_v54  ;;  %v713_v60 = vrot.slane %v452_v49, 1  ;;  %v714_v61 = vrot.slane %v516_v56, 1  ;;  %v737_v63 = vrot.slane %v460_v53, 1 }
  0x6d   : > { %v2652_v0 = vmax.f32 %v2534_v9, %v2643_v55  ;;  %v738_v3 = vrot.slane %v524_v57, 1  ;;  %v1034_v4 = vrot.slane %v452_v49, 2  ;;  %v1035_v7 = vrot.slane %v516_v56, 2 }
  0x6e   : > { %v2658_v18 = vmax.f32 %v2540_v15, %v2648_v58  ;;  %v715_v19 = vsel %vm706_vm1, %v713_v60, %v714_v61  ;;  %v1058_v20 = vrot.slane %v460_v53, 2  ;;  %v1059_v21 = vrot.slane %v524_v57, 2 }
  0x6f   : > { %v1493_v29 = vmax.f32 %v2632_v36, %v2652_v0  ;;  %v739_v30 = vsel %vm706_vm1, %v737_v63, %v738_v3  ;;  %v965_v31 = vmax.f32 %v452_v49, %v715_v19  ;;  %v1036_v33 = vsel %vm1027_vm2, %v1034_v4, %v1035_v7 }
  0x70   : > { %v973_v34 = vmax.f32 %v460_v53, %v739_v30  ;;  %v1060_v35 = vsel %vm1027_vm2, %v1058_v20, %v1059_v21  ;;  %v339_v37 = vrot.slane %v211_v8, 7  ;;  %v348_v39 = vrot.slane %v220_v12, 7 }
  0x71   : > { %v1549_v40 = vmax.f32 %v1493_v29, %v2658_v18  ;;  %v2669_v41 = vmax.f32 %v965_v31, %v1036_v33  ;;  %v356_v42 = vrot.slane %v228_v22, 7  ;;  %v364_v43 = vrot.slane %v236_v27, 7 }
  0x72   : > { %v2671_v44 = vmax.f32 %v973_v34, %v1060_v35  ;;  %v468_v46 = vsel %vm449_vm0, -inf, %v339_v37  ;;  %v532_v47 = vsel %vm449_vm0, %v339_v37, -inf  ;;  %v477_v48 = vsel %vm449_vm0, -inf, %v348_v39 }
  0x73   : > { %2218 = vmatmul.msk.f32.gmra.mxu3 %vm1562_vm3, %v1549_v40  ;;  %v1404_v49 = vmax.f32 %v2568_v1, %v2669_v41  ;;  %v761_v50 = vrot.slane %v468_v46, 1  ;;  %v762_v51 = vrot.slane %v532_v47, 1  ;;  %v1082_v52 = vrot.slane %v468_v46, 2 }
  0x74   : > { %v1410_v53 = vmax.f32 %v2574_v11, %v2671_v44  ;;  %v1083_v54 = vrot.slane %v532_v47, 2  ;;  %v485_v56 = vsel %vm449_vm0, -inf, %v356_v42  ;;  %v493_v57 = vsel %vm449_vm0, -inf, %v364_v43 }
  0x75   : > { %v763_v60 = vsel %vm706_vm1, %v761_v50, %v762_v51  ;;  %v541_v61 = vsel %vm449_vm0, %v348_v39, -inf  ;;  %v549_v63 = vsel %vm449_vm0, %v356_v42, -inf  ;;  %v557_v3 = vsel %vm449_vm0, %v364_v43, -inf  ;;  %v244_v42 = vld [vmem:[%s2443_s26 + $0x198] sm:$0xff] }
  0x76   : > { %v2687_v1 = vmax.f32 %v1404_v49, %v1410_v53  ;;  %v981_v4 = vmax.f32 %v468_v46, %v763_v60  ;;  %v1084_v7 = vsel %vm1027_vm2, %v1082_v52, %v1083_v54  ;;  %v788_v8 = vrot.slane %v477_v48, 1  ;;  %v252_v50 = vld [vmem:[%s2443_s26 + $0x1d8] sm:$0xff] }
  0x77   : > { %v789_v11 = vrot.slane %v541_v61, 1  ;;  %v812_v12 = vrot.slane %v485_v56, 1  ;;  %v813_v19 = vrot.slane %v549_v63, 1  ;;  %v836_v20 = vrot.slane %v493_v57, 1 }
  0x78   : > { %2170 = vmatmul.msk.f32.gmra.mxu0 %vm1562_vm3, %v2687_v1  ;;  %v2692_v21 = vmax.f32 %v981_v4, %v1084_v7  ;;  %v837_v22 = vrot.slane %v557_v3, 1  ;;  %v1109_v27 = vrot.slane %v477_v48, 2  ;;  %v1110_v29 = vrot.slane %v541_v61, 2 }
  0x79   : > { %v790_v30 = vsel %vm706_vm1, %v788_v8, %v789_v11  ;;  %v814_v31 = vsel %vm706_vm1, %v812_v12, %v813_v19  ;;  %v1133_v33 = vrot.slane %v485_v56, 2  ;;  %v1134_v34 = vrot.slane %v549_v63, 2 }
  0x7a   : > { %v2698_v35 = vmax.f32 %v2596_v45, %v2692_v21  ;;  %v838_v37 = vsel %vm706_vm1, %v836_v20, %v837_v22  ;;  %v990_v39 = vmax.f32 %v477_v48, %v790_v30  ;;  %v998_v40 = vmax.f32 %v485_v56, %v814_v31 }
  0x7b   : > { %v1006_v43 = vmax.f32 %v493_v57, %v838_v37  ;;  %v1111_v46 = vsel %vm1027_vm2, %v1109_v27, %v1110_v29  ;;  %v1135_v47 = vsel %vm1027_vm2, %v1133_v33, %v1134_v34  ;;  %v1157_v49 = vrot.slane %v493_v57, 2  ;;  %v196_v29 = vld [vmem:[%s2443_s26 + $0x18] sm:$0xff] }
  0x7c   : > { %v1461_v51 = vmax.f32 %v1410_v53, %v2698_v35  ;;  %v1158_v52 = vrot.slane %v557_v3, 2  ;;  %v2706_v54 = vmax.f32 %v990_v39, %v1111_v46  ;;  %v2708_v60 = vmax.f32 %v998_v40, %v1135_v47  ;;  %v204_v37 = vld [vmem:[%s2443_s26 + $0x58] sm:$0xff] }
  0x7d   : > { %v1370_v61 = vmax.f32 %v2485_v5, %v2609_v13  ;;  %v1377_v48 = vmax.f32 %v2490_v10, %v2614_v23  ;;  %v1384_v56 = vmax.f32 %v2496_v16, %v2620_v28  ;;  %v372_v63 = vrot.slane %v244_v42, 7 }
  0x7e   : > { %v1517_v57 = vmax.f32 %v1461_v51, %v2618_v26  ;;  %v1159_v4 = vsel %vm1027_vm2, %v1157_v49, %v1158_v52  ;;  %v380_v53 = vrot.slane %v252_v50, 7  ;;  %v1391_v3 = vmax.f32 %v2528_v2, %v2643_v55 }
  0x7f   : > { %v2720_v7 = vmax.f32 %v1006_v43, %v1159_v4  ;;  %v2723_v5 = vmax.f32 %v1370_v61, %v2706_v54  ;;  %v2726_v10 = vmax.f32 %v1377_v48, %v2708_v60  ;;  %v501_v16 = vsel %vm449_vm0, -inf, %v372_v63 }
  0x80   : > { %2186 = vmatmul.msk.f32.gmra.mxu1 %vm1562_vm3, %v1517_v57  ;;  %v509_v8 = vsel %vm449_vm0, -inf, %v380_v53  ;;  %v565_v11 = vsel %vm449_vm0, %v372_v63, -inf  ;;  %v573_v12 = vsel %vm449_vm0, %v380_v53, -inf  ;;  %v860_v2 = vrot.slane %v501_v16, 1 }
  0x81   : > { %3639 = vst [vmem:[#allocation6_spill] sm:$0xff] %v2723_v5  ;;  %v2734_v19 = vmax.f32 %v1384_v56, %v2720_v7  ;;  %v1478_v20 = vmax.f32 %v2723_v5, %v2726_v10  ;;  %v861_v22 = vrot.slane %v565_v11, 1  ;;  %v884_v27 = vrot.slane %v509_v8, 1 }
  0x82   : > { %v885_v30 = vrot.slane %v573_v12, 1  ;;  %v1181_v31 = vrot.slane %v501_v16, 2  ;;  %v1182_v33 = vrot.slane %v565_v11, 2  ;;  %v1205_v34 = vrot.slane %v509_v8, 2 }
  0x83   : > { %v1534_v39 = vmax.f32 %v1478_v20, %v2734_v19  ;;  %v862_v40 = vsel %vm706_vm1, %v860_v2, %v861_v22  ;;  %v1206_v42 = vrot.slane %v573_v12, 2  ;;  %v1398_v43 = vmax.f32 %v2530_v6, %v2648_v58  ;;  %v212_v20 = vld [vmem:[%s2443_s26 + $0x98] sm:$0xff] }
  0x84   : > { %v886_v46 = vsel %vm706_vm1, %v884_v27, %v885_v30  ;;  %v1014_v47 = vmax.f32 %v501_v16, %v862_v40  ;;  %v1183_v49 = vsel %vm1027_vm2, %v1181_v31, %v1182_v33  ;;  %v324_v50 = vrot.slane %v196_v29, 7  ;;  %v221_v30 = vld [vmem:[%s2443_s26 + $0xe0] sm:$0xff] }
  0x85   : > { %2203 = vmatmul.msk.f32.gmra.mxu2 %vm1562_vm3, %v1534_v39  ;;  %v1022_v51 = vmax.f32 %v509_v8, %v886_v46  ;;  %v1207_v52 = vsel %vm1027_vm2, %v1205_v34, %v1206_v42  ;;  %v332_v61 = vrot.slane %v204_v37, 7  ;;  %v1349_v48 = vmax.f32 %v2561_v59, %v2669_v41 }
  0x86   : > { %v2750_v56 = vmax.f32 %v1014_v47, %v1183_v49  ;;  %v453_v6 = vsel %vm449_vm0, -inf, %v324_v50  ;;  %v517_v63 = vsel %vm449_vm0, %v324_v50, -inf  ;;  %v1356_v57 = vmax.f32 %v2563_v62, %v2671_v44  ;;  %v229_v49 = vld [vmem:[%s2443_s26 + $0x120] sm:$0xff] }
  0x87   : > { %v2756_v4 = vmax.f32 %v1022_v51, %v1207_v52  ;;  %v461_v53 = vsel %vm449_vm0, -inf, %v332_v61  ;;  %v525_v16 = vsel %vm449_vm0, %v332_v61, -inf  ;;  %v716_v8 = vrot.slane %v453_v6, 1  ;;  %v237_v50 = vld [vmem:[%s2443_s26 + $0x160] sm:$0xff] }
  0x88   : > { %v2761_v11 = vmax.f32 %v1391_v3, %v2750_v56  ;;  %v717_v59 = vrot.slane %v517_v63, 1  ;;  %v740_v12 = vrot.slane %v461_v53, 1  ;;  %v741_v2 = vrot.slane %v525_v16, 1 }
  0x89   : > { %v2765_v22 = vmax.f32 %v1398_v43, %v2756_v4  ;;  %v1037_v27 = vrot.slane %v453_v6, 2  ;;  %v1038_v62 = vrot.slane %v517_v63, 2  ;;  %v1061_v29 = vrot.slane %v461_v53, 2 }
  0x8a   : > { %3640 = vst [vmem:[#allocation7_spill] sm:$0xff] %v2761_v11  ;;  %v1494_v31 = vmax.f32 %v2734_v19, %v2761_v11  ;;  %v718_v33 = vsel %vm706_vm1, %v716_v8, %v717_v59  ;;  %v742_v3 = vsel %vm706_vm1, %v740_v12, %v741_v2  ;;  %v1062_v34 = vrot.slane %v525_v16, 2  ;;  %v256_v11 = vld [vmem:[%s2443_s26 + $0x1f8] sm:$0xff] }
  0x8b   : > { %3641 = vst [vmem:[#allocation8_spill] sm:$0xff] %v2765_v22  ;;  %v966_v37 = vmax.f32 %v453_v6, %v718_v33  ;;  %v974_v39 = vmax.f32 %v461_v53, %v742_v3  ;;  %v1039_v40 = vsel %vm1027_vm2, %v1037_v27, %v1038_v62  ;;  %v340_v42 = vrot.slane %v212_v20, 7 }
  0x8c   : > { %v1550_v43 = vmax.f32 %v1494_v31, %v2765_v22  ;;  %v1063_v46 = vsel %vm1027_vm2, %v1061_v29, %v1062_v34  ;;  %v1363_v47 = vmax.f32 %v2590_v38, %v2692_v21  ;;  %v349_v51 = vrot.slane %v221_v30, 7 }
  0x8d   : > { %v2779_v52 = vmax.f32 %v966_v37, %v1039_v40  ;;  %v2781_v61 = vmax.f32 %v974_v39, %v1063_v46  ;;  %v469_v6 = vsel %vm449_vm0, -inf, %v340_v42  ;;  %v533_v63 = vsel %vm449_vm0, %v340_v42, -inf }
  0x8e   : > { %2219 = vmatmul.msk.f32.gmra.mxu3 %vm1562_vm3, %v1550_v43  ;;  %v764_v53 = vrot.slane %v469_v6, 1  ;;  %v765_v16 = vrot.slane %v533_v63, 1  ;;  %v1085_v8 = vrot.slane %v469_v6, 2  ;;  %v1086_v59 = vrot.slane %v533_v63, 2 }
  0x8f   : > { %v1405_v12 = vmax.f32 %v1349_v48, %v2779_v52  ;;  %v1411_v38 = vmax.f32 %v1356_v57, %v2781_v61  ;;  %v357_v2 = vrot.slane %v229_v49, 7  ;;  %v365_v20 = vrot.slane %v237_v50, 7 }
  0x90   : > { %v766_v27 = vsel %vm706_vm1, %v764_v53, %v765_v16  ;;  %v1087_v62 = vsel %vm1027_vm2, %v1085_v8, %v1086_v59  ;;  %v478_v29 = vsel %vm449_vm0, -inf, %v349_v51  ;;  %v542_v30 = vsel %vm449_vm0, %v349_v51, -inf }
  0x91   : > { %v2792_v31 = vmax.f32 %v1405_v12, %v1411_v38  ;;  %v982_v33 = vmax.f32 %v469_v6, %v766_v27  ;;  %v486_v3 = vsel %vm449_vm0, -inf, %v357_v2  ;;  %v494_v34 = vsel %vm449_vm0, -inf, %v365_v20 }
  0x92   : > { %v550_v48 = vsel %vm449_vm0, %v357_v2, -inf  ;;  %v558_v57 = vsel %vm449_vm0, %v365_v20, -inf  ;;  %v791_v37 = vrot.slane %v478_v29, 1  ;;  %v792_v39 = vrot.slane %v542_v30, 1 }
  0x93   : > { %3642 = vst [vmem:[#allocation9_spill] sm:$0xff] %v2792_v31  ;;  %2171 = vmatmul.msk.f32.gmra.mxu0 %vm1562_vm3, %v2792_v31  ;;  %v2800_v40 = vmax.f32 %v982_v33, %v1087_v62  ;;  %v815_v42 = vrot.slane %v486_v3, 1  ;;  %v816_v43 = vrot.slane %v550_v48, 1  ;;  %v839_v46 = vrot.slane %v494_v34, 1 }
  0x94   : > { %v793_v49 = vsel %vm706_vm1, %v791_v37, %v792_v39  ;;  %v840_v50 = vrot.slane %v558_v57, 1  ;;  %v1112_v51 = vrot.slane %v478_v29, 2  ;;  %v1113_v6 = vrot.slane %v542_v30, 2  ;;  %v245_v30 = vld [vmem:[%s2443_s26 + $0x1a0] sm:$0xff] }
  0x95   : > { %v2804_v63 = vmax.f32 %v1363_v47, %v2800_v40  ;;  %v817_v53 = vsel %vm706_vm1, %v815_v42, %v816_v43  ;;  %v991_v16 = vmax.f32 %v478_v29, %v793_v49  ;;  %v1136_v8 = vrot.slane %v486_v3, 2  ;;  %v253_v39 = vld [vmem:[%s2443_s26 + $0x1e0] sm:$0xff] }
  0x96   : > { %v841_v59 = vsel %vm706_vm1, %v839_v46, %v840_v50  ;;  %v999_v12 = vmax.f32 %v486_v3, %v817_v53  ;;  %v1114_v2 = vsel %vm1027_vm2, %v1112_v51, %v1113_v6  ;;  %v1137_v20 = vrot.slane %v550_v48, 2  ;;  %v197_v42 = vld [vmem:[%s2443_s26 + $0x20] sm:$0xff] }
  0x97   : > { %3643 = vst [vmem:[#allocation10_spill] sm:$0xff] %v2804_v63  ;;  %v1462_v27 = vmax.f32 %v1411_v38, %v2804_v63  ;;  %v1007_v62 = vmax.f32 %v494_v34, %v841_v59  ;;  %v1160_v33 = vrot.slane %v494_v34, 2  ;;  %v1161_v37 = vrot.slane %v558_v57, 2  ;;  %v246_v63 = vld [vmem:[%s2443_s26 + $0x1a8] sm:$0xff] }
  0x98   : > { %v1138_v47 = vsel %vm1027_vm2, %v1136_v8, %v1137_v20  ;;  %v2813_v31 = vmax.f32 %v991_v16, %v1114_v2  ;;  %v1371_v29 = vmax.f32 %v2609_v13, %v2706_v54  ;;  %v1378_v3 = vmax.f32 %v2614_v23, %v2708_v60  ;;  %v205_v20 = vld [vmem:[%s2443_s26 + $0x60] sm:$0xff] }
  0x99   : > { %v1518_v48 = vmax.f32 %v1462_v27, %v2723_v5  ;;  %v1162_v38 = vsel %vm1027_vm2, %v1160_v33, %v1161_v37  ;;  %v2822_v43 = vmax.f32 %v999_v12, %v1138_v47  ;;  %v1385_v34 = vmax.f32 %v2620_v28, %v2720_v7 }
  0x9a   : > { %v2826_v57 = vmax.f32 %v1007_v62, %v1162_v38  ;;  %v2829_v46 = vmax.f32 %v1371_v29, %v2813_v31  ;;  %v373_v13 = vrot.slane %v245_v30, 7  ;;  %v381_v49 = vrot.slane %v253_v39, 7 }
  0x9b   : > { %2187 = vmatmul.msk.f32.gmra.mxu1 %vm1562_vm3, %v1518_v48  ;;  %v2833_v23 = vmax.f32 %v1378_v3, %v2822_v43  ;;  %v1392_v50 = vmax.f32 %v2643_v55, %v2750_v56  ;;  %v1399_v51 = vmax.f32 %v2648_v58, %v2756_v4  ;;  %v325_v28 = vrot.slane %v197_v42, 7 }
  0x9c   : > { %3644 = vst [vmem:[#allocation11_spill] sm:$0xff] %v2829_v46  ;;  %v2840_v6 = vmax.f32 %v1385_v34, %v2826_v57  ;;  %v502_v53 = vsel %vm449_vm0, -inf, %v373_v13  ;;  %v510_v16 = vsel %vm449_vm0, -inf, %v381_v49  ;;  %v566_v8 = vsel %vm449_vm0, %v373_v13, -inf }
  0x9d   : > { %3645 = vst [vmem:[#allocation12_spill] sm:$0xff] %v2833_v23  ;;  %v1479_v59 = vmax.f32 %v2829_v46, %v2833_v23  ;;  %v574_v12 = vsel %vm449_vm0, %v381_v49, -inf  ;;  %v863_v2 = vrot.slane %v502_v53, 1  ;;  %v864_v55 = vrot.slane %v566_v8, 1 }
  0x9e   : > { %3646 = vst [vmem:[#allocation13_spill] sm:$0xff] %v2840_v6  ;;  %v887_v27 = vrot.slane %v510_v16, 1  ;;  %v888_v58 = vrot.slane %v574_v12, 1  ;;  %v1184_v62 = vrot.slane %v502_v53, 2  ;;  %v1185_v33 = vrot.slane %v566_v8, 2 }
  0x9f   : > { %v1535_v37 = vmax.f32 %v1479_v59, %v2840_v6  ;;  %v865_v30 = vsel %vm706_vm1, %v863_v2, %v864_v55  ;;  %v1208_v39 = vrot.slane %v510_v16, 2  ;;  %v1209_v47 = vrot.slane %v574_v12, 2 }
  0xa0   : > { %v889_v29 = vsel %vm706_vm1, %v887_v27, %v888_v58  ;;  %v1015_v3 = vmax.f32 %v502_v53, %v865_v30  ;;  %v1186_v42 = vsel %vm1027_vm2, %v1184_v62, %v1185_v33  ;;  %v333_v48 = vrot.slane %v205_v20, 7  ;;  %v213_v33 = vld [vmem:[%s2443_s26 + $0xa0] sm:$0xff] }
  0xa1   : > { %2204 = vmatmul.msk.f32.gmra.mxu2 %vm1562_vm3, %v1535_v37  ;;  %v1023_v38 = vmax.f32 %v510_v16, %v889_v29  ;;  %v1210_v34 = vsel %vm1027_vm2, %v1208_v39, %v1209_v47  ;;  %v454_v13 = vsel %vm449_vm0, -inf, %v325_v28  ;;  %v518_v49 = vsel %vm449_vm0, %v325_v28, -inf }
  0xa2   : > { %v2857_v8 = vmax.f32 %v1015_v3, %v1186_v42  ;;  %v462_v59 = vsel %vm449_vm0, -inf, %v333_v48  ;;  %v526_v12 = vsel %vm449_vm0, %v333_v48, -inf  ;;  %v719_v53 = vrot.slane %v454_v13, 1  ;;  %v222_v48 = vld [vmem:[%s2443_s26 + $0xe8] sm:$0xff] }
  0xa3   : > { %v2861_v2 = vmax.f32 %v1023_v38, %v1210_v34  ;;  %v720_v55 = vrot.slane %v518_v49, 1  ;;  %v743_v20 = vrot.slane %v462_v59, 1  ;;  %v744_v16 = vrot.slane %v526_v12, 1  ;;  %v230_v38 = vld [vmem:[%s2443_s26 + $0x128] sm:$0xff] }
  0xa4   : > { %v2864_v27 = vmax.f32 %v1392_v50, %v2857_v8  ;;  %v1040_v58 = vrot.slane %v454_v13, 2  ;;  %v1041_v62 = vrot.slane %v518_v49, 2  ;;  %v1064_v28 = vrot.slane %v462_v59, 2 }
  0xa5   : > { %v2868_v37 = vmax.f32 %v1399_v51, %v2861_v2  ;;  %v721_v30 = vsel %vm706_vm1, %v719_v53, %v720_v55  ;;  %v745_v39 = vsel %vm706_vm1, %v743_v20, %v744_v16  ;;  %v1065_v47 = vrot.slane %v526_v12, 2 }
  0xa6   : > { %3647 = vst [vmem:[#allocation14_spill] sm:$0xff] %v2864_v27  ;;  %v1495_v29 = vmax.f32 %v2840_v6, %v2864_v27  ;;  %v967_v3 = vmax.f32 %v454_v13, %v721_v30  ;;  %v975_v42 = vmax.f32 %v462_v59, %v745_v39  ;;  %v1042_v50 = vsel %vm1027_vm2, %v1040_v58, %v1041_v62  ;;  %v238_v59 = vld [vmem:[%s2443_s26 + $0x168] sm:$0xff] }
  0xa7   : > { %3648 = vst [vmem:[#allocation15_spill] sm:$0xff] %v2868_v37  ;;  %v1066_v34 = vsel %vm1027_vm2, %v1064_v28, %v1065_v47  ;;  %v1350_v51 = vmax.f32 %v2669_v41, %v2779_v52  ;;  %v1357_v49 = vmax.f32 %v2671_v44, %v2781_v61  ;;  %v341_v53 = vrot.slane %v213_v33, 7  ;;  %v254_v6 = vld [vmem:[%s2443_s26 + $0x1e8] sm:$0xff] }
  0xa8   : > { %v1551_v12 = vmax.f32 %v1495_v29, %v2868_v37  ;;  %v2883_v55 = vmax.f32 %v967_v3, %v1042_v50  ;;  %v2885_v20 = vmax.f32 %v975_v42, %v1066_v34  ;;  %v1364_v13 = vmax.f32 %v2692_v21, %v2800_v40 }
  0xa9   : > { %v470_v16 = vsel %vm449_vm0, -inf, %v341_v53  ;;  %v534_v58 = vsel %vm449_vm0, %v341_v53, -inf  ;;  %v350_v62 = vrot.slane %v222_v48, 7  ;;  %v358_v41 = vrot.slane %v230_v38, 7 }
  0xaa   : > { %2220 = vmatmul.msk.f32.gmra.mxu3 %vm1562_vm3, %v1551_v12  ;;  %v1406_v44 = vmax.f32 %v1350_v51, %v2883_v55  ;;  %v1412_v28 = vmax.f32 %v1357_v49, %v2885_v20  ;;  %v767_v33 = vrot.slane %v470_v16, 1  ;;  %v768_v30 = vrot.slane %v534_v58, 1 }
  0xab   : > { %v1088_v39 = vrot.slane %v470_v16, 2  ;;  %v1089_v47 = vrot.slane %v534_v58, 2  ;;  %v366_v29 = vrot.slane %v238_v59, 7  ;;  %v479_v21 = vsel %vm449_vm0, -inf, %v350_v62 }
  0xac   : > { %v2896_v3 = vmax.f32 %v1406_v44, %v1412_v28  ;;  %v769_v42 = vsel %vm706_vm1, %v767_v33, %v768_v30  ;;  %v487_v50 = vsel %vm449_vm0, -inf, %v358_v41  ;;  %v543_v48 = vsel %vm449_vm0, %v350_v62, -inf }
  0xad   : > { %v983_v38 = vmax.f32 %v470_v16, %v769_v42  ;;  %v1090_v34 = vsel %vm1027_vm2, %v1088_v39, %v1089_v47  ;;  %v495_v51 = vsel %vm449_vm0, -inf, %v366_v29  ;;  %v551_v49 = vsel %vm449_vm0, %v358_v41, -inf }
  0xae   : > { %3649 = vst [vmem:[#allocation16_spill] sm:$0xff] %v2896_v3  ;;  %2172 = vmatmul.msk.f32.gmra.mxu0 %vm1562_vm3, %v2896_v3  ;;  %v559_v53 = vsel %vm449_vm0, %v366_v29, -inf  ;;  %v794_v12 = vrot.slane %v479_v21, 1  ;;  %v795_v59 = vrot.slane %v543_v48, 1  ;;  %v818_v58 = vrot.slane %v487_v50, 1 }
  0xaf   : > { %v2907_v44 = vmax.f32 %v983_v38, %v1090_v34  ;;  %v819_v33 = vrot.slane %v551_v49, 1  ;;  %v842_v62 = vrot.slane %v495_v51, 1  ;;  %v843_v16 = vrot.slane %v559_v53, 1 }
  0xb0   : > { %v796_v30 = vsel %vm706_vm1, %v794_v12, %v795_v59  ;;  %v1115_v39 = vrot.slane %v479_v21, 2  ;;  %v1116_v47 = vrot.slane %v543_v48, 2  ;;  %v1139_v41 = vrot.slane %v487_v50, 2 }
  0xb1   : > { %v2911_v42 = vmax.f32 %v1364_v13, %v2907_v44  ;;  %v820_v29 = vsel %vm706_vm1, %v818_v58, %v819_v33  ;;  %v844_v3 = vsel %vm706_vm1, %v842_v62, %v843_v16  ;;  %v992_v37 = vmax.f32 %v479_v21, %v796_v30  ;;  %v198_v62 = vld [vmem:[%s2443_s26 + $0x28] sm:$0xff] }
  0xb2   : > { %v1000_v38 = vmax.f32 %v487_v50, %v820_v29  ;;  %v1008_v34 = vmax.f32 %v495_v51, %v844_v3  ;;  %v1117_v5 = vsel %vm1027_vm2, %v1115_v39, %v1116_v47  ;;  %v1140_v27 = vrot.slane %v551_v49, 2 }
  0xb3   : > { %3650 = vst [vmem:[#allocation17_spill] sm:$0xff] %v2911_v42  ;;  %v1463_v12 = vmax.f32 %v1412_v28, %v2911_v42  ;;  %v1163_v59 = vrot.slane %v495_v51, 2  ;;  %v1164_v23 = vrot.slane %v559_v53, 2  ;;  %v2918_v48 = vmax.f32 %v992_v37, %v1117_v5 }
  0xb4   : > { %v1141_v13 = vsel %vm1027_vm2, %v1139_v41, %v1140_v27  ;;  %v1372_v58 = vmax.f32 %v2706_v54, %v2813_v31  ;;  %v1379_v21 = vmax.f32 %v2708_v60, %v2822_v43  ;;  %v1386_v3 = vmax.f32 %v2720_v7, %v2826_v57 }
  0xb5   : > { %v1519_v50 = vmax.f32 %v1463_v12, %v2829_v46  ;;  %v1165_v28 = vsel %vm1027_vm2, %v1163_v59, %v1164_v23  ;;  %v2930_v51 = vmax.f32 %v1000_v38, %v1141_v13  ;;  %v374_v5 = vrot.slane %v246_v63, 7 }
  0xb6   : > { %v2932_v37 = vmax.f32 %v1008_v34, %v1165_v28  ;;  %v2935_v27 = vmax.f32 %v1372_v58, %v2918_v48  ;;  %v382_v54 = vrot.slane %v254_v6, 7  ;;  %v1393_v60 = vmax.f32 %v2750_v56, %v2857_v8 }
  0xb7   : > { %2188 = vmatmul.msk.f32.gmra.mxu1 %vm1562_vm3, %v1519_v50  ;;  %v2941_v7 = vmax.f32 %v1379_v21, %v2930_v51  ;;  %v503_v23 = vsel %vm449_vm0, -inf, %v374_v5  ;;  %v567_v49 = vsel %vm449_vm0, %v374_v5, -inf  ;;  %v1400_v63 = vmax.f32 %v2756_v4, %v2861_v2  ;;  %v206_v4 = vld [vmem:[%s2443_s26 + $0x68] sm:$0xff] }
  0xb8   : > { %3651 = vst [vmem:[#allocation18_spill] sm:$0xff] %v2935_v27  ;;  %v2948_v53 = vmax.f32 %v1386_v3, %v2932_v37  ;;  %v511_v6 = vsel %vm449_vm0, -inf, %v382_v54  ;;  %v575_v56 = vsel %vm449_vm0, %v382_v54, -inf  ;;  %v866_v33 = vrot.slane %v503_v23, 1 }
  0xb9   : > { %3652 = vst [vmem:[#allocation19_spill] sm:$0xff] %v2941_v7  ;;  %v1480_v16 = vmax.f32 %v2935_v27, %v2941_v7  ;;  %v867_v30 = vrot.slane %v567_v49, 1  ;;  %v890_v39 = vrot.slane %v511_v6, 1  ;;  %v891_v47 = vrot.slane %v575_v56, 1 }
  0xba   : > { %3653 = vst [vmem:[#allocation20_spill] sm:$0xff] %v2948_v53  ;;  %v1187_v41 = vrot.slane %v503_v23, 2  ;;  %v1188_v29 = vrot.slane %v567_v49, 2  ;;  %v1211_v38 = vrot.slane %v511_v6, 2  ;;  %v1212_v34 = vrot.slane %v575_v56, 2 }
  0xbb   : > { %v1536_v12 = vmax.f32 %v1480_v16, %v2948_v53  ;;  %v868_v59 = vsel %vm706_vm1, %v866_v33, %v867_v30  ;;  %v892_v13 = vsel %vm706_vm1, %v890_v39, %v891_v47  ;;  %v326_v58 = vrot.slane %v198_v62, 7 }
  0xbc   : > { %v1016_v21 = vmax.f32 %v503_v23, %v868_v59  ;;  %v1024_v3 = vmax.f32 %v511_v6, %v892_v13  ;;  %v1189_v50 = vsel %vm1027_vm2, %v1187_v41, %v1188_v29  ;;  %v1213_v28 = vsel %vm1027_vm2, %v1211_v38, %v1212_v34  ;;  %v214_v41 = vld [vmem:[%s2443_s26 + $0xa8] sm:$0xff] }
  0xbd   : > { %2205 = vmatmul.msk.f32.gmra.mxu2 %vm1562_vm3, %v1536_v12  ;;  %v334_v5 = vrot.slane %v206_v4, 7  ;;  %v455_v54 = vsel %vm449_vm0, -inf, %v326_v58  ;;  %v519_v49 = vsel %vm449_vm0, %v326_v58, -inf  ;;  %v1351_v56 = vmax.f32 %v2779_v52, %v2883_v55  ;;  %v223_v4 = vld [vmem:[%s2443_s26 + $0xf0] sm:$0xff] }
  0xbe   : > { %v2966_v33 = vmax.f32 %v1016_v21, %v1189_v50  ;;  %v2968_v23 = vmax.f32 %v1024_v3, %v1213_v28  ;;  %v722_v6 = vrot.slane %v455_v54, 1  ;;  %v723_v62 = vrot.slane %v519_v49, 1 }
  0xbf   : > { %v463_v16 = vsel %vm449_vm0, -inf, %v334_v5  ;;  %v527_v30 = vsel %vm449_vm0, %v334_v5, -inf  ;;  %v1043_v39 = vrot.slane %v455_v54, 2  ;;  %v1044_v47 = vrot.slane %v519_v49, 2 }
  0xc0   : > { %v2974_v29 = vmax.f32 %v1393_v60, %v2966_v33  ;;  %v2977_v38 = vmax.f32 %v1400_v63, %v2968_v23  ;;  %v724_v52 = vsel %vm706_vm1, %v722_v6, %v723_v62  ;;  %v746_v34 = vrot.slane %v463_v16, 1 }
  0xc1   : > { %v747_v12 = vrot.slane %v527_v30, 1  ;;  %v968_v59 = vmax.f32 %v455_v54, %v724_v52  ;;  %v1045_v13 = vsel %vm1027_vm2, %v1043_v39, %v1044_v47  ;;  %v1067_v58 = vrot.slane %v463_v16, 2  ;;  %v231_v54 = vld [vmem:[%s2443_s26 + $0x130] sm:$0xff] }
  0xc2   : > { %3654 = vst [vmem:[#allocation21_spill] sm:$0xff] %v2974_v29  ;;  %v1496_v21 = vmax.f32 %v2948_v53, %v2974_v29  ;;  %v1068_v3 = vrot.slane %v527_v30, 2  ;;  %v1358_v60 = vmax.f32 %v2781_v61, %v2885_v20  ;;  %v342_v50 = vrot.slane %v214_v41, 7  ;;  %v239_v47 = vld [vmem:[%s2443_s26 + $0x170] sm:$0xff] }
  0xc3   : > { %3655 = vst [vmem:[#allocation22_spill] sm:$0xff] %v2977_v38  ;;  %v748_v63 = vsel %vm706_vm1, %v746_v34, %v747_v12  ;;  %v2987_v28 = vmax.f32 %v968_v59, %v1045_v13  ;;  %v1365_v5 = vmax.f32 %v2800_v40, %v2907_v44  ;;  %v351_v49 = vrot.slane %v223_v4, 7  ;;  %v255_v53 = vld [vmem:[%s2443_s26 + $0x1f0] sm:$0xff] }
  0xc4   : > { %v1552_v6 = vmax.f32 %v1496_v21, %v2977_v38  ;;  %v976_v62 = vmax.f32 %v463_v16, %v748_v63  ;;  %v1069_v39 = vsel %vm1027_vm2, %v1067_v58, %v1068_v3  ;;  %v471_v30 = vsel %vm449_vm0, -inf, %v342_v50  ;;  %v247_v38 = vld [vmem:[%s2443_s26 + $0x1b0] sm:$0xff] }
  0xc5   : > { %v1407_v61 = vmax.f32 %v1351_v56, %v2987_v28  ;;  %v535_v41 = vsel %vm449_vm0, %v342_v50, -inf  ;;  %v770_v52 = vrot.slane %v471_v30, 1  ;;  %v1091_v34 = vrot.slane %v471_v30, 2 }
  0xc6   : > { %2221 = vmatmul.msk.f32.gmra.mxu3 %vm1562_vm3, %v1552_v6  ;;  %v2999_v12 = vmax.f32 %v976_v62, %v1069_v39  ;;  %v771_v40 = vrot.slane %v535_v41, 1  ;;  %v1092_v4 = vrot.slane %v535_v41, 2  ;;  %v359_v59 = vrot.slane %v231_v54, 7 }
  0xc7   : > { %v367_v13 = vrot.slane %v239_v47, 7  ;;  %v480_v16 = vsel %vm449_vm0, -inf, %v351_v49  ;;  %v544_v58 = vsel %vm449_vm0, %v351_v49, -inf  ;;  %v1373_v21 = vmax.f32 %v2813_v31, %v2918_v48 }
  0xc8   : > { %v1413_v56 = vmax.f32 %v1358_v60, %v2999_v12  ;;  %v772_v3 = vsel %vm706_vm1, %v770_v52, %v771_v40  ;;  %v1093_v50 = vsel %vm1027_vm2, %v1091_v34, %v1092_v4  ;;  %v488_v63 = vsel %vm449_vm0, -inf, %v359_v59 }
  0xc9   : > { %v984_v6 = vmax.f32 %v471_v30, %v772_v3  ;;  %v496_v62 = vsel %vm449_vm0, -inf, %v367_v13  ;;  %v552_v54 = vsel %vm449_vm0, %v359_v59, -inf  ;;  %v560_v39 = vsel %vm449_vm0, %v367_v13, -inf }
  0xca   : > { %v3012_v47 = vmax.f32 %v1407_v61, %v1413_v56  ;;  %v797_v49 = vrot.slane %v480_v16, 1  ;;  %v798_v31 = vrot.slane %v544_v58, 1  ;;  %v821_v41 = vrot.slane %v488_v63, 1 }
  0xcb   : > { %v3014_v60 = vmax.f32 %v984_v6, %v1093_v50  ;;  %v822_v52 = vrot.slane %v552_v54, 1  ;;  %v845_v40 = vrot.slane %v496_v62, 1  ;;  %v846_v34 = vrot.slane %v560_v39, 1 }
  0xcc   : > { %3656 = vst [vmem:[#allocation23_spill] sm:$0xff] %v3012_v47  ;;  %2173 = vmatmul.msk.f32.gmra.mxu0 %vm1562_vm3, %v3012_v47  ;;  %v799_v30 = vsel %vm706_vm1, %v797_v49, %v798_v31  ;;  %v1118_v4 = vrot.slane %v480_v16, 2  ;;  %v1119_v59 = vrot.slane %v544_v58, 2  ;;  %v1142_v13 = vrot.slane %v488_v63, 2 }
  0xcd   : > { %v3020_v61 = vmax.f32 %v1365_v5, %v3014_v60  ;;  %v823_v3 = vsel %vm706_vm1, %v821_v41, %v822_v52  ;;  %v847_v50 = vsel %vm706_vm1, %v845_v40, %v846_v34  ;;  %v993_v6 = vmax.f32 %v480_v16, %v799_v30 }
  0xce   : > { %v1001_v46 = vmax.f32 %v488_v63, %v823_v3  ;;  %v1009_v29 = vmax.f32 %v496_v62, %v847_v50  ;;  %v1120_v42 = vsel %vm1027_vm2, %v1118_v4, %v1119_v59  ;;  %v1143_v47 = vrot.slane %v552_v54, 2 }
  0xcf   : > { %3657 = vst [vmem:[#allocation24_spill] sm:$0xff] %v3020_v61  ;;  %v1464_v49 = vmax.f32 %v1413_v56, %v3020_v61  ;;  %v1166_v31 = vrot.slane %v496_v62, 2  ;;  %v1167_v7 = vrot.slane %v560_v39, 2  ;;  %v3027_v58 = vmax.f32 %v993_v6, %v1120_v42 }
  0xd0   : > { %v1144_v5 = vsel %vm1027_vm2, %v1142_v13, %v1143_v47  ;;  %v1380_v41 = vmax.f32 %v2822_v43, %v2930_v51  ;;  %v1387_v16 = vmax.f32 %v2826_v57, %v2932_v37  ;;  %v375_v63 = vrot.slane %v247_v38, 7  ;;  %v199_v13 = vld [vmem:[%s2443_s26 + $0x30] sm:$0xff] }
  0xd1   : > { %v1520_v52 = vmax.f32 %v1464_v49, %v2935_v27  ;;  %v1168_v54 = vsel %vm1027_vm2, %v1166_v31, %v1167_v7  ;;  %v3037_v40 = vmax.f32 %v1001_v46, %v1144_v5  ;;  %v3040_v56 = vmax.f32 %v1373_v21, %v3027_v58  ;;  %v207_v31 = vld [vmem:[%s2443_s26 + $0x70] sm:$0xff]  ;;  %v232_v27 = vld [vmem:[%s2443_s26 + $0x138] sm:$0xff] }
  0xd2   : > { %v3042_v42 = vmax.f32 %v1009_v29, %v1168_v54  ;;  %v383_v62 = vrot.slane %v255_v53, 7  ;;  %v504_v39 = vsel %vm449_vm0, -inf, %v375_v63  ;;  %v568_v43 = vsel %vm449_vm0, %v375_v63, -inf  ;;  %v215_v5 = vld [vmem:[%s2443_s26 + $0xb0] sm:$0xff] }
  0xd3   : > { %3658 = vst [vmem:[#allocation25_spill] sm:$0xff] %v3040_v56  ;;  %2189 = vmatmul.msk.f32.gmra.mxu1 %vm1562_vm3, %v1520_v52  ;;  %v3048_v57 = vmax.f32 %v1380_v41, %v3037_v40  ;;  %v869_v38 = vrot.slane %v504_v39, 1  ;;  %v870_v46 = vrot.slane %v568_v43, 1  ;;  %v1190_v7 = vrot.slane %v504_v39, 2 }
  0xd4   : > { %v3051_v21 = vmax.f32 %v1387_v16, %v3042_v42  ;;  %v512_v53 = vsel %vm449_vm0, -inf, %v383_v62  ;;  %v576_v29 = vsel %vm449_vm0, %v383_v62, -inf  ;;  %v1191_v47 = vrot.slane %v568_v43, 2 }
  0xd5   : > { %v1481_v34 = vmax.f32 %v3040_v56, %v3048_v57  ;;  %v871_v30 = vsel %vm706_vm1, %v869_v38, %v870_v46  ;;  %v893_v4 = vrot.slane %v512_v53, 1  ;;  %v894_v59 = vrot.slane %v576_v29, 1 }
  0xd6   : > { %v1017_v3 = vmax.f32 %v504_v39, %v871_v30  ;;  %v1192_v50 = vsel %vm1027_vm2, %v1190_v7, %v1191_v47  ;;  %v1214_v6 = vrot.slane %v512_v53, 2  ;;  %v1215_v49 = vrot.slane %v576_v29, 2 }
  0xd7   : > { %v1537_v41 = vmax.f32 %v1481_v34, %v3051_v21  ;;  %v895_v16 = vsel %vm706_vm1, %v893_v4, %v894_v59  ;;  %v1394_v63 = vmax.f32 %v2857_v8, %v2966_v33  ;;  %v1401_v52 = vmax.f32 %v2861_v2, %v2968_v23 }
  0xd8   : > { %v1025_v54 = vmax.f32 %v512_v53, %v895_v16  ;;  %v1216_v62 = vsel %vm1027_vm2, %v1214_v6, %v1215_v49  ;;  %v3069_v39 = vmax.f32 %v1017_v3, %v1192_v50  ;;  %v327_v43 = vrot.slane %v199_v13, 7 }
  0xd9   : > { %2206 = vmatmul.msk.f32.gmra.mxu2 %vm1562_vm3, %v1537_v41  ;;  %v335_v38 = vrot.slane %v207_v31, 7  ;;  %v1352_v46 = vmax.f32 %v2883_v55, %v2987_v28  ;;  %v1359_v7 = vmax.f32 %v2885_v20, %v2999_v12  ;;  %v343_v29 = vrot.slane %v215_v5, 7 }
  0xda   : > { %v3076_v8 = vmax.f32 %v1025_v54, %v1216_v62  ;;  %v3079_v2 = vmax.f32 %v1394_v63, %v3069_v39  ;;  %v456_v53 = vsel %vm449_vm0, -inf, %v327_v43  ;;  %v520_v47 = vsel %vm449_vm0, %v327_v43, -inf }
  0xdb   : > { %v464_v34 = vsel %vm449_vm0, -inf, %v335_v38  ;;  %v528_v30 = vsel %vm449_vm0, %v335_v38, -inf  ;;  %v725_v4 = vrot.slane %v456_v53, 1  ;;  %v726_v59 = vrot.slane %v520_v47, 1  ;;  %v224_v38 = vld [vmem:[%s2443_s26 + $0xf8] sm:$0xff] }
  0xdc   : > { %3659 = vst [vmem:[#allocation26_spill] sm:$0xff] %v3079_v2  ;;  %v3086_v55 = vmax.f32 %v1401_v52, %v3076_v8  ;;  %v1497_v20 = vmax.f32 %v3051_v21, %v3079_v2  ;;  %v749_v13 = vrot.slane %v464_v34, 1  ;;  %v750_v3 = vrot.slane %v528_v30, 1 }
  0xdd   : > { %v727_v50 = vsel %vm706_vm1, %v725_v4, %v726_v59  ;;  %v1046_v6 = vrot.slane %v456_v53, 2  ;;  %v1047_v49 = vrot.slane %v520_v47, 2  ;;  %v1070_v31 = vrot.slane %v464_v34, 2 }
  0xde   : > { %3660 = vst [vmem:[#allocation27_spill] sm:$0xff] %v3086_v55  ;;  %v1553_v5 = vmax.f32 %v1497_v20, %v3086_v55  ;;  %v751_v41 = vsel %vm706_vm1, %v749_v13, %v750_v3  ;;  %v969_v16 = vmax.f32 %v456_v53, %v727_v50  ;;  %v1071_v63 = vrot.slane %v528_v30, 2  ;;  %v240_v13 = vld [vmem:[%s2443_s26 + $0x178] sm:$0xff] }
  0xdf   : > { %v977_v52 = vmax.f32 %v464_v34, %v751_v41  ;;  %v1048_v54 = vsel %vm1027_vm2, %v1046_v6, %v1047_v49  ;;  %v472_v62 = vsel %vm449_vm0, -inf, %v343_v29  ;;  %v536_v43 = vsel %vm449_vm0, %v343_v29, -inf }
  0xe0   : > { %2222 = vmatmul.msk.f32.gmra.mxu3 %vm1562_vm3, %v1553_v5  ;;  %v1072_v47 = vsel %vm1027_vm2, %v1070_v31, %v1071_v63  ;;  %v3100_v4 = vmax.f32 %v969_v16, %v1048_v54  ;;  %v773_v59 = vrot.slane %v472_v62, 1  ;;  %v774_v20 = vrot.slane %v536_v43, 1 }
  0xe1   : > { %v3103_v53 = vmax.f32 %v977_v52, %v1072_v47  ;;  %v1094_v34 = vrot.slane %v472_v62, 2  ;;  %v1095_v30 = vrot.slane %v536_v43, 2  ;;  %v1366_v3 = vmax.f32 %v2907_v44, %v3014_v60 }
  0xe2   : > { %v1408_v29 = vmax.f32 %v1352_v46, %v3100_v4  ;;  %v775_v50 = vsel %vm706_vm1, %v773_v59, %v774_v20  ;;  %v352_v6 = vrot.slane %v224_v38, 7  ;;  %v360_v49 = vrot.slane %v232_v27, 7 }
  0xe3   : > { %v1414_v31 = vmax.f32 %v1359_v7, %v3103_v53  ;;  %v985_v5 = vmax.f32 %v472_v62, %v775_v50  ;;  %v1096_v41 = vsel %vm1027_vm2, %v1094_v34, %v1095_v30  ;;  %v368_v16 = vrot.slane %v240_v13, 7 }
  0xe4   : > { %v481_v63 = vsel %vm449_vm0, -inf, %v352_v6  ;;  %v489_v52 = vsel %vm449_vm0, -inf, %v360_v49  ;;  %v545_v54 = vsel %vm449_vm0, %v352_v6, -inf  ;;  %v553_v44 = vsel %vm449_vm0, %v360_v49, -inf }
  0xe5   : > { %v3115_v43 = vmax.f32 %v1408_v29, %v1414_v31  ;;  %v3117_v46 = vmax.f32 %v985_v5, %v1096_v41  ;;  %v497_v27 = vsel %vm449_vm0, -inf, %v368_v16  ;;  %v561_v7 = vsel %vm449_vm0, %v368_v16, -inf }
  0xe6   : > { %v800_v62 = vrot.slane %v481_v63, 1  ;;  %v801_v38 = vrot.slane %v545_v54, 1  ;;  %v824_v47 = vrot.slane %v489_v52, 1  ;;  %v825_v59 = vrot.slane %v553_v44, 1 }
  0xe7   : > { %3661 = vst [vmem:[#allocation28_spill] sm:$0xff] %v3115_v43  ;;  %2174 = vmatmul.msk.f32.gmra.mxu0 %vm1562_vm3, %v3115_v43  ;;  %v3124_v20 = vmax.f32 %v1366_v3, %v3117_v46  ;;  %v848_v13 = vrot.slane %v497_v27, 1  ;;  %v849_v34 = vrot.slane %v561_v7, 1  ;;  %v1121_v30 = vrot.slane %v481_v63, 2  ;;  %v248_v43 = vld [vmem:[%s2443_s26 + $0x1b8] sm:$0xff] }
  0xe8   : > { %v802_v29 = vsel %vm706_vm1, %v800_v62, %v801_v38  ;;  %v826_v50 = vsel %vm706_vm1, %v824_v47, %v825_v59  ;;  %v1122_v6 = vrot.slane %v545_v54, 2  ;;  %v1145_v49 = vrot.slane %v489_v52, 2 }
  0xe9   : > { %v1465_v5 = vmax.f32 %v1414_v31, %v3124_v20  ;;  %v850_v41 = vsel %vm706_vm1, %v848_v13, %v849_v34  ;;  %v994_v16 = vmax.f32 %v481_v63, %v802_v29  ;;  %v1002_v61 = vmax.f32 %v489_v52, %v826_v50 }
  0xea   : > { %v1010_v55 = vmax.f32 %v497_v27, %v850_v41  ;;  %v1123_v3 = vsel %vm1027_vm2, %v1121_v30, %v1122_v6  ;;  %v1146_v2 = vrot.slane %v553_v44, 2  ;;  %v1169_v22 = vrot.slane %v497_v27, 2  ;;  %v200_v6 = vld [vmem:[%s2443_s26 + $0x38] sm:$0xff] }
  0xeb   : > { %v1521_v26 = vmax.f32 %v1465_v5, %v3040_v56  ;;  %v1170_v62 = vrot.slane %v561_v7, 2  ;;  %v3134_v38 = vmax.f32 %v994_v16, %v1123_v3  ;;  %v1374_v54 = vmax.f32 %v2918_v48, %v3027_v58 }
  0xec   : > { %v1147_v31 = vsel %vm1027_vm2, %v1145_v49, %v1146_v2  ;;  %v1381_v63 = vmax.f32 %v2930_v51, %v3037_v40  ;;  %v1388_v52 = vmax.f32 %v2932_v37, %v3042_v42  ;;  %v376_v47 = vrot.slane %v248_v43, 7  ;;  %v208_v49 = vld [vmem:[%s2443_s26 + $0x78] sm:$0xff] }
  0xed   : > { %2190 = vmatmul.msk.f32.gmra.mxu1 %vm1562_vm3, %v1521_v26  ;;  %v1171_v44 = vsel %vm1027_vm2, %v1169_v22, %v1170_v62  ;;  %v3145_v27 = vmax.f32 %v1002_v61, %v1147_v31  ;;  %v3148_v7 = vmax.f32 %v1374_v54, %v3134_v38  ;;  %v384_v59 = vrot.slane %v256_v11, 7  ;;  %v216_v62 = vld [vmem:[%s2443_s26 + $0xb8] sm:$0xff] }
  0xee   : > { %v3150_v48 = vmax.f32 %v1010_v55, %v1171_v44  ;;  %v505_v2 = vsel %vm449_vm0, -inf, %v376_v47  ;;  %v569_v51 = vsel %vm449_vm0, %v376_v47, -inf  ;;  %v1395_v37 = vmax.f32 %v2966_v33, %v3069_v39 }
  0xef   : > { %v3157_v26 = vmax.f32 %v1381_v63, %v3145_v27  ;;  %v513_v22 = vsel %vm449_vm0, -inf, %v384_v59  ;;  %v577_v61 = vsel %vm449_vm0, %v384_v59, -inf  ;;  %v872_v11 = vrot.slane %v505_v2, 1 }
  0xf0   : > { %v3162_v55 = vmax.f32 %v1388_v52, %v3150_v48  ;;  %v873_v43 = vrot.slane %v569_v51, 1  ;;  %v896_v13 = vrot.slane %v513_v22, 1  ;;  %v897_v34 = vrot.slane %v577_v61, 1 }
  0xf1   : > { %v1482_v30 = vmax.f32 %v3148_v7, %v3157_v26  ;;  %v1193_v29 = vrot.slane %v505_v2, 2  ;;  %v1194_v33 = vrot.slane %v569_v51, 2  ;;  %v1217_v50 = vrot.slane %v513_v22, 2 }
  0xf2   : > { %v874_v5 = vsel %vm706_vm1, %v872_v11, %v873_v43  ;;  %v898_v41 = vsel %vm706_vm1, %v896_v13, %v897_v34  ;;  %v1218_v16 = vrot.slane %v577_v61, 2  ;;  %v1402_v3 = vmax.f32 %v2968_v23, %v3076_v8 }
  0xf3   : > { %v1538_v54 = vmax.f32 %v1482_v30, %v3162_v55  ;;  %v1018_v31 = vmax.f32 %v505_v2, %v874_v5  ;;  %v1026_v63 = vmax.f32 %v513_v22, %v898_v41  ;;  %v1195_v52 = vsel %vm1027_vm2, %v1193_v29, %v1194_v33 }
  0xf4   : > { %v1219_v47 = vsel %vm1027_vm2, %v1217_v50, %v1218_v16  ;;  %v328_v44 = vrot.slane %v200_v6, 7  ;;  %v336_v59 = vrot.slane %v208_v49, 7  ;;  %v1353_v51 = vmax.f32 %v2987_v28, %v3100_v4 }
  0xf5   : > { %2207 = vmatmul.msk.f32.gmra.mxu2 %vm1562_vm3, %v1538_v54  ;;  %v1339_v61 = vmax.f32 %v1018_v31, %v1195_v52  ;;  %v1347_v11 = vmax.f32 %v1026_v63, %v1219_v47  ;;  %v1360_v23 = vmax.f32 %v2999_v12, %v3103_v53  ;;  %v344_v43 = vrot.slane %v216_v62, 7 }
  0xf6   : > { %v457_v2 = vsel %vm449_vm0, -inf, %v328_v44  ;;  %v465_v22 = vsel %vm449_vm0, -inf, %v336_v59  ;;  %v521_v13 = vsel %vm449_vm0, %v328_v44, -inf  ;;  %v529_v34 = vsel %vm449_vm0, %v336_v59, -inf }
  0xf7   : > { %v3185_v30 = vmax.f32 %v1395_v37, %v1339_v61  ;;  %v3187_v29 = vmax.f32 %v1402_v3, %v1347_v11  ;;  %v728_v28 = vrot.slane %v457_v2, 1  ;;  %v729_v33 = vrot.slane %v521_v13, 1 }
  0xf8   : > { %v752_v50 = vrot.slane %v465_v22, 1  ;;  %v753_v6 = vrot.slane %v529_v34, 1  ;;  %v1049_v49 = vrot.slane %v457_v2, 2  ;;  %v1050_v5 = vrot.slane %v521_v13, 2 }
  0xf9   : > { %v1498_v12 = vmax.f32 %v3162_v55, %v3185_v30  ;;  %v730_v41 = vsel %vm706_vm1, %v728_v28, %v729_v33  ;;  %v1073_v16 = vrot.slane %v465_v22, 2  ;;  %v1074_v62 = vrot.slane %v529_v34, 2 }
  0xfa   : > { %v754_v54 = vsel %vm706_vm1, %v752_v50, %v753_v6  ;;  %v970_v31 = vmax.f32 %v457_v2, %v730_v41  ;;  %v1051_v37 = vsel %vm1027_vm2, %v1049_v49, %v1050_v5  ;;  %v473_v3 = vsel %vm449_vm0, -inf, %v344_v43 }
  0xfb   : > { %v1554_v63 = vmax.f32 %v1498_v12, %v3187_v29  ;;  %v978_v52 = vmax.f32 %v465_v22, %v754_v54  ;;  %v1075_v47 = vsel %vm1027_vm2, %v1073_v16, %v1074_v62  ;;  %v537_v44 = vsel %vm449_vm0, %v344_v43, -inf }
  0xfc   : > { %v1291_v59 = vmax.f32 %v970_v31, %v1051_v37  ;;  %v776_v13 = vrot.slane %v473_v3, 1  ;;  %v777_v56 = vrot.slane %v537_v44, 1  ;;  %v1097_v28 = vrot.slane %v473_v3, 2 }
  0xfd   : > { %2223 = vmatmul.msk.f32.gmra.mxu3 %vm1562_vm3, %v1554_v63  ;;  %v1299_v34 = vmax.f32 %v978_v52, %v1075_v47  ;;  %v1098_v33 = vrot.slane %v537_v44, 2  ;;  %v1367_v2 = vmax.f32 %v3014_v60, %v3117_v46  ;;  %v3203_v50 = vmax.f32 %v3027_v58, %v3134_v38  ;;  %v3664_v52 = vld [vmem:[#allocation8_spill] sm:$0xff]  ;;  %v3665_v47 = vld [vmem:[#allocation26_spill] sm:$0xff]  ;;  %v3666_v44 = vld [vmem:[#allocation27_spill] sm:$0xff] }
  0xfe   : > { %v1409_v22 = vmax.f32 %v1353_v51, %v1291_v59  ;;  %v778_v6 = vsel %vm706_vm1, %v776_v13, %v777_v56  ;;  %v3208_v43 = vmax.f32 %v3037_v40, %v3145_v27  ;;  %v3212_v49 = vmax.f32 %v3042_v42, %v3150_v48 }
  0xff   : > { %v1415_v5 = vmax.f32 %v1360_v23, %v1299_v34  ;;  %v986_v12 = vmax.f32 %v473_v3, %v778_v6  ;;  %v1099_v41 = vsel %vm1027_vm2, %v1097_v28, %v1098_v33  ;;  %v3216_v60 = vmax.f32 %v3069_v39, %v1339_v61  ;;  %v3670_v33 = vld [vmem:[#allocation10_spill] sm:$0xff] }
 0x100   : > { %v1483_v58 = vmax.f32 %v3203_v50, %v3208_v43  ;;  %v3221_v56 = vmax.f32 %v3076_v8, %v1347_v11  ;;  %v1354_v51 = vmax.f32 %v3100_v4, %v1291_v59  ;;  %v1484_v8 = vmax.f32 %v2499_v17, %v2506_v24 }
 0x101   : > { %v3223_v38 = vmax.f32 %v1409_v22, %v1415_v5  ;;  %v1307_v40 = vmax.f32 %v986_v12, %v1099_v41  ;;  %v1499_v42 = vmax.f32 %v3212_v49, %v3216_v60  ;;  %v1361_v11 = vmax.f32 %v3103_v53, %v1299_v34  ;;  %v3673_v41 = vld [vmem:[#allocation6_spill] sm:$0xff] }
 0x102   : > { %v1539_v27 = vmax.f32 %v1483_v58, %v3212_v49  ;;  %v1540_v4 = vmax.f32 %v1484_v8, %v2534_v9  ;;  %v1500_v24 = vmax.f32 %v2534_v9, %v2540_v15  ;;  %v1485_v53 = vmax.f32 %v2627_v32, %v2632_v36 }
 0x103   : > { %2175 = vmatmul.msk.f32.gmra.mxu0 %vm1562_vm3, %v3223_v38  ;;  %v3230_v48 = vmax.f32 %v1367_v2, %v1307_v40  ;;  %v1555_v39 = vmax.f32 %v1499_v42, %v3221_v56  ;;  %v3241_v23 = vmax.f32 %v3117_v46, %v1307_v40  ;;  %v3244_v62 = vmax.f32 %v1354_v51, %v1361_v11  ;;  %v3671_v2 = vld [vmem:[#allocation9_spill] sm:$0xff]  ;;  %v3674_v40 = vld [vmem:[#allocation15_spill] sm:$0xff] }
 0x104   : > { %2208 = vmatmul.msk.f32.gmra.mxu2 %vm1562_vm3, %v1539_v27  ;;  %v1508_v31 = vmax.f32 %v2579_v25, %v2596_v45  ;;  %v1541_v37 = vmax.f32 %v1485_v53, %v2652_v0  ;;  %v1468_v9 = vmax.f32 %v2596_v45, %v2494_v14  ;;  %v1501_v15 = vmax.f32 %v2652_v0, %v2658_v18  ;;  %v3662_v45 = vld [vmem:[#allocation5_spill] sm:$0xff]  ;;  %v3663_v18 = vld [vmem:[#allocation7_spill] sm:$0xff] }
 0x105   : > { %v1466_v61 = vmax.f32 %v1415_v5, %v3230_v48  ;;  %2224 = vmatmul.msk.f32.gmra.mxu3 %vm1562_vm3, %v1555_v39  ;;  %v1467_v54 = vmax.f32 %v1361_v11, %v3241_v23  ;;  %v1486_v36 = vmax.f32 %v2726_v10, %v2734_v19  ;;  %v1509_v25 = vmax.f32 %v2687_v1, %v2698_v35  ;;  %v3667_v1 = vld [vmem:[#allocation28_spill] sm:$0xff]  ;;  %v3672_v5 = vld [vmem:[#allocation14_spill] sm:$0xff]  ;;  %v3676_v51 = vld [vmem:[#allocation19_spill] sm:$0xff] }
 0x106   : > { %v1524_v3 = vmax.f32 %v1468_v9, %v2499_v17  ;;  %v1489_v14 = vmax.f32 %v3048_v57, %v3051_v21  ;;  %v1469_v0 = vmax.f32 %v2698_v35, %v3662_v45  ;;  %v1502_v19 = vmax.f32 %v3663_v18, %v3664_v52  ;;  %v3668_v35 = vld [vmem:[#allocation13_spill] sm:$0xff]  ;;  %v3669_v21 = vld [vmem:[#allocation12_spill] sm:$0xff]  ;;  %v3684_v45 = vld [vmem:[#allocation18_spill] sm:$0xff]  ;;  %v1868_v52 = vpop.f32.mrf.mxu2 }
 0x107   : > { %v1522_v16 = vmax.f32 %v1466_v61, %v3148_v7  ;;  %v1523_v46 = vmax.f32 %v1467_v54, %v3203_v50  ;;  %v1542_v63 = vmax.f32 %v1486_v36, %v3663_v18  ;;  %v1505_v59 = vmax.f32 %v3665_v47, %v3666_v44  ;;  %v3675_v39 = vld [vmem:[#allocation20_spill] sm:$0xff]  ;;  %v1772_v18 = vpop.f32.mrf.mxu0 }
 0x108   : > { %v1545_v17 = vmax.f32 %v1489_v14, %v3665_v47  ;;  %v1513_v13 = vmax.f32 %v3667_v1, %v3124_v20  ;;  %v1487_v28 = vmax.f32 %v3669_v21, %v3668_v35  ;;  %v1525_v34 = vmax.f32 %v1469_v0, %v2627_v32 }
 0x109   : > { %2191 = vmatmul.msk.f32.gmra.mxu1 %vm1562_vm3, %v1522_v16  ;;  %v1510_v22 = vmax.f32 %v3671_v2, %v3670_v33  ;;  %v1490_v6 = vmax.f32 %v3157_v26, %v3162_v55  ;;  %v1470_v58 = vmax.f32 %v3670_v33, %v3673_v41  ;;  %v1503_v42 = vmax.f32 %v3672_v5, %v3674_v40  ;;  %v3677_v16 = vld [vmem:[#allocation17_spill] sm:$0xff] }
 0x10a   : > { %v1543_v12 = vmax.f32 %v1487_v28, %v3672_v5  ;;  %v1506_v27 = vmax.f32 %v3185_v30, %v3187_v29  ;;  %v1474_v55 = vmax.f32 %v3230_v48, %v3148_v7  ;;  %v1488_v8 = vmax.f32 %v3676_v51, %v3675_v39  ;;  %v3679_v7 = vld [vmem:[#allocation21_spill] sm:$0xff] }
 0x10b   : > { %2176 = vmatmul.msk.f32.gmra.mxu0 %vm1562_vm3, %v3244_v62  ;;  %v1546_v32 = vmax.f32 %v1490_v6, %v3185_v30  ;;  %v1526_v61 = vmax.f32 %v1470_v58, %v2726_v10  ;;  %v3681_v10 = vld [vmem:[#allocation22_spill] sm:$0xff]  ;;  %v1507_v9 = vmax.f32 %v3216_v60, %v3221_v56  ;;  %v1514_v1 = vmax.f32 %v3223_v38, %v3230_v48 }
 0x10c   : > { %2209 = vmatmul.msk.f32.gmra.mxu2 %vm1562_vm3, %v1540_v4  ;;  %v3315_v11 = vmax.f32 %v1474_v55, %v3157_v26  ;;  %v3678_v4 = vld [vmem:[#allocation16_spill] sm:$0xff]  ;;  %v1544_v53 = vmax.f32 %v1488_v8, %v3679_v7 }
 0x10d   : > { %2225 = vmatmul.msk.f32.gmra.mxu3 %vm1562_vm3, %v1500_v24  ;;  %v1511_v54 = vmax.f32 %v3678_v4, %v3677_v16  ;;  %v1491_v24 = vmax.f32 %v3208_v43, %v3212_v49  ;;  %v1475_v49 = vmax.f32 %v3241_v23, %v3203_v50  ;;  %v3351_v50 = vld [vmem:[%s3599_s2] ss:$0 sm:$0xff] }
 0x10e   : > { %v1869_v44 = vadd.f32 %v3351_v50, %v1868_v52  ;;  %v1871_v41 = vpop.f32.mrf.mxu2 }
 0x10f   : > { %v3328_v26 = vmax.f32 %v1491_v24, %v3216_v60  ;;  %v3340_v36 = vmax.f32 %v1475_v49, %v3208_v43  ;;  %v1916_v43 = vpop.f32.mrf.mxu3  ;;  %v1775_v6 = vpop.f32.mrf.mxu0  ;;  %v1872_v40 = vadd.f32 %v3351_v50, %v1871_v41  ;;  %v1515_v24 = vmax.f32 %v3244_v62, %v3241_v23 }
 0x110   : > { %v1917_v35 = vadd.f32 %v3351_v50, %v1916_v43  ;;  %v1996_v33 = vmax.f32 %v1869_v44, 0.0 }
 0x111   : > { %2192 = vmatmul.msk.f32.gmra.mxu1 %vm1562_vm3, %v1523_v46  ;;  %v3680_v46 = vld [vmem:[#allocation11_spill] sm:$0xff]  ;;  %v1997_v8 = vmax.f32 %v1872_v40, 0.0 }
 0x112   : > { %v2012_v2 = vmax.f32 %v1917_v35, 0.0  ;;  %2060 = vst.msk [vmem:[%s3362_s6 + $0x100] sm:$0xff] %vm1562_vm3, %v1996_v33 }
 0x113   : > { %2177 = vmatmul.msk.f32.gmra.mxu0 %vm1562_vm3, %v1508_v31  ;;  %v1471_v31 = vmax.f32 %v3677_v16, %v3680_v46  ;;  %2061 = vst.msk [vmem:[%s3362_s6 + $0x108] sm:$0xff] %vm1562_vm3, %v1997_v8 }
 0x114   : > { %2210 = vmatmul.msk.f32.gmra.mxu2 %vm1562_vm3, %v1541_v37  ;;  %v1504_v37 = vmax.f32 %v3679_v7, %v3681_v10  ;;  %2076 = vst.msk [vmem:[%s3362_s6 + $0x180] sm:$0xff] %vm1562_vm3, %v2012_v2 }
 0x115   : > { %2226 = vmatmul.msk.f32.gmra.mxu3 %vm1562_vm3, %v1501_v15  ;;  %v1527_v15 = vmax.f32 %v1471_v31, %v3669_v21 }
 0x117   : > { %v1919_v58 = vpop.f32.mrf.mxu3 }
 0x119   : > { %2193 = vmatmul.msk.f32.gmra.mxu1 %vm1562_vm3, %v1524_v3  ;;  %v3682_v3 = vld [vmem:[#allocation24_spill] sm:$0xff] }
 0x11a   : > { %v1472_v0 = vmax.f32 %v3682_v3, %v3684_v45 }
 0x11b   : > { %2178 = vmatmul.msk.f32.gmra.mxu0 %vm1562_vm3, %v1509_v25  ;;  %v3683_v25 = vld [vmem:[#allocation23_spill] sm:$0xff] }
 0x11c   : > { %2211 = vmatmul.msk.f32.gmra.mxu2 %vm1562_vm3, %v1542_v63  ;;  %v1512_v14 = vmax.f32 %v3683_v25, %v3682_v3  ;;  %v1820_v63 = vpop.f32.mrf.mxu1  ;;  %v1528_v21 = vmax.f32 %v1472_v0, %v3676_v51 }
 0x11d   : > { %2227 = vmatmul.msk.f32.gmra.mxu3 %vm1562_vm3, %v1502_v19  ;;  %v1773_v19 = vadd.f32 %v3351_v50, %v1772_v18  ;;  %v1821_v47 = vadd.f32 %v3351_v50, %v1820_v63 }
 0x11f   : > { %v1964_v28 = vmax.f32 %v1773_v19, 0.0  ;;  %v1922_v38 = vpop.f32.mrf.mxu3 }
 0x121   : > { %2194 = vmatmul.msk.f32.gmra.mxu1 %vm1562_vm3, %v1525_v34  ;;  %v1980_v34 = vmax.f32 %v1821_v47, 0.0  ;;  %2028 = vst.msk [vmem:[%s3362_s6] sm:$0xff] %vm1562_vm3, %v1964_v28 }
 0x123   : > { %2179 = vmatmul.msk.f32.gmra.mxu0 %vm1562_vm3, %v1510_v22  ;;  %2044 = vst.msk [vmem:[%s3362_s6 + $0x80] sm:$0xff] %vm1562_vm3, %v1980_v34 }
 0x124   : > { %2212 = vmatmul.msk.f32.gmra.mxu2 %vm1562_vm3, %v1543_v12  ;;  %v1823_v5 = vpop.f32.mrf.mxu1 }
 0x125   : > { %2228 = vmatmul.msk.f32.gmra.mxu3 %vm1562_vm3, %v1503_v42  ;;  %v1824_v12 = vadd.f32 %v3351_v50, %v1823_v5  ;;  %v1920_v42 = vadd.f32 %v3351_v50, %v1919_v58 }
 0x127   : > { %v1981_v39 = vmax.f32 %v1824_v12, 0.0 }
 0x129   : > { %2195 = vmatmul.msk.f32.gmra.mxu1 %vm1562_vm3, %v1526_v61  ;;  %2045 = vst.msk [vmem:[%s3362_s6 + $0x88] sm:$0xff] %vm1562_vm3, %v1981_v39 }
 0x12b   : > { %2180 = vmatmul.msk.f32.gmra.mxu0 %vm1562_vm3, %v1511_v54 }
 0x12c   : > { %2213 = vmatmul.msk.f32.gmra.mxu2 %vm1562_vm3, %v1544_v53  ;;  %v1826_v30 = vpop.f32.mrf.mxu1 }
 0x12d   : > { %2229 = vmatmul.msk.f32.gmra.mxu3 %vm1562_vm3, %v1504_v37  ;;  %v1925_v62 = vpop.f32.mrf.mxu3 }
 0x12e   : > { %v1926_v31 = vadd.f32 %v3351_v50, %v1925_v62 }
 0x131   : > { %2196 = vmatmul.msk.f32.gmra.mxu1 %vm1562_vm3, %v1527_v15 }
 0x133   : > { %2181 = vmatmul.msk.f32.gmra.mxu0 %vm1562_vm3, %v1512_v14 }
 0x134   : > { %2214 = vmatmul.msk.f32.gmra.mxu2 %vm1562_vm3, %v1545_v17  ;;  %v3685_v17 = vld [vmem:[#allocation25_spill] sm:$0xff]  ;;  %v1829_v56 = vpop.f32.mrf.mxu1 }
 0x135   : > { %2230 = vmatmul.msk.f32.gmra.mxu3 %vm1562_vm3, %v1505_v59  ;;  %v1473_v22 = vmax.f32 %v3124_v20, %v3685_v17  ;;  %v1776_v59 = vadd.f32 %v3351_v50, %v1775_v6  ;;  %v2013_v20 = vmax.f32 %v1920_v42, 0.0  ;;  %v1830_v53 = vadd.f32 %v3351_v50, %v1829_v56 }
 0x137   : > { %v1965_v55 = vmax.f32 %v1776_v59, 0.0  ;;  %v1529_v51 = vmax.f32 %v1473_v22, %v3048_v57  ;;  %2077 = vst.msk [vmem:[%s3362_s6 + $0x188] sm:$0xff] %vm1562_vm3, %v2013_v20  ;;  %v1778_v57 = vpop.f32.mrf.mxu0  ;;  %v1983_v10 = vmax.f32 %v1830_v53, 0.0 }
 0x138   : > { %v1779_v29 = vadd.f32 %v3351_v50, %v1778_v57 }
 0x139   : > { %2197 = vmatmul.msk.f32.gmra.mxu1 %vm1562_vm3, %v1528_v21  ;;  %2029 = vst.msk [vmem:[%s3362_s6 + $0x8] sm:$0xff] %vm1562_vm3, %v1965_v55 }
 0x13a   : > { %v1966_v61 = vmax.f32 %v1779_v29, 0.0  ;;  %2047 = vst.msk [vmem:[%s3362_s6 + $0x98] sm:$0xff] %vm1562_vm3, %v1983_v10 }
 0x13b   : > { %2182 = vmatmul.msk.f32.gmra.mxu0 %vm1562_vm3, %v1513_v13  ;;  %v1827_v13 = vadd.f32 %v3351_v50, %v1826_v30 }
 0x13c   : > { %2215 = vmatmul.msk.f32.gmra.mxu2 %vm1562_vm3, %v1546_v32  ;;  %v1874_v32 = vpop.f32.mrf.mxu2  ;;  %2030 = vst.msk [vmem:[%s3362_s6 + $0x10] sm:$0xff] %vm1562_vm3, %v1966_v61 }
 0x13d   : > { %2231 = vmatmul.msk.f32.gmra.mxu3 %vm1562_vm3, %v1506_v27  ;;  %v1875_v48 = vadd.f32 %v3351_v50, %v1874_v32  ;;  %v1923_v27 = vadd.f32 %v3351_v50, %v1922_v38  ;;  %v1982_v16 = vmax.f32 %v1827_v13, 0.0 }
 0x13f   : > { %v1998_v4 = vmax.f32 %v1875_v48, 0.0  ;;  %v2014_v54 = vmax.f32 %v1923_v27, 0.0  ;;  %2046 = vst.msk [vmem:[%s3362_s6 + $0x90] sm:$0xff] %vm1562_vm3, %v1982_v16  ;;  %v1781_v60 = vpop.f32.mrf.mxu0 }
 0x140   : > { %v1782_v7 = vadd.f32 %v3351_v50, %v1781_v60 }
 0x141   : > { %2198 = vmatmul.msk.f32.gmra.mxu1 %vm1562_vm3, %v1529_v51  ;;  %2062 = vst.msk [vmem:[%s3362_s6 + $0x110] sm:$0xff] %vm1562_vm3, %v1998_v4 }
 0x142   : > { %2078 = vst.msk [vmem:[%s3362_s6 + $0x190] sm:$0xff] %vm1562_vm3, %v2014_v54 }
 0x143   : > { %2183 = vmatmul.msk.f32.gmra.mxu0 %vm1562_vm3, %v1514_v1 }
 0x144   : > { %2216 = vmatmul.msk.f32.gmra.mxu2 %vm1562_vm3, %v3328_v26  ;;  %v1877_v23 = vpop.f32.mrf.mxu2  ;;  %v2015_v26 = vmax.f32 %v1926_v31, 0.0 }
 0x145   : > { %2232 = vmatmul.msk.f32.gmra.mxu3 %vm1562_vm3, %v1507_v9  ;;  %v1878_v46 = vadd.f32 %v3351_v50, %v1877_v23 }
 0x146   : > { %2079 = vst.msk [vmem:[%s3362_s6 + $0x198] sm:$0xff] %vm1562_vm3, %v2015_v26 }
 0x147   : > { %v1999_v37 = vmax.f32 %v1878_v46, 0.0 }
 0x149   : > { %2199 = vmatmul.msk.f32.gmra.mxu1 %vm1562_vm3, %v3315_v11  ;;  %v1967_v11 = vmax.f32 %v1782_v7, 0.0  ;;  %2063 = vst.msk [vmem:[%s3362_s6 + $0x118] sm:$0xff] %vm1562_vm3, %v1999_v37  ;;  %v1784_v9 = vpop.f32.mrf.mxu0  ;;  %v1928_v14 = vpop.f32.mrf.mxu3 }
 0x14a   : > { %v1785_v15 = vadd.f32 %v3351_v50, %v1784_v9  ;;  %v1929_v0 = vadd.f32 %v3351_v50, %v1928_v14 }
 0x14b   : > { %2184 = vmatmul.msk.f32.gmra.mxu0 %vm1562_vm3, %v1515_v24  ;;  %2031 = vst.msk [vmem:[%s3362_s6 + $0x18] sm:$0xff] %vm1562_vm3, %v1967_v11 }
 0x14c   : > { %v1880_v25 = vpop.f32.mrf.mxu2  ;;  %v1968_v18 = vmax.f32 %v1785_v15, 0.0  ;;  %v2016_v52 = vmax.f32 %v1929_v0, 0.0 }
 0x14d   : > { %v1881_v45 = vadd.f32 %v3351_v50, %v1880_v25 }
 0x14e   : > { %2032 = vst.msk [vmem:[%s3362_s6 + $0x20] sm:$0xff] %vm1562_vm3, %v1968_v18 }
 0x14f   : > { %2080 = vst.msk [vmem:[%s3362_s6 + $0x1a0] sm:$0xff] %vm1562_vm3, %v2016_v52 }
 0x150   : > { %v1832_v49 = vpop.f32.mrf.mxu1 }
 0x151   : > { %2200 = vmatmul.msk.f32.gmra.mxu1 %vm1562_vm3, %v3340_v36  ;;  %v1833_v3 = vadd.f32 %v3351_v50, %v1832_v49  ;;  %v2000_v36 = vmax.f32 %v1881_v45, 0.0 }
 0x153   : > { %v1984_v63 = vmax.f32 %v1833_v3, 0.0  ;;  %2064 = vst.msk [vmem:[%s3362_s6 + $0x120] sm:$0xff] %vm1562_vm3, %v2000_v36 }
 0x155   : > { %2048 = vst.msk [vmem:[%s3362_s6 + $0xa0] sm:$0xff] %vm1562_vm3, %v1984_v63 }
 0x15c   : > { %v1883_v43 = vpop.f32.mrf.mxu2 }
 0x15d   : > { %v1884_v19 = vadd.f32 %v3351_v50, %v1883_v43 }
 0x15f   : > { %v2001_v47 = vmax.f32 %v1884_v19, 0.0 }
 0x161   : > { %2065 = vst.msk [vmem:[%s3362_s6 + $0x128] sm:$0xff] %vm1562_vm3, %v2001_v47 }
 0x163   : > { %v1931_v44 = vpop.f32.mrf.mxu3 }
 0x164   : > { %v1787_v35 = vpop.f32.mrf.mxu0  ;;  %v1932_v21 = vadd.f32 %v3351_v50, %v1931_v44 }
 0x165   : > { %v1788_v28 = vadd.f32 %v3351_v50, %v1787_v35 }
 0x166   : > { %v2017_v34 = vmax.f32 %v1932_v21, 0.0 }
 0x167   : > { %v1969_v33 = vmax.f32 %v1788_v28, 0.0 }
 0x168   : > { %2081 = vst.msk [vmem:[%s3362_s6 + $0x1a8] sm:$0xff] %vm1562_vm3, %v2017_v34 }
 0x169   : > { %2033 = vst.msk [vmem:[%s3362_s6 + $0x28] sm:$0xff] %vm1562_vm3, %v1969_v33 }
 0x16a   : > { %v1835_v2 = vpop.f32.mrf.mxu1 }
 0x16b   : > { %v1836_v17 = vadd.f32 %v3351_v50, %v1835_v2 }
 0x16d   : > { %v1985_v22 = vmax.f32 %v1836_v17, 0.0 }
 0x16f   : > { %2049 = vst.msk [vmem:[%s3362_s6 + $0xa8] sm:$0xff] %vm1562_vm3, %v1985_v22 }
 0x178   : > { %v1886_v6 = vpop.f32.mrf.mxu2 }
 0x179   : > { %v1887_v5 = vadd.f32 %v3351_v50, %v1886_v6 }
 0x17b   : > { %v2002_v59 = vmax.f32 %v1887_v5, 0.0 }
 0x17d   : > { %2066 = vst.msk [vmem:[%s3362_s6 + $0x130] sm:$0xff] %vm1562_vm3, %v2002_v59 }
 0x180   : > { %v1790_v12 = vpop.f32.mrf.mxu0  ;;  %v1934_v41 = vpop.f32.mrf.mxu3 }
 0x181   : > { %v1791_v58 = vadd.f32 %v3351_v50, %v1790_v12  ;;  %v1935_v40 = vadd.f32 %v3351_v50, %v1934_v41 }
 0x183   : > { %v1970_v42 = vmax.f32 %v1791_v58, 0.0  ;;  %v2018_v55 = vmax.f32 %v1935_v40, 0.0 }
 0x185   : > { %2034 = vst.msk [vmem:[%s3362_s6 + $0x30] sm:$0xff] %vm1562_vm3, %v1970_v42 }
 0x186   : > { %v1838_v39 = vpop.f32.mrf.mxu1  ;;  %2082 = vst.msk [vmem:[%s3362_s6 + $0x1b0] sm:$0xff] %vm1562_vm3, %v2018_v55 }
 0x187   : > { %v1839_v51 = vadd.f32 %v3351_v50, %v1838_v39  ;;  %v1889_v8 = vpop.f32.mrf.mxu2 }
 0x188   : > { %v1793_v20 = vpop.f32.mrf.mxu0  ;;  %v1890_v1 = vadd.f32 %v3351_v50, %v1889_v8  ;;  %v1937_v57 = vpop.f32.mrf.mxu3 }
 0x189   : > { %v1986_v30 = vmax.f32 %v1839_v51, 0.0  ;;  %v1794_v29 = vadd.f32 %v3351_v50, %v1793_v20  ;;  %v1938_v13 = vadd.f32 %v3351_v50, %v1937_v57 }
 0x18a   : > { %v2003_v32 = vmax.f32 %v1890_v1, 0.0 }
 0x18b   : > { %2050 = vst.msk [vmem:[%s3362_s6 + $0xb0] sm:$0xff] %vm1562_vm3, %v1986_v30  ;;  %v1971_v38 = vmax.f32 %v1794_v29, 0.0  ;;  %v2019_v48 = vmax.f32 %v1938_v13, 0.0 }
 0x18c   : > { %2067 = vst.msk [vmem:[%s3362_s6 + $0x138] sm:$0xff] %vm1562_vm3, %v2003_v32 }
 0x18d   : > { %2035 = vst.msk [vmem:[%s3362_s6 + $0x38] sm:$0xff] %vm1562_vm3, %v1971_v38 }
 0x18e   : > { %v1841_v27 = vpop.f32.mrf.mxu1  ;;  %2083 = vst.msk [vmem:[%s3362_s6 + $0x1b8] sm:$0xff] %vm1562_vm3, %v2019_v48 }
 0x18f   : > { %v1842_v61 = vadd.f32 %v3351_v50, %v1841_v27  ;;  %v1892_v16 = vpop.f32.mrf.mxu2 }
 0x190   : > { %v1796_v4 = vpop.f32.mrf.mxu0  ;;  %v1893_v54 = vadd.f32 %v3351_v50, %v1892_v16  ;;  %v1940_v24 = vpop.f32.mrf.mxu3 }
 0x191   : > { %v1987_v60 = vmax.f32 %v1842_v61, 0.0  ;;  %v1797_v56 = vadd.f32 %v3351_v50, %v1796_v4  ;;  %v1941_v7 = vadd.f32 %v3351_v50, %v1940_v24 }
 0x192   : > { %v2004_v53 = vmax.f32 %v1893_v54, 0.0 }
 0x193   : > { %2051 = vst.msk [vmem:[%s3362_s6 + $0xb8] sm:$0xff] %vm1562_vm3, %v1987_v60  ;;  %v1972_v23 = vmax.f32 %v1797_v56, 0.0  ;;  %v2020_v62 = vmax.f32 %v1941_v7, 0.0 }
 0x194   : > { %2068 = vst.msk [vmem:[%s3362_s6 + $0x140] sm:$0xff] %vm1562_vm3, %v2004_v53 }
 0x195   : > { %2036 = vst.msk [vmem:[%s3362_s6 + $0x40] sm:$0xff] %vm1562_vm3, %v1972_v23 }
 0x196   : > { %v1844_v46 = vpop.f32.mrf.mxu1  ;;  %2084 = vst.msk [vmem:[%s3362_s6 + $0x1c0] sm:$0xff] %vm1562_vm3, %v2020_v62 }
 0x197   : > { %v1845_v31 = vadd.f32 %v3351_v50, %v1844_v46  ;;  %v1895_v11 = vpop.f32.mrf.mxu2 }
 0x198   : > { %v1799_v10 = vpop.f32.mrf.mxu0  ;;  %v1896_v37 = vadd.f32 %v3351_v50, %v1895_v11  ;;  %v1943_v26 = vpop.f32.mrf.mxu3 }
 0x199   : > { %v1988_v9 = vmax.f32 %v1845_v31, 0.0  ;;  %v1800_v49 = vadd.f32 %v3351_v50, %v1799_v10  ;;  %v1944_v15 = vadd.f32 %v3351_v50, %v1943_v26 }
 0x19a   : > { %v2005_v3 = vmax.f32 %v1896_v37, 0.0 }
 0x19b   : > { %2052 = vst.msk [vmem:[%s3362_s6 + $0xc0] sm:$0xff] %vm1562_vm3, %v1988_v9  ;;  %v1973_v25 = vmax.f32 %v1800_v49, 0.0  ;;  %v2021_v14 = vmax.f32 %v1944_v15, 0.0 }
 0x19c   : > { %2069 = vst.msk [vmem:[%s3362_s6 + $0x148] sm:$0xff] %vm1562_vm3, %v2005_v3 }
 0x19d   : > { %2037 = vst.msk [vmem:[%s3362_s6 + $0x48] sm:$0xff] %vm1562_vm3, %v1973_v25 }
 0x19e   : > { %v1847_v45 = vpop.f32.mrf.mxu1  ;;  %2085 = vst.msk [vmem:[%s3362_s6 + $0x1c8] sm:$0xff] %vm1562_vm3, %v2021_v14 }
 0x19f   : > { %v1848_v0 = vadd.f32 %v3351_v50, %v1847_v45  ;;  %v1898_v18 = vpop.f32.mrf.mxu2 }
 0x1a0   : > { %v1802_v63 = vpop.f32.mrf.mxu0  ;;  %v1899_v36 = vadd.f32 %v3351_v50, %v1898_v18  ;;  %v1946_v52 = vpop.f32.mrf.mxu3 }
 0x1a1   : > { %v1989_v43 = vmax.f32 %v1848_v0, 0.0  ;;  %v1803_v19 = vadd.f32 %v3351_v50, %v1802_v63  ;;  %v1947_v47 = vadd.f32 %v3351_v50, %v1946_v52 }
 0x1a2   : > { %v2006_v44 = vmax.f32 %v1899_v36, 0.0 }
 0x1a3   : > { %2053 = vst.msk [vmem:[%s3362_s6 + $0xc8] sm:$0xff] %vm1562_vm3, %v1989_v43  ;;  %v1974_v35 = vmax.f32 %v1803_v19, 0.0  ;;  %v2022_v21 = vmax.f32 %v1947_v47, 0.0 }
 0x1a4   : > { %2070 = vst.msk [vmem:[%s3362_s6 + $0x150] sm:$0xff] %vm1562_vm3, %v2006_v44 }
 0x1a5   : > { %2038 = vst.msk [vmem:[%s3362_s6 + $0x50] sm:$0xff] %vm1562_vm3, %v1974_v35 }
 0x1a6   : > { %v1850_v28 = vpop.f32.mrf.mxu1  ;;  %2086 = vst.msk [vmem:[%s3362_s6 + $0x1d0] sm:$0xff] %vm1562_vm3, %v2022_v21 }
 0x1a7   : > { %v1851_v34 = vadd.f32 %v3351_v50, %v1850_v28  ;;  %v1901_v33 = vpop.f32.mrf.mxu2 }
 0x1a8   : > { %v1805_v2 = vpop.f32.mrf.mxu0  ;;  %v1902_v17 = vadd.f32 %v3351_v50, %v1901_v33  ;;  %v1949_v22 = vpop.f32.mrf.mxu3 }
 0x1a9   : > { %v1990_v6 = vmax.f32 %v1851_v34, 0.0  ;;  %v1806_v5 = vadd.f32 %v3351_v50, %v1805_v2  ;;  %v1950_v59 = vadd.f32 %v3351_v50, %v1949_v22 }
 0x1aa   : > { %v2007_v12 = vmax.f32 %v1902_v17, 0.0 }
 0x1ab   : > { %2054 = vst.msk [vmem:[%s3362_s6 + $0xd0] sm:$0xff] %vm1562_vm3, %v1990_v6  ;;  %v1975_v41 = vmax.f32 %v1806_v5, 0.0  ;;  %v2023_v58 = vmax.f32 %v1950_v59, 0.0 }
 0x1ac   : > { %2071 = vst.msk [vmem:[%s3362_s6 + $0x158] sm:$0xff] %vm1562_vm3, %v2007_v12 }
 0x1ad   : > { %2039 = vst.msk [vmem:[%s3362_s6 + $0x58] sm:$0xff] %vm1562_vm3, %v1975_v41 }
 0x1ae   : > { %v1853_v40 = vpop.f32.mrf.mxu1  ;;  %2087 = vst.msk [vmem:[%s3362_s6 + $0x1d8] sm:$0xff] %vm1562_vm3, %v2023_v58 }
 0x1af   : > { %v1854_v42 = vadd.f32 %v3351_v50, %v1853_v40  ;;  %v1904_v55 = vpop.f32.mrf.mxu2 }
 0x1b0   : > { %v1808_v39 = vpop.f32.mrf.mxu0  ;;  %v1905_v51 = vadd.f32 %v3351_v50, %v1904_v55  ;;  %v1952_v8 = vpop.f32.mrf.mxu3 }
 0x1b1   : > { %v1991_v20 = vmax.f32 %v1854_v42, 0.0  ;;  %v1809_v1 = vadd.f32 %v3351_v50, %v1808_v39  ;;  %v1953_v57 = vadd.f32 %v3351_v50, %v1952_v8 }
 0x1b2   : > { %v2008_v30 = vmax.f32 %v1905_v51, 0.0 }
 0x1b3   : > { %2055 = vst.msk [vmem:[%s3362_s6 + $0xd8] sm:$0xff] %vm1562_vm3, %v1991_v20  ;;  %v1976_v29 = vmax.f32 %v1809_v1, 0.0  ;;  %v2024_v13 = vmax.f32 %v1953_v57, 0.0 }
 0x1b4   : > { %2072 = vst.msk [vmem:[%s3362_s6 + $0x160] sm:$0xff] %vm1562_vm3, %v2008_v30 }
 0x1b5   : > { %2040 = vst.msk [vmem:[%s3362_s6 + $0x60] sm:$0xff] %vm1562_vm3, %v1976_v29 }
 0x1b6   : > { %v1856_v32 = vpop.f32.mrf.mxu1  ;;  %2088 = vst.msk [vmem:[%s3362_s6 + $0x1e0] sm:$0xff] %vm1562_vm3, %v2024_v13 }
 0x1b7   : > { %v1857_v38 = vadd.f32 %v3351_v50, %v1856_v32  ;;  %v1907_v48 = vpop.f32.mrf.mxu2 }
 0x1b8   : > { %v1811_v27 = vpop.f32.mrf.mxu0  ;;  %v1908_v61 = vadd.f32 %v3351_v50, %v1907_v48  ;;  %v1955_v16 = vpop.f32.mrf.mxu3 }
 0x1b9   : > { %v1992_v4 = vmax.f32 %v1857_v38, 0.0  ;;  %v1812_v54 = vadd.f32 %v3351_v50, %v1811_v27  ;;  %v1956_v24 = vadd.f32 %v3351_v50, %v1955_v16 }
 0x1ba   : > { %v2009_v60 = vmax.f32 %v1908_v61, 0.0 }
 0x1bb   : > { %2056 = vst.msk [vmem:[%s3362_s6 + $0xe0] sm:$0xff] %vm1562_vm3, %v1992_v4  ;;  %v1977_v56 = vmax.f32 %v1812_v54, 0.0  ;;  %v2025_v7 = vmax.f32 %v1956_v24, 0.0 }
 0x1bc   : > { %2073 = vst.msk [vmem:[%s3362_s6 + $0x168] sm:$0xff] %vm1562_vm3, %v2009_v60 }
 0x1bd   : > { %2041 = vst.msk [vmem:[%s3362_s6 + $0x68] sm:$0xff] %vm1562_vm3, %v1977_v56 }
 0x1be   : > { %v1859_v53 = vpop.f32.mrf.mxu1  ;;  %2089 = vst.msk [vmem:[%s3362_s6 + $0x1e8] sm:$0xff] %vm1562_vm3, %v2025_v7 }
 0x1bf   : > { %v1860_v23 = vadd.f32 %v3351_v50, %v1859_v53  ;;  %v1910_v62 = vpop.f32.mrf.mxu2 }
 0x1c0   : > { %v1814_v46 = vpop.f32.mrf.mxu0  ;;  %v1911_v31 = vadd.f32 %v3351_v50, %v1910_v62  ;;  %v1958_v11 = vpop.f32.mrf.mxu3 }
 0x1c1   : > { %v1993_v10 = vmax.f32 %v1860_v23, 0.0  ;;  %v1815_v37 = vadd.f32 %v3351_v50, %v1814_v46  ;;  %v1959_v26 = vadd.f32 %v3351_v50, %v1958_v11 }
 0x1c2   : > { %v2010_v9 = vmax.f32 %v1911_v31, 0.0 }
 0x1c3   : > { %2057 = vst.msk [vmem:[%s3362_s6 + $0xe8] sm:$0xff] %vm1562_vm3, %v1993_v10  ;;  %v1978_v49 = vmax.f32 %v1815_v37, 0.0  ;;  %v2026_v15 = vmax.f32 %v1959_v26, 0.0 }
 0x1c4   : > { %2074 = vst.msk [vmem:[%s3362_s6 + $0x170] sm:$0xff] %vm1562_vm3, %v2010_v9 }
 0x1c5   : > { %2042 = vst.msk [vmem:[%s3362_s6 + $0x70] sm:$0xff] %vm1562_vm3, %v1978_v49 }
 0x1c6   : > { %v1862_v3 = vpop.f32.mrf.mxu1  ;;  %2090 = vst.msk [vmem:[%s3362_s6 + $0x1f0] sm:$0xff] %vm1562_vm3, %v2026_v15 }
 0x1c7   : > { %v1863_v25 = vadd.f32 %v3351_v50, %v1862_v3  ;;  %v1913_v14 = vpop.f32.mrf.mxu2 }
 0x1c8   : > { %v1817_v45 = vpop.f32.mrf.mxu0  ;;  %v1914_v0 = vadd.f32 %v3351_v50, %v1913_v14  ;;  %v1961_v18 = vpop.f32.mrf.mxu3 }
 0x1c9   : > { %v1994_v63 = vmax.f32 %v1863_v25, 0.0  ;;  %v1818_v36 = vadd.f32 %v3351_v50, %v1817_v45  ;;  %v1962_v52 = vadd.f32 %v3351_v50, %v1961_v18 }
 0x1ca   : > { %v2011_v43 = vmax.f32 %v1914_v0, 0.0 }
 0x1cb   : > { %2058 = vst.msk [vmem:[%s3362_s6 + $0xf0] sm:$0xff] %vm1562_vm3, %v1994_v63  ;;  %v1979_v19 = vmax.f32 %v1818_v36, 0.0  ;;  %v2027_v47 = vmax.f32 %v1962_v52, 0.0 }
 0x1cc   : > { %2075 = vst.msk [vmem:[%s3362_s6 + $0x178] sm:$0xff] %vm1562_vm3, %v2011_v43 }
 0x1cd   : > { %2043 = vst.msk [vmem:[%s3362_s6 + $0x78] sm:$0xff] %vm1562_vm3, %v1979_v19 }
 0x1ce   : > { %v1865_v44 = vpop.f32.mrf.mxu1  ;;  %2091 = vst.msk [vmem:[%s3362_s6 + $0x1f8] sm:$0xff] %vm1562_vm3, %v2027_v47 }
 0x1cf   : > { %v1866_v35 = vadd.f32 %v3351_v50, %v1865_v44 }
 0x1d1   : > { %v1995_v21 = vmax.f32 %v1866_v35, 0.0 }
 0x1d3   : > { %2059 = vst.msk [vmem:[%s3362_s6 + $0xf8] sm:$0xff] %vm1562_vm3, %v1995_v21 }
 0x1d4 PF: > { %p13_p7 = scmp.ge.s32.totalorder %s2395_s17, 4   ;;  %s3686_s12 = smov %s2341_s13 }
 0x1d5   : > { %s3687_s13 = smov %s2345_s14  ;;  %s3688_s14 = smov %s2405_s20 }
 0x1d6   : > { %s3689_s15 = smov %s2395_s17  ;;  %15 = sbr.rel (!%p13_p7) target bundleno = 3 (0x3), region = 72 }
 0x1db   :  { %2113 = vsyncpa [#allocation3], 1 }
 0x1dc   :  { %2115 = vsyncpa [#allocation3 + $0x1], 1 }

// kernel: inception_forward.7
= control target key start
LH: loop header
LB: loop body
LE: loop exit
PB: predicated region body
PF: predicated region fallthrough
CT: control target
= control target key end

     0   :  { %s4703_s12 = smov 0   ;;  %s8920_s0 = inlined_call_operand.vmem [shape: f32[2,8,8,8,16], index: 0, kind: input, shape index: {}]   ;;  %s8921_s1 = inlined_call_operand.vmem [shape: f32[432,16], index: 1, kind: input, shape index: {}]   ;;  %s8922_s2 = inlined_call_operand.vmem [shape: f32[1,16], index: 2, kind: input, shape index: {}]   ;;  %s8923_s3 = inlined_call_operand.vmem [shape: f32[2,8,8,8,16], index: 3, kind: output, shape index: {}]  }
   0x1 LB: > { %s4286_s13 = sadd.s32 4294967295, %s4676_s12   ;;  %p4290_p0 = scmp.ge.s32.totalorder %s4676_s12, 1  ;;  %s4676_s12 = sphi %s4703_s12, %s13_s12  }
   0x2   : > { %p137_p1 = scmp.lt.s32.totalorder %s4676_s12, 3 }
   0x4   : > { %p138_p2 = pnand %p4290_p0, %p137_p1 }
   0x6   : > { %141 = sbr.rel (%p138_p2) target bundleno = 1462 (0x5b6), region = 32 }
   0xb   : > { %p161_p3 = scmp.lt.s32.totalorder %s4286_s13, 1  ;;  %vm427_vm0 = vcmask 1040384   ;;  %vm684_vm1 = vcmask 1046528   ;;  %s4678_s18 = smov 16   ;;  %vm1069_vm2 = vcmask 1045504   ;;  %vm1454_vm3 = vcmask 130048  }
   0xc   : > { %s4679_s19 = smov 32   ;;  %vm1519_vm4 = vcmask 261120   ;;  %s4680_s20 = smov 48   ;;  %vm2012_vm5 = vcmask 392192   ;;  %vm2077_vm6 = vcmask 785408   ;;  %vm7312_vm7 = vmneg %vm1454_vm3 }
   0xd   : > { %s9757_s13 = smov (!%p161_p3, %s4286_s13), 1  ;;  %s4681_s6 = smov 96  }
   0xe   : > { %s4377_s14 = sshll.u32 %s9757_s13, 9 }
   0xf   : > { %s4719_s17 = scalar_lea.vmem %s8920_s0, %s4377_s14  ;;  %s7796_s24 = scalar_lea.vmem %s8923_s3, %s4377_s14 }
  0x10   : > { %v175_v0 = vld [vmem:[%s4719_s17 + $0x20] sm:$0xff]  ;;  %v173_v1 = vld [vmem:[%s4719_s17 + $0x10] sm:$0xff]  ;;  %v176_v6 = vld [vmem:[%s4719_s17 + $0x28] sm:$0xff] }
  0x11   : > { %v171_v2 = vld [vmem:[%s4719_s17] sm:$0xff]  ;;  %v303_v3 = vrot.slane %v175_v0, 7  ;;  %v301_v4 = vrot.slane %v173_v1, 7  ;;  %v174_v7 = vld [vmem:[%s4719_s17 + $0x18] sm:$0xff]  ;;  %v172_v8 = vld [vmem:[%s4719_s17 + $0x8] sm:$0xff]  ;;  %v304_v9 = vrot.slane %v176_v6, 7 }
  0x12   : > { %v299_v5 = vrot.slane %v171_v2, 7  ;;  %v302_v10 = vrot.slane %v174_v7, 7  ;;  %v300_v11 = vrot.slane %v172_v8, 7  ;;  %v179_v28 = vld [vmem:[%s4719_s17 + $0x40] sm:$0xff]  ;;  %v178_v33 = vld [vmem:[%s4719_s17 + $0x38] sm:$0xff]  ;;  %v177_v38 = vld [vmem:[%s4719_s17 + $0x30] sm:$0xff] }
  0x13   : > { %v4728_v12 = vsel %vm427_vm0, 0.0, %v303_v3  ;;  %v4731_v13 = vsel %vm427_vm0, %v303_v3, 0.0  ;;  %v4734_v14 = vsel %vm427_vm0, 0.0, %v301_v4  ;;  %v4737_v15 = vsel %vm427_vm0, %v301_v4, 0.0  ;;  %v182_v52 = vld [vmem:[%s4719_s17 + $0x58] sm:$0xff]  ;;  %v181_v53 = vld [vmem:[%s4719_s17 + $0x50] sm:$0xff] }
  0x14   : > { %v697_v16 = vrot.slane %v4728_v12, 1  ;;  %v698_v17 = vrot.slane %v4731_v13, 1  ;;  %v691_v18 = vrot.slane %v4734_v14, 1  ;;  %v692_v19 = vrot.slane %v4737_v15, 1  ;;  %v180_v60 = vld [vmem:[%s4719_s17 + $0x48] sm:$0xff] }
  0x15   : > { %v4744_v20 = vsel %vm427_vm0, 0.0, %v299_v5  ;;  %v4747_v21 = vsel %vm427_vm0, %v299_v5, 0.0  ;;  %v4750_v22 = vsel %vm427_vm0, 0.0, %v304_v9  ;;  %v4753_v23 = vsel %vm427_vm0, %v304_v9, 0.0  ;;  %v185_v9 = vld [vmem:[%s4719_s17 + $0x70] sm:$0xff] }
  0x16   : > { %v699_v24 = vsel %vm684_vm1, %v697_v16, %v698_v17  ;;  %v693_v25 = vsel %vm684_vm1, %v691_v18, %v692_v19  ;;  %v685_v26 = vrot.slane %v4744_v20, 1  ;;  %v686_v27 = vrot.slane %v4747_v21, 1 }
  0x17   : > { %885 = vrot.lane.b32.xlu2 %v699_v24, %s4678_s18  ;;  %881 = vrot.lane.b32.xlu1 %v693_v25, %s4678_s18  ;;  %v700_v29 = vrot.slane %v4750_v22, 1  ;;  %v701_v30 = vrot.slane %v4753_v23, 1  ;;  %v4765_v31 = vsel %vm427_vm0, 0.0, %v302_v10  ;;  %v4768_v32 = vsel %vm427_vm0, %v302_v10, 0.0  ;;  %v184_v10 = vld [vmem:[%s4719_s17 + $0x68] sm:$0xff]  ;;  %v183_v25 = vld [vmem:[%s4719_s17 + $0x60] sm:$0xff] }
  0x18   : > { %v687_v34 = vsel %vm684_vm1, %v685_v26, %v686_v27  ;;  %v694_v35 = vrot.slane %v4765_v31, 1  ;;  %v695_v36 = vrot.slane %v4768_v32, 1  ;;  %v4775_v37 = vsel %vm427_vm0, 0.0, %v300_v11 }
  0x19   : > { %877 = vrot.lane.b32.xlu0 %v687_v34, %s4678_s18  ;;  %v4780_v39 = vsel %vm427_vm0, %v300_v11, 0.0  ;;  %v307_v40 = vrot.slane %v179_v28, 7  ;;  %v688_v41 = vrot.slane %v4775_v37, 1  ;;  %v306_v43 = vrot.slane %v178_v33, 7 }
  0x1a   : > { %v689_v42 = vrot.slane %v4780_v39, 1  ;;  %v305_v44 = vrot.slane %v177_v38, 7  ;;  %v702_v45 = vsel %vm684_vm1, %v700_v29, %v701_v30  ;;  %v696_v46 = vsel %vm684_vm1, %v694_v35, %v695_v36 }
  0x1b   : > { %v4787_v47 = vsel %vm427_vm0, 0.0, %v307_v40  ;;  %v4790_v48 = vsel %vm427_vm0, %v307_v40, 0.0  ;;  %v4793_v49 = vsel %vm427_vm0, 0.0, %v306_v43  ;;  %v4796_v50 = vsel %vm427_vm0, %v306_v43, 0.0  ;;  %v187_v43 = vld [vmem:[%s4719_s17 + $0x80] sm:$0xff] }
  0x1c   : > { %v690_v51 = vsel %vm684_vm1, %v688_v41, %v689_v42  ;;  %v4804_v54 = vsel %vm427_vm0, 0.0, %v305_v44  ;;  %v4807_v55 = vsel %vm427_vm0, %v305_v44, 0.0  ;;  %v709_v56 = vrot.slane %v4787_v47, 1  ;;  %v188_v42 = vld [vmem:[%s4719_s17 + $0x88] sm:$0xff] }
  0x1d   : > { %v710_v57 = vrot.slane %v4790_v48, 1  ;;  %v706_v58 = vrot.slane %v4793_v49, 1  ;;  %v707_v59 = vrot.slane %v4796_v50, 1  ;;  %v310_v61 = vrot.slane %v182_v52, 7 }
  0x1e   : > { %v309_v62 = vrot.slane %v181_v53, 7  ;;  %v703_v63 = vrot.slane %v4804_v54, 1  ;;  %v704_v0 = vrot.slane %v4807_v55, 1  ;;  %v308_v1 = vrot.slane %v180_v60, 7 }
  0x1f   : > { %887 = vrot.lane.b32.xlu2 %v702_v45, %s4678_s18  ;;  %883 = vrot.lane.b32.xlu1 %v696_v46, %s4678_s18  ;;  %v711_v2 = vsel %vm684_vm1, %v709_v56, %v710_v57  ;;  %v708_v3 = vsel %vm684_vm1, %v706_v58, %v707_v59  ;;  %v4820_v4 = vsel %vm427_vm0, 0.0, %v310_v61  ;;  %v4823_v5 = vsel %vm427_vm0, %v310_v61, 0.0  ;;  %v186_v56 = vld [vmem:[%s4719_s17 + $0x78] sm:$0xff] }
  0x20   : > { %v4826_v6 = vsel %vm427_vm0, 0.0, %v309_v62  ;;  %v4829_v7 = vsel %vm427_vm0, %v309_v62, 0.0  ;;  %v705_v8 = vsel %vm684_vm1, %v703_v63, %v704_v0  ;;  %v4837_v11 = vsel %vm427_vm0, 0.0, %v308_v1 }
  0x21   : > { %879 = vrot.lane.b32.xlu0 %v690_v51, %s4678_s18  ;;  %v4840_v16 = vsel %vm427_vm0, %v308_v1, 0.0  ;;  %v718_v17 = vrot.slane %v4820_v4, 1  ;;  %v719_v18 = vrot.slane %v4823_v5, 1  ;;  %v715_v19 = vrot.slane %v4826_v6, 1 }
  0x22   : > { %v716_v24 = vrot.slane %v4829_v7, 1  ;;  %v313_v26 = vrot.slane %v185_v9, 7  ;;  %v312_v27 = vrot.slane %v184_v10, 7  ;;  %v712_v28 = vrot.slane %v4837_v11, 1  ;;  %v191_v9 = vld [vmem:[%s4719_s17 + $0xa0] sm:$0xff]  ;;  %v190_v10 = vld [vmem:[%s4719_s17 + $0x98] sm:$0xff] }
  0x23   : > { %v713_v29 = vrot.slane %v4840_v16, 1  ;;  %v311_v30 = vrot.slane %v183_v25, 7  ;;  %v720_v33 = vsel %vm684_vm1, %v718_v17, %v719_v18  ;;  %v316_v57 = vrot.slane %v188_v42, 7 }
  0x24   : > { %v717_v34 = vsel %vm684_vm1, %v715_v19, %v716_v24  ;;  %v4853_v35 = vsel %vm427_vm0, 0.0, %v313_v26  ;;  %v4856_v36 = vsel %vm427_vm0, %v313_v26, 0.0  ;;  %v4859_v38 = vsel %vm427_vm0, 0.0, %v312_v27 }
  0x25   : > { %v4862_v40 = vsel %vm427_vm0, %v312_v27, 0.0  ;;  %v714_v41 = vsel %vm684_vm1, %v712_v28, %v713_v29  ;;  %v4870_v44 = vsel %vm427_vm0, 0.0, %v311_v30  ;;  %v4873_v45 = vsel %vm427_vm0, %v311_v30, 0.0  ;;  %v189_v27 = vld [vmem:[%s4719_s17 + $0x90] sm:$0xff] }
  0x26   : > { %v727_v46 = vrot.slane %v4853_v35, 1  ;;  %v728_v51 = vrot.slane %v4856_v36, 1  ;;  %v724_v52 = vrot.slane %v4859_v38, 1  ;;  %v725_v53 = vrot.slane %v4862_v40, 1 }
  0x27   : > { %893 = vrot.lane.b32.xlu2 %v711_v2, %s4678_s18  ;;  %891 = vrot.lane.b32.xlu1 %v708_v3, %s4678_s18  ;;  %v315_v58 = vrot.slane %v187_v43, 7  ;;  %v721_v59 = vrot.slane %v4870_v44, 1  ;;  %v722_v60 = vrot.slane %v4873_v45, 1  ;;  %v314_v61 = vrot.slane %v186_v56, 7  ;;  %v194_v56 = vld [vmem:[%s4719_s17 + $0xb8] sm:$0xff] }
  0x28   : > { %v729_v62 = vsel %vm684_vm1, %v727_v46, %v728_v51  ;;  %v726_v63 = vsel %vm684_vm1, %v724_v52, %v725_v53  ;;  %v4886_v0 = vsel %vm427_vm0, 0.0, %v316_v57  ;;  %v4889_v1 = vsel %vm427_vm0, %v316_v57, 0.0  ;;  %v193_v57 = vld [vmem:[%s4719_s17 + $0xb0] sm:$0xff] }
  0x29   : > { %889 = vrot.lane.b32.xlu0 %v705_v8, %s4678_s18  ;;  %v4892_v2 = vsel %vm427_vm0, 0.0, %v315_v58  ;;  %v4895_v3 = vsel %vm427_vm0, %v315_v58, 0.0  ;;  %v723_v8 = vsel %vm684_vm1, %v721_v59, %v722_v60  ;;  %v4903_v17 = vsel %vm427_vm0, 0.0, %v314_v61 }
  0x2a   : > { %v4906_v18 = vsel %vm427_vm0, %v314_v61, 0.0  ;;  %v736_v19 = vrot.slane %v4886_v0, 1  ;;  %v737_v24 = vrot.slane %v4889_v1, 1  ;;  %v733_v25 = vrot.slane %v4892_v2, 1 }
  0x2b   : > { %v734_v26 = vrot.slane %v4895_v3, 1  ;;  %v319_v28 = vrot.slane %v191_v9, 7  ;;  %v318_v29 = vrot.slane %v190_v10, 7  ;;  %v730_v30 = vrot.slane %v4903_v17, 1 }
  0x2c   : > { %v322_v9 = vrot.slane %v194_v56, 7  ;;  %v321_v10 = vrot.slane %v193_v57, 7 }
  0x2d   : > { %v735_v42 = vsel %vm684_vm1, %v733_v25, %v734_v26  ;;  %v4919_v43 = vsel %vm427_vm0, 0.0, %v319_v28  ;;  %v4922_v46 = vsel %vm427_vm0, %v319_v28, 0.0  ;;  %v4925_v51 = vsel %vm427_vm0, 0.0, %v318_v29 }
  0x2e   : > { %9131 = vst [vmem:[#allocation2_spill] sm:$0xff] %v4919_v43  ;;  %v4928_v52 = vsel %vm427_vm0, %v318_v29, 0.0  ;;  %v745_v60 = vrot.slane %v4919_v43, 1  ;;  %v746_v61 = vrot.slane %v4922_v46, 1  ;;  %v4952_v28 = vsel %vm427_vm0, 0.0, %v322_v9 }
  0x2f   : > { %899 = vrot.lane.b32.xlu2 %v720_v33, %s4678_s18  ;;  %897 = vrot.lane.b32.xlu1 %v717_v34, %s4678_s18  ;;  %v731_v33 = vrot.slane %v4906_v18, 1  ;;  %v317_v34 = vrot.slane %v189_v27, 7  ;;  %9132 = vst [vmem:[#allocation3_spill] sm:$0xff] %v4922_v46  ;;  %v4955_v29 = vsel %vm427_vm0, %v322_v9, 0.0  ;;  %v754_v57 = vrot.slane %v4952_v28, 1 }
  0x30   : > { %v747_v26 = vsel %vm684_vm1, %v745_v60, %v746_v61  ;;  %9133 = vst [vmem:[#allocation4_spill] sm:$0xff] %v4952_v28  ;;  %v755_v60 = vrot.slane %v4955_v29, 1  ;;  %v199_v28 = vld [vmem:[%s4719_s17 + $0xe0] sm:$0xff] }
  0x31   : > { %895 = vrot.lane.b32.xlu0 %v714_v41, %s4678_s18  ;;  %v738_v41 = vsel %vm684_vm1, %v736_v19, %v737_v24  ;;  %v732_v53 = vsel %vm684_vm1, %v730_v30, %v731_v33  ;;  %v4936_v58 = vsel %vm427_vm0, 0.0, %v317_v34  ;;  %v4939_v59 = vsel %vm427_vm0, %v317_v34, 0.0  ;;  %9134 = vst [vmem:[#allocation5_spill] sm:$0xff] %v4955_v29 }
  0x32   : > { %v739_v19 = vrot.slane %v4936_v58, 1  ;;  %v740_v24 = vrot.slane %v4939_v59, 1  ;;  %v4958_v30 = vsel %vm427_vm0, 0.0, %v321_v10  ;;  %v4961_v33 = vsel %vm427_vm0, %v321_v10, 0.0 }
  0x33   : > { %9135 = vst [vmem:[#allocation6_spill] sm:$0xff] %v4958_v30  ;;  %v751_v61 = vrot.slane %v4958_v30, 1 }
  0x34   : > { %v741_v34 = vsel %vm684_vm1, %v739_v19, %v740_v24 }
  0x37   : > { %905 = vrot.lane.b32.xlu2 %v729_v62, %s4678_s18  ;;  %903 = vrot.lane.b32.xlu1 %v726_v63, %s4678_s18  ;;  %v742_v62 = vrot.slane %v4925_v51, 1  ;;  %v743_v63 = vrot.slane %v4928_v52, 1 }
  0x39   : > { %901 = vrot.lane.b32.xlu0 %v723_v8, %s4678_s18  ;;  %v192_v8 = vld [vmem:[%s4719_s17 + $0xa8] sm:$0xff]  ;;  %v744_v27 = vsel %vm684_vm1, %v742_v62, %v743_v63  ;;  %v752_v62 = vrot.slane %v4961_v33, 1  ;;  %v195_v63 = vld [vmem:[%s4719_s17 + $0xc0] sm:$0xff] }
  0x3a   : > { %v320_v25 = vrot.slane %v192_v8, 7  ;;  %v323_v24 = vrot.slane %v195_v63, 7  ;;  %v200_v63 = vld [vmem:[%s4719_s17 + $0xe8] sm:$0xff] }
  0x3c   : > { %v4972_v56 = vsel %vm427_vm0, %v320_v25, 0.0 }
  0x3d   : > { %v749_v19 = vrot.slane %v4972_v56, 1 }
  0x3f   : > { %911 = vrot.lane.b32.xlu2 %v738_v41, %s4678_s18  ;;  %909 = vrot.lane.b32.xlu1 %v735_v42, %s4678_s18  ;;  %v197_v41 = vld [vmem:[%s4719_s17 + $0xd0] sm:$0xff]  ;;  %v196_v42 = vld [vmem:[%s4719_s17 + $0xc8] sm:$0xff] }
  0x40   : > { %v325_v8 = vrot.slane %v197_v41, 7  ;;  %v324_v9 = vrot.slane %v196_v42, 7 }
  0x41   : > { %907 = vrot.lane.b32.xlu0 %v732_v53, %s4678_s18  ;;  %v4969_v53 = vsel %vm427_vm0, 0.0, %v320_v25  ;;  %v756_v25 = vsel %vm684_vm1, %v754_v57, %v755_v60  ;;  %v5002_v57 = vsel %vm427_vm0, 0.0, %v323_v24  ;;  %v5005_v60 = vsel %vm427_vm0, %v323_v24, 0.0 }
  0x42   : > { %v748_v10 = vrot.slane %v4969_v53, 1  ;;  %v4988_v29 = vsel %vm427_vm0, %v325_v8, 0.0  ;;  %v4994_v41 = vsel %vm427_vm0, %v324_v9, 0.0  ;;  %9140 = vst [vmem:[#allocation11_spill] sm:$0xff] %v5002_v57  ;;  %v758_v24 = vrot.slane %v5005_v60, 1 }
  0x43   : > { %9137 = vst [vmem:[#allocation8_spill] sm:$0xff] %v4988_v29 }
  0x44   : > { %9139 = vst [vmem:[#allocation10_spill] sm:$0xff] %v4994_v41  ;;  %v750_v42 = vsel %vm684_vm1, %v748_v10, %v749_v19  ;;  %v198_v10 = vld [vmem:[%s4719_s17 + $0xd8] sm:$0xff]  ;;  %v328_v19 = vrot.slane %v200_v63, 7 }
  0x45   : > { %9141 = vst [vmem:[#allocation12_spill] sm:$0xff] %v5005_v60  ;;  %v326_v46 = vrot.slane %v198_v10, 7  ;;  %v203_v10 = vld [vmem:[%s4719_s17 + $0x100] sm:$0xff]  ;;  %v202_v60 = vld [vmem:[%s4719_s17 + $0xf8] sm:$0xff] }
  0x47   : > { %917 = vrot.lane.b32.xlu2 %v747_v26, %s4678_s18  ;;  %915 = vrot.lane.b32.xlu1 %v744_v27, %s4678_s18  ;;  %v753_v26 = vsel %vm684_vm1, %v751_v61, %v752_v62  ;;  %v4985_v27 = vsel %vm427_vm0, 0.0, %v325_v8  ;;  %v764_v62 = vrot.slane %v4988_v29, 1 }
  0x48   : > { %9136 = vst [vmem:[#allocation7_spill] sm:$0xff] %v4985_v27  ;;  %v763_v61 = vrot.slane %v4985_v27, 1 }
  0x49   : > { %913 = vrot.lane.b32.xlu0 %v741_v34, %s4678_s18  ;;  %v4991_v34 = vsel %vm427_vm0, 0.0, %v324_v9  ;;  %v761_v9 = vrot.slane %v4994_v41, 1  ;;  %v5021_v41 = vsel %vm427_vm0, %v328_v19, 0.0 }
  0x4a   : > { %9138 = vst [vmem:[#allocation9_spill] sm:$0xff] %v4991_v34  ;;  %v760_v8 = vrot.slane %v4991_v34, 1  ;;  %v765_v27 = vsel %vm684_vm1, %v763_v61, %v764_v62  ;;  %v5018_v34 = vsel %vm427_vm0, 0.0, %v328_v19  ;;  %v5035_v61 = vsel %vm427_vm0, 0.0, %v326_v46 }
  0x4b   : > { %9142 = vst [vmem:[#allocation13_spill] sm:$0xff] %v5018_v34  ;;  %v5038_v62 = vsel %vm427_vm0, %v326_v46, 0.0 }
  0x4c   : > { %v762_v29 = vsel %vm684_vm1, %v760_v8, %v761_v9  ;;  %9143 = vst [vmem:[#allocation14_spill] sm:$0xff] %v5021_v41  ;;  %v772_v8 = vrot.slane %v5018_v34, 1  ;;  %v773_v9 = vrot.slane %v5021_v41, 1  ;;  %v767_v46 = vrot.slane %v5038_v62, 1 }
  0x4d   : > { %9146 = vst [vmem:[#allocation17_spill] sm:$0xff] %v5035_v61 }
  0x4e   : > { %9147 = vst [vmem:[#allocation18_spill] sm:$0xff] %v5038_v62  ;;  %v774_v34 = vsel %vm684_vm1, %v772_v8, %v773_v9  ;;  %v205_v62 = vld [vmem:[%s4719_s17 + $0x110] sm:$0xff] }
  0x4f   : > { %923 = vrot.lane.b32.xlu2 %v756_v25, %s4678_s18  ;;  %921 = vrot.lane.b32.xlu1 %v753_v26, %s4678_s18  ;;  %v327_v25 = vrot.slane %v199_v28, 7  ;;  %v757_v26 = vrot.slane %v5002_v57, 1 }
  0x51   : > { %919 = vrot.lane.b32.xlu0 %v750_v42, %s4678_s18  ;;  %v5024_v42 = vsel %vm427_vm0, 0.0, %v327_v25  ;;  %v5027_v28 = vsel %vm427_vm0, %v327_v25, 0.0  ;;  %v759_v63 = vsel %vm684_vm1, %v757_v26, %v758_v24  ;;  %v201_v26 = vld [vmem:[%s4719_s17 + $0xf0] sm:$0xff]  ;;  %v766_v24 = vrot.slane %v5035_v61, 1 }
  0x52   : > { %9144 = vst [vmem:[#allocation15_spill] sm:$0xff] %v5024_v42  ;;  %v769_v19 = vrot.slane %v5024_v42, 1  ;;  %v770_v25 = vrot.slane %v5027_v28, 1  ;;  %v329_v57 = vrot.slane %v201_v26, 7  ;;  %v206_v26 = vld [vmem:[%s4719_s17 + $0x118] sm:$0xff] }
  0x53   : > { %9145 = vst [vmem:[#allocation16_spill] sm:$0xff] %v5027_v28 }
  0x54   : > { %v771_v41 = vsel %vm684_vm1, %v769_v19, %v770_v25  ;;  %v5068_v8 = vsel %vm427_vm0, 0.0, %v329_v57  ;;  %v5071_v9 = vsel %vm427_vm0, %v329_v57, 0.0 }
  0x55   : > { %9152 = vst [vmem:[#allocation23_spill] sm:$0xff] %v5068_v8  ;;  %v776_v57 = vrot.slane %v5071_v9, 1 }
  0x56   : > { %9153 = vst [vmem:[#allocation24_spill] sm:$0xff] %v5071_v9  ;;  %v208_v9 = vld [vmem:[%s4719_s17 + $0x128] sm:$0xff] }
  0x57   : > { %929 = vrot.lane.b32.xlu2 %v765_v27, %s4678_s18  ;;  %927 = vrot.lane.b32.xlu1 %v762_v29, %s4678_s18  ;;  %v331_v29 = vrot.slane %v203_v10, 7  ;;  %v330_v27 = vrot.slane %v202_v60, 7  ;;  %v768_v10 = vsel %vm684_vm1, %v766_v24, %v767_v46  ;;  %v204_v24 = vld [vmem:[%s4719_s17 + $0x108] sm:$0xff]  ;;  %v775_v46 = vrot.slane %v5068_v8, 1 }
  0x58   : > { %v332_v61 = vrot.slane %v204_v24, 7  ;;  %v209_v24 = vld [vmem:[%s4719_s17 + $0x130] sm:$0xff] }
  0x59   : > { %925 = vrot.lane.b32.xlu0 %v759_v63, %s4678_s18  ;;  %v5051_v42 = vsel %vm427_vm0, 0.0, %v331_v29  ;;  %v5054_v28 = vsel %vm427_vm0, %v331_v29, 0.0  ;;  %v5057_v63 = vsel %vm427_vm0, 0.0, %v330_v27  ;;  %v5060_v60 = vsel %vm427_vm0, %v330_v27, 0.0 }
  0x5a   : > { %9148 = vst [vmem:[#allocation19_spill] sm:$0xff] %v5051_v42  ;;  %v781_v19 = vrot.slane %v5051_v42, 1  ;;  %v782_v25 = vrot.slane %v5054_v28, 1  ;;  %v778_v29 = vrot.slane %v5057_v63, 1  ;;  %v779_v27 = vrot.slane %v5060_v60, 1 }
  0x5b   : > { %9149 = vst [vmem:[#allocation20_spill] sm:$0xff] %v5054_v28 }
  0x5c   : > { %9150 = vst [vmem:[#allocation21_spill] sm:$0xff] %v5057_v63  ;;  %v783_v42 = vsel %vm684_vm1, %v781_v19, %v782_v25  ;;  %v780_v28 = vsel %vm684_vm1, %v778_v29, %v779_v27  ;;  %v5101_v19 = vsel %vm427_vm0, 0.0, %v332_v61  ;;  %v5104_v25 = vsel %vm427_vm0, %v332_v61, 0.0 }
  0x5d   : > { %9151 = vst [vmem:[#allocation22_spill] sm:$0xff] %v5060_v60  ;;  %v785_v61 = vrot.slane %v5104_v25, 1 }
  0x5e   : > { %9158 = vst [vmem:[#allocation29_spill] sm:$0xff] %v5101_v19 }
  0x5f   : > { %935 = vrot.lane.b32.xlu2 %v774_v34, %s4678_s18  ;;  %933 = vrot.lane.b32.xlu1 %v771_v41, %s4678_s18  ;;  %v334_v34 = vrot.slane %v206_v26, 7  ;;  %v333_v41 = vrot.slane %v205_v62, 7  ;;  %v777_v26 = vsel %vm684_vm1, %v775_v46, %v776_v57  ;;  %9159 = vst [vmem:[#allocation30_spill] sm:$0xff] %v5104_v25  ;;  %v207_v46 = vld [vmem:[%s4719_s17 + $0x120] sm:$0xff]  ;;  %v784_v57 = vrot.slane %v5101_v19, 1 }
  0x60   : > { %v335_v8 = vrot.slane %v207_v46, 7  ;;  %v212_v46 = vld [vmem:[%s4719_s17 + $0x148] sm:$0xff]  ;;  %v211_v25 = vld [vmem:[%s4719_s17 + $0x140] sm:$0xff] }
  0x61   : > { %931 = vrot.lane.b32.xlu0 %v768_v10, %s4678_s18  ;;  %v5084_v63 = vsel %vm427_vm0, 0.0, %v334_v34  ;;  %v5087_v60 = vsel %vm427_vm0, %v334_v34, 0.0  ;;  %v5090_v10 = vsel %vm427_vm0, 0.0, %v333_v41  ;;  %v5093_v62 = vsel %vm427_vm0, %v333_v41, 0.0 }
  0x62   : > { %9154 = vst [vmem:[#allocation25_spill] sm:$0xff] %v5084_v63  ;;  %v790_v29 = vrot.slane %v5084_v63, 1  ;;  %v791_v27 = vrot.slane %v5087_v60, 1  ;;  %v787_v34 = vrot.slane %v5090_v10, 1  ;;  %v788_v41 = vrot.slane %v5093_v62, 1 }
  0x63   : > { %9155 = vst [vmem:[#allocation26_spill] sm:$0xff] %v5087_v60 }
  0x64   : > { %9156 = vst [vmem:[#allocation27_spill] sm:$0xff] %v5090_v10  ;;  %v792_v63 = vsel %vm684_vm1, %v790_v29, %v791_v27  ;;  %v789_v60 = vsel %vm684_vm1, %v787_v34, %v788_v41  ;;  %v5134_v29 = vsel %vm427_vm0, 0.0, %v335_v8  ;;  %v5137_v27 = vsel %vm427_vm0, %v335_v8, 0.0 }
  0x65   : > { %9157 = vst [vmem:[#allocation28_spill] sm:$0xff] %v5093_v62  ;;  %v793_v8 = vrot.slane %v5134_v29, 1  ;;  %v794_v19 = vrot.slane %v5137_v27, 1 }
  0x66   : > { %9164 = vst [vmem:[#allocation35_spill] sm:$0xff] %v5134_v29 }
  0x67   : > { %941 = vrot.lane.b32.xlu2 %v783_v42, %s4678_s18  ;;  %939 = vrot.lane.b32.xlu1 %v780_v28, %s4678_s18  ;;  %v337_v42 = vrot.slane %v209_v24, 7  ;;  %v336_v28 = vrot.slane %v208_v9, 7  ;;  %v786_v24 = vsel %vm684_vm1, %v784_v57, %v785_v61  ;;  %9165 = vst [vmem:[#allocation36_spill] sm:$0xff] %v5137_v27  ;;  %v210_v57 = vld [vmem:[%s4719_s17 + $0x138] sm:$0xff]  ;;  %v339_v61 = vrot.slane %v211_v25, 7 }
  0x69   : > { %937 = vrot.lane.b32.xlu0 %v777_v26, %s4678_s18  ;;  %v5117_v10 = vsel %vm427_vm0, 0.0, %v337_v42  ;;  %v5120_v62 = vsel %vm427_vm0, %v337_v42, 0.0  ;;  %v5123_v26 = vsel %vm427_vm0, 0.0, %v336_v28  ;;  %v5126_v9 = vsel %vm427_vm0, %v336_v28, 0.0 }
  0x6a   : > { %9160 = vst [vmem:[#allocation31_spill] sm:$0xff] %v5117_v10  ;;  %v799_v34 = vrot.slane %v5117_v10, 1  ;;  %v800_v41 = vrot.slane %v5120_v62, 1  ;;  %v796_v42 = vrot.slane %v5123_v26, 1  ;;  %v797_v28 = vrot.slane %v5126_v9, 1 }
  0x6b   : > { %9161 = vst [vmem:[#allocation32_spill] sm:$0xff] %v5120_v62  ;;  %v338_v10 = vrot.slane %v210_v57, 7  ;;  %v5161_v25 = vsel %vm427_vm0, %v339_v61, 0.0  ;;  %v215_v57 = vld [vmem:[%s4719_s17 + $0x160] sm:$0xff] }
  0x6c   : > { %9162 = vst [vmem:[#allocation33_spill] sm:$0xff] %v5123_v26  ;;  %v801_v62 = vsel %vm684_vm1, %v799_v34, %v800_v41  ;;  %v798_v26 = vsel %vm684_vm1, %v796_v42, %v797_v28 }
  0x6d   : > { %9163 = vst [vmem:[#allocation34_spill] sm:$0xff] %v5126_v9  ;;  %v5169_v34 = vsel %vm427_vm0, 0.0, %v338_v10  ;;  %v5172_v41 = vsel %vm427_vm0, %v338_v10, 0.0 }
  0x6e   : > { %9170 = vst [vmem:[#allocation41_spill] sm:$0xff] %v5161_v25  ;;  %v802_v10 = vrot.slane %v5169_v34, 1  ;;  %v803_v27 = vrot.slane %v5172_v41, 1 }
  0x6f   : > { %947 = vrot.lane.b32.xlu2 %v792_v63, %s4678_s18  ;;  %945 = vrot.lane.b32.xlu1 %v789_v60, %s4678_s18  ;;  %v340_v60 = vrot.slane %v212_v46, 7  ;;  %v795_v46 = vsel %vm684_vm1, %v793_v8, %v794_v19  ;;  %9171 = vst [vmem:[#allocation42_spill] sm:$0xff] %v5169_v34  ;;  %v806_v19 = vrot.slane %v5161_v25, 1 }
  0x70   : > { %9172 = vst [vmem:[#allocation43_spill] sm:$0xff] %v5172_v41 }
  0x71   : > { %943 = vrot.lane.b32.xlu0 %v786_v24, %s4678_s18  ;;  %v5145_v63 = vpop.permute.xlu2 %885  ;;  %v5152_v9 = vsel %vm427_vm0, 0.0, %v340_v60  ;;  %v5155_v43 = vsel %vm427_vm0, %v340_v60, 0.0  ;;  %v5158_v24 = vsel %vm427_vm0, 0.0, %v339_v61  ;;  %v213_v61 = vld [vmem:[%s4719_s17 + $0x150] sm:$0xff] }
  0x72   : > { %9166 = vst [vmem:[#allocation37_spill] sm:$0xff] %v5145_v63  ;;  %v214_v63 = vld [vmem:[%s4719_s17 + $0x158] sm:$0xff]  ;;  %v808_v42 = vrot.slane %v5152_v9, 1  ;;  %v809_v28 = vrot.slane %v5155_v43, 1  ;;  %v805_v60 = vrot.slane %v5158_v24, 1 }
  0x73   : > { %9167 = vst [vmem:[#allocation38_spill] sm:$0xff] %v5152_v9  ;;  %v342_v8 = vrot.slane %v214_v63, 7  ;;  %v341_v9 = vrot.slane %v213_v61, 7  ;;  %v218_v61 = vld [vmem:[%s4719_s17 + $0x178] sm:$0xff] }
  0x74   : > { %9168 = vst [vmem:[#allocation39_spill] sm:$0xff] %v5155_v43  ;;  %v810_v43 = vsel %vm684_vm1, %v808_v42, %v809_v28 }
  0x75   : > { %9169 = vst [vmem:[#allocation40_spill] sm:$0xff] %v5158_v24  ;;  %v807_v24 = vsel %vm684_vm1, %v805_v60, %v806_v19  ;;  %v5196_v63 = vsel %vm427_vm0, %v342_v8, 0.0  ;;  %v5204_v42 = vsel %vm427_vm0, 0.0, %v341_v9  ;;  %v5207_v28 = vsel %vm427_vm0, %v341_v9, 0.0 }
  0x76   : > { %9177 = vst [vmem:[#allocation48_spill] sm:$0xff] %v5196_v63  ;;  %v811_v9 = vrot.slane %v5204_v42, 1  ;;  %v812_v41 = vrot.slane %v5207_v28, 1 }
  0x77   : > { %953 = vrot.lane.b32.xlu2 %v801_v62, %s4678_s18  ;;  %951 = vrot.lane.b32.xlu1 %v798_v26, %s4678_s18  ;;  %v343_v26 = vrot.slane %v215_v57, 7  ;;  %v804_v57 = vsel %vm684_vm1, %v802_v10, %v803_v27  ;;  %9178 = vst [vmem:[#allocation49_spill] sm:$0xff] %v5204_v42  ;;  %v815_v27 = vrot.slane %v5196_v63, 1 }
  0x78   : > { %9179 = vst [vmem:[#allocation50_spill] sm:$0xff] %v5207_v28 }
  0x79   : > { %949 = vrot.lane.b32.xlu0 %v795_v46, %s4678_s18  ;;  %v5180_v62 = vpop.permute.xlu2 %887  ;;  %v5187_v25 = vsel %vm427_vm0, 0.0, %v343_v26  ;;  %v5190_v29 = vsel %vm427_vm0, %v343_v26, 0.0  ;;  %v5193_v46 = vsel %vm427_vm0, 0.0, %v342_v8  ;;  %v216_v8 = vld [vmem:[%s4719_s17 + $0x168] sm:$0xff] }
  0x7a   : > { %9173 = vst [vmem:[#allocation44_spill] sm:$0xff] %v5180_v62  ;;  %v217_v62 = vld [vmem:[%s4719_s17 + $0x170] sm:$0xff]  ;;  %v817_v60 = vrot.slane %v5187_v25, 1  ;;  %v818_v19 = vrot.slane %v5190_v29, 1  ;;  %v814_v26 = vrot.slane %v5193_v46, 1 }
  0x7b   : > { %9174 = vst [vmem:[#allocation45_spill] sm:$0xff] %v5187_v25  ;;  %v345_v10 = vrot.slane %v217_v62, 7  ;;  %v344_v25 = vrot.slane %v216_v8, 7  ;;  %v221_v8 = vld [vmem:[%s4719_s17 + $0x190] sm:$0xff] }
  0x7c   : > { %9175 = vst [vmem:[#allocation46_spill] sm:$0xff] %v5190_v29  ;;  %v819_v29 = vsel %vm684_vm1, %v817_v60, %v818_v19 }
  0x7d   : > { %9176 = vst [vmem:[#allocation47_spill] sm:$0xff] %v5193_v46  ;;  %v816_v46 = vsel %vm684_vm1, %v814_v26, %v815_v27  ;;  %v5231_v62 = vsel %vm427_vm0, %v345_v10, 0.0  ;;  %v5239_v60 = vsel %vm427_vm0, 0.0, %v344_v25  ;;  %v5242_v19 = vsel %vm427_vm0, %v344_v25, 0.0 }
  0x7e   : > { %9184 = vst [vmem:[#allocation55_spill] sm:$0xff] %v5231_v62  ;;  %v820_v28 = vrot.slane %v5239_v60, 1 }
  0x7f   : > { %959 = vrot.lane.b32.xlu2 %v810_v43, %s4678_s18  ;;  %957 = vrot.lane.b32.xlu1 %v807_v24, %s4678_s18  ;;  %v346_v24 = vrot.slane %v218_v61, 7  ;;  %v813_v61 = vsel %vm684_vm1, %v811_v9, %v812_v41  ;;  %9185 = vst [vmem:[#allocation56_spill] sm:$0xff] %v5239_v60  ;;  %v824_v41 = vrot.slane %v5231_v62, 1  ;;  %v349_v9 = vrot.slane %v221_v8, 7 }
  0x80   : > { %9186 = vst [vmem:[#allocation57_spill] sm:$0xff] %v5242_v19 }
  0x81   : > { %955 = vrot.lane.b32.xlu0 %v804_v57, %s4678_s18  ;;  %v5215_v43 = vpop.permute.xlu2 %893  ;;  %v5222_v63 = vsel %vm427_vm0, 0.0, %v346_v24  ;;  %v5225_v34 = vsel %vm427_vm0, %v346_v24, 0.0  ;;  %v5228_v57 = vsel %vm427_vm0, 0.0, %v345_v10  ;;  %v219_v10 = vld [vmem:[%s4719_s17 + $0x180] sm:$0xff] }
  0x82   : > { %9180 = vst [vmem:[#allocation51_spill] sm:$0xff] %v5215_v43  ;;  %v220_v43 = vld [vmem:[%s4719_s17 + $0x188] sm:$0xff]  ;;  %v826_v26 = vrot.slane %v5222_v63, 1  ;;  %v827_v27 = vrot.slane %v5225_v34, 1  ;;  %v823_v24 = vrot.slane %v5228_v57, 1 }
  0x83   : > { %9181 = vst [vmem:[#allocation52_spill] sm:$0xff] %v5222_v63  ;;  %v348_v25 = vrot.slane %v220_v43, 7  ;;  %v821_v63 = vrot.slane %v5242_v19, 1 }
  0x84   : > { %9182 = vst [vmem:[#allocation53_spill] sm:$0xff] %v5225_v34  ;;  %v828_v62 = vsel %vm684_vm1, %v826_v26, %v827_v27  ;;  %v825_v42 = vsel %vm684_vm1, %v823_v24, %v824_v41 }
  0x85   : > { %9183 = vst [vmem:[#allocation54_spill] sm:$0xff] %v5228_v57  ;;  %v347_v57 = vrot.slane %v219_v10, 7  ;;  %v5267_v43 = vsel %vm427_vm0, 0.0, %v348_v25  ;;  %v5270_v8 = vsel %vm427_vm0, %v348_v25, 0.0  ;;  %v224_v10 = vld [vmem:[%s4719_s17 + $0x1a8] sm:$0xff] }
  0x86   : > { %9192 = vst [vmem:[#allocation63_spill] sm:$0xff] %v5267_v43  ;;  %v352_v25 = vrot.slane %v224_v10, 7 }
  0x87   : > { %965 = vrot.lane.b32.xlu2 %v819_v29, %s4678_s18  ;;  %963 = vrot.lane.b32.xlu1 %v816_v46, %s4678_s18  ;;  %9193 = vst [vmem:[#allocation64_spill] sm:$0xff] %v5270_v8  ;;  %v5278_v26 = vsel %vm427_vm0, 0.0, %v347_v57  ;;  %v5281_v27 = vsel %vm427_vm0, %v347_v57, 0.0 }
  0x88   : > { %9194 = vst [vmem:[#allocation65_spill] sm:$0xff] %v5278_v26  ;;  %v829_v19 = vrot.slane %v5278_v26, 1 }
  0x89   : > { %961 = vrot.lane.b32.xlu0 %v813_v61, %s4678_s18  ;;  %v5250_v29 = vpop.permute.xlu2 %899  ;;  %v5252_v46 = vpop.permute.xlu1 %881  ;;  %v5261_v61 = vsel %vm427_vm0, 0.0, %v349_v9  ;;  %9195 = vst [vmem:[#allocation66_spill] sm:$0xff] %v5281_v27 }
  0x8a   : > { %9187 = vst [vmem:[#allocation58_spill] sm:$0xff] %v5250_v29  ;;  %v5264_v29 = vsel %vm427_vm0, %v349_v9, 0.0  ;;  %v835_v24 = vrot.slane %v5261_v61, 1  ;;  %v832_v9 = vrot.slane %v5267_v43, 1 }
  0x8b   : > { %9188 = vst [vmem:[#allocation59_spill] sm:$0xff] %v5252_v46  ;;  %v5256_v34 = vpop.permute.xlu0 %877  ;;  %v822_v46 = vsel %vm684_vm1, %v820_v28, %v821_v63  ;;  %v836_v41 = vrot.slane %v5264_v29, 1  ;;  %v833_v63 = vrot.slane %v5270_v8, 1  ;;  %v222_v28 = vld [vmem:[%s4719_s17 + $0x198] sm:$0xff] }
  0x8c   : > { %9189 = vst [vmem:[#allocation60_spill] sm:$0xff] %v5256_v34  ;;  %v223_v34 = vld [vmem:[%s4719_s17 + $0x1a0] sm:$0xff]  ;;  %v350_v43 = vrot.slane %v222_v28, 7 }
  0x8d   : > { %9190 = vst [vmem:[#allocation61_spill] sm:$0xff] %v5261_v61  ;;  %v351_v57 = vrot.slane %v223_v34, 7  ;;  %v830_v61 = vrot.slane %v5281_v27, 1  ;;  %v837_v8 = vsel %vm684_vm1, %v835_v24, %v836_v41  ;;  %v834_v60 = vsel %vm684_vm1, %v832_v9, %v833_v63  ;;  %v227_v28 = vld [vmem:[%s4719_s17 + $0x1c0] sm:$0xff] }
  0x8e   : > { %9191 = vst [vmem:[#allocation62_spill] sm:$0xff] %v5264_v29  ;;  %v5317_v24 = vsel %vm427_vm0, 0.0, %v350_v43  ;;  %v5320_v41 = vsel %vm427_vm0, %v350_v43, 0.0 }
  0x8f   : > { %971 = vrot.lane.b32.xlu2 %v828_v62, %s4678_s18  ;;  %969 = vrot.lane.b32.xlu1 %v825_v42, %s4678_s18  ;;  %v5306_v34 = vsel %vm427_vm0, 0.0, %v351_v57  ;;  %v5309_v10 = vsel %vm427_vm0, %v351_v57, 0.0  ;;  %9203 = vst [vmem:[#allocation74_spill] sm:$0xff] %v5317_v24  ;;  %v355_v57 = vrot.slane %v227_v28, 7  ;;  %v838_v27 = vrot.slane %v5317_v24, 1 }
  0x90   : > { %9201 = vst [vmem:[#allocation72_spill] sm:$0xff] %v5306_v34 }
  0x91   : > { %967 = vrot.lane.b32.xlu0 %v822_v46, %s4678_s18  ;;  %v5289_v62 = vpop.permute.xlu2 %905  ;;  %v5291_v42 = vpop.permute.xlu1 %883  ;;  %v5300_v46 = vsel %vm427_vm0, 0.0, %v352_v25  ;;  %9202 = vst [vmem:[#allocation73_spill] sm:$0xff] %v5309_v10 }
  0x92   : > { %9196 = vst [vmem:[#allocation67_spill] sm:$0xff] %v5289_v62  ;;  %v5303_v62 = vsel %vm427_vm0, %v352_v25, 0.0  ;;  %v844_v9 = vrot.slane %v5300_v46, 1  ;;  %v841_v25 = vrot.slane %v5306_v34, 1 }
  0x93   : > { %9197 = vst [vmem:[#allocation68_spill] sm:$0xff] %v5291_v42  ;;  %v5295_v29 = vpop.permute.xlu0 %879  ;;  %v226_v42 = vld [vmem:[%s4719_s17 + $0x1b8] sm:$0xff]  ;;  %v845_v63 = vrot.slane %v5303_v62, 1 }
  0x94   : > { %9198 = vst [vmem:[#allocation69_spill] sm:$0xff] %v5295_v29  ;;  %v831_v29 = vsel %vm684_vm1, %v829_v19, %v830_v61  ;;  %v842_v19 = vrot.slane %v5309_v10, 1  ;;  %v225_v61 = vld [vmem:[%s4719_s17 + $0x1b0] sm:$0xff]  ;;  %v354_v43 = vrot.slane %v226_v42, 7 }
  0x95   : > { %9199 = vst [vmem:[#allocation70_spill] sm:$0xff] %v5300_v46  ;;  %v839_v46 = vrot.slane %v5320_v41, 1  ;;  %v353_v34 = vrot.slane %v225_v61, 7  ;;  %v846_v10 = vsel %vm684_vm1, %v844_v9, %v845_v63  ;;  %v230_v61 = vld [vmem:[%s4719_s17 + $0x1d8] sm:$0xff] }
  0x96   : > { %9200 = vst [vmem:[#allocation71_spill] sm:$0xff] %v5303_v62  ;;  %v843_v26 = vsel %vm684_vm1, %v841_v25, %v842_v19  ;;  %v5345_v42 = vsel %vm427_vm0, 0.0, %v354_v43  ;;  %v5348_v28 = vsel %vm427_vm0, %v354_v43, 0.0  ;;  %v358_v43 = vrot.slane %v230_v61, 7 }
  0x97   : > { %977 = vrot.lane.b32.xlu2 %v837_v8, %s4678_s18  ;;  %975 = vrot.lane.b32.xlu1 %v834_v60, %s4678_s18  ;;  %9204 = vst [vmem:[#allocation75_spill] sm:$0xff] %v5320_v41  ;;  %v5356_v9 = vsel %vm427_vm0, 0.0, %v353_v34  ;;  %v5359_v63 = vsel %vm427_vm0, %v353_v34, 0.0 }
  0x98   : > { %9210 = vst [vmem:[#allocation81_spill] sm:$0xff] %v5345_v42  ;;  %v847_v41 = vrot.slane %v5356_v9, 1 }
  0x99   : > { %973 = vrot.lane.b32.xlu0 %v831_v29, %s4678_s18  ;;  %v5328_v8 = vpop.permute.xlu2 %911  ;;  %v5330_v60 = vpop.permute.xlu1 %891  ;;  %v5339_v29 = vsel %vm427_vm0, 0.0, %v355_v57  ;;  %9211 = vst [vmem:[#allocation82_spill] sm:$0xff] %v5348_v28 }
  0x9a   : > { %9205 = vst [vmem:[#allocation76_spill] sm:$0xff] %v5328_v8  ;;  %v5342_v8 = vsel %vm427_vm0, %v355_v57, 0.0  ;;  %v853_v25 = vrot.slane %v5339_v29, 1  ;;  %v850_v57 = vrot.slane %v5345_v42, 1 }
  0x9b   : > { %9206 = vst [vmem:[#allocation77_spill] sm:$0xff] %v5330_v60  ;;  %v5334_v62 = vpop.permute.xlu0 %889  ;;  %v840_v60 = vsel %vm684_vm1, %v838_v27, %v839_v46  ;;  %v854_v19 = vrot.slane %v5342_v8, 1  ;;  %v851_v27 = vrot.slane %v5348_v28, 1  ;;  %v228_v46 = vld [vmem:[%s4719_s17 + $0x1c8] sm:$0xff] }
  0x9c   : > { %9207 = vst [vmem:[#allocation78_spill] sm:$0xff] %v5334_v62  ;;  %v229_v62 = vld [vmem:[%s4719_s17 + $0x1d0] sm:$0xff]  ;;  %v356_v42 = vrot.slane %v228_v46, 7 }
  0x9d   : > { %9208 = vst [vmem:[#allocation79_spill] sm:$0xff] %v5339_v29  ;;  %v357_v34 = vrot.slane %v229_v62, 7  ;;  %v848_v29 = vrot.slane %v5359_v63, 1  ;;  %v855_v28 = vsel %vm684_vm1, %v853_v25, %v854_v19  ;;  %v852_v24 = vsel %vm684_vm1, %v850_v57, %v851_v27  ;;  %v233_v46 = vld [vmem:[%s4719_s17 + $0x1f0] sm:$0xff] }
  0x9e   : > { %9209 = vst [vmem:[#allocation80_spill] sm:$0xff] %v5342_v8  ;;  %v5395_v25 = vsel %vm427_vm0, 0.0, %v356_v42  ;;  %v5398_v19 = vsel %vm427_vm0, %v356_v42, 0.0 }
  0x9f   : > { %983 = vrot.lane.b32.xlu2 %v846_v10, %s4678_s18  ;;  %981 = vrot.lane.b32.xlu1 %v843_v26, %s4678_s18  ;;  %9212 = vst [vmem:[#allocation83_spill] sm:$0xff] %v5356_v9  ;;  %v5384_v62 = vsel %vm427_vm0, 0.0, %v357_v34  ;;  %v5387_v61 = vsel %vm427_vm0, %v357_v34, 0.0  ;;  %v361_v34 = vrot.slane %v233_v46, 7  ;;  %v856_v42 = vrot.slane %v5395_v25, 1 }
  0xa0   : > { %9213 = vst [vmem:[#allocation84_spill] sm:$0xff] %v5359_v63  ;;  %v857_v9 = vrot.slane %v5398_v19, 1 }
  0xa1   : > { %979 = vrot.lane.b32.xlu0 %v840_v60, %s4678_s18  ;;  %v5367_v10 = vpop.permute.xlu2 %917  ;;  %v5369_v26 = vpop.permute.xlu1 %897  ;;  %v5378_v60 = vsel %vm427_vm0, 0.0, %v358_v43  ;;  %9219 = vst [vmem:[#allocation90_spill] sm:$0xff] %v5384_v62 }
  0xa2   : > { %9214 = vst [vmem:[#allocation85_spill] sm:$0xff] %v5367_v10  ;;  %v5381_v10 = vsel %vm427_vm0, %v358_v43, 0.0  ;;  %v862_v57 = vrot.slane %v5378_v60, 1  ;;  %v859_v43 = vrot.slane %v5384_v62, 1 }
  0xa3   : > { %9215 = vst [vmem:[#allocation86_spill] sm:$0xff] %v5369_v26  ;;  %v5373_v8 = vpop.permute.xlu0 %895  ;;  %v849_v26 = vsel %vm684_vm1, %v847_v41, %v848_v29  ;;  %v863_v27 = vrot.slane %v5381_v10, 1  ;;  %v860_v41 = vrot.slane %v5387_v61, 1  ;;  %v231_v29 = vld [vmem:[%s4719_s17 + $0x1e0] sm:$0xff] }
  0xa4   : > { %9216 = vst [vmem:[#allocation87_spill] sm:$0xff] %v5373_v8  ;;  %v232_v8 = vld [vmem:[%s4719_s17 + $0x1e8] sm:$0xff] }
  0xa5   : > { %9217 = vst [vmem:[#allocation88_spill] sm:$0xff] %v5378_v60  ;;  %v360_v63 = vrot.slane %v232_v8, 7  ;;  %v864_v62 = vsel %vm684_vm1, %v862_v57, %v863_v27 }
  0xa6   : > { %9218 = vst [vmem:[#allocation89_spill] sm:$0xff] %v5381_v10  ;;  %v359_v10 = vrot.slane %v231_v29, 7 }
  0xa7   : > { %9220 = vst [vmem:[#allocation91_spill] sm:$0xff] %v5387_v61  ;;  %989 = vrot.lane.b32.xlu2 %v855_v28, %s4678_s18  ;;  %987 = vrot.lane.b32.xlu1 %v852_v24, %s4678_s18  ;;  %v861_v61 = vsel %vm684_vm1, %v859_v43, %v860_v41  ;;  %v5423_v8 = vsel %vm427_vm0, 0.0, %v360_v63  ;;  %v5426_v46 = vsel %vm427_vm0, %v360_v63, 0.0 }
  0xa8   : > { %9221 = vst [vmem:[#allocation92_spill] sm:$0xff] %v5395_v25  ;;  %v5432_v57 = vsel %vm427_vm0, 0.0, %v359_v10  ;;  %v5435_v27 = vsel %vm427_vm0, %v359_v10, 0.0  ;;  %v868_v29 = vrot.slane %v5423_v8, 1  ;;  %v869_v63 = vrot.slane %v5426_v46, 1 }
  0xa9   : > { %985 = vrot.lane.b32.xlu0 %v849_v26, %s4678_s18  ;;  %v5406_v28 = vpop.permute.xlu2 %923  ;;  %v5408_v24 = vpop.permute.xlu1 %903  ;;  %v5417_v26 = vsel %vm427_vm0, 0.0, %v361_v34  ;;  %9227 = vst [vmem:[#allocation98_spill] sm:$0xff] %v5423_v8  ;;  %v866_v10 = vrot.slane %v5435_v27, 1 }
  0xaa   : > { %9222 = vst [vmem:[#allocation93_spill] sm:$0xff] %v5406_v28  ;;  %v5420_v28 = vsel %vm427_vm0, %v361_v34, 0.0  ;;  %v871_v43 = vrot.slane %v5417_v26, 1  ;;  %v234_v34 = vld [vmem:[%s4719_s17 + $0x1f8] sm:$0xff] }
  0xab   : > { %9223 = vst [vmem:[#allocation94_spill] sm:$0xff] %v5408_v24  ;;  %v5412_v60 = vpop.permute.xlu0 %901  ;;  %v858_v24 = vsel %vm684_vm1, %v856_v42, %v857_v9  ;;  %v872_v41 = vrot.slane %v5420_v28, 1 }
  0xac   : > { %9224 = vst [vmem:[#allocation95_spill] sm:$0xff] %v5412_v60  ;;  %v362_v60 = vrot.slane %v234_v34, 7  ;;  %v1074_v34 = vrot.slane %v4780_v39, 2 }
  0xad   : > { %9225 = vst [vmem:[#allocation96_spill] sm:$0xff] %v5417_v26  ;;  %v870_v26 = vsel %vm684_vm1, %v868_v29, %v869_v63 }
  0xae   : > { %9226 = vst [vmem:[#allocation97_spill] sm:$0xff] %v5420_v28  ;;  %v873_v28 = vsel %vm684_vm1, %v871_v43, %v872_v41  ;;  %v1070_v43 = vrot.slane %v4744_v20, 2  ;;  %v1071_v41 = vrot.slane %v4747_v21, 2  ;;  %v1082_v21 = vrot.slane %v4728_v12, 2 }
  0xaf   : > { %9228 = vst [vmem:[#allocation99_spill] sm:$0xff] %v5426_v46  ;;  %995 = vrot.lane.b32.xlu2 %v864_v62, %s4678_s18  ;;  %993 = vrot.lane.b32.xlu1 %v861_v61, %s4678_s18  ;;  %v865_v61 = vrot.slane %v5432_v57, 1 }
  0xb0   : > { %v1072_v39 = vsel %vm1069_vm2, %v1070_v43, %v1071_v41  ;;  %v1076_v43 = vrot.slane %v4734_v14, 2  ;;  %v1077_v41 = vrot.slane %v4737_v15, 2  ;;  %v1089_v15 = vrot.slane %v4807_v55, 2 }
  0xb1   : > { %991 = vrot.lane.b32.xlu0 %v858_v24, %s4678_s18  ;;  %v5443_v9 = vpop.permute.xlu2 %929  ;;  %v5445_v62 = vpop.permute.xlu1 %909  ;;  %v867_v46 = vsel %vm684_vm1, %v865_v61, %v866_v10  ;;  %v5457_v24 = vsel %vm427_vm0, 0.0, %v362_v60  ;;  %v1100_v55 = vrot.slane %v4826_v6, 2 }
  0xb2   : > { %9229 = vst [vmem:[#allocation100_spill] sm:$0xff] %v5443_v9  ;;  %v5460_v9 = vsel %vm427_vm0, %v362_v60, 0.0 }
  0xb3   : > { %9230 = vst [vmem:[#allocation101_spill] sm:$0xff] %v5445_v62  ;;  %v5449_v42 = vpop.permute.xlu0 %907  ;;  %v1073_v62 = vrot.slane %v4775_v37, 2  ;;  %v875_v60 = vrot.slane %v5460_v9, 1 }
  0xb5   : > { %v1075_v61 = vsel %vm1069_vm2, %v1073_v62, %v1074_v34 }
  0xb7   : > { %1001 = vrot.lane.b32.xlu2 %v873_v28, %s4678_s18  ;;  %999 = vrot.lane.b32.xlu1 %v870_v26, %s4678_s18  ;;  %v874_v26 = vrot.slane %v5457_v24, 1 }
  0xb9   : > { %997 = vrot.lane.b32.xlu0 %v867_v46, %s4678_s18  ;;  %v5467_v29 = vpop.permute.xlu2 %935  ;;  %v5469_v28 = vpop.permute.xlu1 %915  ;;  %v876_v10 = vsel %vm684_vm1, %v874_v26, %v875_v60  ;;  %v1083_v46 = vrot.slane %v4731_v13, 2 }
  0xba   : > { %9231 = vst [vmem:[#allocation102_spill] sm:$0xff] %v5467_v29  ;;  %v1079_v29 = vrot.slane %v4765_v31, 2 }
  0xbb   : > { %9232 = vst [vmem:[#allocation103_spill] sm:$0xff] %v5469_v28  ;;  %v5473_v63 = vpop.permute.xlu0 %913  ;;  %v1080_v28 = vrot.slane %v4768_v32, 2  ;;  %v1084_v60 = vsel %vm1069_vm2, %v1082_v21, %v1083_v46  ;;  %v1091_v32 = vrot.slane %v4793_v49, 2 }
  0xbd   : > { %v1081_v13 = vsel %vm1069_vm2, %v1079_v29, %v1080_v28  ;;  %v1085_v29 = vrot.slane %v4750_v22, 2  ;;  %v1086_v28 = vrot.slane %v4753_v23, 2  ;;  %v1098_v23 = vrot.slane %v4840_v16, 2 }
  0xbe   : > { %v1109_v16 = vrot.slane %v4859_v38, 2 }
  0xbf   : > { %1264 = vrot.lane.b32.xlu2 %v1075_v61, %s4679_s19  ;;  %1262 = vrot.lane.b32.xlu1 %v1072_v39, %s4679_s19  ;;  %v1078_v61 = vsel %vm1069_vm2, %v1076_v43, %v1077_v41  ;;  %v1092_v39 = vrot.slane %v4796_v50, 2  ;;  %v1087_v41 = vsel %vm1069_vm2, %v1085_v29, %v1086_v28 }
  0xc1   : > { %1003 = vrot.lane.b32.xlu0 %v876_v10, %s4678_s18  ;;  %v5485_v62 = vpop.permute.xlu2 %941  ;;  %v5487_v34 = vpop.permute.xlu1 %921  ;;  %v1088_v10 = vrot.slane %v4804_v54, 2  ;;  %v1093_v43 = vsel %vm1069_vm2, %v1091_v32, %v1092_v39  ;;  %v1094_v39 = vrot.slane %v4787_v47, 2 }
  0xc2   : > { %9233 = vst [vmem:[#allocation104_spill] sm:$0xff] %v5485_v62 }
  0xc3   : > { %9234 = vst [vmem:[#allocation105_spill] sm:$0xff] %v5487_v34  ;;  %v5491_v26 = vpop.permute.xlu0 %919  ;;  %v1090_v50 = vsel %vm1069_vm2, %v1088_v10, %v1089_v15  ;;  %v1095_v10 = vrot.slane %v4790_v48, 2  ;;  %v1107_v48 = vrot.slane %v4873_v45, 2  ;;  %v1118_v45 = vrot.slane %v4892_v2, 2 }
  0xc5   : > { %v1096_v28 = vsel %vm1069_vm2, %v1094_v39, %v1095_v10 }
  0xc7   : > { %1270 = vrot.lane.b32.xlu2 %v1084_v60, %s4679_s19  ;;  %1268 = vrot.lane.b32.xlu1 %v1081_v13, %s4679_s19  ;;  %v1101_v60 = vrot.slane %v4829_v7, 2  ;;  %v1097_v13 = vrot.slane %v4837_v11, 2 }
  0xc9   : > { %1266 = vrot.lane.b32.xlu0 %v1078_v61, %s4679_s19  ;;  %v5503_v62 = vpop.permute.xlu2 %947  ;;  %v5505_v21 = vpop.permute.xlu1 %927  ;;  %v1102_v29 = vsel %vm1069_vm2, %v1100_v55, %v1101_v60  ;;  %v1099_v7 = vsel %vm1069_vm2, %v1097_v13, %v1098_v23  ;;  %v1103_v60 = vrot.slane %v4820_v4, 2  ;;  %v1104_v13 = vrot.slane %v4823_v5, 2 }
  0xca   : > { %9235 = vst [vmem:[#allocation106_spill] sm:$0xff] %v5503_v62  ;;  %v1116_v5 = vrot.slane %v4906_v18, 2  ;;  %v1127_v18 = vrot.slane %v4925_v51, 2 }
  0xcb   : > { %9236 = vst [vmem:[#allocation107_spill] sm:$0xff] %v5505_v21  ;;  %v5509_v46 = vpop.permute.xlu0 %925  ;;  %v1105_v10 = vsel %vm1069_vm2, %v1103_v60, %v1104_v13  ;;  %v9329_v21 = vld [vmem:[#allocation74_spill] sm:$0xff] }
  0xcf   : > { %1276 = vrot.lane.b32.xlu2 %v1093_v43, %s4679_s19  ;;  %1274 = vrot.lane.b32.xlu1 %v1090_v50, %s4679_s19  ;;  %v1110_v43 = vrot.slane %v4862_v40, 2  ;;  %v1106_v50 = vrot.slane %v4870_v44, 2 }
  0xd1   : > { %1272 = vrot.lane.b32.xlu0 %v1087_v41, %s4679_s19  ;;  %v5521_v61 = vpop.permute.xlu2 %953  ;;  %v5523_v32 = vpop.permute.xlu1 %933  ;;  %v1111_v39 = vsel %vm1069_vm2, %v1109_v16, %v1110_v43  ;;  %v1108_v40 = vsel %vm1069_vm2, %v1106_v50, %v1107_v48  ;;  %v1112_v43 = vrot.slane %v4853_v35, 2  ;;  %v1113_v50 = vrot.slane %v4856_v36, 2 }
  0xd2   : > { %9237 = vst [vmem:[#allocation108_spill] sm:$0xff] %v5521_v61  ;;  %v1125_v36 = vrot.slane %v4939_v59, 2  ;;  %v1136_v59 = vrot.slane %v4958_v30, 2  ;;  %v9336_v30 = vld [vmem:[#allocation84_spill] sm:$0xff] }
  0xd3   : > { %9238 = vst [vmem:[#allocation109_spill] sm:$0xff] %v5523_v32  ;;  %v5527_v15 = vpop.permute.xlu0 %931  ;;  %v1114_v13 = vsel %vm1069_vm2, %v1112_v43, %v1113_v50  ;;  %v9301_v32 = vld [vmem:[#allocation43_spill] sm:$0xff] }
  0xd4   : > { %9239 = vst [vmem:[#allocation110_spill] sm:$0xff] %v5527_v15 }
  0xd7   : > { %1282 = vrot.lane.b32.xlu2 %v1102_v29, %s4679_s19  ;;  %1280 = vrot.lane.b32.xlu1 %v1099_v7, %s4679_s19  ;;  %v1119_v29 = vrot.slane %v4895_v3, 2  ;;  %v1115_v7 = vrot.slane %v4903_v17, 2 }
  0xd9   : > { %1278 = vrot.lane.b32.xlu0 %v1096_v28, %s4679_s19  ;;  %v5539_v41 = vpop.permute.xlu2 %959  ;;  %v5541_v55 = vpop.permute.xlu1 %939  ;;  %v1120_v60 = vsel %vm1069_vm2, %v1118_v45, %v1119_v29  ;;  %v1117_v3 = vsel %vm1069_vm2, %v1115_v7, %v1116_v5  ;;  %v1121_v29 = vrot.slane %v4886_v0, 2  ;;  %v1122_v7 = vrot.slane %v4889_v1, 2 }
  0xda   : > { %9240 = vst [vmem:[#allocation111_spill] sm:$0xff] %v5539_v41  ;;  %v1134_v1 = vrot.slane %v4972_v56, 2  ;;  %v9254_v56 = vld [vmem:[#allocation9_spill] sm:$0xff]  ;;  %v9257_v41 = vld [vmem:[#allocation12_spill] sm:$0xff] }
  0xdb   : > { %9241 = vst [vmem:[#allocation112_spill] sm:$0xff] %v5541_v55  ;;  %v5545_v23 = vpop.permute.xlu0 %937  ;;  %v1123_v50 = vsel %vm1069_vm2, %v1121_v29, %v1122_v7  ;;  %v9275_v55 = vld [vmem:[#allocation24_spill] sm:$0xff] }
  0xdc   : > { %9242 = vst [vmem:[#allocation113_spill] sm:$0xff] %v5545_v23  ;;  %v9317_v23 = vld [vmem:[#allocation57_spill] sm:$0xff] }
  0xdf   : > { %1288 = vrot.lane.b32.xlu2 %v1111_v39, %s4679_s19  ;;  %1286 = vrot.lane.b32.xlu1 %v1108_v40, %s4679_s19  ;;  %v1128_v39 = vrot.slane %v4928_v52, 2  ;;  %v1124_v40 = vrot.slane %v4936_v58, 2 }
  0xe1   : > { %1284 = vrot.lane.b32.xlu0 %v1105_v10, %s4679_s19  ;;  %v5557_v28 = vpop.permute.xlu2 %965  ;;  %v5559_v16 = vpop.permute.xlu1 %945  ;;  %v1129_v43 = vsel %vm1069_vm2, %v1127_v18, %v1128_v39  ;;  %v1126_v52 = vsel %vm1069_vm2, %v1124_v40, %v1125_v36  ;;  %v9251_v39 = vld [vmem:[#allocation2_spill] sm:$0xff]  ;;  %v9252_v36 = vld [vmem:[#allocation3_spill] sm:$0xff] }
  0xe2   : > { %9243 = vst [vmem:[#allocation114_spill] sm:$0xff] %v5557_v28  ;;  %v1130_v40 = vrot.slane %v9251_v39, 2  ;;  %v1131_v29 = vrot.slane %v9252_v36, 2  ;;  %v9256_v28 = vld [vmem:[#allocation11_spill] sm:$0xff]  ;;  %v1143_v36 = vrot.slane %v9257_v41, 2 }
  0xe3   : > { %9244 = vst [vmem:[#allocation115_spill] sm:$0xff] %v5559_v16  ;;  %v5563_v48 = vpop.permute.xlu0 %943  ;;  %v9263_v41 = vld [vmem:[#allocation15_spill] sm:$0xff]  ;;  %v9266_v16 = vld [vmem:[#allocation18_spill] sm:$0xff] }
  0xe4   : > { %9245 = vst [vmem:[#allocation116_spill] sm:$0xff] %v5563_v48 }
  0xe7   : > { %1294 = vrot.lane.b32.xlu2 %v1120_v60, %s4679_s19  ;;  %1292 = vrot.lane.b32.xlu1 %v1117_v3, %s4679_s19  ;;  %v1137_v60 = vrot.slane %v4961_v33, 2  ;;  %v1133_v3 = vrot.slane %v4969_v53, 2 }
  0xe9   : > { %1290 = vrot.lane.b32.xlu0 %v1114_v13, %s4679_s19  ;;  %v5575_v10 = vpop.permute.xlu2 %971  ;;  %v5577_v45 = vpop.permute.xlu1 %951  ;;  %v1135_v33 = vsel %vm1069_vm2, %v1133_v3, %v1134_v1  ;;  %v9261_v1 = vld [vmem:[#allocation5_spill] sm:$0xff] }
  0xea   : > { %9246 = vst [vmem:[#allocation117_spill] sm:$0xff] %v5575_v10 }
  0xeb   : > { %9247 = vst [vmem:[#allocation118_spill] sm:$0xff] %v5577_v45  ;;  %v5581_v5 = vpop.permute.xlu0 %949 }
  0xec   : > { %9248 = vst [vmem:[#allocation119_spill] sm:$0xff] %v5581_v5  ;;  %v9274_v5 = vld [vmem:[#allocation23_spill] sm:$0xff] }
  0xed   : > { %v1160_v62 = vrot.slane %v9274_v5, 2  ;;  %v9309_v5 = vld [vmem:[#allocation50_spill] sm:$0xff] }
  0xef   : > { %1300 = vrot.lane.b32.xlu2 %v1129_v43, %s4679_s19  ;;  %1298 = vrot.lane.b32.xlu1 %v1126_v52, %s4679_s19  ;;  %v1138_v43 = vsel %vm1069_vm2, %v1136_v59, %v1137_v60  ;;  %v1132_v52 = vsel %vm1069_vm2, %v1130_v40, %v1131_v29  ;;  %v9260_v60 = vld [vmem:[#allocation4_spill] sm:$0xff]  ;;  %v1140_v40 = vrot.slane %v9261_v1, 2  ;;  %v1152_v1 = vrot.slane %v9266_v16, 2  ;;  %v9272_v16 = vld [vmem:[#allocation21_spill] sm:$0xff] }
  0xf0   : > { %v1139_v3 = vrot.slane %v9260_v60, 2 }
  0xf1   : > { %1296 = vrot.lane.b32.xlu0 %v1123_v50, %s4679_s19  ;;  %v5593_v13 = vpop.permute.xlu2 %977  ;;  %v5595_v18 = vpop.permute.xlu1 %957  ;;  %v1145_v50 = vrot.slane %v9254_v56, 2  ;;  %v9324_v56 = vld [vmem:[#allocation66_spill] sm:$0xff] }
  0xf2   : > { %9249 = vst [vmem:[#allocation120_spill] sm:$0xff] %v5593_v13  ;;  %v9255_v13 = vld [vmem:[#allocation10_spill] sm:$0xff] }
  0xf3   : > { %9250 = vst [vmem:[#allocation121_spill] sm:$0xff] %v5595_v18  ;;  %v5599_v7 = vpop.permute.xlu0 %955  ;;  %v1146_v10 = vrot.slane %v9255_v13, 2  ;;  %v1142_v18 = vrot.slane %v9256_v28, 2 }
  0xf4   : > { %9253 = vst [vmem:[#allocation2_spill] sm:$0xff] %v5599_v7  ;;  %v9265_v7 = vld [vmem:[#allocation17_spill] sm:$0xff] }
  0xf5   : > { %v1144_v13 = vsel %vm1069_vm2, %v1142_v18, %v1143_v36  ;;  %v1151_v61 = vrot.slane %v9265_v7, 2  ;;  %v9269_v18 = vld [vmem:[#allocation7_spill] sm:$0xff]  ;;  %v9270_v36 = vld [vmem:[#allocation8_spill] sm:$0xff] }
  0xf6   : > { %v9330_v7 = vld [vmem:[#allocation75_spill] sm:$0xff] }
  0xf7   : > { %1306 = vrot.lane.b32.xlu2 %v1138_v43, %s4679_s19  ;;  %1304 = vrot.lane.b32.xlu1 %v1135_v33, %s4679_s19  ;;  %v1147_v43 = vsel %vm1069_vm2, %v1145_v50, %v1146_v10  ;;  %v1141_v33 = vsel %vm1069_vm2, %v1139_v3, %v1140_v40  ;;  %v1148_v50 = vrot.slane %v9269_v18, 2  ;;  %v1149_v3 = vrot.slane %v9270_v36, 2  ;;  %v9335_v18 = vld [vmem:[#allocation83_spill] sm:$0xff] }
  0xf8   : > { %v1161_v36 = vrot.slane %v9275_v55, 2  ;;  %v9281_v55 = vld [vmem:[#allocation27_spill] sm:$0xff] }
  0xf9   : > { %1302 = vrot.lane.b32.xlu0 %v1132_v52, %s4679_s19  ;;  %v5611_v45 = vpop.permute.xlu2 %983  ;;  %v5613_v59 = vpop.permute.xlu1 %963  ;;  %v1154_v52 = vrot.slane %v9263_v41, 2  ;;  %v9284_v41 = vld [vmem:[#allocation30_spill] sm:$0xff] }
  0xfa   : > { %9258 = vst [vmem:[#allocation3_spill] sm:$0xff] %v5611_v45  ;;  %v9264_v45 = vld [vmem:[#allocation16_spill] sm:$0xff] }
  0xfb   : > { %9259 = vst [vmem:[#allocation10_spill] sm:$0xff] %v5613_v59  ;;  %v5617_v29 = vpop.permute.xlu0 %961  ;;  %v1155_v59 = vrot.slane %v9264_v45, 2  ;;  %v1153_v45 = vsel %vm1069_vm2, %v1151_v61, %v1152_v1  ;;  %v9278_v61 = vld [vmem:[#allocation13_spill] sm:$0xff]  ;;  %v9279_v1 = vld [vmem:[#allocation14_spill] sm:$0xff] }
  0xfc   : > { %9262 = vst [vmem:[#allocation12_spill] sm:$0xff] %v5617_v29 }
  0xff   : > { %1312 = vrot.lane.b32.xlu2 %v1147_v43, %s4679_s19  ;;  %1310 = vrot.lane.b32.xlu1 %v1144_v13, %s4679_s19  ;;  %v1156_v43 = vsel %vm1069_vm2, %v1154_v52, %v1155_v59  ;;  %v1150_v13 = vsel %vm1069_vm2, %v1148_v50, %v1149_v3  ;;  %v1157_v52 = vrot.slane %v9278_v61, 2  ;;  %v1158_v50 = vrot.slane %v9279_v1, 2  ;;  %v9323_v61 = vld [vmem:[#allocation65_spill] sm:$0xff] }
 0x100   : > { %v1170_v1 = vrot.slane %v9284_v41, 2  ;;  %v9290_v41 = vld [vmem:[#allocation33_spill] sm:$0xff] }
 0x101   : > { %1308 = vrot.lane.b32.xlu0 %v1141_v33, %s4679_s19  ;;  %v5629_v29 = vpop.permute.xlu2 %989  ;;  %v5631_v10 = vpop.permute.xlu1 %969  ;;  %v1163_v33 = vrot.slane %v9272_v16, 2  ;;  %v9283_v16 = vld [vmem:[#allocation29_spill] sm:$0xff] }
 0x102   : > { %9267 = vst [vmem:[#allocation4_spill] sm:$0xff] %v5629_v29  ;;  %v9273_v29 = vld [vmem:[#allocation22_spill] sm:$0xff]  ;;  %v1169_v48 = vrot.slane %v9283_v16, 2 }
 0x103   : > { %9268 = vst [vmem:[#allocation5_spill] sm:$0xff] %v5631_v10  ;;  %v5635_v40 = vpop.permute.xlu0 %967  ;;  %v1164_v10 = vrot.slane %v9273_v29, 2  ;;  %v1162_v29 = vsel %vm1069_vm2, %v1160_v62, %v1161_v36  ;;  %v9287_v62 = vld [vmem:[#allocation19_spill] sm:$0xff]  ;;  %v9288_v36 = vld [vmem:[#allocation20_spill] sm:$0xff] }
 0x104   : > { %9271 = vst [vmem:[#allocation16_spill] sm:$0xff] %v5635_v40 }
 0x107   : > { %1318 = vrot.lane.b32.xlu2 %v1156_v43, %s4679_s19  ;;  %1316 = vrot.lane.b32.xlu1 %v1153_v45, %s4679_s19  ;;  %v1165_v43 = vsel %vm1069_vm2, %v1163_v33, %v1164_v10  ;;  %v1159_v45 = vsel %vm1069_vm2, %v1157_v52, %v1158_v50  ;;  %v1166_v33 = vrot.slane %v9287_v62, 2  ;;  %v1167_v52 = vrot.slane %v9288_v36, 2  ;;  %v9293_v62 = vld [vmem:[#allocation36_spill] sm:$0xff] }
 0x108   : > { %v1179_v36 = vrot.slane %v9293_v62, 2  ;;  %v9298_v62 = vld [vmem:[#allocation40_spill] sm:$0xff] }
 0x109   : > { %1314 = vrot.lane.b32.xlu0 %v1150_v13, %s4679_s19  ;;  %v5647_v40 = vpop.permute.xlu2 %995  ;;  %v5649_v59 = vpop.permute.xlu1 %975  ;;  %v1172_v13 = vrot.slane %v9281_v55, 2  ;;  %v9292_v55 = vld [vmem:[#allocation35_spill] sm:$0xff] }
 0x10a   : > { %9276 = vst [vmem:[#allocation18_spill] sm:$0xff] %v5647_v40  ;;  %v9282_v40 = vld [vmem:[#allocation28_spill] sm:$0xff]  ;;  %v1178_v16 = vrot.slane %v9292_v55, 2  ;;  %v9300_v55 = vld [vmem:[#allocation42_spill] sm:$0xff] }
 0x10b   : > { %9277 = vst [vmem:[#allocation8_spill] sm:$0xff] %v5649_v59  ;;  %v5653_v3 = vpop.permute.xlu0 %973  ;;  %v1173_v59 = vrot.slane %v9282_v40, 2  ;;  %v1171_v40 = vsel %vm1069_vm2, %v1169_v48, %v1170_v1  ;;  %v9295_v48 = vld [vmem:[#allocation25_spill] sm:$0xff]  ;;  %v9296_v1 = vld [vmem:[#allocation26_spill] sm:$0xff] }
 0x10c   : > { %9280 = vst [vmem:[#allocation22_spill] sm:$0xff] %v5653_v3 }
 0x10f   : > { %1324 = vrot.lane.b32.xlu2 %v1165_v43, %s4679_s19  ;;  %1322 = vrot.lane.b32.xlu1 %v1162_v29, %s4679_s19  ;;  %v1174_v43 = vsel %vm1069_vm2, %v1172_v13, %v1173_v59  ;;  %v1168_v29 = vsel %vm1069_vm2, %v1166_v33, %v1167_v52  ;;  %v1175_v13 = vrot.slane %v9295_v48, 2  ;;  %v1176_v33 = vrot.slane %v9296_v1, 2 }
 0x110   : > { %v1187_v48 = vrot.slane %v9300_v55, 2  ;;  %v1188_v1 = vrot.slane %v9301_v32, 2  ;;  %v9306_v32 = vld [vmem:[#allocation47_spill] sm:$0xff]  ;;  %v9308_v55 = vld [vmem:[#allocation49_spill] sm:$0xff] }
 0x111   : > { %1320 = vrot.lane.b32.xlu0 %v1159_v45, %s4679_s19  ;;  %v5665_v3 = vpop.permute.xlu2 %1001  ;;  %v5667_v10 = vpop.permute.xlu1 %981  ;;  %v1181_v45 = vrot.slane %v9290_v41, 2 }
 0x112   : > { %9285 = vst [vmem:[#allocation24_spill] sm:$0xff] %v5665_v3  ;;  %v9291_v3 = vld [vmem:[#allocation34_spill] sm:$0xff] }
 0x113   : > { %9286 = vst [vmem:[#allocation14_spill] sm:$0xff] %v5667_v10  ;;  %v5671_v50 = vpop.permute.xlu0 %979  ;;  %v1182_v10 = vrot.slane %v9291_v3, 2  ;;  %v1180_v3 = vsel %vm1069_vm2, %v1178_v16, %v1179_v36  ;;  %v9303_v16 = vld [vmem:[#allocation31_spill] sm:$0xff]  ;;  %v9304_v36 = vld [vmem:[#allocation32_spill] sm:$0xff] }
 0x114   : > { %9289 = vst [vmem:[#allocation28_spill] sm:$0xff] %v5671_v50 }
 0x117   : > { %1330 = vrot.lane.b32.xlu2 %v1174_v43, %s4679_s19  ;;  %1328 = vrot.lane.b32.xlu1 %v1171_v40, %s4679_s19  ;;  %v1183_v43 = vsel %vm1069_vm2, %v1181_v45, %v1182_v10  ;;  %v1177_v40 = vsel %vm1069_vm2, %v1175_v13, %v1176_v33  ;;  %v1184_v45 = vrot.slane %v9303_v16, 2  ;;  %v1185_v13 = vrot.slane %v9304_v36, 2 }
 0x118   : > { %v1196_v16 = vrot.slane %v9308_v55, 2  ;;  %v1197_v36 = vrot.slane %v9309_v5, 2  ;;  %v9314_v5 = vld [vmem:[#allocation54_spill] sm:$0xff]  ;;  %v9316_v55 = vld [vmem:[#allocation56_spill] sm:$0xff] }
 0x119   : > { %1326 = vrot.lane.b32.xlu0 %v1168_v29, %s4679_s19  ;;  %v5683_v50 = vpop.permute.xlu1 %987  ;;  %v5685_v59 = vpop.permute.xlu2 %1264  ;;  %v1190_v29 = vrot.slane %v9298_v62, 2 }
 0x11a   : > { %9294 = vst [vmem:[#allocation30_spill] sm:$0xff] %v5683_v50  ;;  %v9299_v50 = vld [vmem:[#allocation41_spill] sm:$0xff] }
 0x11b   : > { %v5689_v52 = vpop.permute.xlu0 %985  ;;  %v1191_v41 = vrot.slane %v9299_v50, 2  ;;  %v1189_v50 = vsel %vm1069_vm2, %v1187_v48, %v1188_v1  ;;  %v9311_v48 = vld [vmem:[#allocation38_spill] sm:$0xff]  ;;  %v9312_v1 = vld [vmem:[#allocation39_spill] sm:$0xff] }
 0x11c   : > { %9297 = vst [vmem:[#allocation20_spill] sm:$0xff] %v5689_v52 }
 0x11f   : > { %1336 = vrot.lane.b32.xlu2 %v1183_v43, %s4679_s19  ;;  %1334 = vrot.lane.b32.xlu1 %v1180_v3, %s4679_s19  ;;  %v1192_v43 = vsel %vm1069_vm2, %v1190_v29, %v1191_v41  ;;  %v1186_v3 = vsel %vm1069_vm2, %v1184_v45, %v1185_v13  ;;  %v1193_v29 = vrot.slane %v9311_v48, 2  ;;  %v1194_v45 = vrot.slane %v9312_v1, 2 }
 0x120   : > { %v1205_v48 = vrot.slane %v9316_v55, 2  ;;  %v1206_v1 = vrot.slane %v9317_v23, 2  ;;  %v9321_v23 = vld [vmem:[#allocation63_spill] sm:$0xff] }
 0x121   : > { %1332 = vrot.lane.b32.xlu0 %v1177_v40, %s4679_s19  ;;  %v5701_v52 = vpop.permute.xlu1 %993  ;;  %v5703_v10 = vpop.permute.xlu2 %1270  ;;  %v1199_v40 = vrot.slane %v9306_v32, 2 }
 0x122   : > { %9302 = vst [vmem:[#allocation34_spill] sm:$0xff] %v5701_v52  ;;  %v9307_v52 = vld [vmem:[#allocation48_spill] sm:$0xff] }
 0x123   : > { %v5707_v33 = vpop.permute.xlu0 %991  ;;  %v1200_v62 = vrot.slane %v9307_v52, 2  ;;  %v1198_v52 = vsel %vm1069_vm2, %v1196_v16, %v1197_v36  ;;  %v9318_v16 = vld [vmem:[#allocation45_spill] sm:$0xff]  ;;  %v9319_v36 = vld [vmem:[#allocation46_spill] sm:$0xff] }
 0x124   : > { %9305 = vst [vmem:[#allocation36_spill] sm:$0xff] %v5707_v33 }
 0x127   : > { %1342 = vrot.lane.b32.xlu2 %v1192_v43, %s4679_s19  ;;  %1340 = vrot.lane.b32.xlu1 %v1189_v50, %s4679_s19  ;;  %v1201_v43 = vsel %vm1069_vm2, %v1199_v40, %v1200_v62  ;;  %v1195_v50 = vsel %vm1069_vm2, %v1193_v29, %v1194_v45  ;;  %v1202_v40 = vrot.slane %v9318_v16, 2  ;;  %v1203_v29 = vrot.slane %v9319_v36, 2 }
 0x128   : > { %v1214_v16 = vrot.slane %v9323_v61, 2  ;;  %v1215_v36 = vrot.slane %v9324_v56, 2  ;;  %v9327_v56 = vld [vmem:[#allocation72_spill] sm:$0xff] }
 0x129   : > { %1338 = vrot.lane.b32.xlu0 %v1186_v3, %s4679_s19  ;;  %v5719_v33 = vpop.permute.xlu1 %999  ;;  %v5721_v41 = vpop.permute.xlu2 %1276  ;;  %v1208_v3 = vrot.slane %v9314_v5, 2  ;;  %v9322_v5 = vld [vmem:[#allocation64_spill] sm:$0xff] }
 0x12a   : > { %9310 = vst [vmem:[#allocation26_spill] sm:$0xff] %v5719_v33  ;;  %v9315_v33 = vld [vmem:[#allocation55_spill] sm:$0xff]  ;;  %v1218_v55 = vrot.slane %v9322_v5, 2  ;;  %v1216_v5 = vsel %vm1069_vm2, %v1214_v16, %v1215_v36  ;;  %v9331_v16 = vld [vmem:[#allocation61_spill] sm:$0xff]  ;;  %v9332_v36 = vld [vmem:[#allocation62_spill] sm:$0xff] }
 0x12b   : > { %v5725_v13 = vpop.permute.xlu0 %997  ;;  %v1209_v32 = vrot.slane %v9315_v33, 2  ;;  %v1207_v33 = vsel %vm1069_vm2, %v1205_v48, %v1206_v1  ;;  %v9325_v48 = vld [vmem:[#allocation52_spill] sm:$0xff]  ;;  %v9326_v1 = vld [vmem:[#allocation53_spill] sm:$0xff] }
 0x12c   : > { %9313 = vst [vmem:[#allocation41_spill] sm:$0xff] %v5725_v13 }
 0x12f   : > { %1348 = vrot.lane.b32.xlu2 %v1201_v43, %s4679_s19  ;;  %1346 = vrot.lane.b32.xlu1 %v1198_v52, %s4679_s19  ;;  %v1210_v43 = vsel %vm1069_vm2, %v1208_v3, %v1209_v32  ;;  %v1204_v52 = vsel %vm1069_vm2, %v1202_v40, %v1203_v29  ;;  %v1211_v3 = vrot.slane %v9325_v48, 2  ;;  %v1212_v40 = vrot.slane %v9326_v1, 2 }
 0x130   : > { %v1223_v48 = vrot.slane %v9329_v21, 2  ;;  %v1224_v1 = vrot.slane %v9330_v7, 2  ;;  %v9333_v7 = vld [vmem:[#allocation81_spill] sm:$0xff] }
 0x131   : > { %1344 = vrot.lane.b32.xlu0 %v1195_v50, %s4679_s19  ;;  %v5737_v13 = vpop.permute.xlu2 %1282  ;;  %v5739_v62 = vpop.permute.xlu1 %1262  ;;  %v1217_v50 = vrot.slane %v9321_v23, 2  ;;  %v9328_v23 = vld [vmem:[#allocation73_spill] sm:$0xff] }
 0x132   : > { %v1227_v61 = vrot.slane %v9328_v23, 2  ;;  %v1225_v23 = vsel %vm1069_vm2, %v1223_v48, %v1224_v1  ;;  %v9337_v48 = vld [vmem:[#allocation70_spill] sm:$0xff]  ;;  %v9338_v1 = vld [vmem:[#allocation71_spill] sm:$0xff] }
 0x133   : > { %v5743_v45 = vpop.permute.xlu0 %1003 }
 0x134   : > { %9320 = vst [vmem:[#allocation43_spill] sm:$0xff] %v5743_v45 }
 0x137   : > { %1354 = vrot.lane.b32.xlu2 %v1210_v43, %s4679_s19  ;;  %1352 = vrot.lane.b32.xlu1 %v1207_v33, %s4679_s19  ;;  %v1219_v43 = vsel %vm1069_vm2, %v1217_v50, %v1218_v55  ;;  %v1213_v33 = vsel %vm1069_vm2, %v1211_v3, %v1212_v40  ;;  %v1220_v50 = vrot.slane %v9331_v16, 2  ;;  %v1221_v3 = vrot.slane %v9332_v36, 2 }
 0x138   : > { %v1232_v16 = vrot.slane %v9335_v18, 2  ;;  %v1233_v36 = vrot.slane %v9336_v30, 2  ;;  %v9339_v30 = vld [vmem:[#allocation90_spill] sm:$0xff] }
 0x139   : > { %1350 = vrot.lane.b32.xlu0 %v1204_v52, %s4679_s19  ;;  %v5755_v45 = vpop.permute.xlu2 %1288  ;;  %v5757_v32 = vpop.permute.xlu1 %1268  ;;  %v1226_v52 = vrot.slane %v9327_v56, 2  ;;  %v9334_v56 = vld [vmem:[#allocation82_spill] sm:$0xff] }
 0x13a   : > { %v1236_v21 = vrot.slane %v9334_v56, 2  ;;  %v1234_v56 = vsel %vm1069_vm2, %v1232_v16, %v1233_v36  ;;  %v9341_v16 = vld [vmem:[#allocation79_spill] sm:$0xff]  ;;  %v9342_v36 = vld [vmem:[#allocation80_spill] sm:$0xff] }
 0x13b   : > { %v5761_v29 = vpop.permute.xlu0 %1266 }
 0x13f   : > { %1360 = vrot.lane.b32.xlu2 %v1219_v43, %s4679_s19  ;;  %1358 = vrot.lane.b32.xlu1 %v1216_v5, %s4679_s19  ;;  %v1228_v43 = vsel %vm1069_vm2, %v1226_v52, %v1227_v61  ;;  %v1222_v5 = vsel %vm1069_vm2, %v1220_v50, %v1221_v3  ;;  %v1229_v52 = vrot.slane %v9337_v48, 2  ;;  %v1230_v50 = vrot.slane %v9338_v1, 2 }
 0x140   : > { %v1241_v48 = vrot.slane %v5395_v25, 2  ;;  %v1242_v1 = vrot.slane %v5398_v19, 2  ;;  %v1253_v19 = vrot.slane %v5423_v8, 2  ;;  %v1250_v25 = vrot.slane %v5432_v57, 2 }
 0x141   : > { %1356 = vrot.lane.b32.xlu0 %v1213_v33, %s4679_s19  ;;  %v5773_v15 = vpop.permute.xlu2 %1294  ;;  %v5775_v55 = vpop.permute.xlu1 %1274  ;;  %v1235_v33 = vrot.slane %v9333_v7, 2  ;;  %v9340_v7 = vld [vmem:[#allocation91_spill] sm:$0xff] }
 0x142   : > { %v1245_v18 = vrot.slane %v9340_v7, 2  ;;  %v1243_v7 = vsel %vm1069_vm2, %v1241_v48, %v1242_v1  ;;  %v9344_v48 = vld [vmem:[#allocation88_spill] sm:$0xff]  ;;  %v9345_v1 = vld [vmem:[#allocation89_spill] sm:$0xff] }
 0x143   : > { %v5779_v40 = vpop.permute.xlu0 %1272 }
 0x147   : > { %1366 = vrot.lane.b32.xlu2 %v1228_v43, %s4679_s19  ;;  %1364 = vrot.lane.b32.xlu1 %v1225_v23, %s4679_s19  ;;  %v1237_v43 = vsel %vm1069_vm2, %v1235_v33, %v1236_v21  ;;  %v1231_v23 = vsel %vm1069_vm2, %v1229_v52, %v1230_v50  ;;  %v1238_v33 = vrot.slane %v9341_v16, 2  ;;  %v1239_v52 = vrot.slane %v9342_v36, 2 }
 0x148   : > { %v1251_v36 = vrot.slane %v5435_v27, 2  ;;  %v1259_v27 = vrot.slane %v5457_v24, 2 }
 0x149   : > { %1362 = vrot.lane.b32.xlu0 %v1222_v5, %s4679_s19  ;;  %v5791_v34 = vpop.permute.xlu2 %1300  ;;  %v5793_v61 = vpop.permute.xlu1 %1280  ;;  %v1244_v5 = vrot.slane %v9339_v30, 2 }
 0x14b   : > { %v5797_v3 = vpop.permute.xlu0 %1278 }
 0x14f   : > { %1372 = vrot.lane.b32.xlu2 %v1237_v43, %s4679_s19  ;;  %1370 = vrot.lane.b32.xlu1 %v1234_v56, %s4679_s19  ;;  %v1246_v43 = vsel %vm1069_vm2, %v1244_v5, %v1245_v18  ;;  %v1240_v56 = vsel %vm1069_vm2, %v1238_v33, %v1239_v52  ;;  %v1247_v5 = vrot.slane %v9344_v48, 2  ;;  %v1248_v33 = vrot.slane %v9345_v1, 2 }
 0x151   : > { %1368 = vrot.lane.b32.xlu0 %v1231_v23, %s4679_s19  ;;  %v5809_v28 = vpop.permute.xlu2 %1306  ;;  %v5811_v21 = vpop.permute.xlu1 %1286  ;;  %v9343_v23 = vld [vmem:[#allocation99_spill] sm:$0xff] }
 0x152   : > { %v1254_v30 = vrot.slane %v9343_v23, 2  ;;  %v1249_v23 = vsel %vm1069_vm2, %v1247_v5, %v1248_v33 }
 0x153   : > { %v5815_v50 = vpop.permute.xlu0 %1284 }
 0x157   : > { %1378 = vrot.lane.b32.xlu2 %v1246_v43, %s4679_s19  ;;  %1376 = vrot.lane.b32.xlu1 %v1243_v7, %s4679_s19  ;;  %v1255_v43 = vsel %vm1069_vm2, %v1253_v19, %v1254_v30  ;;  %v1252_v7 = vsel %vm1069_vm2, %v1250_v25, %v1251_v36  ;;  %v9346_v30 = vld [vmem:[#allocation96_spill] sm:$0xff]  ;;  %v9347_v25 = vld [vmem:[#allocation97_spill] sm:$0xff] }
 0x158   : > { %v1256_v19 = vrot.slane %v9346_v30, 2  ;;  %v1257_v36 = vrot.slane %v9347_v25, 2  ;;  %v9350_v25 = vld [vmem:[#allocation59_spill] sm:$0xff] }
 0x159   : > { %1374 = vrot.lane.b32.xlu0 %v1240_v56, %s4679_s19  ;;  %v5827_v16 = vpop.permute.xlu2 %1312  ;;  %v5829_v18 = vpop.permute.xlu1 %1292  ;;  %v1260_v56 = vrot.slane %v5460_v9, 2 }
 0x15a   : > { %v1258_v9 = vsel %vm1069_vm2, %v1256_v19, %v1257_v36  ;;  %v1457_v19 = vsel %vm1454_vm3, %v4734_v14, %v9350_v25 }
 0x15b   : > { %v5833_v52 = vpop.permute.xlu0 %1290  ;;  %v1261_v33 = vsel %vm1069_vm2, %v1259_v27, %v1260_v56 }
 0x15f   : > { %1384 = vrot.lane.b32.xlu2 %v1255_v43, %s4679_s19  ;;  %1382 = vrot.lane.b32.xlu1 %v1252_v7, %s4679_s19  ;;  %v9348_v43 = vld [vmem:[#allocation60_spill] sm:$0xff] }
 0x160   : > { %v1455_v7 = vsel %vm1454_vm3, %v4744_v20, %v9348_v43  ;;  %v5882_v43 = vsel %vm1519_vm4, %v1457_v19, %v5761_v29  ;;  %v9354_v19 = vld [vmem:[#allocation78_spill] sm:$0xff] }
 0x161   : > { %1380 = vrot.lane.b32.xlu0 %v1249_v23, %s4679_s19  ;;  %v5843_v8 = vpop.permute.xlu2 %1318  ;;  %v5845_v1 = vpop.permute.xlu1 %1298  ;;  %v5858_v23 = vsel %vm1519_vm4, %v1455_v7, %v5739_v62  ;;  %v9351_v62 = vld [vmem:[#allocation68_spill] sm:$0xff]  ;;  %v9352_v7 = vld [vmem:[#allocation69_spill] sm:$0xff] }
 0x162   : > { %9349 = vst [vmem:[#allocation32_spill] sm:$0xff] %v5858_v23  ;;  %v1458_v36 = vsel %vm1454_vm3, %v4765_v31, %v9351_v62  ;;  %v1461_v62 = vsel %vm1454_vm3, %v4804_v54, %v9354_v19 }
 0x163   : > { %v5849_v5 = vpop.permute.xlu0 %1296 }
 0x167   : > { %1388 = vrot.lane.b32.xlu1 %v1261_v33, %s4679_s19  ;;  %1648 = vrot.lane.b32.xlu2 %v5858_v23, %s4680_s20  ;;  %v5878_v33 = vsel %vm1519_vm4, %v1458_v36, %v5757_v32 }
 0x169   : > { %1386 = vrot.lane.b32.xlu0 %v1258_v9, %s4679_s19  ;;  %v5864_v27 = vpop.permute.xlu2 %1324  ;;  %v5866_v56 = vpop.permute.xlu1 %1304  ;;  %v1456_v9 = vsel %vm1454_vm3, %v4775_v37, %v9352_v7  ;;  %v9353_v37 = vld [vmem:[#allocation44_spill] sm:$0xff]  ;;  %v9355_v7 = vld [vmem:[#allocation37_spill] sm:$0xff] }
 0x16a   : > { %v5893_v14 = vsel %vm1519_vm4, %v1456_v9, %v5685_v59  ;;  %v1460_v25 = vsel %vm1454_vm3, %v4750_v22, %v9353_v37  ;;  %v5911_v59 = vsel %vm1519_vm4, %v1461_v62, %v5775_v55  ;;  %v1459_v9 = vsel %vm1454_vm3, %v4728_v12, %v9355_v7  ;;  %v9356_v12 = vld [vmem:[#allocation51_spill] sm:$0xff]  ;;  %v9359_v7 = vld [vmem:[#allocation77_spill] sm:$0xff] }
 0x16b   : > { %v5868_v20 = vpop.permute.xlu0 %1302  ;;  %v5915_v36 = vsel %vm1519_vm4, %v1460_v25, %v5779_v40  ;;  %v5926_v22 = vsel %vm1519_vm4, %v1459_v9, %v5703_v10  ;;  %v1463_v37 = vsel %vm1454_vm3, %v4787_v47, %v9356_v12  ;;  %v9357_v25 = vld [vmem:[#allocation87_spill] sm:$0xff]  ;;  %v1462_v9 = vsel %vm1454_vm3, %v4793_v49, %v9359_v7  ;;  %v9360_v49 = vld [vmem:[#allocation58_spill] sm:$0xff] }
 0x16c   : > { %v1464_v19 = vsel %vm1454_vm3, %v4837_v11, %v9357_v25  ;;  %v5948_v62 = vsel %vm1519_vm4, %v1463_v37, %v5797_v3  ;;  %v5959_v47 = vsel %vm1519_vm4, %v1462_v9, %v5721_v41  ;;  %v1466_v12 = vsel %vm1454_vm3, %v4820_v4, %v9360_v49  ;;  %v9361_v37 = vld [vmem:[#allocation95_spill] sm:$0xff]  ;;  %v9362_v7 = vld [vmem:[#allocation86_spill] sm:$0xff] }
 0x16d   : > { %v5944_v10 = vsel %vm1519_vm4, %v1464_v19, %v5793_v61  ;;  %9358 = vst [vmem:[#allocation48_spill] sm:$0xff] %v5948_v62  ;;  %v1467_v25 = vsel %vm1454_vm3, %v4870_v44, %v9361_v37  ;;  %v5981_v19 = vsel %vm1519_vm4, %v1466_v12, %v5815_v50  ;;  %v1465_v9 = vsel %vm1454_vm3, %v4826_v6, %v9362_v7  ;;  %v9363_v6 = vld [vmem:[#allocation67_spill] sm:$0xff] }
 0x16e   : > { %v5977_v41 = vsel %vm1519_vm4, %v1467_v25, %v5811_v21  ;;  %v5992_v4 = vsel %vm1519_vm4, %v1465_v9, %v5737_v13  ;;  %v1469_v49 = vsel %vm1454_vm3, %v4853_v35, %v9363_v6  ;;  %v1470_v12 = vsel %vm1454_vm3, %v4903_v17, %v5449_v42  ;;  %v9364_v25 = vld [vmem:[#allocation94_spill] sm:$0xff] }
 0x16f   : > { %1654 = vrot.lane.b32.xlu2 %v5878_v33, %s4680_s20  ;;  %1652 = vrot.lane.b32.xlu1 %v5882_v43, %s4680_s20  ;;  %v6010_v13 = vsel %vm1519_vm4, %v1470_v12, %v5829_v18  ;;  %v6014_v37 = vsel %vm1519_vm4, %v1469_v49, %v5833_v52  ;;  %v1468_v7 = vsel %vm1454_vm3, %v4859_v38, %v9364_v25  ;;  %v9365_v38 = vld [vmem:[#allocation76_spill] sm:$0xff]  ;;  %v9366_v49 = vld [vmem:[#allocation101_spill] sm:$0xff] }
 0x170   : > { %v6025_v35 = vsel %vm1519_vm4, %v1468_v7, %v5755_v45  ;;  %v1472_v52 = vsel %vm1454_vm3, %v4886_v0, %v9365_v38  ;;  %v1473_v9 = vsel %vm1454_vm3, %v4936_v58, %v5473_v63  ;;  %v1471_v12 = vsel %vm1454_vm3, %v4892_v2, %v9366_v49  ;;  %v9368_v2 = vld [vmem:[#allocation85_spill] sm:$0xff]  ;;  %v9369_v38 = vld [vmem:[#allocation103_spill] sm:$0xff] }
 0x171   : > { %1650 = vrot.lane.b32.xlu0 %v5893_v14, %s4680_s20  ;;  %v5897_v31 = vpop.permute.xlu2 %1330  ;;  %v5899_v32 = vpop.permute.xlu1 %1310  ;;  %v6043_v45 = vsel %vm1519_vm4, %v1473_v9, %v5845_v1  ;;  %v6047_v6 = vsel %vm1519_vm4, %v1472_v52, %v5849_v5  ;;  %v6058_v0 = vsel %vm1519_vm4, %v1471_v12, %v5773_v15  ;;  %v1475_v5 = vsel %vm1454_vm3, %v9251_v39, %v9368_v2  ;;  %v9371_v9 = vld [vmem:[#allocation11_spill] sm:$0xff]  ;;  %v9373_v2 = vld [vmem:[#allocation105_spill] sm:$0xff] }
 0x172   : > { %9367 = vst [vmem:[#allocation50_spill] sm:$0xff] %v6058_v0  ;;  %v1476_v25 = vsel %vm1454_vm3, %v4969_v53, %v5491_v26  ;;  %v6080_v7 = vsel %vm1519_vm4, %v1475_v5, %v5868_v20  ;;  %v1474_v52 = vsel %vm1454_vm3, %v4925_v51, %v9369_v38  ;;  %v9370_v51 = vld [vmem:[#allocation93_spill] sm:$0xff]  ;;  %v1479_v49 = vsel %vm1454_vm3, %v9371_v9, %v5509_v46  ;;  %v9374_v5 = vld [vmem:[#allocation6_spill] sm:$0xff]  ;;  %v9375_v38 = vld [vmem:[#allocation100_spill] sm:$0xff] }
 0x173   : > { %v5901_v29 = vpop.permute.xlu0 %1308  ;;  %v6076_v15 = vsel %vm1519_vm4, %v1476_v25, %v5866_v56  ;;  %v6091_v53 = vsel %vm1519_vm4, %v1474_v52, %v5791_v34  ;;  %v1478_v20 = vsel %vm1454_vm3, %v9260_v60, %v9370_v51  ;;  %v6109_v34 = vsel %vm1519_vm4, %v1479_v49, %v5899_v32  ;;  %v9376_v52 = vld [vmem:[#allocation7_spill] sm:$0xff]  ;;  %v9378_v9 = vld [vmem:[#allocation17_spill] sm:$0xff] }
 0x174   : > { %9372 = vst [vmem:[#allocation39_spill] sm:$0xff] %v6109_v34  ;;  %v6113_v12 = vsel %vm1519_vm4, %v1478_v20, %v5901_v29  ;;  %v1477_v25 = vsel %vm1454_vm3, %v9374_v5, %v9373_v2  ;;  %v1481_v51 = vsel %vm1454_vm3, %v9376_v52, %v9375_v38  ;;  %v9377_v20 = vld [vmem:[#allocation110_spill] sm:$0xff]  ;;  %v9380_v5 = vld [vmem:[#allocation107_spill] sm:$0xff] }
 0x175   : > { %v6124_v46 = vsel %vm1519_vm4, %v1477_v25, %v5809_v28  ;;  %v1482_v49 = vsel %vm1454_vm3, %v9378_v9, %v9377_v20  ;;  %v9381_v25 = vld [vmem:[#allocation9_spill] sm:$0xff] }
 0x176   : > { %v9383_v20 = vld [vmem:[#allocation13_spill] sm:$0xff] }
 0x177   : > { %1660 = vrot.lane.b32.xlu2 %v5911_v59, %s4680_s20  ;;  %1658 = vrot.lane.b32.xlu1 %v5915_v36, %s4680_s20 }
 0x179   : > { %1656 = vrot.lane.b32.xlu0 %v5926_v22, %s4680_s20  ;;  %v5930_v54 = vpop.permute.xlu2 %1336  ;;  %v5932_v55 = vpop.permute.xlu1 %1316 }
 0x17a   : > { %v6142_v28 = vsel %vm1519_vm4, %v1482_v49, %v5932_v55  ;;  %v9384_v49 = vld [vmem:[#allocation113_spill] sm:$0xff] }
 0x17b   : > { %v5934_v40 = vpop.permute.xlu0 %1314  ;;  %9379 = vst [vmem:[#allocation55_spill] sm:$0xff] %v6142_v28 }
 0x17c   : > { %v6146_v2 = vsel %vm1519_vm4, %v1481_v51, %v5934_v40  ;;  %v9382_v51 = vld [vmem:[#allocation102_spill] sm:$0xff] }
 0x17d   : > { %v1484_v9 = vsel %vm1454_vm3, %v9383_v20, %v9382_v51 }
 0x17f   : > { %1666 = vrot.lane.b32.xlu2 %v5944_v10, %s4680_s20  ;;  %1664 = vrot.lane.b32.xlu1 %v5948_v62, %s4680_s20  ;;  %v9389_v62 = vld [vmem:[#allocation15_spill] sm:$0xff] }
 0x181   : > { %1662 = vrot.lane.b32.xlu0 %v5959_v47, %s4680_s20  ;;  %v5963_v11 = vpop.permute.xlu2 %1342  ;;  %v5965_v61 = vpop.permute.xlu1 %1322 }
 0x183   : > { %v5967_v3 = vpop.permute.xlu0 %1320 }
 0x187   : > { %1672 = vrot.lane.b32.xlu2 %v5977_v41, %s4680_s20  ;;  %1670 = vrot.lane.b32.xlu1 %v5981_v19, %s4680_s20 }
 0x189   : > { %1668 = vrot.lane.b32.xlu0 %v5992_v4, %s4680_s20  ;;  %v5996_v44 = vpop.permute.xlu2 %1348  ;;  %v5998_v21 = vpop.permute.xlu1 %1328 }
 0x18b   : > { %v6000_v50 = vpop.permute.xlu0 %1326 }
 0x18f   : > { %1678 = vrot.lane.b32.xlu2 %v6010_v13, %s4680_s20  ;;  %1676 = vrot.lane.b32.xlu1 %v6014_v37, %s4680_s20 }
 0x191   : > { %1674 = vrot.lane.b32.xlu0 %v6025_v35, %s4680_s20  ;;  %v6029_v17 = vpop.permute.xlu2 %1354  ;;  %v6031_v42 = vpop.permute.xlu1 %1334 }
 0x193   : > { %v6033_v18 = vpop.permute.xlu0 %1332 }
 0x197   : > { %1684 = vrot.lane.b32.xlu2 %v6043_v45, %s4680_s20  ;;  %1682 = vrot.lane.b32.xlu1 %v6047_v6, %s4680_s20 }
 0x199   : > { %1680 = vrot.lane.b32.xlu0 %v6058_v0, %s4680_s20  ;;  %v6062_v58 = vpop.permute.xlu2 %1360  ;;  %v6064_v63 = vpop.permute.xlu1 %1340  ;;  %v9388_v0 = vld [vmem:[#allocation109_spill] sm:$0xff] }
 0x19a   : > { %v1483_v23 = vsel %vm1454_vm3, %v9389_v62, %v9388_v0  ;;  %v9391_v62 = vld [vmem:[#allocation104_spill] sm:$0xff]  ;;  %v9392_v0 = vld [vmem:[#allocation19_spill] sm:$0xff] }
 0x19b   : > { %v6066_v1 = vpop.permute.xlu0 %1338  ;;  %v6190_v51 = vsel %vm1519_vm4, %v1483_v23, %v5843_v8 }
 0x19c   : > { %9390 = vst [vmem:[#allocation64_spill] sm:$0xff] %v6190_v51 }
 0x19f   : > { %1690 = vrot.lane.b32.xlu2 %v6076_v15, %s4680_s20  ;;  %1688 = vrot.lane.b32.xlu1 %v6080_v7, %s4680_s20 }
 0x1a1   : > { %1686 = vrot.lane.b32.xlu0 %v6091_v53, %s4680_s20  ;;  %v6095_v26 = vpop.permute.xlu2 %1366  ;;  %v6097_v39 = vpop.permute.xlu1 %1346 }
 0x1a3   : > { %v6099_v56 = vpop.permute.xlu0 %1344 }
 0x1a7   : > { %1696 = vrot.lane.b32.xlu2 %v6109_v34, %s4680_s20  ;;  %1694 = vrot.lane.b32.xlu1 %v6113_v12, %s4680_s20  ;;  %v1480_v34 = vsel %vm1454_vm3, %v9381_v25, %v9380_v5  ;;  %v9385_v5 = vld [vmem:[#allocation23_spill] sm:$0xff] }
 0x1a8   : > { %v6157_v38 = vsel %vm1519_vm4, %v1480_v34, %v5827_v16  ;;  %v1485_v25 = vsel %vm1454_vm3, %v9385_v5, %v9384_v49  ;;  %v6179_v34 = vsel %vm1519_vm4, %v1484_v9, %v5967_v3  ;;  %v1487_v9 = vsel %vm1454_vm3, %v9392_v0, %v9391_v62  ;;  %v9393_v49 = vld [vmem:[#allocation116_spill] sm:$0xff]  ;;  %v9394_v5 = vld [vmem:[#allocation29_spill] sm:$0xff] }
 0x1a9   : > { %1692 = vrot.lane.b32.xlu0 %v6124_v46, %s4680_s20  ;;  %v6128_v60 = vpop.permute.xlu2 %1372  ;;  %v6130_v32 = vpop.permute.xlu1 %1352  ;;  %v6175_v16 = vsel %vm1519_vm4, %v1485_v25, %v5965_v61  ;;  %9387 = vst [vmem:[#allocation46_spill] sm:$0xff] %v6179_v34  ;;  %v1488_v25 = vsel %vm1454_vm3, %v9394_v5, %v9393_v49  ;;  %v6212_v23 = vsel %vm1519_vm4, %v1487_v9, %v6000_v50  ;;  %v9403_v49 = vld [vmem:[#allocation119_spill] sm:$0xff] }
 0x1aa   : > { %9386 = vst [vmem:[#allocation57_spill] sm:$0xff] %v6175_v16  ;;  %v6208_v8 = vsel %vm1519_vm4, %v1488_v25, %v5998_v21  ;;  %v9404_v5 = vld [vmem:[#allocation35_spill] sm:$0xff] }
 0x1ab   : > { %v6132_v29 = vpop.permute.xlu0 %1350  ;;  %9395 = vst [vmem:[#allocation66_spill] sm:$0xff] %v6208_v8  ;;  %v1491_v25 = vsel %vm1454_vm3, %v9404_v5, %v9403_v49  ;;  %v9413_v49 = vld [vmem:[#allocation2_spill] sm:$0xff] }
 0x1ac   : > { %9396 = vst [vmem:[#allocation53_spill] sm:$0xff] %v6212_v23  ;;  %v9414_v5 = vld [vmem:[#allocation42_spill] sm:$0xff] }
 0x1af   : > { %1702 = vrot.lane.b32.xlu2 %v6142_v28, %s4680_s20  ;;  %1700 = vrot.lane.b32.xlu1 %v6146_v2, %s4680_s20  ;;  %v9398_v28 = vld [vmem:[#allocation21_spill] sm:$0xff] }
 0x1b1   : > { %1698 = vrot.lane.b32.xlu0 %v6157_v38, %s4680_s20  ;;  %v6161_v55 = vpop.permute.xlu2 %1378  ;;  %v6163_v40 = vpop.permute.xlu1 %1358 }
 0x1b3   : > { %v6165_v52 = vpop.permute.xlu0 %1356 }
 0x1b7   : > { %1708 = vrot.lane.b32.xlu2 %v6175_v16, %s4680_s20  ;;  %1706 = vrot.lane.b32.xlu1 %v6179_v34, %s4680_s20  ;;  %v9397_v16 = vld [vmem:[#allocation112_spill] sm:$0xff] }
 0x1b9   : > { %1704 = vrot.lane.b32.xlu0 %v6190_v51, %s4680_s20  ;;  %v6194_v61 = vpop.permute.xlu2 %1384  ;;  %v6196_v3 = vpop.permute.xlu1 %1364  ;;  %v1486_v51 = vsel %vm1454_vm3, %v9398_v28, %v9397_v16  ;;  %v9401_v28 = vld [vmem:[#allocation106_spill] sm:$0xff]  ;;  %v9402_v16 = vld [vmem:[#allocation25_spill] sm:$0xff] }
 0x1ba   : > { %v6223_v62 = vsel %vm1519_vm4, %v1486_v51, %v5864_v27  ;;  %v1490_v9 = vsel %vm1454_vm3, %v9402_v16, %v9401_v28  ;;  %v6241_v27 = vsel %vm1519_vm4, %v1491_v25, %v6031_v42  ;;  %v1494_v25 = vsel %vm1454_vm3, %v9414_v5, %v9413_v49  ;;  %v9422_v49 = vld [vmem:[#allocation12_spill] sm:$0xff]  ;;  %v9423_v5 = vld [vmem:[#allocation49_spill] sm:$0xff] }
 0x1bb   : > { %v6198_v20 = vpop.permute.xlu0 %1362  ;;  %9399 = vst [vmem:[#allocation73_spill] sm:$0xff] %v6223_v62  ;;  %v6245_v51 = vsel %vm1519_vm4, %v1490_v9, %v6033_v18 }
 0x1bc   : > { %9405 = vst [vmem:[#allocation62_spill] sm:$0xff] %v6241_v27 }
 0x1bd   : > { %9406 = vst [vmem:[#allocation82_spill] sm:$0xff] %v6245_v51 }
 0x1bf   : > { %1714 = vrot.lane.b32.xlu2 %v6208_v8, %s4680_s20  ;;  %1712 = vrot.lane.b32.xlu1 %v6212_v23, %s4680_s20  ;;  %v9407_v23 = vld [vmem:[#allocation115_spill] sm:$0xff] }
 0x1c1   : > { %1710 = vrot.lane.b32.xlu0 %v6223_v62, %s4680_s20  ;;  %v6227_v21 = vpop.permute.xlu1 %1370  ;;  %v6229_v50 = vpop.permute.xlu2 %1648 }
 0x1c2   : > { %9400 = vst [vmem:[#allocation75_spill] sm:$0xff] %v6229_v50  ;;  %v9408_v50 = vld [vmem:[#allocation27_spill] sm:$0xff] }
 0x1c3   : > { %v6231_v0 = vpop.permute.xlu0 %1368  ;;  %v1489_v62 = vsel %vm1454_vm3, %v9408_v50, %v9407_v23  ;;  %v9411_v23 = vld [vmem:[#allocation108_spill] sm:$0xff]  ;;  %v9412_v50 = vld [vmem:[#allocation31_spill] sm:$0xff] }
 0x1c4   : > { %v6256_v28 = vsel %vm1519_vm4, %v1489_v62, %v5897_v31  ;;  %v1493_v9 = vsel %vm1454_vm3, %v9412_v50, %v9411_v23  ;;  %v6274_v31 = vsel %vm1519_vm4, %v1494_v25, %v6064_v63  ;;  %v1497_v25 = vsel %vm1454_vm3, %v9423_v5, %v9422_v49  ;;  %v9432_v49 = vld [vmem:[#allocation16_spill] sm:$0xff] }
 0x1c5   : > { %9409 = vst [vmem:[#allocation84_spill] sm:$0xff] %v6256_v28  ;;  %v6278_v62 = vsel %vm1519_vm4, %v1493_v9, %v6066_v1  ;;  %v9433_v5 = vld [vmem:[#allocation56_spill] sm:$0xff] }
 0x1c6   : > { %9415 = vst [vmem:[#allocation91_spill] sm:$0xff] %v6278_v62 }
 0x1c7   : > { %1720 = vrot.lane.b32.xlu2 %v6241_v27, %s4680_s20  ;;  %1718 = vrot.lane.b32.xlu1 %v6245_v51, %s4680_s20 }
 0x1c9   : > { %1716 = vrot.lane.b32.xlu0 %v6256_v28, %s4680_s20  ;;  %v6260_v42 = vpop.permute.xlu1 %1376  ;;  %v6262_v18 = vpop.permute.xlu2 %1654  ;;  %v9416_v28 = vld [vmem:[#allocation118_spill] sm:$0xff] }
 0x1ca   : > { %9410 = vst [vmem:[#allocation71_spill] sm:$0xff] %v6262_v18  ;;  %v9417_v18 = vld [vmem:[#allocation33_spill] sm:$0xff] }
 0x1cb   : > { %v6264_v16 = vpop.permute.xlu0 %1374  ;;  %v1492_v51 = vsel %vm1454_vm3, %v9417_v18, %v9416_v28  ;;  %v9420_v28 = vld [vmem:[#allocation111_spill] sm:$0xff]  ;;  %v9421_v18 = vld [vmem:[#allocation38_spill] sm:$0xff] }
 0x1cc   : > { %v6289_v23 = vsel %vm1519_vm4, %v1492_v51, %v5930_v54  ;;  %v1496_v9 = vsel %vm1454_vm3, %v9421_v18, %v9420_v28  ;;  %v6307_v54 = vsel %vm1519_vm4, %v1497_v25, %v6097_v39  ;;  %v1500_v25 = vsel %vm1454_vm3, %v9433_v5, %v9432_v49  ;;  %v9444_v49 = vld [vmem:[#allocation22_spill] sm:$0xff]  ;;  %v9445_v5 = vld [vmem:[#allocation65_spill] sm:$0xff] }
 0x1cd   : > { %9418 = vst [vmem:[#allocation80_spill] sm:$0xff] %v6289_v23  ;;  %v6311_v51 = vsel %vm1519_vm4, %v1496_v9, %v6099_v56 }
 0x1ce   : > { %9424 = vst [vmem:[#allocation88_spill] sm:$0xff] %v6307_v54 }
 0x1cf   : > { %1726 = vrot.lane.b32.xlu2 %v6274_v31, %s4680_s20  ;;  %1724 = vrot.lane.b32.xlu1 %v6278_v62, %s4680_s20  ;;  %9425 = vst [vmem:[#allocation89_spill] sm:$0xff] %v6311_v51 }
 0x1d1   : > { %1722 = vrot.lane.b32.xlu0 %v6289_v23, %s4680_s20  ;;  %v6293_v63 = vpop.permute.xlu1 %1382  ;;  %v6295_v1 = vpop.permute.xlu2 %1660  ;;  %v9426_v23 = vld [vmem:[#allocation121_spill] sm:$0xff] }
 0x1d2   : > { %9419 = vst [vmem:[#allocation99_spill] sm:$0xff] %v6295_v1  ;;  %v9427_v1 = vld [vmem:[#allocation40_spill] sm:$0xff] }
 0x1d3   : > { %v6297_v50 = vpop.permute.xlu0 %1380  ;;  %v1495_v62 = vsel %vm1454_vm3, %v9427_v1, %v9426_v23  ;;  %v9430_v23 = vld [vmem:[#allocation114_spill] sm:$0xff]  ;;  %v9431_v1 = vld [vmem:[#allocation45_spill] sm:$0xff] }
 0x1d4   : > { %v6322_v28 = vsel %vm1519_vm4, %v1495_v62, %v5963_v11  ;;  %v1499_v9 = vsel %vm1454_vm3, %v9431_v1, %v9430_v23  ;;  %v6340_v11 = vsel %vm1519_vm4, %v1500_v25, %v6130_v32  ;;  %v1503_v25 = vsel %vm1454_vm3, %v9445_v5, %v9444_v49  ;;  %v9454_v49 = vld [vmem:[#allocation28_spill] sm:$0xff]  ;;  %v9455_v5 = vld [vmem:[#allocation74_spill] sm:$0xff] }
 0x1d5   : > { %9428 = vst [vmem:[#allocation96_spill] sm:$0xff] %v6322_v28  ;;  %v6344_v62 = vsel %vm1519_vm4, %v1499_v9, %v6132_v29 }
 0x1d6   : > { %9434 = vst [vmem:[#allocation60_spill] sm:$0xff] %v6340_v11 }
 0x1d7   : > { %1732 = vrot.lane.b32.xlu2 %v6307_v54, %s4680_s20  ;;  %1730 = vrot.lane.b32.xlu1 %v6311_v51, %s4680_s20  ;;  %9435 = vst [vmem:[#allocation59_spill] sm:$0xff] %v6344_v62 }
 0x1d9   : > { %1728 = vrot.lane.b32.xlu0 %v6322_v28, %s4680_s20  ;;  %v6326_v39 = vpop.permute.xlu1 %1388  ;;  %v6328_v56 = vpop.permute.xlu2 %1666  ;;  %v9436_v28 = vld [vmem:[#allocation10_spill] sm:$0xff] }
 0x1da   : > { %9429 = vst [vmem:[#allocation97_spill] sm:$0xff] %v6328_v56  ;;  %v9437_v56 = vld [vmem:[#allocation47_spill] sm:$0xff] }
 0x1db   : > { %v6330_v18 = vpop.permute.xlu0 %1386  ;;  %v1498_v51 = vsel %vm1454_vm3, %v9437_v56, %v9436_v28  ;;  %v9442_v28 = vld [vmem:[#allocation117_spill] sm:$0xff]  ;;  %v9443_v56 = vld [vmem:[#allocation52_spill] sm:$0xff] }
 0x1dc   : > { %v6355_v23 = vsel %vm1519_vm4, %v1498_v51, %v5996_v44  ;;  %v1502_v9 = vsel %vm1454_vm3, %v9443_v56, %v9442_v28  ;;  %v6373_v44 = vsel %vm1519_vm4, %v1503_v25, %v6163_v40  ;;  %v1506_v25 = vsel %vm1454_vm3, %v9455_v5, %v9454_v49  ;;  %v9466_v49 = vld [vmem:[#allocation20_spill] sm:$0xff]  ;;  %v9467_v5 = vld [vmem:[#allocation83_spill] sm:$0xff] }
 0x1dd   : > { %9438 = vst [vmem:[#allocation68_spill] sm:$0xff] %v6355_v23  ;;  %v6377_v51 = vsel %vm1519_vm4, %v1502_v9, %v6165_v52 }
 0x1de   : > { %9446 = vst [vmem:[#allocation37_spill] sm:$0xff] %v6373_v44 }
 0x1df   : > { %1738 = vrot.lane.b32.xlu2 %v6340_v11, %s4680_s20  ;;  %1736 = vrot.lane.b32.xlu1 %v6344_v62, %s4680_s20 }
 0x1e1   : > { %1734 = vrot.lane.b32.xlu0 %v6355_v23, %s4680_s20  ;;  %v6359_v32 = vpop.permute.xlu2 %1672  ;;  %v6361_v29 = vpop.permute.xlu1 %1652 }
 0x1e2   : > { %9439 = vst [vmem:[#allocation69_spill] sm:$0xff] %v6359_v32  ;;  %v9447_v32 = vld [vmem:[#allocation5_spill] sm:$0xff] }
 0x1e3   : > { %9440 = vst [vmem:[#allocation44_spill] sm:$0xff] %v6361_v29  ;;  %v6363_v1 = vpop.permute.xlu0 %1650  ;;  %v9448_v29 = vld [vmem:[#allocation54_spill] sm:$0xff] }
 0x1e4   : > { %9441 = vst [vmem:[#allocation78_spill] sm:$0xff] %v6363_v1  ;;  %v1501_v1 = vsel %vm1454_vm3, %v9448_v29, %v9447_v32  ;;  %v9452_v32 = vld [vmem:[#allocation120_spill] sm:$0xff]  ;;  %v9453_v29 = vld [vmem:[#allocation61_spill] sm:$0xff] }
 0x1e5   : > { %v6388_v28 = vsel %vm1519_vm4, %v1501_v1, %v6029_v17  ;;  %v1505_v9 = vsel %vm1454_vm3, %v9453_v29, %v9452_v32  ;;  %v6406_v17 = vsel %vm1519_vm4, %v1506_v25, %v6196_v3  ;;  %v1509_v25 = vsel %vm1454_vm3, %v9467_v5, %v9466_v49  ;;  %v9478_v49 = vld [vmem:[#allocation36_spill] sm:$0xff] }
 0x1e6   : > { %9449 = vst [vmem:[#allocation51_spill] sm:$0xff] %v6388_v28  ;;  %v6410_v1 = vsel %vm1519_vm4, %v1505_v9, %v6198_v20  ;;  %v9479_v5 = vld [vmem:[#allocation92_spill] sm:$0xff] }
 0x1e7   : > { %1744 = vrot.lane.b32.xlu2 %v6373_v44, %s4680_s20  ;;  %1742 = vrot.lane.b32.xlu1 %v6377_v51, %s4680_s20  ;;  %9456 = vst [vmem:[#allocation58_spill] sm:$0xff] %v6406_v17  ;;  %v9458_v44 = vld [vmem:[#allocation8_spill] sm:$0xff] }
 0x1e8   : > { %9457 = vst [vmem:[#allocation95_spill] sm:$0xff] %v6410_v1 }
 0x1e9   : > { %1740 = vrot.lane.b32.xlu0 %v6388_v28, %s4680_s20  ;;  %v6392_v40 = vpop.permute.xlu2 %1678  ;;  %v6394_v52 = vpop.permute.xlu1 %1658 }
 0x1ea   : > { %9450 = vst [vmem:[#allocation87_spill] sm:$0xff] %v6392_v40  ;;  %v9459_v40 = vld [vmem:[#allocation63_spill] sm:$0xff] }
 0x1eb   : > { %9451 = vst [vmem:[#allocation77_spill] sm:$0xff] %v6394_v52  ;;  %v6396_v56 = vpop.permute.xlu0 %1656  ;;  %v1504_v52 = vsel %vm1454_vm3, %v9459_v40, %v9458_v44  ;;  %v9464_v44 = vld [vmem:[#allocation3_spill] sm:$0xff]  ;;  %v9465_v40 = vld [vmem:[#allocation70_spill] sm:$0xff] }
 0x1ec   : > { %v6421_v32 = vsel %vm1519_vm4, %v1504_v52, %v6062_v58  ;;  %v1508_v9 = vsel %vm1454_vm3, %v9465_v40, %v9464_v44  ;;  %v6439_v58 = vsel %vm1519_vm4, %v1509_v25, %v6227_v21  ;;  %v1512_v25 = vsel %vm1454_vm3, %v9479_v5, %v9478_v49  ;;  %v9489_v5 = vld [vmem:[#allocation34_spill] sm:$0xff] }
 0x1ed   : > { %9460 = vst [vmem:[#allocation86_spill] sm:$0xff] %v6421_v32  ;;  %v6443_v52 = vsel %vm1519_vm4, %v1508_v9, %v6231_v0 }
 0x1ee   : > { %9468 = vst [vmem:[#allocation101_spill] sm:$0xff] %v6439_v58 }
 0x1ef   : > { %1750 = vrot.lane.b32.xlu2 %v6406_v17, %s4680_s20  ;;  %1748 = vrot.lane.b32.xlu1 %v6410_v1, %s4680_s20  ;;  %9469 = vst [vmem:[#allocation85_spill] sm:$0xff] %v6443_v52 }
 0x1f1   : > { %1746 = vrot.lane.b32.xlu0 %v6421_v32, %s4680_s20  ;;  %v6425_v3 = vpop.permute.xlu2 %1684  ;;  %v6427_v20 = vpop.permute.xlu1 %1664 }
 0x1f2   : > { %9461 = vst [vmem:[#allocation67_spill] sm:$0xff] %v6425_v3  ;;  %v9470_v3 = vld [vmem:[#allocation14_spill] sm:$0xff] }
 0x1f3   : > { %9462 = vst [vmem:[#allocation94_spill] sm:$0xff] %v6427_v20  ;;  %v6429_v29 = vpop.permute.xlu0 %1662  ;;  %v9471_v20 = vld [vmem:[#allocation72_spill] sm:$0xff] }
 0x1f4   : > { %9463 = vst [vmem:[#allocation76_spill] sm:$0xff] %v6429_v29  ;;  %v1507_v29 = vsel %vm1454_vm3, %v9471_v20, %v9470_v3  ;;  %v9476_v3 = vld [vmem:[#allocation4_spill] sm:$0xff]  ;;  %v9477_v20 = vld [vmem:[#allocation79_spill] sm:$0xff] }
 0x1f5   : > { %v6454_v44 = vsel %vm1519_vm4, %v1507_v29, %v6095_v26  ;;  %v1511_v9 = vsel %vm1454_vm3, %v9477_v20, %v9476_v3  ;;  %v6472_v26 = vsel %vm1519_vm4, %v1512_v25, %v6260_v42  ;;  %v9490_v25 = vld [vmem:[#allocation90_spill] sm:$0xff] }
 0x1f6   : > { %9472 = vst [vmem:[#allocation103_spill] sm:$0xff] %v6454_v44  ;;  %v6476_v29 = vsel %vm1519_vm4, %v1511_v9, %v6264_v16  ;;  %v9486_v9 = vld [vmem:[#allocation41_spill] sm:$0xff] }
 0x1f7   : > { %1756 = vrot.lane.b32.xlu2 %v6439_v58, %s4680_s20  ;;  %1754 = vrot.lane.b32.xlu1 %v6443_v52, %s4680_s20  ;;  %9480 = vst [vmem:[#allocation6_spill] sm:$0xff] %v6472_v26  ;;  %v1515_v49 = vsel %vm1454_vm3, %v5432_v57, %v9486_v9 }
 0x1f8   : > { %9481 = vst [vmem:[#allocation100_spill] sm:$0xff] %v6476_v29 }
 0x1f9   : > { %1752 = vrot.lane.b32.xlu0 %v6454_v44, %s4680_s20  ;;  %v6458_v21 = vpop.permute.xlu2 %1690  ;;  %v6460_v0 = vpop.permute.xlu1 %1670 }
 0x1fa   : > { %9473 = vst [vmem:[#allocation93_spill] sm:$0xff] %v6458_v21  ;;  %v9482_v21 = vld [vmem:[#allocation30_spill] sm:$0xff] }
 0x1fb   : > { %9474 = vst [vmem:[#allocation11_spill] sm:$0xff] %v6460_v0  ;;  %v6462_v40 = vpop.permute.xlu0 %1668  ;;  %v9483_v0 = vld [vmem:[#allocation81_spill] sm:$0xff] }
 0x1fc   : > { %9475 = vst [vmem:[#allocation105_spill] sm:$0xff] %v6462_v40  ;;  %v1510_v40 = vsel %vm1454_vm3, %v9483_v0, %v9482_v21  ;;  %v9485_v21 = vld [vmem:[#allocation18_spill] sm:$0xff] }
 0x1fd   : > { %v6487_v3 = vsel %vm1519_vm4, %v1510_v40, %v6128_v60  ;;  %v1514_v0 = vsel %vm1454_vm3, %v9344_v48, %v9485_v21  ;;  %v6505_v60 = vsel %vm1519_vm4, %v1515_v49, %v6293_v63  ;;  %v3110_v21 = vld [vmem:[%s8921_s1 + $0x78] sm:$0xff]  ;;  %v9494_v49 = vld [vmem:[#allocation43_spill] sm:$0xff] }
 0x1fe   : > { %9487 = vst [vmem:[#allocation110_spill] sm:$0xff] %v6505_v60  ;;  %v6509_v40 = vsel %vm1519_vm4, %v1514_v0, %v6297_v50  ;;  %v9493_v0 = vld [vmem:[#allocation24_spill] sm:$0xff]  ;;  %3267 = vmatpush.msra.mxu0 %v3110_v21  ;;  %v3106_v21 = vld [vmem:[%s8921_s1 + $0x58] sm:$0xff] }
 0x1ff   : > { %1762 = vrot.lane.b32.xlu2 %v6472_v26, %s4680_s20  ;;  %1760 = vrot.lane.b32.xlu1 %v6476_v29, %s4680_s20  ;;  %9488 = vst [vmem:[#allocation17_spill] sm:$0xff] %v6509_v40  ;;  %v1513_v29 = vsel %vm1454_vm3, %v9490_v25, %v9489_v5  ;;  %v1517_v9 = vsel %vm1454_vm3, %v9346_v30, %v9493_v0  ;;  %v3105_v0 = vld [vmem:[%s8921_s1 + $0x50] sm:$0xff] }
 0x200   : > { %v6520_v57 = vsel %vm1519_vm4, %v1513_v29, %v6161_v55  ;;  %v1518_v55 = vsel %vm1454_vm3, %v5457_v24, %v9494_v49  ;;  %v3109_v29 = vld [vmem:[%s8921_s1 + $0x70] sm:$0xff]  ;;  %v6548_v25 = vsel %vm1519_vm4, %v1517_v9, %v6330_v18 }
 0x201   : > { %1758 = vrot.lane.b32.xlu0 %v6487_v3, %s4680_s20  ;;  %v6491_v42 = vpop.permute.xlu2 %1696  ;;  %v6493_v16 = vpop.permute.xlu1 %1676  ;;  %9491 = vst [vmem:[#allocation107_spill] sm:$0xff] %v6520_v57  ;;  %v6544_v5 = vsel %vm1519_vm4, %v1518_v55, %v6326_v39  ;;  %3268 = vmatpush.msra.mxu0 %v3109_v29  ;;  %v3104_v55 = vld [vmem:[%s8921_s1 + $0x48] sm:$0xff] }
 0x202   : > { %9484 = vst [vmem:[#allocation7_spill] sm:$0xff] %v6491_v42  ;;  %v9497_v42 = vld [vmem:[#allocation98_spill] sm:$0xff] }
 0x203   : > { %v6495_v20 = vpop.permute.xlu0 %1674  ;;  %9495 = vst [vmem:[#allocation102_spill] sm:$0xff] %v6548_v25 }
 0x207   : > { %1768 = vrot.lane.b32.xlu2 %v6505_v60, %s4680_s20  ;;  %1766 = vrot.lane.b32.xlu1 %v6509_v40, %s4680_s20 }
 0x209   : > { %1764 = vrot.lane.b32.xlu0 %v6520_v57, %s4680_s20  ;;  %v6524_v48 = vpop.permute.xlu2 %1702  ;;  %v6526_v63 = vpop.permute.xlu1 %1682 }
 0x20a   : > { %9492 = vst [vmem:[#allocation9_spill] sm:$0xff] %v6524_v48  ;;  %v9496_v48 = vld [vmem:[#allocation26_spill] sm:$0xff] }
 0x20b   : > { %v6528_v50 = vpop.permute.xlu0 %1680  ;;  %v1516_v30 = vsel %vm1454_vm3, %v9497_v42, %v9496_v48  ;;  %v3108_v42 = vld [vmem:[%s8921_s1 + $0x68] sm:$0xff] }
 0x20c   : > { %v6559_v24 = vsel %vm1519_vm4, %v1516_v30, %v6194_v61  ;;  %3269 = vmatpush.msra.mxu0 %v3108_v42  ;;  %v3107_v61 = vld [vmem:[%s8921_s1 + $0x60] sm:$0xff]  ;;  %v3102_v42 = vld [vmem:[%s8921_s1 + $0x38] sm:$0xff] }
 0x20d   : > { %9498 = vst [vmem:[#allocation13_spill] sm:$0xff] %v6559_v24  ;;  %v3103_v30 = vld [vmem:[%s8921_s1 + $0x40] sm:$0xff] }
 0x20e   : > { %3270 = vmatpush.msra.mxu0 %v3107_v61  ;;  %v3101_v61 = vld [vmem:[%s8921_s1 + $0x30] sm:$0xff] }
 0x20f   : > { %1774 = vrot.lane.b32.xlu2 %v6544_v5, %s4680_s20  ;;  %1772 = vrot.lane.b32.xlu1 %v6548_v25, %s4680_s20 }
 0x210   : > { %3271 = vmatpush.msra.mxu0 %v3106_v21 }
 0x211   : > { %1770 = vrot.lane.b32.xlu0 %v6559_v24, %s4680_s20  ;;  %v6563_v39 = vpop.permute.xlu2 %1708  ;;  %v6565_v18 = vpop.permute.xlu1 %1688 }
 0x212   : > { %9499 = vst [vmem:[#allocation113_spill] sm:$0xff] %v6563_v39  ;;  %3272 = vmatpush.msra.mxu0 %v3105_v0  ;;  %v3096_v39 = vld [vmem:[%s8921_s1 + $0x8] sm:$0xff] }
 0x213   : > { %v6570_v48 = vpop.permute.xlu0 %1686 }
 0x214   : > { %3273 = vmatpush.msra.mxu0 %v3104_v55  ;;  %v3100_v55 = vld [vmem:[%s8921_s1 + $0x28] sm:$0xff] }
 0x216   : > { %3274 = vmatpush.msra.mxu0 %v3103_v30 }
 0x217   : > { %1845 = vrot.lane.b32.xlu2 %v5878_v33, %s4681_s6  ;;  %1843 = vrot.lane.b32.xlu1 %v5882_v43, %s4681_s6 }
 0x218   : > { %3275 = vmatpush.msra.mxu0 %v3102_v42  ;;  %v3099_v42 = vld [vmem:[%s8921_s1 + $0x20] sm:$0xff] }
 0x219   : > { %1841 = vrot.lane.b32.xlu0 %v5893_v14, %s4681_s6  ;;  %v6587_v9 = vpop.permute.xlu2 %1714  ;;  %v6589_v49 = vpop.permute.xlu1 %1694 }
 0x21a   : > { %9500 = vst [vmem:[#allocation23_spill] sm:$0xff] %v6587_v9  ;;  %3276 = vmatpush.msra.mxu0 %v3101_v61  ;;  %v3098_v61 = vld [vmem:[%s8921_s1 + $0x18] sm:$0xff] }
 0x21b   : > { %v6594_v29 = vpop.permute.xlu0 %1692 }
 0x21c   : > { %3277 = vmatpush.msra.mxu0 %v3100_v55  ;;  %v9069_v55 = vmov 0.0  }
 0x21e   : > { %3278 = vmatpush.msra.mxu0 %v3099_v42 }
 0x21f   : > { %1851 = vrot.lane.b32.xlu2 %v5911_v59, %s4681_s6  ;;  %1849 = vrot.lane.b32.xlu1 %v5915_v36, %s4681_s6 }
 0x220   : > { %3279 = vmatpush.msra.mxu0 %v3098_v61 }
 0x221   : > { %1847 = vrot.lane.b32.xlu0 %v5926_v22, %s4681_s6  ;;  %v6611_v21 = vpop.permute.xlu2 %1720  ;;  %v6613_v0 = vpop.permute.xlu1 %1700 }
 0x222   : > { %9501 = vst [vmem:[#allocation109_spill] sm:$0xff] %v6611_v21  ;;  %v3097_v21 = vld [vmem:[%s8921_s1 + $0x10] sm:$0xff] }
 0x223   : > { %9502 = vst [vmem:[#allocation15_spill] sm:$0xff] %v6613_v0  ;;  %v6618_v30 = vpop.permute.xlu0 %1698  ;;  %3280 = vmatpush.msra.mxu0 %v3097_v21  ;;  %v3095_v0 = vld [vmem:[%s8921_s1] sm:$0xff] }
 0x225   : > { %3281 = vmatpush.msra.mxu0 %v3096_v39 }
 0x227   : > { %1857 = vrot.lane.b32.xlu2 %v5944_v10, %s4681_s6  ;;  %1855 = vrot.lane.b32.xlu1 %v9069_v55, %s4681_s6 }
 0x228   : > { %3282 = vmatpush.msra.mxu0 %v3095_v0 }
 0x229   : > { %1853 = vrot.lane.b32.xlu0 %v5959_v47, %s4681_s6  ;;  %v6635_v42 = vpop.permute.xlu2 %1726  ;;  %v6637_v9 = vpop.permute.xlu1 %1706  ;;  %3283 = vmatmul.f32.vlgmr.msra.gmra.mxu0 %v9069_v55 }
 0x22a   : > { %9503 = vst [vmem:[#allocation104_spill] sm:$0xff] %v6635_v42 }
 0x22b   : > { %v6642_v61 = vpop.permute.xlu0 %1704 }
 0x22f   : > { %1863 = vrot.lane.b32.xlu2 %v5977_v41, %s4681_s6  ;;  %1861 = vrot.lane.b32.xlu1 %v5981_v19, %s4681_s6 }
 0x231   : > { %1859 = vrot.lane.b32.xlu0 %v5992_v4, %s4681_s6  ;;  %v6654_v47 = vpop.permute.xlu2 %1732  ;;  %v6656_v39 = vpop.permute.xlu1 %1712  ;;  %3286 = vmatmul.f32.gmra.mxu0 %v9069_v55 }
 0x232   : > { %9504 = vst [vmem:[#allocation19_spill] sm:$0xff] %v6654_v47 }
 0x233   : > { %9505 = vst [vmem:[#allocation116_spill] sm:$0xff] %v6656_v39  ;;  %v6658_v21 = vpop.permute.xlu0 %1710 }
 0x234   : > { %9506 = vst [vmem:[#allocation29_spill] sm:$0xff] %v6658_v21 }
 0x237   : > { %1869 = vrot.lane.b32.xlu2 %v6010_v13, %s4681_s6  ;;  %1867 = vrot.lane.b32.xlu1 %v6014_v37, %s4681_s6 }
 0x239   : > { %1865 = vrot.lane.b32.xlu0 %v6025_v35, %s4681_s6  ;;  %v6667_v0 = vpop.permute.xlu2 %1738  ;;  %v6669_v42 = vpop.permute.xlu1 %1718  ;;  %3289 = vmatmul.f32.gmra.mxu0 %v9069_v55 }
 0x23a   : > { %9507 = vst [vmem:[#allocation112_spill] sm:$0xff] %v6667_v0 }
 0x23b   : > { %9508 = vst [vmem:[#allocation21_spill] sm:$0xff] %v6669_v42  ;;  %v6671_v47 = vpop.permute.xlu0 %1716 }
 0x23c   : > { %9509 = vst [vmem:[#allocation106_spill] sm:$0xff] %v6671_v47 }
 0x23f   : > { %1875 = vrot.lane.b32.xlu2 %v6091_v53, %s4681_s6  ;;  %1873 = vrot.lane.b32.xlu1 %v6043_v45, %s4681_s6 }
 0x241   : > { %1871 = vrot.lane.b32.xlu0 %v6047_v6, %s4681_s6  ;;  %v6680_v13 = vpop.permute.xlu2 %1744  ;;  %v6682_v21 = vpop.permute.xlu1 %1724  ;;  %3292 = vmatmul.f32.gmra.mxu0 %v9069_v55 }
 0x242   : > { %9510 = vst [vmem:[#allocation25_spill] sm:$0xff] %v6680_v13 }
 0x243   : > { %9511 = vst [vmem:[#allocation119_spill] sm:$0xff] %v6682_v21  ;;  %v6684_v0 = vpop.permute.xlu0 %1722 }
 0x244   : > { %9512 = vst [vmem:[#allocation35_spill] sm:$0xff] %v6684_v0 }
 0x247   : > { %1881 = vrot.lane.b32.xlu2 %v6124_v46, %s4681_s6  ;;  %1879 = vrot.lane.b32.xlu1 %v6076_v15, %s4681_s6 }
 0x249   : > { %1877 = vrot.lane.b32.xlu0 %v6080_v7, %s4681_s6  ;;  %v6693_v42 = vpop.permute.xlu2 %1750  ;;  %v6695_v47 = vpop.permute.xlu1 %1730  ;;  %3295 = vmatmul.f32.gmra.mxu0 %v9069_v55 }
 0x24a   : > { %9513 = vst [vmem:[#allocation115_spill] sm:$0xff] %v6693_v42 }
 0x24b   : > { %9514 = vst [vmem:[#allocation27_spill] sm:$0xff] %v6695_v47  ;;  %v6697_v13 = vpop.permute.xlu0 %1728  ;;  %v9519_v47 = vld [vmem:[#allocation64_spill] sm:$0xff] }
 0x24c   : > { %9515 = vst [vmem:[#allocation108_spill] sm:$0xff] %v6697_v13  ;;  %v9520_v13 = vld [vmem:[#allocation55_spill] sm:$0xff] }
 0x24f   : > { %1887 = vrot.lane.b32.xlu2 %v6146_v2, %s4681_s6  ;;  %1885 = vrot.lane.b32.xlu1 %v6157_v38, %s4681_s6 }
 0x251   : > { %1883 = vrot.lane.b32.xlu0 %v6113_v12, %s4681_s6  ;;  %v6706_v21 = vpop.permute.xlu2 %1756  ;;  %v6708_v0 = vpop.permute.xlu1 %1736  ;;  %3298 = vmatmul.f32.gmra.mxu0 %v9069_v55 }
 0x252   : > { %9516 = vst [vmem:[#allocation31_spill] sm:$0xff] %v6706_v21 }
 0x253   : > { %9517 = vst [vmem:[#allocation2_spill] sm:$0xff] %v6708_v0  ;;  %v6710_v42 = vpop.permute.xlu0 %1734  ;;  %v9524_v0 = vld [vmem:[#allocation73_spill] sm:$0xff] }
 0x254   : > { %9518 = vst [vmem:[#allocation42_spill] sm:$0xff] %v6710_v42  ;;  %v9525_v42 = vld [vmem:[#allocation57_spill] sm:$0xff] }
 0x257   : > { %1893 = vrot.lane.b32.xlu2 %v6179_v34, %s4681_s6  ;;  %1891 = vrot.lane.b32.xlu1 %v9519_v47, %s4681_s6 }
 0x259   : > { %1889 = vrot.lane.b32.xlu0 %v9520_v13, %s4681_s6  ;;  %v6719_v39 = vpop.permute.xlu2 %1762  ;;  %v6721_v12 = vpop.permute.xlu1 %1742  ;;  %3301 = vmatmul.f32.gmra.mxu0 %v9069_v55 }
 0x25a   : > { %9521 = vst [vmem:[#allocation118_spill] sm:$0xff] %v6719_v39 }
 0x25b   : > { %9522 = vst [vmem:[#allocation33_spill] sm:$0xff] %v6721_v12  ;;  %v6723_v21 = vpop.permute.xlu0 %1740  ;;  %v9529_v12 = vld [vmem:[#allocation82_spill] sm:$0xff] }
 0x25c   : > { %9523 = vst [vmem:[#allocation111_spill] sm:$0xff] %v6723_v21  ;;  %v9530_v21 = vld [vmem:[#allocation84_spill] sm:$0xff] }
 0x25f   : > { %1899 = vrot.lane.b32.xlu2 %v6208_v8, %s4681_s6  ;;  %1897 = vrot.lane.b32.xlu1 %v9524_v0, %s4681_s6 }
 0x261   : > { %1895 = vrot.lane.b32.xlu0 %v9525_v42, %s4681_s6  ;;  %v6732_v34 = vpop.permute.xlu2 %1768  ;;  %v6734_v47 = vpop.permute.xlu1 %1748  ;;  %3304 = vmatmul.f32.gmra.mxu0 %v9069_v55  ;;  %v9534_v55 = vld [vmem:[#allocation91_spill] sm:$0xff]  ;;  %v9574_v42 = vld [vmem:[#allocation69_spill] sm:$0xff] }
 0x262   : > { %9526 = vst [vmem:[#allocation38_spill] sm:$0xff] %v6732_v34 }
 0x263   : > { %9527 = vst [vmem:[#allocation12_spill] sm:$0xff] %v6734_v47  ;;  %v6736_v39 = vpop.permute.xlu0 %1746  ;;  %v9535_v47 = vld [vmem:[#allocation80_spill] sm:$0xff] }
 0x264   : > { %9528 = vst [vmem:[#allocation49_spill] sm:$0xff] %v6736_v39 }
 0x267   : > { %1905 = vrot.lane.b32.xlu2 %v6241_v27, %s4681_s6  ;;  %1903 = vrot.lane.b32.xlu1 %v9529_v12, %s4681_s6 }
 0x269   : > { %1901 = vrot.lane.b32.xlu0 %v9530_v21, %s4681_s6  ;;  %v6745_v0 = vpop.permute.xlu2 %1774  ;;  %v6747_v8 = vpop.permute.xlu1 %1754 }
 0x26a   : > { %9531 = vst [vmem:[#allocation121_spill] sm:$0xff] %v6745_v0 }
 0x26b   : > { %9532 = vst [vmem:[#allocation40_spill] sm:$0xff] %v6747_v8  ;;  %v6749_v34 = vpop.permute.xlu0 %1752 }
 0x26c   : > { %9533 = vst [vmem:[#allocation114_spill] sm:$0xff] %v6749_v34 }
 0x26f   : > { %1911 = vrot.lane.b32.xlu2 %v6274_v31, %s4681_s6  ;;  %1909 = vrot.lane.b32.xlu1 %v9534_v55, %s4681_s6  ;;  %v9539_v31 = vld [vmem:[#allocation89_spill] sm:$0xff] }
 0x270   : > { %v9557_v55 = vld [vmem:[#allocation97_spill] sm:$0xff] }
 0x271   : > { %1907 = vrot.lane.b32.xlu0 %v9535_v47, %s4681_s6  ;;  %v6757_v39 = vpop.permute.xlu2 %1845  ;;  %v6759_v27 = vpop.permute.xlu1 %1760  ;;  %v9558_v47 = vld [vmem:[#allocation48_spill] sm:$0xff] }
 0x272   : > { %9536 = vst [vmem:[#allocation45_spill] sm:$0xff] %v6757_v39  ;;  %v2022_v21 = vsel %vm2012_vm5, %v9558_v47, %v9557_v55  ;;  %v9561_v55 = vld [vmem:[#allocation99_spill] sm:$0xff] }
 0x273   : > { %9537 = vst [vmem:[#allocation16_spill] sm:$0xff] %v6759_v27  ;;  %v6761_v12 = vpop.permute.xlu0 %1758  ;;  %v2019_v47 = vsel %vm2012_vm5, %v5915_v36, %v9561_v55  ;;  %v9563_v55 = vld [vmem:[#allocation76_spill] sm:$0xff] }
 0x274   : > { %9538 = vst [vmem:[#allocation56_spill] sm:$0xff] %v6761_v12 }
 0x277   : > { %1917 = vrot.lane.b32.xlu2 %v6355_v23, %s4681_s6  ;;  %1915 = vrot.lane.b32.xlu1 %v6307_v54, %s4681_s6 }
 0x279   : > { %1913 = vrot.lane.b32.xlu0 %v9539_v31, %s4681_s6  ;;  %v6769_v0 = vpop.permute.xlu2 %1851  ;;  %v6771_v8 = vpop.permute.xlu1 %1766 }
 0x27a   : > { %9540 = vst [vmem:[#allocation10_spill] sm:$0xff] %v6769_v0 }
 0x27b   : > { %9541 = vst [vmem:[#allocation47_spill] sm:$0xff] %v6771_v8  ;;  %v6773_v34 = vpop.permute.xlu0 %1764 }
 0x27c   : > { %9542 = vst [vmem:[#allocation117_spill] sm:$0xff] %v6773_v34 }
 0x27f   : > { %1923 = vrot.lane.b32.xlu2 %v6388_v28, %s4681_s6  ;;  %1921 = vrot.lane.b32.xlu1 %v6340_v11, %s4681_s6  ;;  %v9546_v28 = vld [vmem:[#allocation75_spill] sm:$0xff] }
 0x280   : > { %v2013_v11 = vsel %vm2012_vm5, 0.0, %v9546_v28  ;;  %v9548_v28 = vld [vmem:[#allocation78_spill] sm:$0xff] }
 0x281   : > { %1919 = vrot.lane.b32.xlu0 %v6344_v62, %s4681_s6  ;;  %v6781_v27 = vpop.permute.xlu2 %1857  ;;  %v6783_v12 = vpop.permute.xlu1 %1772 }
 0x282   : > { %9543 = vst [vmem:[#allocation52_spill] sm:$0xff] %v6783_v12 }
 0x283   : > { %v6785_v23 = vpop.permute.xlu0 %1770 }
 0x284   : > { %9544 = vst [vmem:[#allocation22_spill] sm:$0xff] %v6785_v23 }
 0x287   : > { %1929 = vrot.lane.b32.xlu2 %v6410_v1, %s4681_s6  ;;  %1927 = vrot.lane.b32.xlu1 %v6421_v32, %s4681_s6  ;;  %v9549_v32 = vld [vmem:[#allocation32_spill] sm:$0xff] }
 0x288   : > { %v2014_v62 = vsel %vm2012_vm5, %v9549_v32, %v9548_v28  ;;  %v9551_v32 = vld [vmem:[#allocation44_spill] sm:$0xff] }
 0x289   : > { %1925 = vrot.lane.b32.xlu0 %v6377_v51, %s4681_s6  ;;  %v6793_v8 = vpop.permute.xlu2 %1863  ;;  %v6795_v34 = vpop.permute.xlu1 %1843  ;;  %v2015_v28 = vsel %vm2012_vm5, %v5893_v14, %v9551_v32  ;;  %v9552_v14 = vld [vmem:[#allocation71_spill] sm:$0xff] }
 0x28a   : > { %9545 = vst [vmem:[#allocation65_spill] sm:$0xff] %v6795_v34  ;;  %v2016_v32 = vsel %vm2012_vm5, %v5882_v43, %v9552_v14  ;;  %v2017_v43 = vsel %vm2012_vm5, %v5878_v33, %v6396_v56 }
 0x28b   : > { %v6799_v12 = vpop.permute.xlu0 %1841 }
 0x28c   : > { %v2078_v23 = vsel %vm2077_vm6, %v2013_v11, %v6799_v12  ;;  %v2079_v11 = vsel %vm2077_vm6, %v2014_v62, %v6795_v34  ;;  %v2080_v62 = vsel %vm2077_vm6, %v2015_v28, %v6757_v39 }
 0x28d   : > { %3307 = vmatmul.f32.gmra.mxu0 %v2078_v23 }
 0x28f   : > { %1935 = vrot.lane.b32.xlu2 %v6443_v52, %s4681_s6  ;;  %1933 = vrot.lane.b32.xlu1 %v6454_v44, %s4681_s6 }
 0x291   : > { %1931 = vrot.lane.b32.xlu0 %v6406_v17, %s4681_s6  ;;  %v6809_v51 = vpop.permute.xlu2 %1869  ;;  %v6811_v1 = vpop.permute.xlu1 %1849 }
 0x292   : > { %9547 = vst [vmem:[#allocation5_spill] sm:$0xff] %v6811_v1 }
 0x293   : > { %v6816_v54 = vpop.permute.xlu0 %1847 }
 0x294   : > { %9550 = vst [vmem:[#allocation54_spill] sm:$0xff] %v6816_v54  ;;  %v2081_v28 = vsel %vm2077_vm6, %v2016_v32, %v6816_v54  ;;  %v2082_v32 = vsel %vm2077_vm6, %v2017_v43, %v6811_v1  ;;  %v9556_v43 = vld [vmem:[#allocation77_spill] sm:$0xff] }
 0x295   : > { %3310 = vmatmul.f32.gmra.mxu0 %v2079_v11 }
 0x297   : > { %1941 = vrot.lane.b32.xlu2 %v6472_v26, %s4681_s6  ;;  %1939 = vrot.lane.b32.xlu1 %v6487_v3, %s4681_s6 }
 0x299   : > { %1937 = vrot.lane.b32.xlu0 %v6439_v58, %s4681_s6  ;;  %v6826_v52 = vpop.permute.xlu2 %1875  ;;  %v6828_v44 = vpop.permute.xlu1 %1855 }
 0x29b   : > { %v6833_v17 = vpop.permute.xlu0 %1853 }
 0x29d   : > { %3313 = vmatmul.f32.gmra.mxu0 %v2080_v62 }
 0x29f   : > { %1947 = vrot.lane.b32.xlu2 %v6505_v60, %s4681_s6  ;;  %1945 = vrot.lane.b32.xlu1 %v6509_v40, %s4681_s6 }
 0x2a1   : > { %1943 = vrot.lane.b32.xlu0 %v6520_v57, %s4681_s6  ;;  %v6843_v3 = vpop.permute.xlu2 %1881  ;;  %v6845_v26 = vpop.permute.xlu1 %1861 }
 0x2a3   : > { %v6850_v58 = vpop.permute.xlu0 %1859 }
 0x2a5   : > { %3316 = vmatmul.f32.gmra.mxu0 %v2081_v28 }
 0x2a7   : > { %1953 = vrot.lane.b32.xlu2 %v6544_v5, %s4681_s6  ;;  %1951 = vrot.lane.b32.xlu1 %v6548_v25, %s4681_s6  ;;  %v9554_v5 = vld [vmem:[#allocation94_spill] sm:$0xff]  ;;  %v4392_v25 = vpack.i.bf16 %v6795_v34, %v6799_v12 }
 0x2a8   : > { %v2021_v57 = vsel %vm2012_vm5, 0.0, %v9554_v5  ;;  %v2018_v5 = vsel %vm2012_vm5, %v5926_v22, %v9556_v43  ;;  %v6910_v43 = vpop.f32.mrf.mxu0 }
 0x2a9   : > { %1949 = vrot.lane.b32.xlu0 %v6559_v24, %s4681_s6  ;;  %v6860_v60 = vpop.permute.xlu2 %1887  ;;  %v6862_v40 = vpop.permute.xlu1 %1867  ;;  %v6877_v24 = vsel %vm2077_vm6, %v2021_v57, %v6781_v27  ;;  %v2083_v57 = vsel %vm2077_vm6, %v2018_v5, %v6769_v0  ;;  %9560 = vst [vmem:[#allocation74_spill] sm:$0xff] %v6910_v43  ;;  %v4397_v5 = vpack.i.bf16 %v6816_v54, %v6757_v39 }
 0x2aa   : > { %9553 = vst [vmem:[#allocation120_spill] sm:$0xff] %v6860_v60 }
 0x2ab   : > { %v6867_v14 = vpop.permute.xlu0 %1865 }
 0x2ad   : > { %3319 = vmatmul.f32.gmra.mxu0 %v2082_v32 }
 0x2af   : > { %2640 = vrot.lane.b32.xlu2 %v6877_v24, %s4679_s19  ;;  %4393 = vrot.lane.b32.xlu1 %v4392_v25, %s4678_s18 }
 0x2b1   : > { %2206 = vrot.lane.b32.xlu0 %v2078_v23, %s4678_s18  ;;  %v6883_v33 = vpop.permute.xlu2 %1893  ;;  %v6885_v56 = vpop.permute.xlu1 %1873  ;;  %v6899_v23 = vsel %vm2077_vm6, %v2022_v21, %v6850_v58 }
 0x2b2   : > { %9555 = vst [vmem:[#allocation61_spill] sm:$0xff] %v6883_v33 }
 0x2b3   : > { %v6890_v31 = vpop.permute.xlu0 %1871 }
 0x2b5   : > { %3322 = vmatmul.f32.gmra.mxu0 %v2083_v57 }
 0x2b7   : > { %2210 = vrot.lane.b32.xlu1 %v2079_v11, %s4678_s18  ;;  %2644 = vrot.lane.b32.xlu2 %v6899_v23, %s4679_s19  ;;  %v6919_v11 = vsel %vm2077_vm6, %v2019_v47, %v6833_v17  ;;  %v2020_v47 = vsel %vm2012_vm5, %v5911_v59, %v9563_v55 }
 0x2b8   : > { %v6939_v54 = vsel %vm2077_vm6, %v2020_v47, %v6828_v44 }
 0x2b9   : > { %2642 = vrot.lane.b32.xlu0 %v6781_v27, %s4679_s19  ;;  %v6906_v22 = vpop.permute.xlu2 %1899  ;;  %v6908_v25 = vpop.permute.xlu1 %1879 }
 0x2ba   : > { %9559 = vst [vmem:[#allocation28_spill] sm:$0xff] %v6906_v22 }
 0x2bb   : > { %v6915_v21 = vpop.permute.xlu0 %1877 }
 0x2bd   : > { %3325 = vmatmul.f32.gmra.mxu0 %v6919_v11 }
 0x2bf   : > { %2214 = vrot.lane.b32.xlu1 %v2080_v62, %s4678_s18  ;;  %4398 = vrot.lane.b32.xlu2 %v4397_v5, %s4678_s18  ;;  %v6941_v62 = vpop.f32.mrf.mxu0  ;;  %v9565_v5 = vld [vmem:[#allocation105_spill] sm:$0xff] }
 0x2c0   : > { %9564 = vst [vmem:[#allocation63_spill] sm:$0xff] %v6941_v62 }
 0x2c1   : > { %2646 = vrot.lane.b32.xlu0 %v6850_v58, %s4679_s19  ;;  %v6928_v43 = vpop.permute.xlu2 %1905  ;;  %v6930_v36 = vpop.permute.xlu1 %1885 }
 0x2c2   : > { %9562 = vst [vmem:[#allocation8_spill] sm:$0xff] %v6928_v43  ;;  %v2023_v43 = vsel %vm2012_vm5, %v5944_v10, %v9565_v5  ;;  %v9570_v5 = vld [vmem:[#allocation11_spill] sm:$0xff] }
 0x2c3   : > { %v6935_v34 = vpop.permute.xlu0 %1883  ;;  %v6952_v59 = vsel %vm2077_vm6, %v2023_v43, %v6845_v26 }
 0x2c5   : > { %3328 = vmatmul.f32.gmra.mxu0 %v6939_v54 }
 0x2c7   : > { %2650 = vrot.lane.b32.xlu1 %v6845_v26, %s4679_s19  ;;  %2218 = vrot.lane.b32.xlu2 %v2081_v28, %s4678_s18  ;;  %v6963_v10 = vpop.f32.mrf.mxu0  ;;  %v2024_v28 = vsel %vm2012_vm5, %v5992_v4, %v9570_v5  ;;  %v2025_v4 = vsel %vm2012_vm5, %v5981_v19, %v9574_v42  ;;  %v4402_v5 = vpack.i.bf16 %v6769_v0, %v6811_v1 }
 0x2c8   : > { %9569 = vst [vmem:[#allocation83_spill] sm:$0xff] %v6963_v10  ;;  %v6973_v43 = vsel %vm2077_vm6, %v2024_v28, %v6793_v8  ;;  %v4407_v1 = vpack.i.bf16 %v6828_v44, %v6833_v17 }
 0x2c9   : > { %2648 = vrot.lane.b32.xlu0 %v6952_v59, %s4679_s19  ;;  %v6956_v55 = vpop.permute.xlu2 %1911  ;;  %v6958_v47 = vpop.permute.xlu1 %1891 }
 0x2ca   : > { %9566 = vst [vmem:[#allocation3_spill] sm:$0xff] %v6956_v55 }
 0x2cb   : > { %9567 = vst [vmem:[#allocation70_spill] sm:$0xff] %v6958_v47  ;;  %v6960_v62 = vpop.permute.xlu0 %1889 }
 0x2cc   : > { %9568 = vst [vmem:[#allocation20_spill] sm:$0xff] %v6960_v62 }
 0x2cd   : > { %3331 = vmatmul.f32.gmra.mxu0 %v6877_v24 }
 0x2cf   : > { %2654 = vrot.lane.b32.xlu1 %v6793_v8, %s4679_s19  ;;  %2222 = vrot.lane.b32.xlu2 %v2082_v32, %s4678_s18  ;;  %v6989_v32 = vsel %vm2077_vm6, %v2025_v4, %v6867_v14  ;;  %v6997_v28 = vpop.f32.mrf.mxu0  ;;  %v2026_v4 = vsel %vm2012_vm5, %v5977_v41, %v6495_v20  ;;  %v3126_v20 = vld [vmem:[%s8921_s1 + $0xf8] sm:$0xff] }
 0x2d0   : > { %9575 = vst [vmem:[#allocation79_spill] sm:$0xff] %v6997_v28  ;;  %v7012_v0 = vsel %vm2077_vm6, %v2026_v4, %v6862_v40  ;;  %v2027_v4 = vsel %vm2012_vm5, %v6025_v35, %v6493_v16  ;;  %3476 = vmatpush.msra.mxu1 %v3126_v20  ;;  %v3124_v35 = vld [vmem:[%s8921_s1 + $0xe8] sm:$0xff] }
 0x2d1   : > { %2652 = vrot.lane.b32.xlu0 %v6973_v43, %s4679_s19  ;;  %v6977_v55 = vpop.permute.xlu2 %1917  ;;  %v6979_v39 = vpop.permute.xlu1 %1897 }
 0x2d2   : > { %9571 = vst [vmem:[#allocation14_spill] sm:$0xff] %v6977_v55 }
 0x2d3   : > { %9572 = vst [vmem:[#allocation72_spill] sm:$0xff] %v6979_v39  ;;  %v6981_v10 = vpop.permute.xlu0 %1895 }
 0x2d4   : > { %9573 = vst [vmem:[#allocation4_spill] sm:$0xff] %v6981_v10 }
 0x2d5   : > { %3334 = vmatmul.f32.gmra.mxu0 %v6899_v23 }
 0x2d7   : > { %2656 = vrot.lane.b32.xlu1 %v6989_v32, %s4679_s19  ;;  %2658 = vrot.lane.b32.xlu2 %v6867_v14, %s4679_s19  ;;  %v7023_v28 = vpop.f32.mrf.mxu0 }
 0x2d8   : > { %9578 = vst [vmem:[#allocation30_spill] sm:$0xff] %v7023_v28  ;;  %v7044_v28 = vsel %vm2077_vm6, %v2027_v4, %v6809_v51 }
 0x2d9   : > { %4403 = vrot.lane.b32.xlu0 %v4402_v5, %s4678_s18  ;;  %v7000_v19 = vpop.permute.xlu2 %1923  ;;  %v7002_v42 = vpop.permute.xlu1 %1903 }
 0x2da   : > { %9576 = vst [vmem:[#allocation36_spill] sm:$0xff] %v7000_v19 }
 0x2db   : > { %v7004_v55 = vpop.permute.xlu0 %1901 }
 0x2dd   : > { %3337 = vmatmul.f32.gmra.mxu0 %v6952_v59 }
 0x2df   : > { %2660 = vrot.lane.b32.xlu1 %v7012_v0, %s4679_s19  ;;  %2662 = vrot.lane.b32.xlu2 %v6862_v40, %s4679_s19 }
 0x2e1   : > { %2226 = vrot.lane.b32.xlu0 %v2083_v57, %s4678_s18  ;;  %v7019_v5 = vpop.permute.xlu2 %1929  ;;  %v7021_v19 = vpop.permute.xlu1 %1909  ;;  %v3125_v57 = vld [vmem:[%s8921_s1 + $0xf0] sm:$0xff] }
 0x2e2   : > { %9577 = vst [vmem:[#allocation92_spill] sm:$0xff] %v7019_v5  ;;  %v3142_v5 = vld [vmem:[%s8921_s1 + $0x178] sm:$0xff]  ;;  %3477 = vmatpush.msra.mxu1 %v3125_v57  ;;  %v7066_v57 = vpop.f32.mrf.mxu0 }
 0x2e3   : > { %v7025_v41 = vpop.permute.xlu0 %1907  ;;  %3685 = vmatpush.msra.mxu2 %v3142_v5  ;;  %v3141_v5 = vld [vmem:[%s8921_s1 + $0x170] sm:$0xff]  ;;  %9582 = vst [vmem:[#allocation34_spill] sm:$0xff] %v7066_v57 }
 0x2e4   : > { %3478 = vmatpush.msra.mxu1 %v3124_v35  ;;  %v3140_v35 = vld [vmem:[%s8921_s1 + $0x168] sm:$0xff] }
 0x2e5   : > { %3340 = vmatmul.f32.gmra.mxu0 %v6973_v43  ;;  %3686 = vmatpush.msra.mxu2 %v3141_v5  ;;  %v3121_v5 = vld [vmem:[%s8921_s1 + $0xd0] sm:$0xff] }
 0x2e7   : > { %4408 = vrot.lane.b32.xlu1 %v4407_v1, %s4678_s18  ;;  %2664 = vrot.lane.b32.xlu2 %v7044_v28, %s4679_s19  ;;  %v3123_v1 = vld [vmem:[%s8921_s1 + $0xe0] sm:$0xff] }
 0x2e8   : > { %3479 = vmatpush.msra.mxu1 %v3123_v1  ;;  %3687 = vmatpush.msra.mxu2 %v3140_v35  ;;  %v3139_v1 = vld [vmem:[%s8921_s1 + $0x160] sm:$0xff]  ;;  %v3137_v35 = vld [vmem:[%s8921_s1 + $0x150] sm:$0xff] }
 0x2e9   : > { %2230 = vrot.lane.b32.xlu0 %v6919_v11, %s4678_s18  ;;  %v7054_v16 = vpop.permute.xlu2 %1935  ;;  %v7056_v20 = vpop.permute.xlu1 %1915  ;;  %v3122_v11 = vld [vmem:[%s8921_s1 + $0xd8] sm:$0xff] }
 0x2ea   : > { %9579 = vst [vmem:[#allocation81_spill] sm:$0xff] %v7054_v16  ;;  %v9583_v16 = vld [vmem:[#allocation87_spill] sm:$0xff]  ;;  %3480 = vmatpush.msra.mxu1 %v3122_v11  ;;  %3688 = vmatpush.msra.mxu2 %v3139_v1 }
 0x2eb   : > { %9580 = vst [vmem:[#allocation18_spill] sm:$0xff] %v7056_v20  ;;  %v7064_v4 = vpop.permute.xlu0 %1913  ;;  %v2028_v20 = vsel %vm2012_vm5, %v6014_v37, %v9583_v16  ;;  %v3120_v37 = vld [vmem:[%s8921_s1 + $0xc8] sm:$0xff]  ;;  %v3138_v16 = vld [vmem:[%s8921_s1 + $0x158] sm:$0xff] }
 0x2ec   : > { %9581 = vst [vmem:[#allocation41_spill] sm:$0xff] %v7064_v4  ;;  %v7086_v57 = vsel %vm2077_vm6, %v2028_v20, %v6828_v44  ;;  %3481 = vmatpush.msra.mxu1 %v3121_v5  ;;  %3689 = vmatpush.msra.mxu2 %v3138_v16  ;;  %v3118_v5 = vld [vmem:[%s8921_s1 + $0xb8] sm:$0xff]  ;;  %v3136_v1 = vld [vmem:[%s8921_s1 + $0x148] sm:$0xff]  ;;  %v4412_v16 = vpack.i.bf16 %v6781_v27, %v6877_v24 }
 0x2ed   : > { %3343 = vmatmul.f32.gmra.mxu0 %v6989_v32  ;;  %v3134_v24 = vld [vmem:[%s8921_s1 + $0x138] sm:$0xff] }
 0x2ee   : > { %3482 = vmatpush.msra.mxu1 %v3120_v37  ;;  %3690 = vmatpush.msra.mxu2 %v3137_v35  ;;  %v2029_v37 = vsel %vm2012_vm5, 0.0, %v6528_v50  ;;  %v3135_v35 = vld [vmem:[%s8921_s1 + $0x140] sm:$0xff]  ;;  %v3116_v50 = vld [vmem:[%s8921_s1 + $0xa8] sm:$0xff] }
 0x2ef   : > { %2234 = vrot.lane.b32.xlu1 %v6939_v54, %s4678_s18  ;;  %2668 = vrot.lane.b32.xlu2 %v7086_v57, %s4679_s19  ;;  %v3119_v54 = vld [vmem:[%s8921_s1 + $0xc0] sm:$0xff] }
 0x2f0   : > { %3483 = vmatpush.msra.mxu1 %v3119_v54  ;;  %v3117_v54 = vld [vmem:[%s8921_s1 + $0xb0] sm:$0xff]  ;;  %3691 = vmatpush.msra.mxu2 %v3136_v1 }
 0x2f1   : > { %2666 = vrot.lane.b32.xlu0 %v6809_v51, %s4679_s19  ;;  %v7100_v20 = vpop.permute.xlu2 %1941  ;;  %v7102_v11 = vpop.permute.xlu1 %1921 }
 0x2f2   : > { %9584 = vst [vmem:[#allocation90_spill] sm:$0xff] %v7100_v20  ;;  %v7131_v20 = vsel %vm2077_vm6, %v2029_v37, %v6890_v31  ;;  %3484 = vmatpush.msra.mxu1 %v3118_v5  ;;  %3692 = vmatpush.msra.mxu2 %v3135_v35  ;;  %v3115_v37 = vld [vmem:[%s8921_s1 + $0xa0] sm:$0xff]  ;;  %v3132_v35 = vld [vmem:[%s8921_s1 + $0x128] sm:$0xff] }
 0x2f3   : > { %9585 = vst [vmem:[#allocation24_spill] sm:$0xff] %v7102_v11  ;;  %v7110_v4 = vpop.permute.xlu0 %1919  ;;  %v7133_v11 = vpop.f32.mrf.mxu0 }
 0x2f4   : > { %9586 = vst [vmem:[#allocation43_spill] sm:$0xff] %v7110_v4  ;;  %3485 = vmatpush.msra.mxu1 %v3117_v54  ;;  %3693 = vmatpush.msra.mxu2 %v3134_v24  ;;  %v3114_v54 = vld [vmem:[%s8921_s1 + $0x98] sm:$0xff] }
 0x2f5   : > { %3346 = vmatmul.f32.gmra.mxu0 %v7012_v0  ;;  %9587 = vst [vmem:[#allocation26_spill] sm:$0xff] %v7133_v11 }
 0x2f6   : > { %3486 = vmatpush.msra.mxu1 %v3116_v50  ;;  %v9590_v50 = vld [vmem:[#allocation50_spill] sm:$0xff] }
 0x2f7   : > { %4413 = vrot.lane.b32.xlu1 %v4412_v16, %s4678_s18  ;;  %2672 = vrot.lane.b32.xlu2 %v7131_v20, %s4679_s19  ;;  %v3133_v16 = vld [vmem:[%s8921_s1 + $0x130] sm:$0xff]  ;;  %v2030_v24 = vsel %vm2012_vm5, %v9590_v50, %v6526_v63  ;;  %v3112_v63 = vld [vmem:[%s8921_s1 + $0x88] sm:$0xff] }
 0x2f8   : > { %3487 = vmatpush.msra.mxu1 %v3115_v37  ;;  %3694 = vmatpush.msra.mxu2 %v3133_v16  ;;  %v3113_v37 = vld [vmem:[%s8921_s1 + $0x90] sm:$0xff]  ;;  %v3131_v16 = vld [vmem:[%s8921_s1 + $0x120] sm:$0xff] }
 0x2f9   : > { %2670 = vrot.lane.b32.xlu0 %v6828_v44, %s4679_s19  ;;  %v7146_v5 = vpop.permute.xlu2 %1947  ;;  %v7148_v1 = vpop.permute.xlu1 %1927 }
 0x2fa   : > { %9588 = vst [vmem:[#allocation98_spill] sm:$0xff] %v7146_v5  ;;  %v4417_v5 = vpack.i.bf16 %v6850_v58, %v6899_v23  ;;  %3488 = vmatpush.msra.mxu1 %v3114_v54  ;;  %3695 = vmatpush.msra.mxu2 %v3132_v35  ;;  %v3130_v23 = vld [vmem:[%s8921_s1 + $0x118] sm:$0xff]  ;;  %v3148_v35 = vld [vmem:[%s8921_s1 + $0x1a8] sm:$0xff] }
 0x2fb   : > { %9589 = vst [vmem:[#allocation55_spill] sm:$0xff] %v7148_v1  ;;  %v7156_v11 = vpop.permute.xlu0 %1925  ;;  %v7178_v1 = vsel %vm2077_vm6, %v2030_v24, %v6885_v56  ;;  %v7189_v50 = vpop.f32.mrf.mxu0  ;;  %v3111_v24 = vld [vmem:[%s8921_s1 + $0x80] sm:$0xff]  ;;  %3904 = vmatpush.msra.mxu3 %v3148_v35  ;;  %v3146_v35 = vld [vmem:[%s8921_s1 + $0x198] sm:$0xff] }
 0x2fc   : > { %9591 = vst [vmem:[#allocation73_spill] sm:$0xff] %v7189_v50  ;;  %3489 = vmatpush.msra.mxu1 %v3113_v37  ;;  %3696 = vmatpush.msra.mxu2 %v3131_v16  ;;  %v3129_v37 = vld [vmem:[%s8921_s1 + $0x110] sm:$0xff]  ;;  %v4422_v50 = vpack.i.bf16 %v6845_v26, %v6952_v59 }
 0x2fd   : > { %3349 = vmatmul.f32.gmra.mxu0 %v7044_v28 }
 0x2fe   : > { %3490 = vmatpush.msra.mxu1 %v3112_v63  ;;  %3697 = vmatpush.msra.mxu2 %v3130_v23  ;;  %v3128_v63 = vld [vmem:[%s8921_s1 + $0x108] sm:$0xff] }
 0x2ff   : > { %4418 = vrot.lane.b32.xlu1 %v4417_v5, %s4678_s18  ;;  %2676 = vrot.lane.b32.xlu2 %v7178_v1, %s4679_s19  ;;  %v9595_v23 = vld [vmem:[#allocation67_spill] sm:$0xff] }
 0x300   : > { %3491 = vmatpush.msra.mxu1 %v3111_v24  ;;  %3698 = vmatpush.msra.mxu2 %v3129_v37  ;;  %v3127_v24 = vld [vmem:[%s8921_s1 + $0x100] sm:$0xff] }
 0x301   : > { %2674 = vrot.lane.b32.xlu0 %v6890_v31, %s4679_s19  ;;  %v7193_v54 = vpop.permute.xlu2 %1953  ;;  %v7195_v5 = vpop.permute.xlu1 %1933 }
 0x302   : > { %9592 = vst [vmem:[#allocation75_spill] sm:$0xff] %v7193_v54  ;;  %v3147_v54 = vld [vmem:[%s8921_s1 + $0x1a0] sm:$0xff]  ;;  %3699 = vmatpush.msra.mxu2 %v3128_v63 }
 0x303   : > { %9593 = vst [vmem:[#allocation78_spill] sm:$0xff] %v7195_v5  ;;  %v7206_v16 = vpop.permute.xlu0 %1931  ;;  %v2031_v5 = vsel %vm2012_vm5, %v6047_v6, %v9595_v23  ;;  %3905 = vmatpush.msra.mxu3 %v3147_v54  ;;  %v3145_v6 = vld [vmem:[%s8921_s1 + $0x190] sm:$0xff]  ;;  %v3143_v23 = vld [vmem:[%s8921_s1 + $0x180] sm:$0xff] }
 0x304   : > { %9594 = vst [vmem:[#allocation32_spill] sm:$0xff] %v7206_v16  ;;  %v7228_v37 = vsel %vm2077_vm6, %v2031_v5, %v6826_v52  ;;  %3700 = vmatpush.msra.mxu2 %v3127_v24  ;;  %v3144_v5 = vld [vmem:[%s8921_s1 + $0x188] sm:$0xff]  ;;  %v4427_v24 = vpack.i.bf16 %v6793_v8, %v6973_v43 }
 0x305   : > { %3352 = vmatmul.f32.gmra.mxu0 %v7086_v57  ;;  %3906 = vmatpush.msra.mxu3 %v3146_v35  ;;  %v2032_v35 = vsel %vm2012_vm5, %v6043_v45, %v6570_v48 }
 0x307   : > { %4423 = vrot.lane.b32.xlu1 %v4422_v50, %s4678_s18  ;;  %2680 = vrot.lane.b32.xlu2 %v7228_v37, %s4679_s19 }
 0x308   : > { %3907 = vmatpush.msra.mxu3 %v3145_v6 }
 0x309   : > { %2678 = vrot.lane.b32.xlu0 %v6885_v56, %s4679_s19  ;;  %v2641_v59 = vpop.permute.xlu2 %2640  ;;  %v7238_v54 = vpop.permute.xlu1 %1939 }
 0x30a   : > { %9596 = vst [vmem:[#allocation44_spill] sm:$0xff] %v7238_v54  ;;  %v7243_v50 = vpop.f32.mrf.mxu0  ;;  %3908 = vmatpush.msra.mxu3 %v3144_v5  ;;  %v7258_v54 = vsel %vm2077_vm6, %v2032_v35, %v6915_v21  ;;  %v2033_v5 = vsel %vm2012_vm5, %v6091_v53, %v6565_v18 }
 0x30b   : > { %v7245_v63 = vpop.permute.xlu0 %1937  ;;  %v7279_v35 = vsel %vm2077_vm6, %v2033_v5, %v6908_v25 }
 0x30c   : > { %9597 = vst [vmem:[#allocation71_spill] sm:$0xff] %v7245_v63  ;;  %3909 = vmatpush.msra.mxu3 %v3143_v23  ;;  %v4432_v23 = vpack.i.bf16 %v6867_v14, %v6989_v32  ;;  %v4442_v63 = vpack.i.bf16 %v6809_v51, %v7044_v28 }
 0x30d   : > { %3355 = vmatmul.f32.gmra.mxu0 %v7131_v20 }
 0x30f   : > { %4428 = vrot.lane.b32.xlu1 %v4427_v24, %s4678_s18  ;;  %2684 = vrot.lane.b32.xlu2 %v7258_v54, %s4679_s19 }
 0x311   : > { %2682 = vrot.lane.b32.xlu0 %v6826_v52, %s4679_s19  ;;  %v7265_v6 = vpop.permute.xlu1 %1945  ;;  %v2645_v45 = vpop.permute.xlu2 %2644 }
 0x312   : > { %9598 = vst [vmem:[#allocation94_spill] sm:$0xff] %v7265_v6  ;;  %v7267_v48 = vpop.f32.mrf.mxu0  ;;  %v9604_v6 = vld [vmem:[#allocation93_spill] sm:$0xff] }
 0x313   : > { %9599 = vst [vmem:[#allocation77_spill] sm:$0xff] %v7267_v48  ;;  %v7269_v43 = vpop.permute.xlu0 %1943  ;;  %v2034_v5 = vsel %vm2012_vm5, %v6080_v7, %v9604_v6 }
 0x314   : > { %9600 = vst [vmem:[#allocation97_spill] sm:$0xff] %v7269_v43  ;;  %v7302_v43 = vsel %vm2077_vm6, %v2034_v5, %v6843_v3 }
 0x315   : > { %3358 = vmatmul.f32.gmra.mxu0 %v7178_v1 }
 0x317   : > { %4433 = vrot.lane.b32.xlu1 %v4432_v23, %s4678_s18  ;;  %2688 = vrot.lane.b32.xlu2 %v7279_v35, %s4679_s19  ;;  %v4437_v23 = vpack.i.bf16 %v6862_v40, %v7012_v0 }
 0x319   : > { %2686 = vrot.lane.b32.xlu0 %v6915_v21, %s4679_s19  ;;  %v7286_v24 = vpop.permute.xlu1 %1951  ;;  %v7288_v53 = vpop.permute.xlu2 %4398 }
 0x31a   : > { %9601 = vst [vmem:[#allocation48_spill] sm:$0xff] %v7286_v24  ;;  %v7292_v32 = vpop.f32.mrf.mxu0 }
 0x31b   : > { %v7290_v18 = vpop.permute.xlu0 %1949  ;;  %9603 = vst [vmem:[#allocation76_spill] sm:$0xff] %v7292_v32 }
 0x31c   : > { %9602 = vst [vmem:[#allocation99_spill] sm:$0xff] %v7290_v18 }
 0x31d   : > { %3361 = vmatmul.f32.gmra.mxu0 %v7228_v37 }
 0x31f   : > { %4438 = vrot.lane.b32.xlu1 %v4437_v23, %s4678_s18  ;;  %2692 = vrot.lane.b32.xlu2 %v7302_v43, %s4679_s19  ;;  %v2035_v23 = vsel %vm2012_vm5, %v6076_v15, %v6594_v29 }
 0x320   : > { %v7330_v16 = vsel %vm2077_vm6, %v2035_v23, %v6935_v34 }
 0x321   : > { %2690 = vrot.lane.b32.xlu0 %v6908_v25, %s4679_s19  ;;  %v4394_v24 = vpop.permute.xlu1 %4393  ;;  %v7309_v18 = vpop.permute.xlu2 %2218 }
 0x322   : > { %v4395_v0 = vunpack.i.l.bf16 %v4394_v24  ;;  %v7326_v48 = vpop.f32.mrf.mxu0  ;;  %v4396_v15 = vunpack.i.h.bf16 %v4394_v24  ;;  %v4447_v24 = vpack.i.bf16 %v7131_v20, %v7086_v57 }
 0x323   : > { %v2207_v6 = vpop.permute.xlu0 %2206 }
 0x324   : > { %4296 = vmatmul.msk.f32.vlgmr.msra.gmra.mxu1 %vm7312_vm7, %v2207_v6  ;;  %v2448_v5 = vsel %vm1454_vm3, %v2207_v6, %v4395_v0 }
 0x325   : > { %3364 = vmatmul.f32.gmra.mxu0 %v7258_v54  ;;  %v3031_v32 = vsel %vm1519_vm4, %v2448_v5, %v2641_v59 }
 0x326   : > { %3701 = vmatmul.f32.vlgmr.msra.gmra.mxu2 %v3031_v32 }
 0x327   : > { %4443 = vrot.lane.b32.xlu1 %v4442_v63, %s4678_s18  ;;  %2696 = vrot.lane.b32.xlu2 %v7330_v16, %s4679_s19  ;;  %v2036_v63 = vsel %vm2012_vm5, %v6124_v46, %v6589_v49 }
 0x328   : > { %v7353_v23 = vsel %vm2077_vm6, %v2036_v63, %v6828_v44 }
 0x329   : > { %2694 = vrot.lane.b32.xlu0 %v6843_v3, %s4679_s19  ;;  %v2211_v29 = vpop.permute.xlu1 %2210  ;;  %v7337_v28 = vpop.permute.xlu2 %2222  ;;  %v4482_v7 = vpack.i.bf16 %v7353_v23, %v6935_v34 }
 0x32a   : > { %v2449_v0 = vsel %vm1454_vm3, %v2211_v29, %v4396_v15  ;;  %v7358_v46 = vpop.f32.mrf.mxu0  ;;  %v9607_v15 = vld [vmem:[#allocation7_spill] sm:$0xff] }
 0x32b   : > { %v2643_v6 = vpop.permute.xlu0 %2642  ;;  %v3032_v5 = vsel %vm1519_vm4, %v2449_v0, %v2645_v45 }
 0x32c   : > { %4298 = vmatmul.msk.f32.gmra.mxu1 %vm7312_vm7, %v2211_v29  ;;  %v2854_v32 = vsel %vm1519_vm4, %v2641_v59, %v2643_v6  ;;  %v2037_v29 = vsel %vm2012_vm5, 0.0, %v9607_v15  ;;  %v4452_v6 = vpack.i.bf16 %v7178_v1, %v6890_v31  ;;  %v9608_v15 = vld [vmem:[#allocation39_spill] sm:$0xff] }
 0x32d   : > { %3367 = vmatmul.f32.gmra.mxu0 %v7279_v35  ;;  %4311 = vmatmul.msk.f32.vlgmr.msra.gmra.mxu3 %vm2012_vm5, %v2854_v32  ;;  %v7371_v0 = vsel %vm2077_vm6, %v2037_v29, %v6930_v36  ;;  %v2038_v29 = vsel %vm2012_vm5, %v9608_v15, %v6618_v30  ;;  %v4401_v30 = vunpack.i.h.bf16 %v7288_v53 }
 0x32e   : > { %3704 = vmatmul.f32.gmra.mxu2 %v3032_v5 }
 0x32f   : > { %4448 = vrot.lane.b32.xlu1 %v4447_v24, %s4678_s18  ;;  %2700 = vrot.lane.b32.xlu2 %v7353_v23, %s4679_s19 }
 0x331   : > { %2698 = vrot.lane.b32.xlu0 %v6935_v34, %s4679_s19  ;;  %v2215_v49 = vpop.permute.xlu1 %2214  ;;  %v2659_v57 = vpop.permute.xlu2 %2658 }
 0x332   : > { %v7381_v24 = vpop.f32.mrf.mxu0 }
 0x333   : > { %v2647_v20 = vpop.permute.xlu0 %2646 }
 0x334   : > { %4300 = vmatmul.msk.f32.gmra.mxu1 %vm7312_vm7, %v2215_v49  ;;  %v2855_v59 = vsel %vm1519_vm4, %v2645_v45, %v2647_v20  ;;  %v4400_v45 = vunpack.i.l.bf16 %v7288_v53  ;;  %v9609_v53 = vld [vmem:[#allocation15_spill] sm:$0xff] }
 0x335   : > { %3370 = vmatmul.f32.gmra.mxu0 %v7302_v43  ;;  %4312 = vmatmul.msk.f32.gmra.mxu3 %vm2012_vm5, %v2855_v59  ;;  %v2039_v15 = vsel %vm2012_vm5, %v6157_v38, %v9609_v53 }
 0x336   : > { %v2450_v20 = vsel %vm1454_vm3, %v2215_v49, %v4400_v45  ;;  %v7396_v49 = vsel %vm2077_vm6, %v2038_v29, %v6860_v60  ;;  %v4462_v29 = vpack.i.bf16 %v7258_v54, %v6826_v52 }
 0x337   : > { %2702 = vrot.lane.b32.xlu1 %v7371_v0, %s4679_s19  ;;  %2704 = vrot.lane.b32.xlu2 %v6930_v36, %s4679_s19 }
 0x339   : > { %4453 = vrot.lane.b32.xlu0 %v4452_v6, %s4678_s18  ;;  %v2651_v32 = vpop.permute.xlu1 %2650  ;;  %v2663_v63 = vpop.permute.xlu2 %2662  ;;  %v4457_v6 = vpack.i.bf16 %v7228_v37, %v6885_v56 }
 0x33b   : > { %v2649_v5 = vpop.permute.xlu0 %2648 }
 0x33c   : > { %4302 = vmatmul.msk.f32.gmra.mxu1 %vm7312_vm7, %v7309_v18  ;;  %v3033_v1 = vsel %vm1519_vm4, %v2450_v20, %v2649_v5  ;;  %v2856_v59 = vsel %vm1519_vm4, %v2649_v5, %v2651_v32  ;;  %v2451_v20 = vsel %vm1454_vm3, %v7309_v18, %v4401_v30  ;;  %v7424_v18 = vsel %vm2077_vm6, %v2039_v15, %v6960_v62 }
 0x33d   : > { %3373 = vmatmul.f32.gmra.mxu0 %v7330_v16  ;;  %3707 = vmatmul.f32.gmra.mxu2 %v3033_v1  ;;  %v7410_v1 = vpop.f32.mrf.mxu0 }
 0x33e   : > { %4313 = vmatmul.msk.f32.gmra.mxu3 %vm2012_vm5, %v2856_v59 }
 0x33f   : > { %2706 = vrot.lane.b32.xlu1 %v7396_v49, %s4679_s19  ;;  %2708 = vrot.lane.b32.xlu2 %v6860_v60, %s4679_s19 }
 0x341   : > { %4458 = vrot.lane.b32.xlu0 %v4457_v6, %s4678_s18  ;;  %v2655_v45 = vpop.permute.xlu1 %2654  ;;  %v7406_v32 = vpop.permute.xlu2 %2664 }
 0x343   : > { %v2653_v5 = vpop.permute.xlu0 %2652 }
 0x344   : > { %4304 = vmatmul.msk.f32.gmra.mxu1 %vm7312_vm7, %v7337_v28  ;;  %v3034_v37 = vsel %vm1519_vm4, %v2451_v20, %v2653_v5  ;;  %v2857_v59 = vsel %vm1519_vm4, %v2653_v5, %v2655_v45  ;;  %v9610_v20 = vld [vmem:[#allocation9_spill] sm:$0xff] }
 0x345   : > { %3376 = vmatmul.f32.gmra.mxu0 %v7353_v23  ;;  %3710 = vmatmul.f32.gmra.mxu2 %v3034_v37  ;;  %v2040_v37 = vsel %vm2012_vm5, %v6146_v2, %v9610_v20  ;;  %v7440_v54 = vpop.f32.mrf.mxu0 }
 0x346   : > { %4314 = vmatmul.msk.f32.gmra.mxu3 %vm2012_vm5, %v2857_v59  ;;  %v7447_v53 = vsel %vm2077_vm6, %v2040_v37, %v6958_v47 }
 0x347   : > { %2710 = vrot.lane.b32.xlu1 %v7424_v18, %s4679_s19  ;;  %2712 = vrot.lane.b32.xlu2 %v6960_v62, %s4679_s19 }
 0x349   : > { %4463 = vrot.lane.b32.xlu0 %v4462_v29, %s4678_s18  ;;  %v2657_v38 = vpop.permute.xlu1 %2656  ;;  %v7433_v6 = vpop.permute.xlu2 %2668 }
 0x34a   : > { %v2858_v45 = vsel %vm1519_vm4, %v2657_v38, %v2659_v57  ;;  %v4467_v57 = vpack.i.bf16 %v7279_v35, %v6915_v21 }
 0x34b   : > { %v4404_v30 = vpop.permute.xlu0 %4403 }
 0x34c   : > { %v4405_v5 = vunpack.i.l.bf16 %v4404_v30  ;;  %v4406_v29 = vunpack.i.h.bf16 %v4404_v30 }
 0x34d   : > { %3379 = vmatmul.f32.gmra.mxu0 %v7371_v0 }
 0x34e   : > { %4315 = vmatmul.msk.f32.gmra.mxu3 %vm2012_vm5, %v2858_v45  ;;  %v2452_v59 = vsel %vm1454_vm3, %v7337_v28, %v4405_v5 }
 0x34f   : > { %v3035_v15 = vsel %vm1519_vm4, %v2452_v59, %v2657_v38  ;;  %2714 = vrot.lane.b32.xlu1 %v7447_v53, %s4679_s19  ;;  %2716 = vrot.lane.b32.xlu2 %v6958_v47, %s4679_s19  ;;  %v2041_v38 = vsel %vm2012_vm5, %v9520_v13, %v6642_v61  ;;  %v7479_v61 = vpop.f32.mrf.mxu0 }
 0x350   : > { %3713 = vmatmul.f32.gmra.mxu2 %v3035_v15  ;;  %v7470_v20 = vsel %vm2077_vm6, %v2041_v38, %v6883_v33  ;;  %v9611_v15 = vld [vmem:[#allocation64_spill] sm:$0xff] }
 0x351   : > { %4468 = vrot.lane.b32.xlu0 %v4467_v57, %s4678_s18  ;;  %v2661_v2 = vpop.permute.xlu1 %2660  ;;  %v7457_v28 = vpop.permute.xlu2 %2672 }
 0x352   : > { %v2859_v5 = vsel %vm1519_vm4, %v2661_v2, %v2663_v63  ;;  %v4472_v63 = vpack.i.bf16 %v7302_v43, %v6908_v25 }
 0x353   : > { %v2227_v45 = vpop.permute.xlu0 %2226 }
 0x354   : > { %4306 = vmatmul.msk.f32.gmra.mxu1 %vm7312_vm7, %v2227_v45  ;;  %v2453_v35 = vsel %vm1454_vm3, %v2227_v45, %v4406_v29 }
 0x355   : > { %3382 = vmatmul.f32.gmra.mxu0 %v7396_v49  ;;  %v3036_v30 = vsel %vm1519_vm4, %v2453_v35, %v2661_v2  ;;  %v2042_v2 = vsel %vm2012_vm5, %v9611_v15, %v6637_v9 }
 0x356   : > { %4316 = vmatmul.msk.f32.gmra.mxu3 %vm2012_vm5, %v2859_v5  ;;  %v7495_v45 = vsel %vm2077_vm6, %v2042_v2, %v6981_v10  ;;  %v4477_v5 = vpack.i.bf16 %v7330_v16, %v6843_v3 }
 0x357   : > { %2718 = vrot.lane.b32.xlu1 %v7470_v20, %s4679_s19  ;;  %2720 = vrot.lane.b32.xlu2 %v6883_v33, %s4679_s19  ;;  %v7506_v38 = vpop.f32.mrf.mxu0 }
 0x358   : > { %3716 = vmatmul.f32.gmra.mxu2 %v3036_v30  ;;  %9612 = vst [vmem:[#allocation105_spill] sm:$0xff] %v7506_v38  ;;  %v4492_v38 = vpack.i.bf16 %v6860_v60, %v7396_v49  ;;  %v9653_v60 = vld [vmem:[#allocation18_spill] sm:$0xff] }
 0x359   : > { %4473 = vrot.lane.b32.xlu0 %v4472_v63, %s4678_s18  ;;  %v4409_v13 = vpop.permute.xlu1 %4408  ;;  %v7482_v37 = vpop.permute.xlu2 %2676 }
 0x35a   : > { %v4410_v59 = vunpack.i.l.bf16 %v4409_v13  ;;  %v7508_v63 = vunpack.i.h.bf16 %v4409_v13 }
 0x35b   : > { %v2231_v57 = vpop.permute.xlu0 %2230 }
 0x35c   : > { %4308 = vmatmul.msk.f32.gmra.mxu1 %vm7312_vm7, %v2231_v57  ;;  %v2454_v43 = vsel %vm1454_vm3, %v2231_v57, %v4410_v59  ;;  %v9613_v57 = vld [vmem:[#allocation113_spill] sm:$0xff] }
 0x35d   : > { %3385 = vmatmul.f32.gmra.mxu0 %v7424_v18  ;;  %v3037_v29 = vsel %vm1519_vm4, %v2454_v43, %v7406_v32  ;;  %v9614_v43 = vld [vmem:[#allocation46_spill] sm:$0xff] }
 0x35e   : > { %v2043_v15 = vsel %vm2012_vm5, %v9614_v43, %v9613_v57  ;;  %v9616_v43 = vld [vmem:[#allocation116_spill] sm:$0xff] }
 0x35f   : > { %2722 = vrot.lane.b32.xlu1 %v7495_v45, %s4679_s19  ;;  %2724 = vrot.lane.b32.xlu2 %v6981_v10, %s4679_s19  ;;  %v7523_v13 = vsel %vm2077_vm6, %v2043_v15, %v6979_v39  ;;  %v7538_v23 = vpop.f32.mrf.mxu0  ;;  %v2045_v15 = vsel %vm2012_vm5, 0.0, %v9616_v43 }
 0x360   : > { %3719 = vmatmul.f32.gmra.mxu2 %v3037_v29  ;;  %9615 = vst [vmem:[#allocation11_spill] sm:$0xff] %v7538_v23 }
 0x361   : > { %4478 = vrot.lane.b32.xlu0 %v4477_v5, %s4678_s18  ;;  %v2235_v9 = vpop.permute.xlu1 %2234  ;;  %v7504_v35 = vpop.permute.xlu2 %2680 }
 0x362   : > { %v2455_v59 = vsel %vm1454_vm3, %v2235_v9, %v7508_v63 }
 0x363   : > { %v2667_v30 = vpop.permute.xlu0 %2666 }
 0x364   : > { %4310 = vmatmul.msk.f32.gmra.mxu1 %vm7312_vm7, %v2235_v9  ;;  %v2860_v16 = vsel %vm1519_vm4, %v7406_v32, %v2667_v30  ;;  %v3038_v32 = vsel %vm1519_vm4, %v2455_v59, %v7433_v6 }
 0x365   : > { %3388 = vmatmul.f32.gmra.mxu0 %v7447_v53  ;;  %4317 = vmatmul.msk.f32.gmra.mxu3 %vm2012_vm5, %v2860_v16 }
 0x367   : > { %2726 = vrot.lane.b32.xlu1 %v7523_v13, %s4679_s19  ;;  %2728 = vrot.lane.b32.xlu2 %v6979_v39, %s4679_s19 }
 0x368   : > { %3722 = vmatmul.f32.gmra.mxu2 %v3038_v32 }
 0x369   : > { %4483 = vrot.lane.b32.xlu0 %v4482_v7, %s4678_s18  ;;  %v4414_v2 = vpop.permute.xlu1 %4413  ;;  %v7534_v29 = vpop.permute.xlu2 %2684  ;;  %v4487_v7 = vpack.i.bf16 %v6930_v36, %v7371_v0 }
 0x36a   : > { %v4416_v5 = vunpack.i.h.bf16 %v4414_v2  ;;  %v4415_v9 = vunpack.i.l.bf16 %v4414_v2  ;;  %v9618_v2 = vld [vmem:[#allocation57_spill] sm:$0xff] }
 0x36b   : > { %v7536_v30 = vpop.permute.xlu0 %2670 }
 0x36c   : > { %v2861_v16 = vsel %vm1519_vm4, %v7433_v6, %v7536_v30  ;;  %v2975_v59 = vsel %vm1454_vm3, %v6799_v12, %v4415_v9  ;;  %v2456_v57 = vsel %vm1454_vm3, %v4415_v9, %v4416_v5  ;;  %v7556_v6 = vsel %vm2077_vm6, %v2045_v15, %v6906_v22  ;;  %v9617_v12 = vld [vmem:[#allocation29_spill] sm:$0xff] }
 0x36d   : > { %3391 = vmatmul.f32.gmra.mxu0 %v7470_v20  ;;  %4318 = vmatmul.msk.f32.gmra.mxu3 %vm2012_vm5, %v2861_v16  ;;  %v3039_v32 = vsel %vm1519_vm4, %v2456_v57, %v7457_v28  ;;  %v2044_v5 = vsel %vm2012_vm5, %v9618_v2, %v9617_v12  ;;  %v9620_v2 = vld [vmem:[#allocation23_spill] sm:$0xff] }
 0x36e   : > { %3516 = vmatmul.f32.gmra.mxu1 %v2975_v59  ;;  %v7566_v0 = vsel %vm2077_vm6, %v2044_v5, %v6828_v44  ;;  %v9621_v5 = vld [vmem:[#allocation53_spill] sm:$0xff] }
 0x36f   : > { %4488 = vrot.lane.b32.xlu1 %v4487_v7, %s4678_s18  ;;  %2732 = vrot.lane.b32.xlu2 %v7556_v6, %s4679_s19  ;;  %v9619_v7 = vld [vmem:[#allocation65_spill] sm:$0xff]  ;;  %v2046_v23 = vsel %vm2012_vm5, %v9621_v5, %v9620_v2  ;;  %v9624_v2 = vld [vmem:[#allocation106_spill] sm:$0xff] }
 0x370   : > { %3725 = vmatmul.f32.gmra.mxu2 %v3039_v32  ;;  %v9625_v5 = vld [vmem:[#allocation66_spill] sm:$0xff] }
 0x371   : > { %2730 = vrot.lane.b32.xlu0 %v7566_v0, %s4679_s19  ;;  %v4419_v9 = vpop.permute.xlu1 %4418  ;;  %v7570_v16 = vpop.permute.xlu2 %2688 }
 0x372   : > { %v4421_v59 = vunpack.i.h.bf16 %v4419_v9  ;;  %v4420_v57 = vunpack.i.l.bf16 %v4419_v9 }
 0x373   : > { %v2675_v43 = vpop.permute.xlu0 %2674 }
 0x374   : > { %v2862_v15 = vsel %vm1519_vm4, %v7457_v28, %v2675_v43  ;;  %v2976_v12 = vsel %vm1454_vm3, %v9619_v7, %v4420_v57  ;;  %v2457_v32 = vsel %vm1454_vm3, %v4420_v57, %v4421_v59  ;;  %v7586_v28 = vpop.f32.mrf.mxu0  ;;  %v7590_v59 = vsel %vm2077_vm6, %v2046_v23, %v7004_v55  ;;  %v9623_v23 = vld [vmem:[#allocation45_spill] sm:$0xff] }
 0x375   : > { %3394 = vmatmul.f32.gmra.mxu0 %v7495_v45  ;;  %4319 = vmatmul.msk.f32.gmra.mxu3 %vm2012_vm5, %v2862_v15  ;;  %v3040_v9 = vsel %vm1519_vm4, %v2457_v32, %v7482_v37  ;;  %9622 = vst [vmem:[#allocation69_spill] sm:$0xff] %v7586_v28  ;;  %v4497_v28 = vpack.i.bf16 %v6960_v62, %v7424_v18 }
 0x376   : > { %3519 = vmatmul.f32.gmra.mxu1 %v2976_v12  ;;  %v4507_v62 = vpack.i.bf16 %v6883_v33, %v7470_v20 }
 0x377   : > { %4493 = vrot.lane.b32.xlu1 %v4492_v38, %s4678_s18  ;;  %2736 = vrot.lane.b32.xlu2 %v7590_v59, %s4679_s19 }
 0x378   : > { %3728 = vmatmul.f32.gmra.mxu2 %v3040_v9  ;;  %v2047_v9 = vsel %vm2012_vm5, %v9625_v5, %v9624_v2  ;;  %v9628_v5 = vld [vmem:[#allocation21_spill] sm:$0xff] }
 0x379   : > { %2734 = vrot.lane.b32.xlu0 %v6906_v22, %s4679_s19  ;;  %v4424_v49 = vpop.permute.xlu1 %4423  ;;  %v7597_v57 = vpop.permute.xlu2 %2692 }
 0x37a   : > { %v4426_v43 = vunpack.i.h.bf16 %v4424_v49  ;;  %v4425_v15 = vunpack.i.l.bf16 %v4424_v49 }
 0x37b   : > { %v2679_v7 = vpop.permute.xlu0 %2678 }
 0x37c   : > { %v2863_v12 = vsel %vm1519_vm4, %v7482_v37, %v2679_v7  ;;  %v2977_v32 = vsel %vm1454_vm3, %v9623_v23, %v4425_v15  ;;  %v2458_v38 = vsel %vm1454_vm3, %v4425_v15, %v4426_v43  ;;  %v7615_v37 = vsel %vm2077_vm6, %v2047_v9, %v7002_v42  ;;  %v7620_v43 = vpop.f32.mrf.mxu0  ;;  %v9629_v9 = vld [vmem:[#allocation84_spill] sm:$0xff] }
 0x37d   : > { %3397 = vmatmul.f32.gmra.mxu0 %v7523_v13  ;;  %4320 = vmatmul.msk.f32.gmra.mxu3 %vm2012_vm5, %v2863_v12  ;;  %v3041_v49 = vsel %vm1519_vm4, %v2458_v38, %v7504_v35  ;;  %9626 = vst [vmem:[#allocation87_spill] sm:$0xff] %v7620_v43  ;;  %v9627_v38 = vld [vmem:[#allocation54_spill] sm:$0xff]  ;;  %v4502_v43 = vpack.i.bf16 %v6958_v47, %v7447_v53 }
 0x37e   : > { %3522 = vmatmul.f32.gmra.mxu1 %v2977_v32 }
 0x37f   : > { %4498 = vrot.lane.b32.xlu1 %v4497_v28, %s4678_s18  ;;  %2740 = vrot.lane.b32.xlu2 %v7615_v37, %s4679_s19 }
 0x380   : > { %3731 = vmatmul.f32.gmra.mxu2 %v3041_v49  ;;  %v2048_v49 = vsel %vm2012_vm5, %v9629_v9, %v9628_v5  ;;  %v9632_v5 = vld [vmem:[#allocation5_spill] sm:$0xff] }
 0x381   : > { %2738 = vrot.lane.b32.xlu0 %v7004_v55, %s4679_s19  ;;  %v4429_v18 = vpop.permute.xlu1 %4428  ;;  %v7624_v15 = vpop.permute.xlu2 %2696 }
 0x382   : > { %v4431_v7 = vunpack.i.h.bf16 %v4429_v18  ;;  %v4430_v12 = vunpack.i.l.bf16 %v4429_v18 }
 0x383   : > { %v2683_v23 = vpop.permute.xlu0 %2682 }
 0x384   : > { %v2864_v32 = vsel %vm1519_vm4, %v7504_v35, %v2683_v23  ;;  %v2978_v28 = vsel %vm1454_vm3, %v9627_v38, %v4430_v12  ;;  %v2459_v2 = vsel %vm1454_vm3, %v4430_v12, %v4431_v7  ;;  %v9630_v35 = vld [vmem:[#allocation8_spill] sm:$0xff]  ;;  %v7651_v38 = vpop.f32.mrf.mxu0 }
 0x385   : > { %3400 = vmatmul.f32.gmra.mxu0 %v7566_v0  ;;  %4321 = vmatmul.msk.f32.gmra.mxu3 %vm2012_vm5, %v2864_v32  ;;  %v3042_v18 = vsel %vm1519_vm4, %v2459_v2, %v7534_v29  ;;  %v7642_v23 = vsel %vm2077_vm6, %v2048_v49, %v9630_v35  ;;  %9631 = vst [vmem:[#allocation50_spill] sm:$0xff] %v7651_v38  ;;  %v9633_v49 = vld [vmem:[#allocation109_spill] sm:$0xff] }
 0x386   : > { %3525 = vmatmul.f32.gmra.mxu1 %v2978_v28 }
 0x387   : > { %4503 = vrot.lane.b32.xlu1 %v4502_v43, %s4678_s18  ;;  %2744 = vrot.lane.b32.xlu2 %v7642_v23, %s4679_s19 }
 0x388   : > { %3734 = vmatmul.f32.gmra.mxu2 %v3042_v18  ;;  %v9634_v18 = vld [vmem:[#allocation82_spill] sm:$0xff] }
 0x389   : > { %2742 = vrot.lane.b32.xlu0 %v7002_v42, %s4679_s19  ;;  %v4434_v53 = vpop.permute.xlu1 %4433  ;;  %v7649_v7 = vpop.permute.xlu2 %2700  ;;  %v2049_v47 = vsel %vm2012_vm5, %v9634_v18, %v9633_v49  ;;  %v9637_v49 = vld [vmem:[#allocation62_spill] sm:$0xff] }
 0x38a   : > { %v4436_v12 = vunpack.i.h.bf16 %v4434_v53  ;;  %v4435_v32 = vunpack.i.l.bf16 %v4434_v53 }
 0x38b   : > { %v2687_v28 = vpop.permute.xlu0 %2686 }
 0x38c   : > { %v2865_v2 = vsel %vm1519_vm4, %v7534_v29, %v2687_v28  ;;  %v2979_v43 = vsel %vm1454_vm3, %v9632_v5, %v4435_v32  ;;  %v2460_v9 = vsel %vm1454_vm3, %v4435_v32, %v4436_v12  ;;  %v7669_v29 = vsel %vm2077_vm6, %v2049_v47, %v7025_v41  ;;  %v9635_v47 = vld [vmem:[#allocation10_spill] sm:$0xff]  ;;  %v7688_v38 = vpop.f32.mrf.mxu0 }
 0x38d   : > { %3403 = vmatmul.f32.gmra.mxu0 %v7556_v6  ;;  %4322 = vmatmul.msk.f32.gmra.mxu3 %vm2012_vm5, %v2865_v2  ;;  %v3043_v53 = vsel %vm1519_vm4, %v2460_v9, %v7570_v16  ;;  %v9636_v9 = vld [vmem:[#allocation35_spill] sm:$0xff]  ;;  %9638 = vst [vmem:[#allocation67_spill] sm:$0xff] %v7688_v38  ;;  %v9647_v38 = vld [vmem:[#allocation108_spill] sm:$0xff] }
 0x38e   : > { %3528 = vmatmul.f32.gmra.mxu1 %v2979_v43  ;;  %v2050_v18 = vsel %vm2012_vm5, %v9637_v49, %v9636_v9  ;;  %v9639_v9 = vld [vmem:[#allocation119_spill] sm:$0xff]  ;;  %v9640_v49 = vld [vmem:[#allocation80_spill] sm:$0xff] }
 0x38f   : > { %4508 = vrot.lane.b32.xlu1 %v4507_v62, %s4678_s18  ;;  %2748 = vrot.lane.b32.xlu2 %v7669_v29, %s4679_s19 }
 0x390   : > { %3737 = vmatmul.f32.gmra.mxu2 %v3043_v53  ;;  %v4512_v53 = vpack.i.bf16 %v6981_v10, %v7495_v45  ;;  %v9648_v10 = vld [vmem:[#allocation41_spill] sm:$0xff] }
 0x391   : > { %2746 = vrot.lane.b32.xlu0 %v9630_v35, %s4679_s19  ;;  %v4439_v20 = vpop.permute.xlu1 %4438  ;;  %v7676_v12 = vpop.permute.xlu2 %2704 }
 0x392   : > { %v4441_v32 = vunpack.i.h.bf16 %v4439_v20  ;;  %v4440_v28 = vunpack.i.l.bf16 %v4439_v20  ;;  %v7696_v20 = vsel %vm2077_vm6, %v2050_v18, %v7021_v19  ;;  %v2051_v18 = vsel %vm2012_vm5, %v9640_v49, %v9639_v9  ;;  %v9643_v49 = vld [vmem:[#allocation104_spill] sm:$0xff] }
 0x393   : > { %v2691_v2 = vpop.permute.xlu0 %2690 }
 0x394   : > { %v2866_v5 = vsel %vm1519_vm4, %v7570_v16, %v2691_v2  ;;  %v2980_v43 = vsel %vm1454_vm3, %v9635_v47, %v4440_v28  ;;  %v2461_v62 = vsel %vm1454_vm3, %v4440_v28, %v4441_v32 }
 0x395   : > { %3406 = vmatmul.f32.gmra.mxu0 %v7590_v59  ;;  %4323 = vmatmul.msk.f32.gmra.mxu3 %vm2012_vm5, %v2866_v5  ;;  %v3044_v16 = vsel %vm1519_vm4, %v2461_v62, %v7597_v57 }
 0x396   : > { %3531 = vmatmul.f32.gmra.mxu1 %v2980_v43 }
 0x397   : > { %4513 = vrot.lane.b32.xlu1 %v4512_v53, %s4678_s18  ;;  %2752 = vrot.lane.b32.xlu2 %v7696_v20, %s4679_s19  ;;  %v4517_v53 = vpack.i.bf16 %v6979_v39, %v7523_v13 }
 0x398   : > { %3740 = vmatmul.f32.gmra.mxu2 %v3044_v16 }
 0x399   : > { %2750 = vrot.lane.b32.xlu0 %v7025_v41, %s4679_s19  ;;  %v4444_v45 = vpop.permute.xlu1 %4443  ;;  %v7703_v32 = vpop.permute.xlu2 %2708 }
 0x39a   : > { %v4446_v28 = vunpack.i.h.bf16 %v4444_v45  ;;  %v4445_v2 = vunpack.i.l.bf16 %v4444_v45  ;;  %v7723_v45 = vpop.f32.mrf.mxu0 }
 0x39b   : > { %v2695_v5 = vpop.permute.xlu0 %2694  ;;  %9642 = vst [vmem:[#allocation93_spill] sm:$0xff] %v7723_v45 }
 0x39c   : > { %v2867_v47 = vsel %vm1519_vm4, %v7597_v57, %v2695_v5  ;;  %v2981_v43 = vsel %vm1454_vm3, %v6833_v17, %v4445_v2  ;;  %v2462_v62 = vsel %vm1454_vm3, %v4445_v2, %v4446_v28  ;;  %v9641_v57 = vld [vmem:[#allocation3_spill] sm:$0xff] }
 0x39d   : > { %3409 = vmatmul.f32.gmra.mxu0 %v7615_v37  ;;  %4324 = vmatmul.msk.f32.gmra.mxu3 %vm2012_vm5, %v2867_v47  ;;  %v3045_v16 = vsel %vm1519_vm4, %v2462_v62, %v7624_v15  ;;  %v7721_v17 = vsel %vm2077_vm6, %v2051_v18, %v9641_v57  ;;  %v9644_v18 = vld [vmem:[#allocation91_spill] sm:$0xff] }
 0x39e   : > { %3534 = vmatmul.f32.gmra.mxu1 %v2981_v43 }
 0x39f   : > { %4518 = vrot.lane.b32.xlu1 %v4517_v53, %s4678_s18  ;;  %2756 = vrot.lane.b32.xlu2 %v7721_v17, %s4679_s19  ;;  %v2052_v53 = vsel %vm2012_vm5, %v9644_v18, %v9643_v49 }
 0x3a0   : > { %3743 = vmatmul.f32.gmra.mxu2 %v3045_v16  ;;  %v4522_v16 = vpack.i.bf16 %v7556_v6, %v7566_v0  ;;  %v9645_v6 = vld [vmem:[#allocation74_spill] sm:$0xff] }
 0x3a1   : > { %2754 = vrot.lane.b32.xlu0 %v7021_v19, %s4679_s19  ;;  %v3493_v13 = vpop.f32.mrf.mxu1  ;;  %v4449_v28 = vpop.permute.xlu1 %4448 }
 0x3a2   : > { %v4450_v2 = vunpack.i.l.bf16 %v4449_v28  ;;  %v7730_v5 = vpop.permute.xlu2 %2712 }
 0x3a3   : > { %v2699_v47 = vpop.permute.xlu0 %2698 }
 0x3a4   : > { %v2868_v43 = vsel %vm1519_vm4, %v7624_v15, %v2699_v47  ;;  %v2982_v62 = vsel %vm1454_vm3, %v6828_v44, %v4450_v2  ;;  %v2463_v9 = vsel %vm1454_vm3, %v4450_v2, %v7508_v63  ;;  %v7749_v47 = vsel %vm2077_vm6, %v2052_v53, %v6828_v44  ;;  %v7754_v2 = vld [vmem:[%s8922_s2] ss:$0 sm:$0xff] }
 0x3a5   : > { %3412 = vmatmul.f32.gmra.mxu0 %v7642_v23  ;;  %4325 = vmatmul.msk.f32.gmra.mxu3 %vm2012_vm5, %v2868_v43  ;;  %v3046_v15 = vsel %vm1519_vm4, %v2463_v9, %v7649_v7  ;;  %v3285_v0 = vadd.f32 %v7754_v2, %v9645_v6  ;;  %v7761_v43 = vpop.f32.mrf.mxu0  ;;  %v2053_v6 = vsel %vm2012_vm5, 0.0, %v9647_v38 }
 0x3a6   : > { %3537 = vmatmul.f32.gmra.mxu1 %v2982_v62  ;;  %9646 = vst [vmem:[#allocation7_spill] sm:$0xff] %v7761_v43  ;;  %v4451_v62 = vunpack.i.h.bf16 %v4449_v28  ;;  %v7779_v33 = vsel %vm2077_vm6, %v2053_v6, %v9648_v10 }
 0x3a7   : > { %4523 = vrot.lane.b32.xlu1 %v4522_v16, %s4678_s18  ;;  %2760 = vrot.lane.b32.xlu2 %v7749_v47, %s4679_s19  ;;  %v3494_v39 = vadd.f32 %v3493_v13, %v3285_v0  ;;  %v9649_v0 = vld [vmem:[#allocation63_spill] sm:$0xff] }
 0x3a8   : > { %3746 = vmatmul.f32.gmra.mxu2 %v3046_v15  ;;  %v2869_v15 = vsel %vm1519_vm4, %v7649_v7, %v7536_v30  ;;  %v2983_v28 = vsel %vm1454_vm3, %v6781_v27, %v4451_v62  ;;  %v4527_v7 = vpack.i.bf16 %v7590_v59, %v6906_v22 }
 0x3a9   : > { %2758 = vrot.lane.b32.xlu0 %v9641_v57, %s4679_s19  ;;  %v2703_v9 = vpop.permute.xlu1 %2702  ;;  %v3496_v49 = vpop.f32.mrf.mxu1 }
 0x3aa   : > { %v7765_v18 = vpop.permute.xlu2 %2716  ;;  %v3702_v53 = vpop.f32.mrf.mxu2 }
 0x3ab   : > { %v4454_v45 = vpop.permute.xlu0 %4453  ;;  %v3703_v38 = vadd.f32 %v3702_v53, %v3494_v39 }
 0x3ac   : > { %v4455_v16 = vunpack.i.l.bf16 %v4454_v45 }
 0x3ad   : > { %3415 = vmatmul.f32.gmra.mxu0 %v7669_v29  ;;  %4326 = vmatmul.msk.f32.gmra.mxu3 %vm2012_vm5, %v2869_v15  ;;  %v7800_v53 = vpop.f32.mrf.mxu0 }
 0x3ae   : > { %3540 = vmatmul.f32.gmra.mxu1 %v2983_v28  ;;  %v2464_v43 = vsel %vm1454_vm3, %v4451_v62, %v4455_v16  ;;  %v3288_v62 = vadd.f32 %v7754_v2, %v9649_v0  ;;  %v4456_v16 = vunpack.i.h.bf16 %v4454_v45  ;;  %9650 = vst [vmem:[#allocation39_spill] sm:$0xff] %v7800_v53  ;;  %v2870_v45 = vsel %vm1519_vm4, %v2703_v9, %v7676_v12 }
 0x3af   : > { %v3047_v13 = vsel %vm1519_vm4, %v2464_v43, %v2703_v9  ;;  %2762 = vrot.lane.b32.xlu1 %v7779_v33, %s4679_s19  ;;  %2764 = vrot.lane.b32.xlu2 %v9648_v10, %s4679_s19  ;;  %v4532_v9 = vpack.i.bf16 %v7615_v37, %v7004_v55  ;;  %v9654_v37 = vld [vmem:[#allocation83_spill] sm:$0xff] }
 0x3b0   : > { %3749 = vmatmul.f32.gmra.mxu2 %v3047_v13  ;;  %v3911_v27 = vpop.f32.mrf.mxu3  ;;  %v3497_v0 = vadd.f32 %v3496_v49, %v3288_v62 }
 0x3b1   : > { %v3912_v15 = vadd.f32 %v3911_v27, %v3703_v38  ;;  %4528 = vrot.lane.b32.xlu0 %v4527_v7, %s4678_s18  ;;  %v2707_v6 = vpop.permute.xlu1 %2706  ;;  %v9651_v7 = vld [vmem:[#allocation27_spill] sm:$0xff]  ;;  %v9652_v38 = vld [vmem:[#allocation96_spill] sm:$0xff]  ;;  %v3499_v22 = vpop.f32.mrf.mxu1 }
 0x3b2   : > { %v7798_v39 = vpop.permute.xlu2 %2720  ;;  %v3705_v28 = vpop.f32.mrf.mxu2  ;;  %v2054_v27 = vsel %vm2012_vm5, %v9652_v38, %v9651_v7 }
 0x3b3   : > { %v4103_v59 = vmax.f32 %v3912_v15, 0.0  ;;  %v4459_v43 = vpop.permute.xlu0 %4458  ;;  %v2984_v15 = vsel %vm1454_vm3, %v6850_v58, %v4456_v16  ;;  %v7816_v12 = vsel %vm2077_vm6, %v2054_v27, %v9653_v60  ;;  %v3706_v49 = vadd.f32 %v3705_v28, %v3497_v0  ;;  %v9655_v0 = vld [vmem:[#allocation19_spill] sm:$0xff] }
 0x3b4   : > { %v4460_v13 = vunpack.i.l.bf16 %v4459_v43  ;;  %v3291_v28 = vadd.f32 %v7754_v2, %v9654_v37  ;;  %v2871_v27 = vsel %vm1519_vm4, %v2707_v6, %v7703_v32 }
 0x3b5   : > { %4167 = vst.msk [vmem:[%s7796_s24] sm:$0xff] %vm1454_vm3, %v4103_v59  ;;  %3418 = vmatmul.f32.gmra.mxu0 %v7696_v20  ;;  %4327 = vmatmul.msk.f32.gmra.mxu3 %vm2012_vm5, %v2870_v45 }
 0x3b6   : > { %3543 = vmatmul.f32.gmra.mxu1 %v2984_v15  ;;  %v2465_v53 = vsel %vm1454_vm3, %v4456_v16, %v4460_v13  ;;  %v4461_v16 = vunpack.i.h.bf16 %v4459_v43  ;;  %v9656_v15 = vld [vmem:[#allocation89_spill] sm:$0xff] }
 0x3b7   : > { %v3048_v62 = vsel %vm1519_vm4, %v2465_v53, %v2707_v6  ;;  %2766 = vrot.lane.b32.xlu1 %v7816_v12, %s4679_s19  ;;  %2768 = vrot.lane.b32.xlu2 %v9653_v60, %s4679_s19  ;;  %v4537_v6 = vpack.i.bf16 %v7642_v23, %v7002_v42 }
 0x3b8   : > { %3752 = vmatmul.f32.gmra.mxu2 %v3048_v62  ;;  %v3914_v58 = vpop.f32.mrf.mxu3  ;;  %v2055_v62 = vsel %vm2012_vm5, %v9656_v15, %v9655_v0  ;;  %v2985_v43 = vsel %vm1454_vm3, %v6845_v26, %v4461_v16  ;;  %v9659_v15 = vld [vmem:[#allocation79_spill] sm:$0xff] }
 0x3b9   : > { %v3915_v59 = vadd.f32 %v3914_v58, %v3706_v49  ;;  %4533 = vrot.lane.b32.xlu0 %v4532_v9, %s4678_s18  ;;  %v2711_v13 = vpop.permute.xlu1 %2710  ;;  %v7841_v9 = vpop.f32.mrf.mxu0  ;;  %v9658_v58 = vld [vmem:[#allocation14_spill] sm:$0xff] }
 0x3ba   : > { %v7826_v45 = vpop.permute.xlu2 %2724  ;;  %9657 = vst [vmem:[#allocation15_spill] sm:$0xff] %v7841_v9  ;;  %v7846_v32 = vsel %vm2077_vm6, %v2055_v62, %v9658_v58  ;;  %v3502_v37 = vpop.f32.mrf.mxu1  ;;  %v9660_v9 = vld [vmem:[#allocation42_spill] sm:$0xff] }
 0x3bb   : > { %v4104_v53 = vmax.f32 %v3915_v59, 0.0  ;;  %v4464_v7 = vpop.permute.xlu0 %4463  ;;  %v3500_v59 = vadd.f32 %v3499_v22, %v3291_v28  ;;  %v3294_v22 = vadd.f32 %v7754_v2, %v9659_v15 }
 0x3bc   : > { %v4465_v38 = vunpack.i.l.bf16 %v4464_v7 }
 0x3bd   : > { %4168 = vst.msk [vmem:[%s7796_s24 + $0x8] sm:$0xff] %vm1454_vm3, %v4104_v53  ;;  %3421 = vmatmul.f32.gmra.mxu0 %v7721_v17  ;;  %4328 = vmatmul.msk.f32.gmra.mxu3 %vm2012_vm5, %v2871_v27 }
 0x3be   : > { %3546 = vmatmul.f32.gmra.mxu1 %v2985_v43  ;;  %v2466_v49 = vsel %vm1454_vm3, %v4461_v16, %v4465_v38  ;;  %v4466_v16 = vunpack.i.h.bf16 %v4464_v7 }
 0x3bf   : > { %v3049_v53 = vsel %vm1519_vm4, %v2466_v49, %v2711_v13  ;;  %2770 = vrot.lane.b32.xlu1 %v7846_v32, %s4679_s19  ;;  %2772 = vrot.lane.b32.xlu2 %v9658_v58, %s4679_s19  ;;  %v2872_v49 = vsel %vm1519_vm4, %v2711_v13, %v7730_v5  ;;  %v4542_v5 = vpack.i.bf16 %v7669_v29, %v9630_v35 }
 0x3c0   : > { %v3708_v26 = vpop.f32.mrf.mxu2  ;;  %3755 = vmatmul.f32.gmra.mxu2 %v3049_v53  ;;  %v9661_v53 = vld [vmem:[#allocation88_spill] sm:$0xff]  ;;  %v3503_v13 = vadd.f32 %v3502_v37, %v3294_v22 }
 0x3c1   : > { %v3709_v38 = vadd.f32 %v3708_v26, %v3500_v59  ;;  %v3917_v27 = vpop.f32.mrf.mxu3  ;;  %4538 = vrot.lane.b32.xlu0 %v4537_v6, %s4678_s18  ;;  %v2715_v0 = vpop.permute.xlu1 %2714  ;;  %v2056_v7 = vsel %vm2012_vm5, %v9661_v53, %v9660_v9  ;;  %v2986_v6 = vsel %vm1454_vm3, %v6793_v8, %v4466_v16 }
 0x3c2   : > { %v7858_v28 = vpop.permute.xlu2 %2728  ;;  %v7883_v8 = vpop.f32.mrf.mxu0 }
 0x3c3   : > { %v3918_v23 = vadd.f32 %v3917_v27, %v3709_v38  ;;  %v4469_v62 = vpop.permute.xlu0 %4468  ;;  %v7872_v38 = vsel %vm2077_vm6, %v2056_v7, %v7110_v4  ;;  %v3505_v27 = vpop.f32.mrf.mxu1  ;;  %v2873_v7 = vsel %vm1519_vm4, %v2715_v0, %v7765_v18  ;;  %v9665_v18 = vld [vmem:[#allocation30_spill] sm:$0xff] }
 0x3c4   : > { %v4470_v43 = vunpack.i.l.bf16 %v4469_v62  ;;  %v4471_v15 = vunpack.i.h.bf16 %v4469_v62 }
 0x3c5   : > { %v4105_v59 = vmax.f32 %v3918_v23, 0.0  ;;  %3424 = vmatmul.f32.gmra.mxu0 %v7749_v47  ;;  %4329 = vmatmul.msk.f32.gmra.mxu3 %vm2012_vm5, %v2872_v49 }
 0x3c6   : > { %3549 = vmatmul.f32.gmra.mxu1 %v2986_v6  ;;  %v2467_v26 = vsel %vm1454_vm3, %v4466_v16, %v4470_v43  ;;  %v9663_v6 = vld [vmem:[#allocation68_spill] sm:$0xff]  ;;  %v2987_v62 = vsel %vm1454_vm3, %v6867_v14, %v4471_v15 }
 0x3c7   : > { %4169 = vst.msk [vmem:[%s7796_s24 + $0x10] sm:$0xff] %vm1454_vm3, %v4105_v59  ;;  %v3050_v9 = vsel %vm1519_vm4, %v2467_v26, %v2715_v0  ;;  %2774 = vrot.lane.b32.xlu1 %v7872_v38, %s4679_s19  ;;  %2776 = vrot.lane.b32.xlu2 %v7110_v4, %s4679_s19  ;;  %v9662_v59 = vld [vmem:[#allocation2_spill] sm:$0xff]  ;;  %v3297_v0 = vadd.f32 %v7754_v2, %v9665_v18  ;;  %v9668_v18 = vld [vmem:[#allocation59_spill] sm:$0xff] }
 0x3c8   : > { %v3711_v16 = vpop.f32.mrf.mxu2  ;;  %3758 = vmatmul.f32.gmra.mxu2 %v3050_v9  ;;  %v2057_v26 = vsel %vm2012_vm5, %v9663_v6, %v9662_v59 }
 0x3c9   : > { %v3712_v23 = vadd.f32 %v3711_v16, %v3503_v13  ;;  %4543 = vrot.lane.b32.xlu0 %v4542_v5, %s4678_s18  ;;  %v3920_v29 = vpop.f32.mrf.mxu3  ;;  %v2719_v37 = vpop.permute.xlu1 %2718  ;;  %v9664_v13 = vld [vmem:[#allocation24_spill] sm:$0xff] }
 0x3ca   : > { %v7886_v43 = vpop.permute.xlu2 %2732  ;;  %v7900_v16 = vsel %vm2077_vm6, %v2057_v26, %v9664_v13 }
 0x3cb   : > { %v3921_v22 = vadd.f32 %v3920_v29, %v3712_v23  ;;  %v4474_v49 = vpop.permute.xlu0 %4473  ;;  %v4547_v23 = vpack.i.bf16 %v7696_v20, %v7025_v41 }
 0x3cc   : > { %v4475_v53 = vunpack.i.l.bf16 %v4474_v49  ;;  %v4476_v14 = vunpack.i.h.bf16 %v4474_v49 }
 0x3cd   : > { %v4106_v9 = vmax.f32 %v3921_v22, 0.0  ;;  %3427 = vmatmul.f32.gmra.mxu0 %v7779_v33  ;;  %4330 = vmatmul.msk.f32.gmra.mxu3 %vm2012_vm5, %v2873_v7  ;;  %v7914_v22 = vpop.f32.mrf.mxu0  ;;  %v3506_v7 = vadd.f32 %v3505_v27, %v3297_v0  ;;  %v9669_v0 = vld [vmem:[#allocation34_spill] sm:$0xff] }
 0x3ce   : > { %3552 = vmatmul.f32.gmra.mxu1 %v2987_v62  ;;  %v2468_v5 = vsel %vm1454_vm3, %v4471_v15, %v4475_v53  ;;  %9666 = vst [vmem:[#allocation9_spill] sm:$0xff] %v7914_v22  ;;  %v2874_v62 = vsel %vm1519_vm4, %v2719_v37, %v7798_v39  ;;  %v2988_v27 = vsel %vm1454_vm3, %v6862_v40, %v4476_v14  ;;  %v9670_v39 = vld [vmem:[#allocation36_spill] sm:$0xff] }
 0x3cf   : > { %4170 = vst.msk [vmem:[%s7796_s24 + $0x18] sm:$0xff] %vm1454_vm3, %v4106_v9  ;;  %v3051_v29 = vsel %vm1519_vm4, %v2468_v5, %v2719_v37  ;;  %2778 = vrot.lane.b32.xlu1 %v7900_v16, %s4679_s19  ;;  %2780 = vrot.lane.b32.xlu2 %v9664_v13, %s4679_s19  ;;  %v9667_v5 = vld [vmem:[#allocation112_spill] sm:$0xff] }
 0x3d0   : > { %3761 = vmatmul.f32.gmra.mxu2 %v3051_v29  ;;  %v2058_v49 = vsel %vm2012_vm5, %v9668_v18, %v9667_v5 }
 0x3d1   : > { %4548 = vrot.lane.b32.xlu0 %v4547_v23, %s4678_s18  ;;  %v3508_v15 = vpop.f32.mrf.mxu1  ;;  %v2723_v53 = vpop.permute.xlu1 %2722  ;;  %v3300_v23 = vadd.f32 %v7754_v2, %v9669_v0  ;;  %v7932_v37 = vsel %vm2077_vm6, %v2058_v49, %v9670_v39  ;;  %v9672_v0 = vld [vmem:[#allocation60_spill] sm:$0xff] }
 0x3d2   : > { %v7916_v20 = vpop.permute.xlu2 %2736  ;;  %v3923_v6 = vpop.f32.mrf.mxu3 }
 0x3d3   : > { %v4479_v59 = vpop.permute.xlu0 %4478  ;;  %v3714_v9 = vpop.f32.mrf.mxu2  ;;  %v3509_v18 = vadd.f32 %v3508_v15, %v3300_v23 }
 0x3d4   : > { %v4480_v26 = vunpack.i.l.bf16 %v4479_v59  ;;  %v3715_v29 = vadd.f32 %v3714_v9, %v3506_v7  ;;  %v4552_v7 = vpack.i.bf16 %v7721_v17, %v7021_v19  ;;  %v4481_v40 = vunpack.i.h.bf16 %v4479_v59 }
 0x3d5   : > { %3430 = vmatmul.f32.gmra.mxu0 %v7816_v12  ;;  %4331 = vmatmul.msk.f32.gmra.mxu3 %vm2012_vm5, %v2874_v62  ;;  %v7955_v23 = vpop.f32.mrf.mxu0 }
 0x3d6   : > { %3555 = vmatmul.f32.gmra.mxu1 %v2988_v27  ;;  %v2469_v22 = vsel %vm1454_vm3, %v4476_v14, %v4480_v26  ;;  %v3924_v9 = vadd.f32 %v3923_v6, %v3715_v29  ;;  %v2875_v29 = vsel %vm1519_vm4, %v2723_v53, %v7826_v45  ;;  %v9671_v27 = vld [vmem:[#allocation111_spill] sm:$0xff]  ;;  %v2989_v15 = vsel %vm1454_vm3, %v6809_v51, %v4481_v40  ;;  %v9673_v51 = vld [vmem:[#allocation26_spill] sm:$0xff] }
 0x3d7   : > { %v3052_v62 = vsel %vm1519_vm4, %v2469_v22, %v2723_v53  ;;  %2782 = vrot.lane.b32.xlu1 %v7932_v37, %s4679_s19  ;;  %2784 = vrot.lane.b32.xlu2 %v9670_v39, %s4679_s19  ;;  %v2059_v59 = vsel %vm2012_vm5, %v9672_v0, %v9671_v27  ;;  %v4557_v53 = vpack.i.bf16 %v7749_v47, %v9641_v57 }
 0x3d8   : > { %3764 = vmatmul.f32.gmra.mxu2 %v3052_v62  ;;  %v4107_v5 = vmax.f32 %v3924_v9, 0.0  ;;  %v7960_v45 = vsel %vm2077_vm6, %v2059_v59, %v7156_v11 }
 0x3d9   : > { %4553 = vrot.lane.b32.xlu0 %v4552_v7, %s4678_s18  ;;  %v3511_v14 = vpop.f32.mrf.mxu1  ;;  %v2727_v26 = vpop.permute.xlu1 %2726 }
 0x3da   : > { %4171 = vst.msk [vmem:[%s7796_s24 + $0x20] sm:$0xff] %vm1454_vm3, %v4107_v5  ;;  %v7944_v17 = vpop.permute.xlu2 %2740  ;;  %v3926_v7 = vpop.f32.mrf.mxu3 }
 0x3db   : > { %v4484_v6 = vpop.permute.xlu0 %4483  ;;  %v3717_v49 = vpop.f32.mrf.mxu2 }
 0x3dc   : > { %v4485_v22 = vunpack.i.l.bf16 %v4484_v6  ;;  %v3718_v9 = vadd.f32 %v3717_v49, %v3509_v18 }
 0x3dd   : > { %3433 = vmatmul.f32.gmra.mxu0 %v7846_v32  ;;  %4332 = vmatmul.msk.f32.gmra.mxu3 %vm2012_vm5, %v2875_v29 }
 0x3de   : > { %3558 = vmatmul.f32.gmra.mxu1 %v2989_v15  ;;  %v2470_v62 = vsel %vm1454_vm3, %v4481_v40, %v4485_v22  ;;  %v3927_v5 = vadd.f32 %v3926_v7, %v3718_v9  ;;  %v3303_v40 = vadd.f32 %v7754_v2, %v9673_v51  ;;  %v4486_v22 = vunpack.i.h.bf16 %v4484_v6  ;;  %v9674_v15 = vld [vmem:[#allocation25_spill] sm:$0xff]  ;;  %v9677_v51 = vld [vmem:[#allocation51_spill] sm:$0xff] }
 0x3df   : > { %v3053_v18 = vsel %vm1519_vm4, %v2470_v62, %v2727_v26  ;;  %2786 = vrot.lane.b32.xlu1 %v7960_v45, %s4679_s19  ;;  %2788 = vrot.lane.b32.xlu2 %v7156_v11, %s4679_s19  ;;  %v2876_v9 = vsel %vm1519_vm4, %v2727_v26, %v7858_v28  ;;  %v2061_v7 = vsel %vm2012_vm5, 0.0, %v9674_v15  ;;  %v4562_v6 = vpack.i.bf16 %v9648_v10, %v7779_v33  ;;  %v9676_v26 = vld [vmem:[#allocation33_spill] sm:$0xff] }
 0x3e0   : > { %3767 = vmatmul.f32.gmra.mxu2 %v3053_v18  ;;  %v4108_v49 = vmax.f32 %v3927_v5, 0.0  ;;  %v3512_v62 = vadd.f32 %v3511_v14, %v3303_v40  ;;  %v2471_v5 = vsel %vm1454_vm3, %v4486_v22, %v7508_v63  ;;  %v9675_v18 = vld [vmem:[#allocation55_spill] sm:$0xff]  ;;  %v2060_v33 = vsel %vm2012_vm5, %v9677_v51, %v9676_v26 }
 0x3e1   : > { %4558 = vrot.lane.b32.xlu0 %v4557_v53, %s4678_s18  ;;  %v4489_v29 = vpop.permute.xlu1 %4488  ;;  %v3514_v0 = vpop.f32.mrf.mxu1  ;;  %v2990_v53 = vsel %vm1454_vm3, %v6828_v44, %v4486_v22  ;;  %v7990_v28 = vsel %vm2077_vm6, %v2061_v7, %v9675_v18  ;;  %v8003_v7 = vsel %vm2077_vm6, %v2060_v33, %v6828_v44 }
 0x3e2   : > { %4172 = vst.msk [vmem:[%s7796_s24 + $0x28] sm:$0xff] %vm1454_vm3, %v4108_v49  ;;  %v7974_v47 = vpop.permute.xlu2 %2744  ;;  %v7999_v49 = vpop.f32.mrf.mxu0  ;;  %v4490_v22 = vunpack.i.l.bf16 %v4489_v29 }
 0x3e3   : > { %v2731_v27 = vpop.permute.xlu0 %2730  ;;  %v3720_v59 = vpop.f32.mrf.mxu2  ;;  %9678 = vst [vmem:[#allocation64_spill] sm:$0xff] %v7999_v49 }
 0x3e4   : > { %v3721_v14 = vadd.f32 %v3720_v59, %v3512_v62  ;;  %v3054_v40 = vsel %vm1519_vm4, %v2471_v5, %v2731_v27  ;;  %v2877_v33 = vsel %vm1519_vm4, %v2731_v27, %v7536_v30 }
 0x3e5   : > { %3436 = vmatmul.f32.gmra.mxu0 %v7872_v38  ;;  %4333 = vmatmul.msk.f32.gmra.mxu3 %vm2012_vm5, %v2876_v9  ;;  %v4491_v9 = vunpack.i.h.bf16 %v4489_v29  ;;  %v9680_v29 = vld [vmem:[#allocation49_spill] sm:$0xff] }
 0x3e6   : > { %3561 = vmatmul.f32.gmra.mxu1 %v2990_v53  ;;  %v9679_v53 = vld [vmem:[#allocation73_spill] sm:$0xff] }
 0x3e7   : > { %4563 = vrot.lane.b32.xlu1 %v4562_v6, %s4678_s18  ;;  %2792 = vrot.lane.b32.xlu2 %v7990_v28, %s4679_s19  ;;  %v3306_v59 = vadd.f32 %v7754_v2, %v9679_v53  ;;  %v2472_v53 = vsel %vm1454_vm3, %v4490_v22, %v4491_v9 }
 0x3e8   : > { %3770 = vmatmul.f32.gmra.mxu2 %v3054_v40  ;;  %v3929_v15 = vpop.f32.mrf.mxu3  ;;  %v9681_v40 = vld [vmem:[#allocation37_spill] sm:$0xff]  ;;  %v3055_v9 = vsel %vm1519_vm4, %v2472_v53, %v7886_v43 }
 0x3e9   : > { %v3930_v62 = vadd.f32 %v3929_v15, %v3721_v14  ;;  %2790 = vrot.lane.b32.xlu0 %v8003_v7, %s4679_s19  ;;  %v4494_v6 = vpop.permute.xlu1 %4493  ;;  %v2062_v10 = vsel %vm2012_vm5, %v9681_v40, %v9680_v29  ;;  %v4567_v14 = vpack.i.bf16 %v9653_v60, %v7816_v12  ;;  %v3515_v15 = vadd.f32 %v3514_v0, %v3306_v59  ;;  %v9682_v29 = vld [vmem:[#allocation92_spill] sm:$0xff] }
 0x3ea   : > { %v8009_v26 = vpop.permute.xlu2 %2748  ;;  %v8027_v40 = vsel %vm2077_vm6, %v2062_v10, %v9682_v29  ;;  %v4496_v12 = vunpack.i.h.bf16 %v4494_v6  ;;  %v4495_v0 = vunpack.i.l.bf16 %v4494_v6  ;;  %v8036_v10 = vpop.f32.mrf.mxu0  ;;  %v4572_v60 = vpack.i.bf16 %v9658_v58, %v7846_v32 }
 0x3eb   : > { %v4109_v5 = vmax.f32 %v3930_v62, 0.0  ;;  %v2735_v51 = vpop.permute.xlu0 %2734  ;;  %v3723_v49 = vpop.f32.mrf.mxu2  ;;  %v2991_v62 = vsel %vm1454_vm3, %v6890_v31, %v4490_v22  ;;  %9683 = vst [vmem:[#allocation113_spill] sm:$0xff] %v8036_v10  ;;  %v3309_v22 = vadd.f32 %v7754_v2, %v7243_v50 }
 0x3ec   : > { %v3517_v57 = vpop.f32.mrf.mxu1  ;;  %v3724_v27 = vadd.f32 %v3723_v49, %v3515_v15  ;;  %v9685_v15 = vld [vmem:[#allocation86_spill] sm:$0xff]  ;;  %v2992_v50 = vsel %vm1454_vm3, %v6885_v56, %v4495_v0 }
 0x3ed   : > { %4173 = vst.msk [vmem:[%s7796_s24 + $0x30] sm:$0xff] %vm1454_vm3, %v4109_v5  ;;  %3439 = vmatmul.f32.gmra.mxu0 %v7900_v16  ;;  %4334 = vmatmul.msk.f32.gmra.mxu3 %vm2012_vm5, %v2877_v33  ;;  %v3518_v10 = vadd.f32 %v3517_v57, %v3309_v22 }
 0x3ee   : > { %3564 = vmatmul.f32.gmra.mxu1 %v2991_v62  ;;  %v2878_v62 = vsel %vm1519_vm4, %v7886_v43, %v2735_v51 }
 0x3ef   : > { %4568 = vrot.lane.b32.xlu1 %v4567_v14, %s4678_s18  ;;  %2796 = vrot.lane.b32.xlu2 %v8027_v40, %s4679_s19  ;;  %v9684_v14 = vld [vmem:[#allocation12_spill] sm:$0xff] }
 0x3f0   : > { %3773 = vmatmul.f32.gmra.mxu2 %v3055_v9  ;;  %v3932_v59 = vpop.f32.mrf.mxu3  ;;  %v2063_v6 = vsel %vm2012_vm5, %v9685_v15, %v9684_v14 }
 0x3f1   : > { %v3933_v31 = vadd.f32 %v3932_v59, %v3724_v27  ;;  %2794 = vrot.lane.b32.xlu0 %v9675_v18, %s4679_s19  ;;  %v4499_v49 = vpop.permute.xlu1 %4498  ;;  %v2473_v59 = vsel %vm1454_vm3, %v4495_v0, %v4496_v12 }
 0x3f2   : > { %v8040_v33 = vpop.permute.xlu2 %2752  ;;  %v3056_v12 = vsel %vm1519_vm4, %v2473_v59, %v7916_v20  ;;  %v4501_v57 = vunpack.i.h.bf16 %v4499_v49  ;;  %v4500_v32 = vunpack.i.l.bf16 %v4499_v49 }
 0x3f3   : > { %v4110_v5 = vmax.f32 %v3933_v31, 0.0  ;;  %v2739_v53 = vpop.permute.xlu0 %2738  ;;  %v3726_v27 = vpop.f32.mrf.mxu2  ;;  %v9686_v31 = vld [vmem:[#allocation32_spill] sm:$0xff] }
 0x3f4   : > { %v3520_v9 = vpop.f32.mrf.mxu1  ;;  %v8058_v43 = vsel %vm2077_vm6, %v2063_v6, %v9686_v31  ;;  %v3727_v51 = vadd.f32 %v3726_v27, %v3518_v10  ;;  %v9688_v6 = vld [vmem:[#allocation115_spill] sm:$0xff]  ;;  %v2879_v49 = vsel %vm1519_vm4, %v7916_v20, %v2739_v53  ;;  %v9690_v20 = vld [vmem:[#allocation78_spill] sm:$0xff] }
 0x3f5   : > { %4174 = vst.msk [vmem:[%s7796_s24 + $0x38] sm:$0xff] %vm1454_vm3, %v4110_v5  ;;  %3442 = vmatmul.f32.gmra.mxu0 %v7932_v37  ;;  %4335 = vmatmul.msk.f32.gmra.mxu3 %vm2012_vm5, %v2878_v62  ;;  %v9687_v5 = vld [vmem:[#allocation77_spill] sm:$0xff]  ;;  %v9689_v62 = vld [vmem:[#allocation95_spill] sm:$0xff] }
 0x3f6   : > { %3567 = vmatmul.f32.gmra.mxu1 %v2992_v50  ;;  %v3312_v10 = vadd.f32 %v7754_v2, %v9687_v5  ;;  %v2064_v27 = vsel %vm2012_vm5, %v9689_v62, %v9688_v6  ;;  %v2993_v5 = vsel %vm1454_vm3, %v6826_v52, %v4500_v32  ;;  %v9691_v6 = vld [vmem:[#allocation76_spill] sm:$0xff] }
 0x3f7   : > { %4573 = vrot.lane.b32.xlu1 %v4572_v60, %s4678_s18  ;;  %2800 = vrot.lane.b32.xlu2 %v8058_v43, %s4679_s19  ;;  %v8089_v53 = vsel %vm2077_vm6, %v2064_v27, %v9690_v20  ;;  %v3315_v62 = vadd.f32 %v7754_v2, %v9691_v6  ;;  %v9694_v6 = vld [vmem:[#allocation81_spill] sm:$0xff] }
 0x3f8   : > { %3776 = vmatmul.f32.gmra.mxu2 %v3056_v12  ;;  %v3935_v22 = vpop.f32.mrf.mxu3  ;;  %v4577_v12 = vpack.i.bf16 %v7110_v4, %v7872_v38 }
 0x3f9   : > { %v3936_v56 = vadd.f32 %v3935_v22, %v3727_v51  ;;  %2798 = vrot.lane.b32.xlu0 %v9682_v29, %s4679_s19  ;;  %v4504_v0 = vpop.permute.xlu1 %4503  ;;  %v2474_v51 = vsel %vm1454_vm3, %v4500_v32, %v4501_v57  ;;  %v8079_v22 = vpop.f32.mrf.mxu0 }
 0x3fa   : > { %v8069_v15 = vpop.permute.xlu2 %2756  ;;  %v3057_v38 = vsel %vm1519_vm4, %v2474_v51, %v7944_v17  ;;  %v9692_v51 = vld [vmem:[#allocation114_spill] sm:$0xff] }
 0x3fb   : > { %v4111_v14 = vmax.f32 %v3936_v56, 0.0  ;;  %v2743_v60 = vpop.permute.xlu0 %2742  ;;  %v3729_v59 = vpop.f32.mrf.mxu2  ;;  %v3521_v56 = vadd.f32 %v3520_v9, %v3312_v10  ;;  %v4506_v9 = vunpack.i.h.bf16 %v4504_v0  ;;  %v4505_v10 = vunpack.i.l.bf16 %v4504_v0 }
 0x3fc   : > { %v3523_v50 = vpop.f32.mrf.mxu1  ;;  %v2880_v0 = vsel %vm1519_vm4, %v7944_v17, %v2743_v60 }
 0x3fd   : > { %4175 = vst.msk [vmem:[%s7796_s24 + $0x40] sm:$0xff] %vm1454_vm3, %v4111_v14  ;;  %3445 = vmatmul.f32.gmra.mxu0 %v7960_v45  ;;  %4336 = vmatmul.msk.f32.gmra.mxu3 %vm2012_vm5, %v2879_v49  ;;  %v3730_v57 = vadd.f32 %v3729_v59, %v3521_v56  ;;  %v3524_v4 = vadd.f32 %v3523_v50, %v3315_v62 }
 0x3fe   : > { %3570 = vmatmul.f32.gmra.mxu1 %v2993_v5 }
 0x3ff   : > { %4578 = vrot.lane.b32.xlu1 %v4577_v12, %s4678_s18  ;;  %2804 = vrot.lane.b32.xlu2 %v8089_v53, %s4679_s19  ;;  %v9693_v12 = vld [vmem:[#allocation58_spill] sm:$0xff] }
 0x400   : > { %3779 = vmatmul.f32.gmra.mxu2 %v3057_v38  ;;  %v3938_v14 = vpop.f32.mrf.mxu3  ;;  %v2065_v56 = vsel %vm2012_vm5, %v9693_v12, %v9692_v51  ;;  %v2475_v38 = vsel %vm1454_vm3, %v4505_v10, %v4506_v9 }
 0x401   : > { %v3939_v52 = vadd.f32 %v3938_v14, %v3730_v57  ;;  %2802 = vrot.lane.b32.xlu0 %v9686_v31, %s4679_s19  ;;  %v4509_v32 = vpop.permute.xlu1 %4508  ;;  %v4582_v14 = vpack.i.bf16 %v9664_v13, %v7900_v16  ;;  %v8118_v17 = vsel %vm2077_vm6, %v2065_v56, %v9694_v6  ;;  %v8120_v60 = vpop.f32.mrf.mxu0  ;;  %v3058_v16 = vsel %vm1519_vm4, %v2475_v38, %v7974_v47 }
 0x402   : > { %v8100_v49 = vpop.permute.xlu2 %2760  ;;  %v4511_v50 = vunpack.i.h.bf16 %v4509_v32  ;;  %v4510_v62 = vunpack.i.l.bf16 %v4509_v32 }
 0x403   : > { %v4112_v27 = vmax.f32 %v3939_v52, 0.0  ;;  %v2747_v59 = vpop.permute.xlu0 %2746  ;;  %v3732_v5 = vpop.f32.mrf.mxu2  ;;  %v2994_v52 = vsel %vm1454_vm3, %v6915_v21, %v4505_v10 }
 0x404   : > { %v3526_v57 = vpop.f32.mrf.mxu1  ;;  %v3733_v9 = vadd.f32 %v3732_v5, %v3524_v4  ;;  %v3318_v4 = vadd.f32 %v7754_v2, %v7326_v48  ;;  %v9696_v5 = vld [vmem:[#allocation103_spill] sm:$0xff]  ;;  %v2881_v32 = vsel %vm1519_vm4, %v7974_v47, %v2747_v59  ;;  %v2995_v48 = vsel %vm1454_vm3, %v6908_v25, %v4510_v62 }
 0x405   : > { %4176 = vst.msk [vmem:[%s7796_s24 + $0x48] sm:$0xff] %vm1454_vm3, %v4112_v27  ;;  %3448 = vmatmul.f32.gmra.mxu0 %v8003_v7  ;;  %4337 = vmatmul.msk.f32.gmra.mxu3 %vm2012_vm5, %v2880_v0  ;;  %v9695_v0 = vld [vmem:[#allocation40_spill] sm:$0xff] }
 0x406   : > { %3573 = vmatmul.f32.gmra.mxu1 %v2994_v52  ;;  %v2066_v38 = vsel %vm2012_vm5, %v9696_v5, %v9695_v0  ;;  %v3321_v0 = vadd.f32 %v7754_v2, %v7358_v46 }
 0x407   : > { %4583 = vrot.lane.b32.xlu1 %v4582_v14, %s4678_s18  ;;  %2808 = vrot.lane.b32.xlu2 %v8118_v17, %s4679_s19 }
 0x408   : > { %3782 = vmatmul.f32.gmra.mxu2 %v3058_v16  ;;  %v3941_v21 = vpop.f32.mrf.mxu3  ;;  %v4587_v16 = vpack.i.bf16 %v9670_v39, %v7932_v37 }
 0x409   : > { %v3942_v10 = vadd.f32 %v3941_v21, %v3733_v9  ;;  %2806 = vrot.lane.b32.xlu0 %v9690_v20, %s4679_s19  ;;  %v4514_v27 = vpop.permute.xlu1 %4513  ;;  %v2476_v9 = vsel %vm1454_vm3, %v4510_v62, %v4511_v50  ;;  %v3527_v21 = vadd.f32 %v3526_v57, %v3318_v4  ;;  %v8156_v25 = vpop.f32.mrf.mxu0 }
 0x40a   : > { %v8131_v12 = vpop.permute.xlu2 %2764  ;;  %v3059_v50 = vsel %vm1519_vm4, %v2476_v9, %v8009_v26  ;;  %v4516_v37 = vunpack.i.h.bf16 %v4514_v27  ;;  %v4515_v57 = vunpack.i.l.bf16 %v4514_v27  ;;  %v9699_v9 = vld [vmem:[#allocation85_spill] sm:$0xff] }
 0x40b   : > { %v4113_v51 = vmax.f32 %v3942_v10, 0.0  ;;  %v2751_v56 = vpop.permute.xlu0 %2750  ;;  %v3735_v14 = vpop.f32.mrf.mxu2  ;;  %v9697_v10 = vld [vmem:[#allocation71_spill] sm:$0xff] }
 0x40c   : > { %v3529_v52 = vpop.f32.mrf.mxu1  ;;  %v8149_v47 = vsel %vm2077_vm6, %v2066_v38, %v9697_v10  ;;  %v3736_v59 = vadd.f32 %v3735_v14, %v3527_v21  ;;  %v9698_v14 = vld [vmem:[#allocation31_spill] sm:$0xff]  ;;  %v2996_v46 = vsel %vm1454_vm3, %v6843_v3, %v4515_v57 }
 0x40d   : > { %4177 = vst.msk [vmem:[%s7796_s24 + $0x50] sm:$0xff] %vm1454_vm3, %v4113_v51  ;;  %3451 = vmatmul.f32.gmra.mxu0 %v7990_v28  ;;  %4338 = vmatmul.msk.f32.gmra.mxu3 %vm2012_vm5, %v2881_v32  ;;  %v2067_v27 = vsel %vm2012_vm5, %v9699_v9, %v9698_v14 }
 0x40e   : > { %3576 = vmatmul.f32.gmra.mxu1 %v2995_v48 }
 0x40f   : > { %4588 = vrot.lane.b32.xlu1 %v4587_v16, %s4678_s18  ;;  %2812 = vrot.lane.b32.xlu2 %v8149_v47, %s4679_s19  ;;  %v2882_v16 = vsel %vm1519_vm4, %v8009_v26, %v2751_v56 }
 0x410   : > { %3785 = vmatmul.f32.gmra.mxu2 %v3059_v50  ;;  %v3944_v4 = vpop.f32.mrf.mxu3  ;;  %v4592_v50 = vpack.i.bf16 %v7156_v11, %v7960_v45 }
 0x411   : > { %v3945_v62 = vadd.f32 %v3944_v4, %v3736_v59  ;;  %2810 = vrot.lane.b32.xlu0 %v9694_v6, %s4679_s19  ;;  %v4519_v51 = vpop.permute.xlu1 %4518  ;;  %v2477_v59 = vsel %vm1454_vm3, %v4515_v57, %v4516_v37  ;;  %v3530_v4 = vadd.f32 %v3529_v52, %v3321_v0  ;;  %v8193_v14 = vpop.f32.mrf.mxu0 }
 0x412   : > { %v8162_v38 = vpop.permute.xlu2 %2768  ;;  %v3060_v37 = vsel %vm1519_vm4, %v2477_v59, %v8040_v33  ;;  %v4521_v45 = vunpack.i.h.bf16 %v4519_v51  ;;  %v4520_v52 = vunpack.i.l.bf16 %v4519_v51 }
 0x413   : > { %v4114_v5 = vmax.f32 %v3945_v62, 0.0  ;;  %v2755_v32 = vpop.permute.xlu0 %2754  ;;  %v3738_v21 = vpop.f32.mrf.mxu2  ;;  %v9700_v62 = vld [vmem:[#allocation44_spill] sm:$0xff] }
 0x414   : > { %v3532_v48 = vpop.f32.mrf.mxu1  ;;  %v8180_v26 = vsel %vm2077_vm6, %v2067_v27, %v9700_v62  ;;  %v3739_v56 = vadd.f32 %v3738_v21, %v3530_v4  ;;  %v9702_v21 = vld [vmem:[#allocation101_spill] sm:$0xff]  ;;  %v2883_v59 = vsel %vm1519_vm4, %v8040_v33, %v2755_v32 }
 0x415   : > { %4178 = vst.msk [vmem:[%s7796_s24 + $0x58] sm:$0xff] %vm1454_vm3, %v4114_v5  ;;  %3454 = vmatmul.f32.gmra.mxu0 %v8027_v40  ;;  %4339 = vmatmul.msk.f32.gmra.mxu3 %vm2012_vm5, %v2882_v16  ;;  %v3324_v5 = vadd.f32 %v7754_v2, %v7381_v24  ;;  %v9701_v16 = vld [vmem:[#allocation56_spill] sm:$0xff] }
 0x416   : > { %3579 = vmatmul.f32.gmra.mxu1 %v2996_v46  ;;  %v2068_v51 = vsel %vm2012_vm5, %v9702_v21, %v9701_v16  ;;  %v2478_v46 = vsel %vm1454_vm3, %v4520_v52, %v4521_v45 }
 0x417   : > { %4593 = vrot.lane.b32.xlu1 %v4592_v50, %s4678_s18  ;;  %2816 = vrot.lane.b32.xlu2 %v8180_v26, %s4679_s19  ;;  %v8213_v33 = vsel %vm2077_vm6, %v2068_v51, %v6828_v44 }
 0x418   : > { %3788 = vmatmul.f32.gmra.mxu2 %v3060_v37  ;;  %v3947_v0 = vpop.f32.mrf.mxu3  ;;  %v3533_v37 = vadd.f32 %v3532_v48, %v3324_v5 }
 0x419   : > { %v3948_v3 = vadd.f32 %v3947_v0, %v3739_v56  ;;  %2814 = vrot.lane.b32.xlu0 %v9697_v10, %s4679_s19  ;;  %v8189_v57 = vpop.permute.xlu1 %4523  ;;  %v4597_v56 = vpack.i.bf16 %v7990_v28, %v8003_v7  ;;  %v2997_v0 = vsel %vm1454_vm3, %v6935_v34, %v4520_v52  ;;  %v3061_v28 = vsel %vm1519_vm4, %v2478_v46, %v8069_v15 }
 0x41a   : > { %v8205_v24 = vpop.permute.xlu2 %2772  ;;  %v4525_v7 = vunpack.i.l.bf16 %v8189_v57  ;;  %v3327_v52 = vadd.f32 %v7754_v2, %v7410_v1 }
 0x41b   : > { %v4115_v9 = vmax.f32 %v3948_v3, 0.0  ;;  %v2759_v27 = vpop.permute.xlu0 %2758  ;;  %v3741_v50 = vpop.f32.mrf.mxu2 }
 0x41c   : > { %v3535_v4 = vpop.f32.mrf.mxu1  ;;  %v3742_v32 = vadd.f32 %v3741_v50, %v3533_v37  ;;  %v2479_v51 = vsel %vm1454_vm3, %v4525_v7, %v7508_v63  ;;  %v2998_v1 = vsel %vm1454_vm3, %v6828_v44, %v4525_v7  ;;  %v4602_v37 = vpack.i.bf16 %v8027_v40, %v9675_v18 }
 0x41d   : > { %4179 = vst.msk [vmem:[%s7796_s24 + $0x60] sm:$0xff] %vm1454_vm3, %v4115_v9  ;;  %3457 = vmatmul.f32.gmra.mxu0 %v8058_v43  ;;  %4340 = vmatmul.msk.f32.gmra.mxu3 %vm2012_vm5, %v2883_v59  ;;  %v2884_v9 = vsel %vm1519_vm4, %v8069_v15, %v2759_v27  ;;  %v9703_v59 = vld [vmem:[#allocation16_spill] sm:$0xff]  ;;  %v3536_v46 = vadd.f32 %v3535_v4, %v3327_v52  ;;  %v9704_v15 = vld [vmem:[#allocation90_spill] sm:$0xff] }
 0x41e   : > { %3582 = vmatmul.f32.gmra.mxu1 %v2997_v0  ;;  %v2069_v50 = vsel %vm2012_vm5, 0.0, %v9703_v59  ;;  %v3330_v52 = vadd.f32 %v7754_v2, %v7440_v54 }
 0x41f   : > { %4598 = vrot.lane.b32.xlu1 %v4597_v56, %s4678_s18  ;;  %2820 = vrot.lane.b32.xlu2 %v8213_v33, %s4679_s19  ;;  %v8241_v56 = vpop.f32.mrf.mxu0  ;;  %v8245_v27 = vsel %vm2077_vm6, %v2069_v50, %v9704_v15 }
 0x420   : > { %3791 = vmatmul.f32.gmra.mxu2 %v3061_v28  ;;  %v3950_v48 = vpop.f32.mrf.mxu3 }
 0x421   : > { %v3951_v34 = vadd.f32 %v3950_v48, %v3742_v32  ;;  %2818 = vrot.lane.b32.xlu0 %v9700_v62, %s4679_s19  ;;  %v8223_v45 = vpop.permute.xlu1 %2762  ;;  %v3062_v32 = vsel %vm1519_vm4, %v2479_v51, %v8100_v49  ;;  %v4526_v48 = vunpack.i.h.bf16 %v8189_v57  ;;  %v9705_v57 = vld [vmem:[#allocation118_spill] sm:$0xff] }
 0x422   : > { %v8249_v4 = vpop.permute.xlu2 %2776 }
 0x423   : > { %v4116_v3 = vmax.f32 %v3951_v34, 0.0  ;;  %v8227_v5 = vpop.permute.xlu0 %4528  ;;  %v3744_v16 = vpop.f32.mrf.mxu2  ;;  %v2999_v54 = vsel %vm1454_vm3, %v6930_v36, %v4526_v48 }
 0x424   : > { %v3538_v21 = vpop.f32.mrf.mxu1  ;;  %v3745_v0 = vadd.f32 %v3744_v16, %v3536_v46  ;;  %v4530_v28 = vunpack.i.l.bf16 %v8227_v5  ;;  %v2885_v16 = vsel %vm1519_vm4, %v8100_v49, %v7536_v30  ;;  %v9706_v46 = vld [vmem:[#allocation100_spill] sm:$0xff]  ;;  %v9707_v49 = vld [vmem:[#allocation97_spill] sm:$0xff] }
 0x425   : > { %4180 = vst.msk [vmem:[%s7796_s24 + $0x68] sm:$0xff] %vm1454_vm3, %v4116_v3  ;;  %3460 = vmatmul.f32.gmra.mxu0 %v8089_v53  ;;  %4341 = vmatmul.msk.f32.gmra.mxu3 %vm2012_vm5, %v2884_v9 }
 0x426   : > { %3585 = vmatmul.f32.gmra.mxu1 %v2998_v1  ;;  %v2480_v50 = vsel %vm1454_vm3, %v4526_v48, %v4530_v28  ;;  %v2070_v1 = vsel %vm2012_vm5, %v9706_v46, %v9705_v57  ;;  %v2886_v57 = vsel %vm1519_vm4, %v8223_v45, %v8131_v12  ;;  %v9711_v12 = vld [vmem:[#allocation94_spill] sm:$0xff] }
 0x427   : > { %2822 = vrot.lane.b32.xlu1 %v8245_v27, %s4679_s19  ;;  %2824 = vrot.lane.b32.xlu2 %v9704_v15, %s4679_s19 }
 0x428   : > { %3794 = vmatmul.f32.gmra.mxu2 %v3062_v32  ;;  %v3953_v7 = vpop.f32.mrf.mxu3  ;;  %v4607_v32 = vpack.i.bf16 %v8058_v43, %v9682_v29 }
 0x429   : > { %v3954_v40 = vadd.f32 %v3953_v7, %v3745_v0  ;;  %4603 = vrot.lane.b32.xlu0 %v4602_v37, %s4678_s18  ;;  %v8260_v34 = vpop.permute.xlu1 %2766  ;;  %v3539_v37 = vadd.f32 %v3538_v21, %v3330_v52  ;;  %v8281_v0 = vsel %vm2077_vm6, %v2070_v1, %v9707_v49  ;;  %v3063_v21 = vsel %vm1519_vm4, %v2480_v50, %v8223_v45  ;;  %v8291_v7 = vpop.f32.mrf.mxu0 }
 0x42a   : > { %v8295_v43 = vpop.permute.xlu2 %2780 }
 0x42b   : > { %v4117_v3 = vmax.f32 %v3954_v40, 0.0  ;;  %v8264_v9 = vpop.permute.xlu0 %4533  ;;  %v3747_v51 = vpop.f32.mrf.mxu2  ;;  %v4531_v40 = vunpack.i.h.bf16 %v8227_v5 }
 0x42c   : > { %v3541_v59 = vpop.f32.mrf.mxu1  ;;  %v3748_v28 = vadd.f32 %v3747_v51, %v3539_v37  ;;  %v4535_v36 = vunpack.i.l.bf16 %v8264_v9  ;;  %v9708_v37 = vld [vmem:[#allocation117_spill] sm:$0xff] }
 0x42d   : > { %4181 = vst.msk [vmem:[%s7796_s24 + $0x70] sm:$0xff] %vm1454_vm3, %v4117_v3  ;;  %3463 = vmatmul.f32.gmra.mxu0 %v8118_v17  ;;  %4342 = vmatmul.msk.f32.gmra.mxu3 %vm2012_vm5, %v2885_v16  ;;  %v3333_v16 = vadd.f32 %v7754_v2, %v7479_v61  ;;  %v9710_v61 = vld [vmem:[#allocation120_spill] sm:$0xff] }
 0x42e   : > { %3588 = vmatmul.f32.gmra.mxu1 %v2999_v54  ;;  %v2481_v5 = vsel %vm1454_vm3, %v4531_v40, %v4535_v36  ;;  %v9709_v54 = vld [vmem:[#allocation6_spill] sm:$0xff]  ;;  %v3000_v2 = vsel %vm1454_vm3, %v9710_v61, %v4531_v40 }
 0x42f   : > { %2826 = vrot.lane.b32.xlu1 %v8281_v0, %s4679_s19  ;;  %2828 = vrot.lane.b32.xlu2 %v9707_v49, %s4679_s19 }
 0x430   : > { %3797 = vmatmul.f32.gmra.mxu2 %v3063_v21  ;;  %v3956_v48 = vpop.f32.mrf.mxu3  ;;  %v4612_v21 = vpack.i.bf16 %v8089_v53, %v9686_v31 }
 0x431   : > { %v3957_v52 = vadd.f32 %v3956_v48, %v3748_v28  ;;  %4608 = vrot.lane.b32.xlu0 %v4607_v32, %s4678_s18  ;;  %v2771_v3 = vpop.permute.xlu1 %2770  ;;  %v2071_v28 = vsel %vm2012_vm5, %v9709_v54, %v9708_v37  ;;  %v3542_v32 = vadd.f32 %v3541_v59, %v3333_v16  ;;  %v3064_v59 = vsel %vm1519_vm4, %v2481_v5, %v8260_v34  ;;  %v8330_v53 = vpop.f32.mrf.mxu0 }
 0x432   : > { %v8317_v45 = vsel %vm2077_vm6, %v2071_v28, %v9711_v12  ;;  %v8341_v37 = vpop.permute.xlu2 %2784  ;;  %v2887_v28 = vsel %vm1519_vm4, %v8260_v34, %v8162_v38  ;;  %v9716_v38 = vld [vmem:[#allocation98_spill] sm:$0xff] }
 0x433   : > { %v4118_v51 = vmax.f32 %v3957_v52, 0.0  ;;  %v8300_v50 = vpop.permute.xlu0 %4538  ;;  %v3750_v46 = vpop.f32.mrf.mxu2  ;;  %v4536_v52 = vunpack.i.h.bf16 %v8264_v9 }
 0x434   : > { %v3544_v1 = vpop.f32.mrf.mxu1  ;;  %v3751_v36 = vadd.f32 %v3750_v46, %v3542_v32  ;;  %v4540_v48 = vunpack.i.l.bf16 %v8300_v50  ;;  %v9712_v46 = vld [vmem:[#allocation105_spill] sm:$0xff] }
 0x435   : > { %4182 = vst.msk [vmem:[%s7796_s24 + $0x78] sm:$0xff] %vm1454_vm3, %v4118_v51  ;;  %3466 = vmatmul.f32.gmra.mxu0 %v8149_v47  ;;  %4343 = vmatmul.msk.f32.gmra.mxu3 %vm2012_vm5, %v2886_v57  ;;  %v8337_v57 = vld [vmem:[%s8922_s2] ss:$0 sm:$0xff] }
 0x436   : > { %3591 = vmatmul.f32.gmra.mxu1 %v3000_v2  ;;  %v3336_v5 = vadd.f32 %v8337_v57, %v9712_v46  ;;  %v2482_v2 = vsel %vm1454_vm3, %v4536_v52, %v4540_v48  ;;  %v4617_v48 = vpack.i.bf16 %v8118_v17, %v9690_v20  ;;  %v9719_v20 = vld [vmem:[#allocation17_spill] sm:$0xff] }
 0x437   : > { %2830 = vrot.lane.b32.xlu1 %v8317_v45, %s4679_s19  ;;  %2832 = vrot.lane.b32.xlu2 %v9711_v12, %s4679_s19 }
 0x438   : > { %3800 = vmatmul.f32.gmra.mxu2 %v3064_v59  ;;  %v3959_v40 = vpop.f32.mrf.mxu3 }
 0x439   : > { %v3960_v16 = vadd.f32 %v3959_v40, %v3751_v36  ;;  %4613 = vrot.lane.b32.xlu0 %v4612_v21, %s4678_s18  ;;  %v8332_v51 = vpop.permute.xlu1 %2774  ;;  %v9713_v21 = vld [vmem:[#allocation47_spill] sm:$0xff]  ;;  %v3545_v40 = vadd.f32 %v3544_v1, %v3336_v5  ;;  %v3065_v1 = vsel %vm1519_vm4, %v2482_v2, %v2771_v3 }
 0x43a   : > { %v9714_v36 = vld [vmem:[#allocation107_spill] sm:$0xff] }
 0x43b   : > { %v4119_v54 = vmax.f32 %v3960_v16, 0.0  ;;  %v8343_v9 = vpop.permute.xlu0 %4543  ;;  %v3753_v32 = vpop.f32.mrf.mxu2  ;;  %v2072_v59 = vsel %vm2012_vm5, %v9714_v36, %v9713_v21  ;;  %v9715_v16 = vld [vmem:[#allocation20_spill] sm:$0xff] }
 0x43c   : > { %v3547_v61 = vpop.f32.mrf.mxu1  ;;  %v3001_v46 = vsel %vm1454_vm3, %v9715_v16, %v4536_v52  ;;  %v8360_v34 = vsel %vm2077_vm6, %v2072_v59, %v9716_v38  ;;  %v3754_v31 = vadd.f32 %v3753_v32, %v3545_v40  ;;  %v4545_v5 = vunpack.i.l.bf16 %v8343_v9  ;;  %v9717_v32 = vld [vmem:[#allocation11_spill] sm:$0xff] }
 0x43d   : > { %4183 = vst.msk [vmem:[%s7796_s24 + $0x80] sm:$0xff] %vm1454_vm3, %v4119_v54  ;;  %3469 = vmatmul.f32.gmra.mxu0 %v8180_v26  ;;  %4344 = vmatmul.msk.f32.gmra.mxu3 %vm2012_vm5, %v2887_v28  ;;  %v4541_v54 = vunpack.i.h.bf16 %v8300_v50  ;;  %v3339_v2 = vadd.f32 %v8337_v57, %v9717_v32  ;;  %v2888_v59 = vsel %vm1519_vm4, %v2771_v3, %v8205_v24  ;;  %v8382_v50 = vpop.f32.mrf.mxu0  ;;  %v9720_v24 = vld [vmem:[#allocation70_spill] sm:$0xff] }
 0x43e   : > { %3594 = vmatmul.f32.gmra.mxu1 %v3001_v46 }
 0x43f   : > { %2834 = vrot.lane.b32.xlu1 %v8360_v34, %s4679_s19  ;;  %2836 = vrot.lane.b32.xlu2 %v9716_v38, %s4679_s19  ;;  %v2483_v46 = vsel %vm1454_vm3, %v4541_v54, %v4545_v5  ;;  %v3002_v3 = vsel %vm1454_vm3, %v9720_v24, %v4541_v54  ;;  %v9721_v5 = vld [vmem:[#allocation99_spill] sm:$0xff] }
 0x440   : > { %3803 = vmatmul.f32.gmra.mxu2 %v3065_v1  ;;  %v3962_v52 = vpop.f32.mrf.mxu3  ;;  %v9718_v1 = vld [vmem:[#allocation38_spill] sm:$0xff] }
 0x441   : > { %v3963_v28 = vadd.f32 %v3962_v52, %v3754_v31  ;;  %4618 = vrot.lane.b32.xlu0 %v4617_v48, %s4678_s18  ;;  %v2779_v17 = vpop.permute.xlu1 %2778  ;;  %v2073_v31 = vsel %vm2012_vm5, %v9719_v20, %v9718_v1  ;;  %v8384_v48 = vpop.permute.xlu2 %2788  ;;  %v3548_v52 = vadd.f32 %v3547_v61, %v3339_v2  ;;  %v4622_v20 = vpack.i.bf16 %v8149_v47, %v9694_v6  ;;  %v9723_v6 = vld [vmem:[#allocation22_spill] sm:$0xff] }
 0x442   : > { %v3066_v61 = vsel %vm1519_vm4, %v2483_v46, %v8332_v51 }
 0x443   : > { %v4120_v21 = vmax.f32 %v3963_v28, 0.0  ;;  %v8374_v36 = vpop.permute.xlu0 %4548  ;;  %v3756_v40 = vpop.f32.mrf.mxu2  ;;  %v8394_v28 = vsel %vm2077_vm6, %v2073_v31, %v9721_v5 }
 0x444   : > { %v3550_v16 = vpop.f32.mrf.mxu1  ;;  %v3757_v32 = vadd.f32 %v3756_v40, %v3548_v52  ;;  %v4550_v54 = vunpack.i.l.bf16 %v8374_v36  ;;  %v9722_v40 = vld [vmem:[#allocation69_spill] sm:$0xff]  ;;  %v2889_v52 = vsel %vm1519_vm4, %v8332_v51, %v8249_v4  ;;  %v4627_v51 = vpack.i.bf16 %v8180_v26, %v9697_v10 }
 0x445   : > { %4184 = vst.msk [vmem:[%s7796_s24 + $0x88] sm:$0xff] %vm1454_vm3, %v4120_v21  ;;  %3472 = vmatmul.f32.gmra.mxu0 %v8213_v33  ;;  %4345 = vmatmul.msk.f32.gmra.mxu3 %vm2012_vm5, %v2888_v59  ;;  %v4546_v21 = vunpack.i.h.bf16 %v8343_v9  ;;  %v3342_v46 = vadd.f32 %v8337_v57, %v9722_v40  ;;  %v9724_v9 = vld [vmem:[#allocation110_spill] sm:$0xff]  ;;  %v9726_v40 = vld [vmem:[#allocation48_spill] sm:$0xff]  ;;  %v9729_v10 = vld [vmem:[#allocation13_spill] sm:$0xff] }
 0x446   : > { %3597 = vmatmul.f32.gmra.mxu1 %v3002_v3 }
 0x447   : > { %2838 = vrot.lane.b32.xlu1 %v8394_v28, %s4679_s19  ;;  %2840 = vrot.lane.b32.xlu2 %v9721_v5, %s4679_s19 }
 0x448   : > { %3806 = vmatmul.f32.gmra.mxu2 %v3066_v61  ;;  %v3965_v2 = vpop.f32.mrf.mxu3  ;;  %v2484_v61 = vsel %vm1454_vm3, %v4546_v21, %v4550_v54 }
 0x449   : > { %v3966_v59 = vadd.f32 %v3965_v2, %v3757_v32  ;;  %4623 = vrot.lane.b32.xlu0 %v4622_v20, %s4678_s18  ;;  %v2783_v47 = vpop.permute.xlu1 %2782  ;;  %v2074_v32 = vsel %vm2012_vm5, %v9724_v9, %v9723_v6  ;;  %v3551_v20 = vadd.f32 %v3550_v16, %v3342_v46  ;;  %v9725_v2 = vld [vmem:[#allocation61_spill] sm:$0xff]  ;;  %v8429_v54 = vpop.permute.xlu2 %2792  ;;  %v3067_v6 = vsel %vm1519_vm4, %v2484_v61, %v2779_v17 }
 0x44a   : > { %v8425_v4 = vsel %vm2077_vm6, %v2074_v32, %v9726_v40  ;;  %v4551_v46 = vunpack.i.h.bf16 %v8374_v36  ;;  %v2890_v32 = vsel %vm1519_vm4, %v2779_v17, %v8295_v43 }
 0x44b   : > { %v4121_v1 = vmax.f32 %v3966_v59, 0.0  ;;  %v8409_v31 = vpop.permute.xlu0 %4553  ;;  %v3759_v24 = vpop.f32.mrf.mxu2  ;;  %v3003_v59 = vsel %vm1454_vm3, %v9725_v2, %v4546_v21 }
 0x44c   : > { %v3553_v3 = vpop.f32.mrf.mxu1  ;;  %v3760_v29 = vadd.f32 %v3759_v24, %v3551_v20  ;;  %v4555_v16 = vunpack.i.l.bf16 %v8409_v31 }
 0x44d   : > { %4185 = vst.msk [vmem:[%s7796_s24 + $0x90] sm:$0xff] %vm1454_vm3, %v4121_v1  ;;  %4346 = vmatmul.msk.f32.gmra.mxu3 %vm2012_vm5, %v2889_v52  ;;  %v9727_v52 = vld [vmem:[#allocation87_spill] sm:$0xff] }
 0x44e   : > { %3600 = vmatmul.f32.gmra.mxu1 %v3003_v59  ;;  %v3345_v24 = vadd.f32 %v8337_v57, %v9727_v52  ;;  %v2485_v59 = vsel %vm1454_vm3, %v4551_v46, %v4555_v16  ;;  %v4556_v52 = vunpack.i.h.bf16 %v8409_v31 }
 0x44f   : > { %2842 = vrot.lane.b32.xlu1 %v8425_v4, %s4679_s19  ;;  %2844 = vrot.lane.b32.xlu2 %v9726_v40, %s4679_s19  ;;  %v3068_v16 = vsel %vm1519_vm4, %v2485_v59, %v2783_v47 }
 0x450   : > { %3809 = vmatmul.f32.gmra.mxu2 %v3067_v6  ;;  %v3968_v21 = vpop.f32.mrf.mxu3  ;;  %v9728_v6 = vld [vmem:[#allocation52_spill] sm:$0xff]  ;;  %v3554_v36 = vadd.f32 %v3553_v3, %v3345_v24 }
 0x451   : > { %v3969_v1 = vadd.f32 %v3968_v21, %v3760_v29  ;;  %4628 = vrot.lane.b32.xlu0 %v4627_v51, %s4678_s18  ;;  %v2787_v26 = vpop.permute.xlu1 %2786  ;;  %v2075_v29 = vsel %vm2012_vm5, %v9729_v10, %v9728_v6  ;;  %v9730_v51 = vld [vmem:[#allocation4_spill] sm:$0xff] }
 0x452   : > { %v3004_v21 = vsel %vm1454_vm3, %v9730_v51, %v4551_v46  ;;  %v8464_v46 = vpop.permute.xlu2 %2796 }
 0x453   : > { %v4122_v61 = vmax.f32 %v3969_v1, 0.0  ;;  %v8441_v9 = vpop.permute.xlu0 %4558  ;;  %v3762_v20 = vpop.f32.mrf.mxu2  ;;  %v9731_v1 = vld [vmem:[#allocation75_spill] sm:$0xff] }
 0x454   : > { %v3556_v2 = vpop.f32.mrf.mxu1  ;;  %v8456_v43 = vsel %vm2077_vm6, %v2075_v29, %v9731_v1  ;;  %v3763_v17 = vadd.f32 %v3762_v20, %v3554_v36  ;;  %v4560_v10 = vunpack.i.l.bf16 %v8441_v9  ;;  %v9733_v29 = vld [vmem:[#allocation121_spill] sm:$0xff]  ;;  %v9734_v36 = vld [vmem:[#allocation102_spill] sm:$0xff] }
 0x455   : > { %4186 = vst.msk [vmem:[%s7796_s24 + $0x98] sm:$0xff] %vm1454_vm3, %v4122_v61  ;;  %4347 = vmatmul.msk.f32.gmra.mxu3 %vm2012_vm5, %v2890_v32  ;;  %v9732_v32 = vld [vmem:[#allocation50_spill] sm:$0xff]  ;;  %v2076_v51 = vsel %vm2012_vm5, %v9734_v36, %v9733_v29 }
 0x456   : > { %3603 = vmatmul.f32.gmra.mxu1 %v3004_v21  ;;  %v3348_v20 = vadd.f32 %v8337_v57, %v9732_v32  ;;  %v2891_v21 = vsel %vm1519_vm4, %v2783_v47, %v8341_v37  ;;  %v8488_v29 = vsel %vm2077_vm6, %v2076_v51, %v6828_v44  ;;  %v4642_v51 = vpack.i.bf16 %v9711_v12, %v8317_v45 }
 0x457   : > { %2846 = vrot.lane.b32.xlu1 %v8456_v43, %s4679_s19  ;;  %2848 = vrot.lane.b32.xlu2 %v9731_v1, %s4679_s19 }
 0x458   : > { %3812 = vmatmul.f32.gmra.mxu2 %v3068_v16  ;;  %v3971_v3 = vpop.f32.mrf.mxu3 }
 0x459   : > { %v3972_v24 = vadd.f32 %v3971_v3, %v3763_v17  ;;  %2414 = vrot.lane.b32.xlu0 %v9700_v62, %s4678_s18  ;;  %v8469_v61 = vpop.permute.xlu1 %4563  ;;  %v2486_v17 = vsel %vm1454_vm3, %v4556_v52, %v4560_v10  ;;  %v4632_v3 = vpack.i.bf16 %v9704_v15, %v8245_v27  ;;  %v3557_v62 = vadd.f32 %v3556_v2, %v3348_v20 }
 0x45a   : > { %v3069_v47 = vsel %vm1519_vm4, %v2486_v17, %v2787_v26  ;;  %v4561_v27 = vunpack.i.h.bf16 %v8441_v9  ;;  %v8501_v20 = vpop.permute.xlu2 %2800 }
 0x45b   : > { %v4123_v59 = vmax.f32 %v3972_v24, 0.0  ;;  %v2791_v6 = vpop.permute.xlu0 %2790  ;;  %v3765_v16 = vpop.f32.mrf.mxu2  ;;  %v9735_v24 = vld [vmem:[#allocation72_spill] sm:$0xff] }
 0x45c   : > { %v3559_v31 = vpop.f32.mrf.mxu1  ;;  %v3005_v32 = vsel %vm1454_vm3, %v9735_v24, %v4556_v52  ;;  %v3766_v37 = vadd.f32 %v3765_v16, %v3557_v62  ;;  %v9736_v52 = vld [vmem:[#allocation67_spill] sm:$0xff]  ;;  %v2487_v12 = vsel %vm1454_vm3, %v4561_v27, %v7508_v63  ;;  %v9737_v24 = vmov 0.0  }
 0x45d   : > { %4187 = vst.msk [vmem:[%s7796_s24 + $0xa0] sm:$0xff] %vm1454_vm3, %v4123_v59  ;;  %4348 = vmatmul.msk.f32.gmra.mxu3 %vm2012_vm5, %v2891_v21  ;;  %v3351_v62 = vadd.f32 %v8337_v57, %v9736_v52  ;;  %v2892_v21 = vsel %vm1519_vm4, %v2787_v26, %v8384_v48  ;;  %v3070_v48 = vsel %vm1519_vm4, %v2487_v12, %v2791_v6 }
 0x45e   : > { %3606 = vmatmul.f32.gmra.mxu1 %v3005_v32 }
 0x45f   : > { %2850 = vrot.lane.b32.xlu1 %v8488_v29, %s4679_s19  ;;  %4633 = vrot.lane.b32.xlu2 %v4632_v3, %s4678_s18  ;;  %v3560_v17 = vadd.f32 %v3559_v31, %v3351_v62  ;;  %v3006_v3 = vsel %vm1454_vm3, %v6828_v44, %v4561_v27 }
 0x460   : > { %3815 = vmatmul.f32.gmra.mxu2 %v3069_v47  ;;  %v3974_v15 = vpop.f32.mrf.mxu3 }
 0x461   : > { %v3975_v2 = vadd.f32 %v3974_v15, %v3766_v37  ;;  %2416 = vrot.lane.b32.xlu0 %v8213_v33, %s4678_s18  ;;  %v8497_v10 = vpop.permute.xlu1 %4568  ;;  %v4637_v33 = vpack.i.bf16 %v9707_v49, %v8281_v0  ;;  %v4566_v49 = vunpack.i.h.bf16 %v8469_v61  ;;  %v4565_v0 = vunpack.i.l.bf16 %v8469_v61  ;;  %v9738_v37 = vld [vmem:[#allocation93_spill] sm:$0xff] }
 0x462   : > { %v3354_v47 = vadd.f32 %v8337_v57, %v9738_v37  ;;  %v2893_v61 = vsel %vm1519_vm4, %v2791_v6, %v7536_v30  ;;  %v4662_v37 = vpack.i.bf16 %v9731_v1, %v8456_v43  ;;  %v9741_v43 = vld [vmem:[#allocation39_spill] sm:$0xff] }
 0x463   : > { %v4124_v59 = vmax.f32 %v3975_v2, 0.0  ;;  %v2795_v36 = vpop.permute.xlu0 %2794  ;;  %v3768_v9 = vpop.f32.mrf.mxu2  ;;  %v4657_v2 = vpack.i.bf16 %v9726_v40, %v8425_v4  ;;  %v4647_v4 = vpack.i.bf16 %v9716_v38, %v8360_v34  ;;  %v9740_v38 = vld [vmem:[#allocation7_spill] sm:$0xff] }
 0x464   : > { %v3562_v16 = vpop.f32.mrf.mxu1  ;;  %v3769_v45 = vadd.f32 %v3768_v9, %v3560_v17  ;;  %v3357_v34 = vadd.f32 %v8337_v57, %v9740_v38 }
 0x465   : > { %4188 = vst.msk [vmem:[%s7796_s24 + $0xa8] sm:$0xff] %vm1454_vm3, %v4124_v59  ;;  %4349 = vmatmul.msk.f32.gmra.mxu3 %vm2012_vm5, %v2892_v21  ;;  %v2488_v59 = vsel %vm1454_vm3, %v4565_v0, %v4566_v49  ;;  %v8534_v21 = vpop.permute.xlu2 %2804  ;;  %v3563_v9 = vadd.f32 %v3562_v16, %v3354_v47  ;;  %v2894_v49 = vsel %vm1519_vm4, %v8429_v54, %v2795_v36 }
 0x466   : > { %3609 = vmatmul.f32.gmra.mxu1 %v3006_v3  ;;  %v3071_v17 = vsel %vm1519_vm4, %v2488_v59, %v8429_v54 }
 0x467   : > { %4638 = vrot.lane.b32.xlu1 %v4637_v33, %s4678_s18  ;;  %4643 = vrot.lane.b32.xlu2 %v4642_v51, %s4678_s18  ;;  %v4652_v51 = vpack.i.bf16 %v9721_v5, %v8394_v28  ;;  %v9739_v33 = vld [vmem:[#allocation28_spill] sm:$0xff]  ;;  %v4571_v5 = vunpack.i.h.bf16 %v8497_v10  ;;  %v4570_v28 = vunpack.i.l.bf16 %v8497_v10 }
 0x468   : > { %3818 = vmatmul.f32.gmra.mxu2 %v3070_v48  ;;  %v3977_v26 = vpop.f32.mrf.mxu3  ;;  %v3007_v40 = vsel %vm1454_vm3, %v9739_v33, %v4565_v0 }
 0x469   : > { %v3978_v31 = vadd.f32 %v3977_v26, %v3769_v45  ;;  %2852 = vrot.lane.b32.xlu0 %v9737_v24, %s4679_s19  ;;  %v8523_v32 = vpop.permute.xlu1 %4573  ;;  %v3008_v10 = vsel %vm1454_vm3, %v7004_v55, %v4570_v28 }
 0x46a   : > { %v4576_v36 = vunpack.i.h.bf16 %v8523_v32 }
 0x46b   : > { %v4125_v15 = vmax.f32 %v3978_v31, 0.0  ;;  %v2799_v27 = vpop.permute.xlu0 %2798  ;;  %v3771_v52 = vpop.f32.mrf.mxu2  ;;  %v2489_v31 = vsel %vm1454_vm3, %v4570_v28, %v4571_v5 }
 0x46c   : > { %v3565_v62 = vpop.f32.mrf.mxu1  ;;  %v3772_v6 = vadd.f32 %v3771_v52, %v3563_v9  ;;  %v3072_v54 = vsel %vm1519_vm4, %v2489_v31, %v8464_v46  ;;  %v3360_v52 = vadd.f32 %v8337_v57, %v9741_v43 }
 0x46d   : > { %4189 = vst.msk [vmem:[%s7796_s24 + $0xb0] sm:$0xff] %vm1454_vm3, %v4125_v15  ;;  %4350 = vmatmul.msk.f32.gmra.mxu3 %vm2012_vm5, %v2893_v61  ;;  %v3566_v24 = vadd.f32 %v3565_v62, %v3357_v34  ;;  %v8562_v47 = vpop.permute.xlu2 %2808 }
 0x46e   : > { %3612 = vmatmul.f32.gmra.mxu1 %v3007_v40 }
 0x46f   : > { %4653 = vrot.lane.b32.xlu1 %v4652_v51, %s4678_s18  ;;  %4658 = vrot.lane.b32.xlu2 %v4657_v2, %s4678_s18  ;;  %v4575_v2 = vunpack.i.l.bf16 %v8523_v32  ;;  %v2895_v51 = vsel %vm1519_vm4, %v8464_v46, %v2799_v27 }
 0x470   : > { %3821 = vmatmul.f32.gmra.mxu2 %v3071_v17  ;;  %v3980_v16 = vpop.f32.mrf.mxu3 }
 0x471   : > { %v3981_v3 = vadd.f32 %v3980_v16, %v3772_v6  ;;  %4648 = vrot.lane.b32.xlu0 %v4647_v4, %s4678_s18  ;;  %v4579_v12 = vpop.permute.xlu1 %4578  ;;  %v2490_v33 = vsel %vm1454_vm3, %v4575_v2, %v4576_v36  ;;  %v3009_v32 = vsel %vm1454_vm3, %v7002_v42, %v4575_v2  ;;  %v3366_v36 = vadd.f32 %v8337_v57, %v7883_v8 }
 0x472   : > { %v3073_v6 = vsel %vm1519_vm4, %v2490_v33, %v8501_v20  ;;  %v4581_v17 = vunpack.i.h.bf16 %v4579_v12  ;;  %v4580_v46 = vunpack.i.l.bf16 %v4579_v12 }
 0x473   : > { %v4126_v45 = vmax.f32 %v3981_v3, 0.0  ;;  %v2803_v48 = vpop.permute.xlu0 %2802  ;;  %v3774_v0 = vpop.f32.mrf.mxu2  ;;  %v9742_v3 = vld [vmem:[#allocation15_spill] sm:$0xff] }
 0x474   : > { %v3568_v26 = vpop.f32.mrf.mxu1  ;;  %v3775_v15 = vadd.f32 %v3774_v0, %v3566_v24  ;;  %v3363_v38 = vadd.f32 %v8337_v57, %v9742_v3  ;;  %v2896_v42 = vsel %vm1519_vm4, %v8501_v20, %v2803_v48  ;;  %v3010_v12 = vsel %vm1454_vm3, %v9630_v35, %v4580_v46 }
 0x475   : > { %4190 = vst.msk [vmem:[%s7796_s24 + $0xb8] sm:$0xff] %vm1454_vm3, %v4126_v45  ;;  %4351 = vmatmul.msk.f32.gmra.mxu3 %vm2012_vm5, %v2894_v49  ;;  %v3569_v40 = vadd.f32 %v3568_v26, %v3360_v52  ;;  %v8583_v5 = vpop.permute.xlu2 %2812  ;;  %v2491_v26 = vsel %vm1454_vm3, %v4580_v46, %v4581_v17 }
 0x476   : > { %3615 = vmatmul.f32.gmra.mxu1 %v3008_v10  ;;  %v3074_v10 = vsel %vm1519_vm4, %v2491_v26, %v8534_v21  ;;  %v3372_v26 = vadd.f32 %v8337_v57, %v7955_v23 }
 0x477   : > { %2446 = vrot.lane.b32.xlu1 %v8488_v29, %s4678_s18 }
 0x478   : > { %3824 = vmatmul.f32.gmra.mxu2 %v3072_v54  ;;  %v3983_v55 = vpop.f32.mrf.mxu3 }
 0x479   : > { %v3984_v61 = vadd.f32 %v3983_v55, %v3775_v15  ;;  %4663 = vrot.lane.b32.xlu0 %v4662_v37, %s4678_s18  ;;  %v4584_v1 = vpop.permute.xlu1 %4583 }
 0x47a   : > { %v4586_v37 = vunpack.i.h.bf16 %v4584_v1  ;;  %v4585_v20 = vunpack.i.l.bf16 %v4584_v1 }
 0x47b   : > { %v4127_v62 = vmax.f32 %v3984_v61, 0.0  ;;  %v2807_v59 = vpop.permute.xlu0 %2806  ;;  %v3777_v29 = vpop.f32.mrf.mxu2 }
 0x47c   : > { %v3571_v9 = vpop.f32.mrf.mxu1  ;;  %v3778_v4 = vadd.f32 %v3777_v29, %v3569_v40  ;;  %v2897_v35 = vsel %vm1519_vm4, %v8534_v21, %v2807_v59  ;;  %v3011_v1 = vsel %vm1454_vm3, %v7025_v41, %v4585_v20  ;;  %v9743_v40 = vld [vmem:[#allocation9_spill] sm:$0xff] }
 0x47d   : > { %4191 = vst.msk [vmem:[%s7796_s24 + $0xc0] sm:$0xff] %vm1454_vm3, %v4127_v62  ;;  %4352 = vmatmul.msk.f32.gmra.mxu3 %vm2012_vm5, %v2895_v51  ;;  %v3572_v31 = vadd.f32 %v3571_v9, %v3363_v38  ;;  %v8599_v2 = vpop.permute.xlu2 %2816  ;;  %v2492_v62 = vsel %vm1454_vm3, %v4585_v20, %v4586_v37 }
 0x47e   : > { %3618 = vmatmul.f32.gmra.mxu1 %v3009_v32  ;;  %v3075_v29 = vsel %vm1519_vm4, %v2492_v62, %v8562_v47  ;;  %v3369_v32 = vadd.f32 %v8337_v57, %v9743_v40 }
 0x480   : > { %3827 = vmatmul.f32.gmra.mxu2 %v3073_v6  ;;  %v3986_v27 = vpop.f32.mrf.mxu3 }
 0x481   : > { %v3987_v28 = vadd.f32 %v3986_v27, %v3778_v4  ;;  %v4589_v16 = vpop.permute.xlu1 %4588 }
 0x482   : > { %v4591_v9 = vunpack.i.h.bf16 %v4589_v16  ;;  %v4590_v21 = vunpack.i.l.bf16 %v4589_v16 }
 0x483   : > { %v4128_v34 = vmax.f32 %v3987_v28, 0.0  ;;  %v2811_v45 = vpop.permute.xlu0 %2810  ;;  %v3780_v49 = vpop.f32.mrf.mxu2 }
 0x484   : > { %v3574_v0 = vpop.f32.mrf.mxu1  ;;  %v3781_v24 = vadd.f32 %v3780_v49, %v3572_v31  ;;  %v2898_v41 = vsel %vm1519_vm4, %v8562_v47, %v2811_v45  ;;  %v2493_v28 = vsel %vm1454_vm3, %v4590_v21, %v4591_v9  ;;  %v3012_v16 = vsel %vm1454_vm3, %v7021_v19, %v4590_v21 }
 0x485   : > { %4192 = vst.msk [vmem:[%s7796_s24 + $0xc8] sm:$0xff] %vm1454_vm3, %v4128_v34  ;;  %4353 = vmatmul.msk.f32.gmra.mxu3 %vm2012_vm5, %v2896_v42  ;;  %v3575_v51 = vadd.f32 %v3574_v0, %v3366_v36  ;;  %v2821_v3 = vpop.permute.xlu2 %2820  ;;  %v3076_v42 = vsel %vm1519_vm4, %v2493_v28, %v8583_v5 }
 0x486   : > { %3621 = vmatmul.f32.gmra.mxu1 %v3010_v12 }
 0x488   : > { %3830 = vmatmul.f32.gmra.mxu2 %v3074_v10  ;;  %v3989_v48 = vpop.f32.mrf.mxu3 }
 0x489   : > { %v3990_v15 = vadd.f32 %v3989_v48, %v3781_v24  ;;  %v4594_v54 = vpop.permute.xlu1 %4593 }
 0x48a   : > { %v4596_v47 = vunpack.i.h.bf16 %v4594_v54  ;;  %v4595_v45 = vunpack.i.l.bf16 %v4594_v54 }
 0x48b   : > { %v4129_v55 = vmax.f32 %v3990_v15, 0.0  ;;  %v2815_v61 = vpop.permute.xlu0 %2814  ;;  %v3783_v43 = vpop.f32.mrf.mxu2  ;;  %v9744_v15 = vld [vmem:[#allocation3_spill] sm:$0xff] }
 0x48c   : > { %v3577_v52 = vpop.f32.mrf.mxu1  ;;  %v3784_v8 = vadd.f32 %v3783_v43, %v3575_v51  ;;  %v2899_v19 = vsel %vm1519_vm4, %v8583_v5, %v2815_v61  ;;  %v2494_v37 = vsel %vm1454_vm3, %v4595_v45, %v4596_v47  ;;  %v3013_v54 = vsel %vm1454_vm3, %v9744_v15, %v4595_v45  ;;  %v9745_v43 = vld [vmem:[#allocation64_spill] sm:$0xff] }
 0x48d   : > { %4193 = vst.msk [vmem:[%s7796_s24 + $0xd0] sm:$0xff] %vm1454_vm3, %v4129_v55  ;;  %4354 = vmatmul.msk.f32.gmra.mxu3 %vm2012_vm5, %v2897_v35  ;;  %v3578_v38 = vadd.f32 %v3577_v52, %v3369_v32  ;;  %v2825_v23 = vpop.permute.xlu2 %2824  ;;  %v3077_v5 = vsel %vm1519_vm4, %v2494_v37, %v8599_v2  ;;  %v3375_v52 = vadd.f32 %v8337_v57, %v9745_v43  ;;  %v9748_v43 = vld [vmem:[#allocation18_spill] sm:$0xff] }
 0x48e   : > { %3624 = vmatmul.f32.gmra.mxu1 %v3011_v1 }
 0x490   : > { %3833 = vmatmul.f32.gmra.mxu2 %v3075_v29  ;;  %v3992_v59 = vpop.f32.mrf.mxu3 }
 0x491   : > { %v3993_v33 = vadd.f32 %v3992_v59, %v3784_v8  ;;  %v8613_v6 = vpop.permute.xlu1 %4598 }
 0x492   : > { %v4600_v55 = vunpack.i.l.bf16 %v8613_v6 }
 0x493   : > { %v4130_v4 = vmax.f32 %v3993_v33, 0.0  ;;  %v2819_v17 = vpop.permute.xlu0 %2818  ;;  %v3786_v46 = vpop.f32.mrf.mxu2 }
 0x494   : > { %v3580_v27 = vpop.f32.mrf.mxu1  ;;  %v3787_v34 = vadd.f32 %v3786_v46, %v3578_v38  ;;  %v2900_v51 = vsel %vm1519_vm4, %v8599_v2, %v2819_v17  ;;  %v2495_v29 = vsel %vm1454_vm3, %v4600_v55, %v7508_v63  ;;  %v3014_v59 = vsel %vm1454_vm3, %v6828_v44, %v4600_v55 }
 0x495   : > { %4194 = vst.msk [vmem:[%s7796_s24 + $0xd8] sm:$0xff] %vm1454_vm3, %v4130_v4  ;;  %4355 = vmatmul.msk.f32.gmra.mxu3 %vm2012_vm5, %v2898_v41  ;;  %v3581_v20 = vadd.f32 %v3580_v27, %v3372_v26  ;;  %v3078_v2 = vsel %vm1519_vm4, %v2495_v29, %v2821_v3  ;;  %v2829_v17 = vpop.permute.xlu2 %2828  ;;  %v4601_v41 = vunpack.i.h.bf16 %v8613_v6  ;;  %v9746_v27 = vld [vmem:[#allocation113_spill] sm:$0xff] }
 0x496   : > { %3627 = vmatmul.f32.gmra.mxu1 %v3012_v16  ;;  %v3378_v28 = vadd.f32 %v8337_v57, %v9746_v27  ;;  %v2901_v16 = vsel %vm1519_vm4, %v2821_v3, %v7536_v30 }
 0x498   : > { %3836 = vmatmul.f32.gmra.mxu2 %v3076_v42  ;;  %v3995_v49 = vpop.f32.mrf.mxu3 }
 0x499   : > { %v3996_v0 = vadd.f32 %v3995_v49, %v3787_v34  ;;  %v2823_v48 = vpop.permute.xlu1 %2822  ;;  %v9747_v49 = vld [vmem:[#allocation41_spill] sm:$0xff] }
 0x49a   : > { %v3015_v6 = vsel %vm1454_vm3, %v9747_v49, %v4601_v41 }
 0x49b   : > { %v4131_v31 = vmax.f32 %v3996_v0, 0.0  ;;  %v8627_v12 = vpop.permute.xlu0 %4603  ;;  %v3789_v24 = vpop.f32.mrf.mxu2 }
 0x49c   : > { %v3583_v10 = vpop.f32.mrf.mxu1  ;;  %v3790_v36 = vadd.f32 %v3789_v24, %v3581_v20  ;;  %v4605_v32 = vunpack.i.l.bf16 %v8627_v12  ;;  %v4606_v24 = vunpack.i.h.bf16 %v8627_v12  ;;  %v3381_v20 = vadd.f32 %v8337_v57, %v8079_v22 }
 0x49d   : > { %4195 = vst.msk [vmem:[%s7796_s24 + $0xe0] sm:$0xff] %vm1454_vm3, %v4131_v31  ;;  %4356 = vmatmul.msk.f32.gmra.mxu3 %vm2012_vm5, %v2899_v19  ;;  %v3584_v9 = vadd.f32 %v3583_v10, %v3375_v52  ;;  %v2833_v15 = vpop.permute.xlu2 %2832 }
 0x49e   : > { %3630 = vmatmul.f32.gmra.mxu1 %v3013_v54  ;;  %v2496_v47 = vsel %vm1454_vm3, %v4601_v41, %v4605_v32  ;;  %v3016_v12 = vsel %vm1454_vm3, %v9748_v43, %v4606_v24 }
 0x49f   : > { %v3079_v31 = vsel %vm1519_vm4, %v2496_v47, %v2823_v48 }
 0x4a0   : > { %3839 = vmatmul.f32.gmra.mxu2 %v3077_v5  ;;  %v3998_v61 = vpop.f32.mrf.mxu3 }
 0x4a1   : > { %v3999_v35 = vadd.f32 %v3998_v61, %v3790_v36  ;;  %v2827_v33 = vpop.permute.xlu1 %2826  ;;  %v2902_v36 = vsel %vm1519_vm4, %v2823_v48, %v2825_v23 }
 0x4a3   : > { %v4132_v62 = vmax.f32 %v3999_v35, 0.0  ;;  %v3792_v1 = vpop.f32.mrf.mxu2  ;;  %v8648_v21 = vpop.permute.xlu0 %4608 }
 0x4a4   : > { %v3586_v8 = vpop.f32.mrf.mxu1  ;;  %v3793_v40 = vadd.f32 %v3792_v1, %v3584_v9  ;;  %v4610_v3 = vunpack.i.l.bf16 %v8648_v21  ;;  %v4611_v23 = vunpack.i.h.bf16 %v8648_v21 }
 0x4a5   : > { %4196 = vst.msk [vmem:[%s7796_s24 + $0xe8] sm:$0xff] %vm1454_vm3, %v4132_v62  ;;  %4357 = vmatmul.msk.f32.gmra.mxu3 %vm2012_vm5, %v2900_v51  ;;  %v3587_v45 = vadd.f32 %v3586_v8, %v3378_v28  ;;  %v3384_v8 = vadd.f32 %v8337_v57, %v8120_v60 }
 0x4a6   : > { %3633 = vmatmul.f32.gmra.mxu1 %v3014_v59  ;;  %v2497_v61 = vsel %vm1454_vm3, %v4606_v24, %v4610_v3  ;;  %v2903_v59 = vsel %vm1519_vm4, %v2827_v33, %v2829_v17  ;;  %v3017_v21 = vsel %vm1454_vm3, %v9658_v58, %v4611_v23  ;;  %v8693_v17 = vpop.f32.mrf.mxu0 }
 0x4a7   : > { %v3080_v22 = vsel %vm1519_vm4, %v2497_v61, %v2827_v33 }
 0x4a8   : > { %3842 = vmatmul.f32.gmra.mxu2 %v3078_v2  ;;  %v4001_v4 = vpop.f32.mrf.mxu3 }
 0x4a9   : > { %v4002_v46 = vadd.f32 %v4001_v4, %v3793_v40  ;;  %v2831_v10 = vpop.permute.xlu1 %2830  ;;  %v2837_v4 = vpop.permute.xlu2 %2836 }
 0x4aa   : > { %v2904_v58 = vsel %vm1519_vm4, %v2831_v10, %v2833_v15  ;;  %v3390_v15 = vadd.f32 %v8337_v57, %v8193_v14 }
 0x4ab   : > { %v4133_v38 = vmax.f32 %v4002_v46, 0.0  ;;  %v3795_v34 = vpop.f32.mrf.mxu2  ;;  %v8666_v0 = vpop.permute.xlu0 %4613 }
 0x4ac   : > { %v3589_v42 = vpop.f32.mrf.mxu1  ;;  %v3796_v26 = vadd.f32 %v3795_v34, %v3587_v45  ;;  %v4615_v62 = vunpack.i.l.bf16 %v8666_v0  ;;  %v4616_v28 = vunpack.i.h.bf16 %v8666_v0 }
 0x4ad   : > { %4197 = vst.msk [vmem:[%s7796_s24 + $0xf0] sm:$0xff] %vm1454_vm3, %v4133_v38  ;;  %4358 = vmatmul.msk.f32.gmra.mxu3 %vm2012_vm5, %v2901_v16  ;;  %v3590_v35 = vadd.f32 %v3589_v42, %v3381_v20  ;;  %v3387_v16 = vadd.f32 %v8337_v57, %v8156_v25 }
 0x4ae   : > { %3636 = vmatmul.f32.gmra.mxu1 %v3015_v6  ;;  %v2498_v32 = vsel %vm1454_vm3, %v4611_v23, %v4615_v62 }
 0x4af   : > { %v3081_v60 = vsel %vm1519_vm4, %v2498_v32, %v2831_v10 }
 0x4b0   : > { %3845 = vmatmul.f32.gmra.mxu2 %v3079_v31  ;;  %v4004_v19 = vpop.f32.mrf.mxu3  ;;  %v9749_v31 = vld [vmem:[#allocation43_spill] sm:$0xff] }
 0x4b1   : > { %v4005_v37 = vadd.f32 %v4004_v19, %v3796_v26  ;;  %v2835_v29 = vpop.permute.xlu1 %2834  ;;  %v3018_v0 = vsel %vm1454_vm3, %v9749_v31, %v4616_v28  ;;  %v2841_v3 = vpop.permute.xlu2 %2840 }
 0x4b3   : > { %v4134_v54 = vmax.f32 %v4005_v37, 0.0  ;;  %v3798_v5 = vpop.f32.mrf.mxu2  ;;  %v4619_v51 = vpop.permute.xlu0 %4618 }
 0x4b4   : > { %v3592_v55 = vpop.f32.mrf.mxu1  ;;  %v3799_v52 = vadd.f32 %v3798_v5, %v3590_v35  ;;  %v4620_v27 = vunpack.i.l.bf16 %v4619_v51  ;;  %v4621_v37 = vunpack.i.h.bf16 %v4619_v51  ;;  %v2905_v5 = vsel %vm1519_vm4, %v2835_v29, %v2837_v4 }
 0x4b5   : > { %4198 = vst.msk [vmem:[%s7796_s24 + $0xf8] sm:$0xff] %vm1454_vm3, %v4134_v54  ;;  %4359 = vmatmul.msk.f32.gmra.mxu3 %vm2012_vm5, %v2902_v36  ;;  %v3593_v41 = vadd.f32 %v3592_v55, %v3384_v8  ;;  %v8708_v54 = vpop.f32.mrf.mxu0 }
 0x4b6   : > { %3639 = vmatmul.f32.gmra.mxu1 %v3016_v12  ;;  %v2499_v49 = vsel %vm1454_vm3, %v4616_v28, %v4620_v27 }
 0x4b7   : > { %v3082_v19 = vsel %vm1519_vm4, %v2499_v49, %v2835_v29  ;;  %v3393_v29 = vadd.f32 %v8337_v57, %v8241_v56 }
 0x4b8   : > { %3848 = vmatmul.f32.gmra.mxu2 %v3080_v22  ;;  %v4007_v48 = vpop.f32.mrf.mxu3 }
 0x4b9   : > { %v4008_v1 = vadd.f32 %v4007_v48, %v3799_v52  ;;  %v2839_v6 = vpop.permute.xlu1 %2838  ;;  %v3019_v52 = vsel %vm1454_vm3, %v9664_v13, %v4621_v37  ;;  %v2845_v51 = vpop.permute.xlu2 %2844 }
 0x4bb   : > { %v4135_v9 = vmax.f32 %v4008_v1, 0.0  ;;  %v3801_v40 = vpop.f32.mrf.mxu2  ;;  %v4624_v34 = vpop.permute.xlu0 %4623 }
 0x4bc   : > { %v3595_v2 = vpop.f32.mrf.mxu1  ;;  %v3802_v46 = vadd.f32 %v3801_v40, %v3593_v41  ;;  %v4625_v24 = vunpack.i.l.bf16 %v4624_v34  ;;  %v4626_v1 = vunpack.i.h.bf16 %v4624_v34 }
 0x4bd   : > { %4199 = vst.msk [vmem:[%s7796_s24 + $0x100] sm:$0xff] %vm1454_vm3, %v4135_v9  ;;  %4360 = vmatmul.msk.f32.gmra.mxu3 %vm2012_vm5, %v2903_v59  ;;  %v3596_v26 = vadd.f32 %v3595_v2, %v3387_v16  ;;  %v2906_v59 = vsel %vm1519_vm4, %v2839_v6, %v2841_v3  ;;  %v8722_v32 = vpop.f32.mrf.mxu0 }
 0x4be   : > { %3642 = vmatmul.f32.gmra.mxu1 %v3017_v21  ;;  %v2500_v35 = vsel %vm1454_vm3, %v4621_v37, %v4625_v24  ;;  %v3020_v41 = vsel %vm1454_vm3, %v9670_v39, %v4626_v1 }
 0x4bf   : > { %v3083_v62 = vsel %vm1519_vm4, %v2500_v35, %v2839_v6 }
 0x4c0   : > { %3851 = vmatmul.f32.gmra.mxu2 %v3081_v60  ;;  %v4010_v33 = vpop.f32.mrf.mxu3 }
 0x4c1   : > { %v4011_v38 = vadd.f32 %v4010_v33, %v3802_v46  ;;  %v2843_v14 = vpop.permute.xlu1 %2842  ;;  %v2849_v16 = vpop.permute.xlu2 %2848 }
 0x4c3   : > { %v4136_v42 = vmax.f32 %v4011_v38, 0.0  ;;  %v3804_v47 = vpop.f32.mrf.mxu2  ;;  %v4629_v43 = vpop.permute.xlu0 %4628  ;;  %v3396_v38 = vadd.f32 %v8337_v57, %v8291_v7 }
 0x4c4   : > { %v3598_v45 = vpop.f32.mrf.mxu1  ;;  %v3805_v25 = vadd.f32 %v3804_v47, %v3596_v26  ;;  %v4630_v48 = vunpack.i.l.bf16 %v4629_v43  ;;  %v4631_v27 = vunpack.i.h.bf16 %v4629_v43 }
 0x4c5   : > { %4200 = vst.msk [vmem:[%s7796_s24 + $0x108] sm:$0xff] %vm1454_vm3, %v4136_v42  ;;  %4361 = vmatmul.msk.f32.gmra.mxu3 %vm2012_vm5, %v2904_v58  ;;  %v3599_v12 = vadd.f32 %v3598_v45, %v3390_v15  ;;  %v2907_v42 = vsel %vm1519_vm4, %v2843_v14, %v2845_v51  ;;  %v8739_v6 = vpop.f32.mrf.mxu0 }
 0x4c6   : > { %3645 = vmatmul.f32.gmra.mxu1 %v3018_v0  ;;  %v2501_v2 = vsel %vm1454_vm3, %v4626_v1, %v4630_v48  ;;  %v3021_v49 = vsel %vm1454_vm3, %v7156_v11, %v4631_v27 }
 0x4c7   : > { %v3084_v46 = vsel %vm1519_vm4, %v2501_v2, %v2843_v14  ;;  %v3402_v14 = vadd.f32 %v8337_v57, %v8382_v50  ;;  %v8772_v2 = vld [vmem:[%s8922_s2] ss:$0 sm:$0xff] }
 0x4c8   : > { %3854 = vmatmul.f32.gmra.mxu2 %v3082_v19  ;;  %v4013_v10 = vpop.f32.mrf.mxu3 }
 0x4c9   : > { %v4014_v20 = vadd.f32 %v4013_v10, %v3805_v25  ;;  %v2847_v33 = vpop.permute.xlu1 %2846  ;;  %v3399_v25 = vadd.f32 %v8337_v57, %v8330_v53 }
 0x4ca   : > { %v2908_v10 = vsel %vm1519_vm4, %v2847_v33, %v2849_v16 }
 0x4cb   : > { %v4137_v36 = vmax.f32 %v4014_v20, 0.0  ;;  %v3807_v55 = vpop.f32.mrf.mxu2  ;;  %v2415_v21 = vpop.permute.xlu0 %2414 }
 0x4cc   : > { %v3601_v61 = vpop.f32.mrf.mxu1  ;;  %v3808_v22 = vadd.f32 %v3807_v55, %v3599_v12  ;;  %v2502_v39 = vsel %vm1454_vm3, %v4631_v27, %v2415_v21  ;;  %v9750_v27 = vld [vmem:[#allocation92_spill] sm:$0xff] }
 0x4cd   : > { %4201 = vst.msk [vmem:[%s7796_s24 + $0x110] sm:$0xff] %vm1454_vm3, %v4137_v36  ;;  %4362 = vmatmul.msk.f32.gmra.mxu3 %vm2012_vm5, %v2905_v5  ;;  %v3602_v4 = vadd.f32 %v3601_v61, %v3393_v29  ;;  %v3085_v26 = vsel %vm1519_vm4, %v2502_v39, %v2847_v33  ;;  %v4634_v5 = vpop.permute.xlu2 %4633  ;;  %v8753_v35 = vpop.f32.mrf.mxu0 }
 0x4ce   : > { %3648 = vmatmul.f32.gmra.mxu1 %v3019_v52  ;;  %v4635_v43 = vunpack.i.l.bf16 %v4634_v5  ;;  %v4636_v52 = vunpack.i.h.bf16 %v4634_v5 }
 0x4d0   : > { %3857 = vmatmul.f32.gmra.mxu2 %v3083_v62  ;;  %v4016_v23 = vpop.f32.mrf.mxu3  ;;  %v3023_v29 = vsel %vm1454_vm3, %v9675_v18, %v4635_v43  ;;  %v2504_v57 = vsel %vm1454_vm3, %v4635_v43, %v4636_v52  ;;  %v3405_v18 = vadd.f32 %v8772_v2, %v8693_v17  ;;  %v9752_v43 = vld [vmem:[#allocation78_spill] sm:$0xff] }
 0x4d1   : > { %v4017_v8 = vadd.f32 %v4016_v23, %v3808_v22  ;;  %v2851_v19 = vpop.permute.xlu1 %2850 }
 0x4d2   : > { %v2909_v48 = vsel %vm1519_vm4, %v2851_v19, %v7536_v30 }
 0x4d3   : > { %v4138_v9 = vmax.f32 %v4017_v8, 0.0  ;;  %v3810_v40 = vpop.f32.mrf.mxu2  ;;  %v2417_v0 = vpop.permute.xlu0 %2416 }
 0x4d4   : > { %v3604_v13 = vpop.f32.mrf.mxu1  ;;  %v3811_v56 = vadd.f32 %v3810_v40, %v3602_v4  ;;  %v2503_v11 = vsel %vm1454_vm3, %v2417_v0, %v7508_v63  ;;  %v3022_v36 = vsel %vm1454_vm3, %v6828_v44, %v2417_v0  ;;  %v9751_v0 = vld [vmem:[#allocation32_spill] sm:$0xff] }
 0x4d5   : > { %4202 = vst.msk [vmem:[%s7796_s24 + $0x118] sm:$0xff] %vm1454_vm3, %v4138_v9  ;;  %4363 = vmatmul.msk.f32.gmra.mxu3 %vm2012_vm5, %v2906_v59  ;;  %v3605_v45 = vadd.f32 %v3604_v13, %v3396_v38  ;;  %v3086_v55 = vsel %vm1519_vm4, %v2503_v11, %v2851_v19  ;;  %v8776_v4 = vpop.f32.mrf.mxu0 }
 0x4d6   : > { %3651 = vmatmul.f32.gmra.mxu1 %v3020_v41 }
 0x4d8   : > { %3860 = vmatmul.f32.gmra.mxu2 %v3084_v46  ;;  %v4019_v60 = vpop.f32.mrf.mxu3 }
 0x4d9   : > { %v4020_v28 = vadd.f32 %v4019_v60, %v3811_v56  ;;  %v4639_v1 = vpop.permute.xlu1 %4638 }
 0x4da   : > { %v4641_v30 = vunpack.i.h.bf16 %v4639_v1  ;;  %v4640_v59 = vunpack.i.l.bf16 %v4639_v1  ;;  %v3414_v1 = vadd.f32 %v8772_v2, %v8739_v6 }
 0x4db   : > { %v4139_v34 = vmax.f32 %v4020_v28, 0.0  ;;  %v3813_v58 = vpop.f32.mrf.mxu2  ;;  %v8757_v22 = vpop.permute.xlu0 %2852 }
 0x4dc   : > { %v3607_v47 = vpop.f32.mrf.mxu1  ;;  %v3814_v7 = vadd.f32 %v3813_v58, %v3605_v45  ;;  %v3087_v9 = vsel %vm1519_vm4, %v2504_v57, %v8757_v22  ;;  %v2505_v46 = vsel %vm1454_vm3, %v4640_v59, %v4641_v30  ;;  %v3024_v33 = vsel %vm1454_vm3, %v9750_v27, %v4640_v59  ;;  %v4644_v28 = vpop.permute.xlu2 %4643  ;;  %v9753_v30 = vld [vmem:[#allocation81_spill] sm:$0xff] }
 0x4dd   : > { %4203 = vst.msk [vmem:[%s7796_s24 + $0x120] sm:$0xff] %vm1454_vm3, %v4139_v34  ;;  %4364 = vmatmul.msk.f32.gmra.mxu3 %vm2012_vm5, %v2907_v42  ;;  %v3608_v15 = vadd.f32 %v3607_v47, %v3399_v25  ;;  %v3088_v38 = vsel %vm1519_vm4, %v2505_v46, %v8757_v22  ;;  %v4645_v34 = vunpack.i.l.bf16 %v4644_v28  ;;  %v4646_v39 = vunpack.i.h.bf16 %v4644_v28 }
 0x4de   : > { %3654 = vmatmul.f32.gmra.mxu1 %v3021_v49  ;;  %v3408_v58 = vadd.f32 %v8772_v2, %v8708_v54 }
 0x4df   : > { %v2506_v25 = vsel %vm1454_vm3, %v4645_v34, %v4646_v39 }
 0x4e0   : > { %3863 = vmatmul.f32.gmra.mxu2 %v3085_v26  ;;  %v4022_v31 = vpop.f32.mrf.mxu3  ;;  %v3089_v19 = vsel %vm1519_vm4, %v2506_v25, %v8757_v22 }
 0x4e1   : > { %v4023_v3 = vadd.f32 %v4022_v31, %v3814_v7  ;;  %v8789_v7 = vpop.f32.mrf.mxu0 }
 0x4e3   : > { %v4140_v24 = vmax.f32 %v4023_v3, 0.0  ;;  %v3816_v37 = vpop.f32.mrf.mxu2  ;;  %v4649_v26 = vpop.permute.xlu0 %4648  ;;  %v3025_v3 = vsel %vm1454_vm3, %v9751_v0, %v4645_v34 }
 0x4e4   : > { %v3610_v20 = vpop.f32.mrf.mxu1  ;;  %v3817_v53 = vadd.f32 %v3816_v37, %v3608_v15 }
 0x4e5   : > { %4204 = vst.msk [vmem:[%s7796_s24 + $0x128] sm:$0xff] %vm1454_vm3, %v4140_v24  ;;  %4365 = vmatmul.msk.f32.gmra.mxu3 %vm2012_vm5, %v2908_v10  ;;  %v3611_v8 = vadd.f32 %v3610_v20, %v3402_v14  ;;  %v4651_v24 = vunpack.i.h.bf16 %v4649_v26  ;;  %v4650_v10 = vunpack.i.l.bf16 %v4649_v26  ;;  %v3411_v20 = vadd.f32 %v8772_v2, %v8722_v32 }
 0x4e6   : > { %3657 = vmatmul.f32.gmra.mxu1 %v3022_v36  ;;  %v3420_v26 = vadd.f32 %v8772_v2, %v8776_v4 }
 0x4e8   : > { %3866 = vmatmul.f32.gmra.mxu2 %v3086_v55  ;;  %v4025_v61 = vpop.f32.mrf.mxu3  ;;  %v4654_v55 = vpop.permute.xlu1 %4653 }
 0x4e9   : > { %v4026_v12 = vadd.f32 %v4025_v61, %v3817_v53  ;;  %v2507_v53 = vsel %vm1454_vm3, %v4650_v10, %v4651_v24  ;;  %v8809_v52 = vpop.f32.mrf.mxu0  ;;  %v9755_v24 = vld [vmem:[#allocation44_spill] sm:$0xff] }
 0x4ea   : > { %v3090_v14 = vsel %vm1519_vm4, %v2507_v53, %v8757_v22 }
 0x4eb   : > { %v4141_v62 = vmax.f32 %v4026_v12, 0.0  ;;  %v3819_v23 = vpop.f32.mrf.mxu2  ;;  %v3026_v12 = vsel %vm1454_vm3, %v9752_v43, %v4650_v10 }
 0x4ec   : > { %v3613_v51 = vpop.f32.mrf.mxu1  ;;  %v3820_v50 = vadd.f32 %v3819_v23, %v3611_v8 }
 0x4ed   : > { %4205 = vst.msk [vmem:[%s7796_s24 + $0x130] sm:$0xff] %vm1454_vm3, %v4141_v62  ;;  %4366 = vmatmul.msk.f32.gmra.mxu3 %vm2012_vm5, %v2909_v48  ;;  %v3614_v60 = vadd.f32 %v3613_v51, %v3405_v18  ;;  %v4656_v62 = vunpack.i.h.bf16 %v4654_v55  ;;  %v4655_v48 = vunpack.i.l.bf16 %v4654_v55 }
 0x4ee   : > { %3660 = vmatmul.f32.gmra.mxu1 %v3023_v29 }
 0x4ef   : > { %v3027_v59 = vsel %vm1454_vm3, %v9753_v30, %v4655_v48 }
 0x4f0   : > { %3869 = vmatmul.f32.gmra.mxu2 %v3087_v9  ;;  %v4028_v40 = vpop.f32.mrf.mxu3 }
 0x4f1   : > { %v4029_v13 = vadd.f32 %v4028_v40, %v3820_v50  ;;  %v2508_v50 = vsel %vm1454_vm3, %v4655_v48, %v4656_v62  ;;  %v4659_v40 = vpop.permute.xlu2 %4658  ;;  %v3426_v48 = vadd.f32 %v8772_v2, %v8809_v52 }
 0x4f2   : > { %v3091_v6 = vsel %vm1519_vm4, %v2508_v50, %v8757_v22  ;;  %v4661_v46 = vunpack.i.h.bf16 %v4659_v40 }
 0x4f3   : > { %v4142_v41 = vmax.f32 %v4029_v13, 0.0  ;;  %v3822_v21 = vpop.f32.mrf.mxu2 }
 0x4f4   : > { %v3616_v56 = vpop.f32.mrf.mxu1  ;;  %v3823_v17 = vadd.f32 %v3822_v21, %v3614_v60  ;;  %v4660_v21 = vunpack.i.l.bf16 %v4659_v40  ;;  %v3417_v60 = vadd.f32 %v8772_v2, %v8753_v35 }
 0x4f5   : > { %4206 = vst.msk [vmem:[%s7796_s24 + $0x138] sm:$0xff] %vm1454_vm3, %v4142_v41  ;;  %4367 = vmatmul.msk.f32.gmra.mxu3 %vm2012_vm5, %v8757_v22  ;;  %v3617_v31 = vadd.f32 %v3616_v56, %v3408_v58  ;;  %v8824_v41 = vpop.f32.mrf.mxu0 }
 0x4f6   : > { %3663 = vmatmul.f32.gmra.mxu1 %v3024_v33 }
 0x4f8   : > { %3872 = vmatmul.f32.gmra.mxu2 %v3088_v38  ;;  %v4031_v16 = vpop.f32.mrf.mxu3 }
 0x4f9   : > { %v4032_v42 = vadd.f32 %v4031_v16, %v3823_v17  ;;  %v4664_v17 = vpop.permute.xlu0 %4663  ;;  %v9754_v16 = vld [vmem:[#allocation71_spill] sm:$0xff] }
 0x4fa   : > { %v3028_v34 = vsel %vm1454_vm3, %v9754_v16, %v4660_v21  ;;  %v4666_v58 = vunpack.i.h.bf16 %v4664_v17 }
 0x4fb   : > { %v4143_v47 = vmax.f32 %v4032_v42, 0.0  ;;  %v3825_v45 = vpop.f32.mrf.mxu2  ;;  %v2509_v42 = vsel %vm1454_vm3, %v4660_v21, %v4661_v46 }
 0x4fc   : > { %v3619_v49 = vpop.f32.mrf.mxu1  ;;  %v3826_v54 = vadd.f32 %v3825_v45, %v3617_v31  ;;  %v3092_v35 = vsel %vm1519_vm4, %v2509_v42, %v8757_v22 }
 0x4fd   : > { %4207 = vst.msk [vmem:[%s7796_s24 + $0x140] sm:$0xff] %vm1454_vm3, %v4143_v47  ;;  %4368 = vmatmul.msk.f32.gmra.mxu3 %vm2012_vm5, %v8757_v22  ;;  %v3620_v61 = vadd.f32 %v3619_v49, %v3411_v20  ;;  %v4665_v47 = vunpack.i.l.bf16 %v4664_v17  ;;  %v3431_v31 = vpop.f32.mrf.mxu0  ;;  %v2447_v20 = vpop.permute.xlu1 %2446 }
 0x4fe   : > { %3666 = vmatmul.f32.gmra.mxu1 %v3025_v3  ;;  %v2511_v53 = vsel %vm1454_vm3, %v2447_v20, %v7508_v63 }
 0x4ff   : > { %v3029_v10 = vsel %vm1454_vm3, %v9755_v24, %v4665_v47 }
 0x500   : > { %3875 = vmatmul.f32.gmra.mxu2 %v3089_v19  ;;  %v4034_v11 = vpop.f32.mrf.mxu3 }
 0x501   : > { %v4035_v37 = vadd.f32 %v4034_v11, %v3826_v54  ;;  %v2510_v54 = vsel %vm1454_vm3, %v4665_v47, %v4666_v58 }
 0x502   : > { %v3093_v4 = vsel %vm1519_vm4, %v2510_v54, %v8757_v22 }
 0x503   : > { %v4144_v15 = vmax.f32 %v4035_v37, 0.0  ;;  %v3828_v36 = vpop.f32.mrf.mxu2 }
 0x504   : > { %v3622_v5 = vpop.f32.mrf.mxu1  ;;  %v3829_v32 = vadd.f32 %v3828_v36, %v3620_v61  ;;  %v3423_v36 = vadd.f32 %v8772_v2, %v8789_v7  ;;  %v3094_v7 = vsel %vm1519_vm4, %v2511_v53, %v8757_v22 }
 0x505   : > { %4208 = vst.msk [vmem:[%s7796_s24 + $0x148] sm:$0xff] %vm1454_vm3, %v4144_v15  ;;  %4369 = vmatmul.msk.f32.gmra.mxu3 %vm2012_vm5, %v8757_v22  ;;  %v3623_v9 = vadd.f32 %v3622_v5, %v3414_v1  ;;  %v3434_v43 = vpop.f32.mrf.mxu0 }
 0x506   : > { %3669 = vmatmul.f32.gmra.mxu1 %v3026_v12  ;;  %v3435_v17 = vadd.f32 %v8772_v2, %v3434_v43 }
 0x508   : > { %3878 = vmatmul.f32.gmra.mxu2 %v3090_v14  ;;  %v4037_v23 = vpop.f32.mrf.mxu3 }
 0x509   : > { %v4038_v51 = vadd.f32 %v4037_v23, %v3829_v32  ;;  %v3030_v32 = vsel %vm1454_vm3, %v6828_v44, %v2447_v20 }
 0x50b   : > { %v4145_v8 = vmax.f32 %v4038_v51, 0.0  ;;  %v3831_v29 = vpop.f32.mrf.mxu2 }
 0x50c   : > { %v3625_v57 = vpop.f32.mrf.mxu1  ;;  %v3832_v13 = vadd.f32 %v3831_v29, %v3623_v9  ;;  %v3429_v9 = vadd.f32 %v8772_v2, %v8824_v41 }
 0x50d   : > { %4209 = vst.msk [vmem:[%s7796_s24 + $0x150] sm:$0xff] %vm1454_vm3, %v4145_v8  ;;  %4370 = vmatmul.msk.f32.gmra.mxu3 %vm2012_vm5, %v8757_v22  ;;  %v3626_v38 = vadd.f32 %v3625_v57, %v3417_v60  ;;  %v3437_v44 = vpop.f32.mrf.mxu0 }
 0x50e   : > { %3672 = vmatmul.f32.gmra.mxu1 %v3027_v59 }
 0x510   : > { %3881 = vmatmul.f32.gmra.mxu2 %v3091_v6  ;;  %v4040_v18 = vpop.f32.mrf.mxu3 }
 0x511   : > { %v4041_v56 = vadd.f32 %v4040_v18, %v3832_v13 }
 0x513   : > { %v4146_v27 = vmax.f32 %v4041_v56, 0.0  ;;  %v3834_v33 = vpop.f32.mrf.mxu2 }
 0x514   : > { %v3628_v28 = vpop.f32.mrf.mxu1  ;;  %v3835_v39 = vadd.f32 %v3834_v33, %v3626_v38 }
 0x515   : > { %4210 = vst.msk [vmem:[%s7796_s24 + $0x158] sm:$0xff] %vm1454_vm3, %v4146_v27  ;;  %4371 = vmatmul.msk.f32.gmra.mxu3 %vm2012_vm5, %v8757_v22  ;;  %v3629_v19 = vadd.f32 %v3628_v28, %v3420_v26  ;;  %v3440_v18 = vpop.f32.mrf.mxu0 }
 0x516   : > { %3675 = vmatmul.f32.gmra.mxu1 %v3028_v34  ;;  %v3441_v24 = vadd.f32 %v8772_v2, %v3440_v18 }
 0x518   : > { %3884 = vmatmul.f32.gmra.mxu2 %v3092_v35  ;;  %v4043_v45 = vpop.f32.mrf.mxu3 }
 0x519   : > { %v4044_v49 = vadd.f32 %v4043_v45, %v3835_v39  ;;  %v3438_v45 = vadd.f32 %v8772_v2, %v3437_v44 }
 0x51b   : > { %v4147_v0 = vmax.f32 %v4044_v49, 0.0  ;;  %v3837_v3 = vpop.f32.mrf.mxu2 }
 0x51c   : > { %v3631_v25 = vpop.f32.mrf.mxu1  ;;  %v3838_v11 = vadd.f32 %v3837_v3, %v3629_v19 }
 0x51d   : > { %4211 = vst.msk [vmem:[%s7796_s24 + $0x160] sm:$0xff] %vm1454_vm3, %v4147_v0  ;;  %4372 = vmatmul.msk.f32.gmra.mxu3 %vm2012_vm5, %v8757_v22  ;;  %v3632_v12 = vadd.f32 %v3631_v25, %v3423_v36  ;;  %v3443_v38 = vpop.f32.mrf.mxu0 }
 0x51e   : > { %3678 = vmatmul.f32.gmra.mxu1 %v3029_v10  ;;  %v3444_v53 = vadd.f32 %v8772_v2, %v3443_v38 }
 0x520   : > { %3887 = vmatmul.f32.gmra.mxu2 %v3093_v4  ;;  %v4046_v37 = vpop.f32.mrf.mxu3 }
 0x521   : > { %v4047_v15 = vadd.f32 %v4046_v37, %v3838_v11 }
 0x523   : > { %v4148_v5 = vmax.f32 %v4047_v15, 0.0  ;;  %v3840_v55 = vpop.f32.mrf.mxu2 }
 0x524   : > { %v3634_v61 = vpop.f32.mrf.mxu1  ;;  %v3841_v14 = vadd.f32 %v3840_v55, %v3632_v12 }
 0x525   : > { %4212 = vst.msk [vmem:[%s7796_s24 + $0x168] sm:$0xff] %vm1454_vm3, %v4148_v5  ;;  %4373 = vmatmul.msk.f32.gmra.mxu3 %vm2012_vm5, %v8757_v22  ;;  %v3635_v8 = vadd.f32 %v3634_v61, %v3426_v48  ;;  %v3446_v0 = vpop.f32.mrf.mxu0 }
 0x526   : > { %3681 = vmatmul.f32.gmra.mxu1 %v3030_v32 }
 0x528   : > { %3890 = vmatmul.f32.gmra.mxu2 %v3094_v7  ;;  %v4049_v63 = vpop.f32.mrf.mxu3 }
 0x529   : > { %v4050_v62 = vadd.f32 %v4049_v63, %v3841_v14 }
 0x52b   : > { %v4149_v23 = vmax.f32 %v4050_v62, 0.0  ;;  %v3843_v51 = vpop.f32.mrf.mxu2  ;;  %v3447_v62 = vadd.f32 %v8772_v2, %v3446_v0 }
 0x52c   : > { %v3637_v1 = vpop.f32.mrf.mxu1  ;;  %v3844_v29 = vadd.f32 %v3843_v51, %v3635_v8 }
 0x52d   : > { %4213 = vst.msk [vmem:[%s7796_s24 + $0x170] sm:$0xff] %vm1454_vm3, %v4149_v23  ;;  %4374 = vmatmul.msk.f32.gmra.mxu3 %vm2012_vm5, %v8757_v22  ;;  %v3638_v40 = vadd.f32 %v3637_v1, %v3429_v9  ;;  %v3432_v22 = vadd.f32 %v8772_v2, %v3431_v31  ;;  %v3449_v20 = vpop.f32.mrf.mxu0 }
 0x530   : > { %v4052_v57 = vpop.f32.mrf.mxu3 }
 0x531   : > { %v4053_v50 = vadd.f32 %v4052_v57, %v3844_v29  ;;  %v3450_v57 = vadd.f32 %v8772_v2, %v3449_v20 }
 0x533   : > { %v4150_v30 = vmax.f32 %v4053_v50, 0.0  ;;  %v3846_v52 = vpop.f32.mrf.mxu2 }
 0x534   : > { %v3640_v59 = vpop.f32.mrf.mxu1  ;;  %v3847_v13 = vadd.f32 %v3846_v52, %v3638_v40 }
 0x535   : > { %4214 = vst.msk [vmem:[%s7796_s24 + $0x178] sm:$0xff] %vm1454_vm3, %v4150_v30  ;;  %v3641_v27 = vadd.f32 %v3640_v59, %v3432_v22  ;;  %v3452_v7 = vpop.f32.mrf.mxu0 }
 0x536   : > { %v3453_v18 = vadd.f32 %v8772_v2, %v3452_v7 }
 0x538   : > { %v4055_v6 = vpop.f32.mrf.mxu3 }
 0x539   : > { %v4056_v21 = vadd.f32 %v4055_v6, %v3847_v13 }
 0x53b   : > { %v4151_v56 = vmax.f32 %v4056_v21, 0.0  ;;  %v3849_v46 = vpop.f32.mrf.mxu2 }
 0x53c   : > { %v3643_v60 = vpop.f32.mrf.mxu1  ;;  %v3850_v41 = vadd.f32 %v3849_v46, %v3641_v27 }
 0x53d   : > { %4215 = vst.msk [vmem:[%s7796_s24 + $0x180] sm:$0xff] %vm1454_vm3, %v4151_v56  ;;  %v3644_v39 = vadd.f32 %v3643_v60, %v3435_v17  ;;  %v3455_v50 = vpop.f32.mrf.mxu0 }
 0x540   : > { %v4058_v33 = vpop.f32.mrf.mxu3 }
 0x541   : > { %v4059_v28 = vadd.f32 %v4058_v33, %v3850_v41 }
 0x543   : > { %v4152_v16 = vmax.f32 %v4059_v28, 0.0  ;;  %v3852_v34 = vpop.f32.mrf.mxu2  ;;  %v3456_v28 = vadd.f32 %v8772_v2, %v3455_v50 }
 0x544   : > { %v3646_v42 = vpop.f32.mrf.mxu1  ;;  %v3853_v35 = vadd.f32 %v3852_v34, %v3644_v39 }
 0x545   : > { %4216 = vst.msk [vmem:[%s7796_s24 + $0x188] sm:$0xff] %vm1454_vm3, %v4152_v16  ;;  %v3647_v3 = vadd.f32 %v3646_v42, %v3438_v45  ;;  %v3458_v60 = vpop.f32.mrf.mxu0 }
 0x548   : > { %v4061_v58 = vpop.f32.mrf.mxu3 }
 0x549   : > { %v4062_v47 = vadd.f32 %v4061_v58, %v3853_v35 }
 0x54b   : > { %v4153_v49 = vmax.f32 %v4062_v47, 0.0  ;;  %v3855_v26 = vpop.f32.mrf.mxu2  ;;  %v3459_v47 = vadd.f32 %v8772_v2, %v3458_v60 }
 0x54c   : > { %v3649_v31 = vpop.f32.mrf.mxu1  ;;  %v3856_v25 = vadd.f32 %v3855_v26, %v3647_v3 }
 0x54d   : > { %4217 = vst.msk [vmem:[%s7796_s24 + $0x190] sm:$0xff] %vm1454_vm3, %v4153_v49  ;;  %v3650_v37 = vadd.f32 %v3649_v31, %v3441_v24  ;;  %v3461_v39 = vpop.f32.mrf.mxu0 }
 0x550   : > { %v4064_v54 = vpop.f32.mrf.mxu3 }
 0x551   : > { %v4065_v19 = vadd.f32 %v4064_v54, %v3856_v25 }
 0x553   : > { %v4154_v10 = vmax.f32 %v4065_v19, 0.0  ;;  %v3858_v11 = vpop.f32.mrf.mxu2  ;;  %v3462_v19 = vadd.f32 %v8772_v2, %v3461_v39 }
 0x554   : > { %v3652_v4 = vpop.f32.mrf.mxu1  ;;  %v3859_v15 = vadd.f32 %v3858_v11, %v3650_v37 }
 0x555   : > { %4218 = vst.msk [vmem:[%s7796_s24 + $0x198] sm:$0xff] %vm1454_vm3, %v4154_v10  ;;  %v3653_v12 = vadd.f32 %v3652_v4, %v3444_v53  ;;  %v3464_v54 = vpop.f32.mrf.mxu0 }
 0x558   : > { %v4067_v36 = vpop.f32.mrf.mxu3 }
 0x559   : > { %v4068_v5 = vadd.f32 %v4067_v36, %v3859_v15  ;;  %v3465_v36 = vadd.f32 %v8772_v2, %v3464_v54 }
 0x55b   : > { %v4155_v55 = vmax.f32 %v4068_v5, 0.0  ;;  %v3861_v61 = vpop.f32.mrf.mxu2 }
 0x55c   : > { %v3655_v43 = vpop.f32.mrf.mxu1  ;;  %v3862_v32 = vadd.f32 %v3861_v61, %v3653_v12 }
 0x55d   : > { %4219 = vst.msk [vmem:[%s7796_s24 + $0x1a0] sm:$0xff] %vm1454_vm3, %v4155_v55  ;;  %v3656_v1 = vadd.f32 %v3655_v43, %v3447_v62  ;;  %v3467_v53 = vpop.f32.mrf.mxu0 }
 0x55e   : > { %v3468_v7 = vadd.f32 %v8772_v2, %v3467_v53 }
 0x560   : > { %v4070_v14 = vpop.f32.mrf.mxu3 }
 0x561   : > { %v4071_v63 = vadd.f32 %v4070_v14, %v3862_v32 }
 0x563   : > { %v4156_v48 = vmax.f32 %v4071_v63, 0.0  ;;  %v3864_v23 = vpop.f32.mrf.mxu2 }
 0x564   : > { %v3658_v51 = vpop.f32.mrf.mxu1  ;;  %v3865_v8 = vadd.f32 %v3864_v23, %v3656_v1 }
 0x565   : > { %4220 = vst.msk [vmem:[%s7796_s24 + $0x1a8] sm:$0xff] %vm1454_vm3, %v4156_v48  ;;  %v3659_v59 = vadd.f32 %v3658_v51, %v3450_v57  ;;  %v3470_v23 = vpop.f32.mrf.mxu0 }
 0x568   : > { %v4073_v44 = vpop.f32.mrf.mxu3 }
 0x569   : > { %v4074_v29 = vadd.f32 %v4073_v44, %v3865_v8 }
 0x56b   : > { %v4157_v9 = vmax.f32 %v4074_v29, 0.0  ;;  %v3867_v30 = vpop.f32.mrf.mxu2  ;;  %v3471_v29 = vadd.f32 %v8772_v2, %v3470_v23 }
 0x56c   : > { %v3661_v52 = vpop.f32.mrf.mxu1  ;;  %v3868_v40 = vadd.f32 %v3867_v30, %v3659_v59 }
 0x56d   : > { %4221 = vst.msk [vmem:[%s7796_s24 + $0x1b0] sm:$0xff] %vm1454_vm3, %v4157_v9  ;;  %v3662_v46 = vadd.f32 %v3661_v52, %v3453_v18  ;;  %v3473_v52 = vpop.f32.mrf.mxu0 }
 0x570   : > { %v4076_v13 = vpop.f32.mrf.mxu3 }
 0x571   : > { %v4077_v6 = vadd.f32 %v4076_v13, %v3868_v40 }
 0x573   : > { %v4158_v21 = vmax.f32 %v4077_v6, 0.0  ;;  %v3870_v22 = vpop.f32.mrf.mxu2  ;;  %v3474_v6 = vadd.f32 %v8772_v2, %v3473_v52 }
 0x574   : > { %v3664_v56 = vpop.f32.mrf.mxu1  ;;  %v3871_v27 = vadd.f32 %v3870_v22, %v3662_v46 }
 0x575   : > { %4222 = vst.msk [vmem:[%s7796_s24 + $0x1b8] sm:$0xff] %vm1454_vm3, %v4158_v21  ;;  %v3665_v34 = vadd.f32 %v3664_v56, %v3456_v28 }
 0x578   : > { %v4079_v41 = vpop.f32.mrf.mxu3 }
 0x579   : > { %v4080_v33 = vadd.f32 %v4079_v41, %v3871_v27 }
 0x57b   : > { %v4159_v17 = vmax.f32 %v4080_v33, 0.0  ;;  %v3873_v38 = vpop.f32.mrf.mxu2 }
 0x57c   : > { %v3667_v16 = vpop.f32.mrf.mxu1  ;;  %v3874_v42 = vadd.f32 %v3873_v38, %v3665_v34 }
 0x57d   : > { %4223 = vst.msk [vmem:[%s7796_s24 + $0x1c0] sm:$0xff] %vm1454_vm3, %v4159_v17  ;;  %v3668_v31 = vadd.f32 %v3667_v16, %v3459_v47 }
 0x580   : > { %v4082_v35 = vpop.f32.mrf.mxu3 }
 0x581   : > { %v4083_v58 = vadd.f32 %v4082_v35, %v3874_v42 }
 0x583   : > { %v4160_v45 = vmax.f32 %v4083_v58, 0.0  ;;  %v3876_v49 = vpop.f32.mrf.mxu2 }
 0x584   : > { %v3670_v26 = vpop.f32.mrf.mxu1  ;;  %v3877_v0 = vadd.f32 %v3876_v49, %v3668_v31 }
 0x585   : > { %4224 = vst.msk [vmem:[%s7796_s24 + $0x1c8] sm:$0xff] %vm1454_vm3, %v4160_v45  ;;  %v3671_v4 = vadd.f32 %v3670_v26, %v3462_v19 }
 0x588   : > { %v4085_v3 = vpop.f32.mrf.mxu3 }
 0x589   : > { %v4086_v25 = vadd.f32 %v4085_v3, %v3877_v0 }
 0x58b   : > { %v4161_v24 = vmax.f32 %v4086_v25, 0.0  ;;  %v3879_v10 = vpop.f32.mrf.mxu2 }
 0x58c   : > { %v3673_v11 = vpop.f32.mrf.mxu1  ;;  %v3880_v37 = vadd.f32 %v3879_v10, %v3671_v4 }
 0x58d   : > { %4225 = vst.msk [vmem:[%s7796_s24 + $0x1d0] sm:$0xff] %vm1454_vm3, %v4161_v24  ;;  %v3674_v61 = vadd.f32 %v3673_v11, %v3465_v36 }
 0x590   : > { %v4088_v20 = vpop.f32.mrf.mxu3 }
 0x591   : > { %v4089_v15 = vadd.f32 %v4088_v20, %v3880_v37 }
 0x593   : > { %v4162_v5 = vmax.f32 %v4089_v15, 0.0  ;;  %v3882_v55 = vpop.f32.mrf.mxu2 }
 0x594   : > { %v3676_v43 = vpop.f32.mrf.mxu1  ;;  %v3883_v12 = vadd.f32 %v3882_v55, %v3674_v61 }
 0x595   : > { %4226 = vst.msk [vmem:[%s7796_s24 + $0x1d8] sm:$0xff] %vm1454_vm3, %v4162_v5  ;;  %v3677_v48 = vadd.f32 %v3676_v43, %v3468_v7 }
 0x598   : > { %v4091_v32 = vpop.f32.mrf.mxu3 }
 0x599   : > { %v4092_v14 = vadd.f32 %v4091_v32, %v3883_v12 }
 0x59b   : > { %v4163_v63 = vmax.f32 %v4092_v14, 0.0  ;;  %v3885_v62 = vpop.f32.mrf.mxu2 }
 0x59c   : > { %v3886_v51 = vadd.f32 %v3885_v62, %v3677_v48  ;;  %v3679_v1 = vpop.f32.mrf.mxu1 }
 0x59d   : > { %4227 = vst.msk [vmem:[%s7796_s24 + $0x1e0] sm:$0xff] %vm1454_vm3, %v4163_v63  ;;  %v3680_v9 = vadd.f32 %v3679_v1, %v3471_v29 }
 0x5a0   : > { %v4094_v8 = vpop.f32.mrf.mxu3 }
 0x5a1   : > { %v4095_v44 = vadd.f32 %v4094_v8, %v3886_v51 }
 0x5a3   : > { %v4164_v57 = vmax.f32 %v4095_v44, 0.0  ;;  %v3888_v50 = vpop.f32.mrf.mxu2 }
 0x5a4   : > { %v3889_v30 = vadd.f32 %v3888_v50, %v3680_v9  ;;  %v3682_v13 = vpop.f32.mrf.mxu1 }
 0x5a5   : > { %4228 = vst.msk [vmem:[%s7796_s24 + $0x1e8] sm:$0xff] %vm1454_vm3, %v4164_v57  ;;  %v3683_v22 = vadd.f32 %v3682_v13, %v3474_v6 }
 0x5a8   : > { %v4097_v59 = vpop.f32.mrf.mxu3 }
 0x5a9   : > { %v4098_v40 = vadd.f32 %v4097_v59, %v3889_v30 }
 0x5ab   : > { %v4165_v18 = vmax.f32 %v4098_v40, 0.0  ;;  %v3891_v21 = vpop.f32.mrf.mxu2 }
 0x5ac   : > { %v3892_v56 = vadd.f32 %v3891_v21, %v3683_v22 }
 0x5ad   : > { %4229 = vst.msk [vmem:[%s7796_s24 + $0x1f0] sm:$0xff] %vm1454_vm3, %v4165_v18 }
 0x5b0   : > { %v4100_v46 = vpop.f32.mrf.mxu3 }
 0x5b1   : > { %v4101_v60 = vadd.f32 %v4100_v46, %v3892_v56 }
 0x5b3   : > { %v4166_v27 = vmax.f32 %v4101_v60, 0.0 }
 0x5b5   : > { %4230 = vst.msk [vmem:[%s7796_s24 + $0x1f8] sm:$0xff] %vm1454_vm3, %v4166_v27 }
 0x5b6 PF: > { %s13_s12 = sadd.s32 1, %s4676_s12  }
 0x5b7   : > { %p10_p4 = scmp.ge.s32.totalorder %s13_s12, 4  }
 0x5b9   :  { %12 = sbr.rel (!%p10_p4) target bundleno = 1 (0x1), region = 62 }

</bundles_post_ra>
